<compile_context>
chip_gen: v5e
topology: v5e:2x2
jax: 0.10.0
libtpu: 0.0.40
codegen_flags: <defaults>
</compile_context>

<pallas_src>
import math

import jax
import jax.numpy as jnp
from jax import lax
from jax.experimental import pallas as pl
from jax.experimental.pallas import tpu as pltpu

# ----------------------------- config ---------------------------------------
B = 2            # batch
S = 16           # sequence length
H = 128          # hidden size (bert-tiny)
NH = 2           # attention heads (bert-tiny)
HD = H // NH     # head dim = 64
I = 512          # intermediate / FFN size (bert-tiny)
V = 1024         # vocab (scaled down from 30522)
L = 2            # encoder layers (bert-tiny)
LN_EPS = 1e-12


# ----------------------------- fused Pallas kernel ---------------------------
def _bert_fused_kernel(
    x_ref, ln_emb_g_ref, ln_emb_b_ref,
    wqkv_ref, bqkv_ref, wo_ref, bo_ref, ln1_g_ref, ln1_b_ref,
    w1_ref, b1_ref, w2_ref, b2_ref, ln2_g_ref, ln2_b_ref,
    head_w_ref, head_b_ref, ln_head_g_ref, ln_head_b_ref,
    word_emb_ref, dec_bias_ref,
    out_ref,
):
    f32 = jnp.float32
    bf16 = jnp.bfloat16

    def layer_norm(x, g, b):
        # f32 elementwise math (VPU/XLU), matches HF BERT LN (eps=1e-12).
        mean = jnp.mean(x, axis=-1, keepdims=True)
        xc = x - mean
        var = jnp.mean(xc * xc, axis=-1, keepdims=True)
        return xc * lax.rsqrt(var + LN_EPS) * g + b

    def gelu(x):
        # exact (erf-based) GELU, matching HF BERT's "gelu", f32 on the EUP/VPU.
        return 0.5 * x * (1.0 + lax.erf(x * (1.0 / math.sqrt(2.0))))

    def mm(x, w):
        # bf16 MXU operands, f32 accumulate.
        return jnp.dot(x.astype(bf16), w.astype(bf16),
                       preferred_element_type=f32)

    def mm_nt(x, w):
        # x @ w^T without materializing the transpose (contract last dims).
        return lax.dot_general(x.astype(bf16), w.astype(bf16),
                               (((1,), (1,)), ((), ())),
                               preferred_element_type=f32)

    scale = 1.0 / math.sqrt(HD)

    # --- embedding LayerNorm (no residual, no zeros tensor) ---
    x = layer_norm(x_ref[...], ln_emb_g_ref[...], ln_emb_b_ref[...])   # (M, H)

    for l in range(L):
        # --- fused QKV projection: single lane-dense (M, 3H) matmul ---
        qkv = mm(x, wqkv_ref[l]) + bqkv_ref[l]
        q = qkv[:, 0:H] * scale            # fold 1/sqrt(HD) into q
        k = qkv[:, H:2 * H]
        v = qkv[:, 2 * H:3 * H]

        # --- full (non-causal, unmasked) attention, all (batch, head) pairs
        #     fully unrolled inside the single kernel invocation ---
        # TODO(synk): no attention mask (fine for fixed S=16 with no padding).
        ctx_rows = []
        for bb in range(B):
            r0 = bb * S
            head_outs = []
            for hh in range(NH):
                c0 = hh * HD
                q_bh = q[r0:r0 + S, c0:c0 + HD]            # (S, HD)
                k_bh = k[r0:r0 + S, c0:c0 + HD]
                v_bh = v[r0:r0 + S, c0:c0 + HD]
                s_bh = lax.dot_general(q_bh, k_bh,         # q @ k^T  (S, S)
                                       (((1,), (1,)), ((), ())),
                                       preferred_element_type=f32)
                m = jnp.max(s_bh, axis=-1, keepdims=True)
                p = jnp.exp(s_bh - m)
                denom = jnp.sum(p, axis=-1, keepdims=True)
                p = p * pl.reciprocal(denom, approx=True)  # EUP recip
                head_outs.append(jnp.dot(p, v_bh, preferred_element_type=f32))
            ctx_rows.append(jnp.concatenate(head_outs, axis=1))   # (S, H)
        ctx = jnp.concatenate(ctx_rows, axis=0)                   # (M, H)

        # --- output projection + residual + LayerNorm (fused epilogue) ---
        attn_out = mm(ctx, wo_ref[l]) + bo_ref[l]
        x = layer_norm(attn_out + x, ln1_g_ref[l], ln1_b_ref[l])

        # --- feed-forward (GELU) + residual + LayerNorm ---
        h1 = gelu(mm(x, w1_ref[l]) + b1_ref[l])
        ffn = mm(h1, w2_ref[l]) + b2_ref[l]
        x = layer_norm(ffn + x, ln2_g_ref[l], ln2_b_ref[l])

    # --- MLM head: dense + gelu + LN, tied decoder (h @ word_emb^T) + bias ---
    h = gelu(mm(x, head_w_ref[...]) + head_b_ref[...])
    h = layer_norm(h, ln_head_g_ref[...], ln_head_b_ref[...])
    logits = mm_nt(h, word_emb_ref[...]) + dec_bias_ref[...]       # (M, V)
    out_ref[...] = logits.astype(out_ref.dtype)


# ----------------------------- parameters -----------------------------------
def make_params(key):
    keys = iter(jax.random.split(key, 32))

    def nrm(shape, dtype=jnp.float32, std=0.02):
        w = std * jax.random.normal(next(keys), shape, dtype=jnp.float32)
        return w.astype(dtype)

    p = {
        # tied embedding / decoder weight stays f32 (used by the gather too)
        "word_emb": nrm((V, H)),
        "pos_emb": nrm((S, H)),
        "type_emb": nrm((2, H)),
        "ln_emb_g": jnp.ones((1, H), jnp.float32),
        "ln_emb_b": jnp.zeros((1, H), jnp.float32),
        # MLM head transform + LN; decoder weight tied to word_emb
        "head_w": nrm((H, H), jnp.bfloat16),
        "head_b": jnp.zeros((1, H), jnp.float32),
        "ln_head_g": jnp.ones((1, H), jnp.float32),
        "ln_head_b": jnp.zeros((1, H), jnp.float32),
        "decoder_bias": jnp.zeros((1, V), jnp.float32),
    }

    wqkv, wo, w1, w2 = [], [], [], []
    for _ in range(L):
        wq, wk, wv = nrm((H, H)), nrm((H, H)), nrm((H, H))
        wqkv.append(jnp.concatenate([wq, wk, wv], axis=1).astype(jnp.bfloat16))
        wo.append(nrm((H, H), jnp.bfloat16))
        w1.append(nrm((H, I), jnp.bfloat16))
        w2.append(nrm((I, H), jnp.bfloat16))

    p["wqkv"] = jnp.stack(wqkv)                              # (L, H, 3H) bf16
    p["bqkv"] = jnp.zeros((L, 1, 3 * H), jnp.float32)
    p["wo"] = jnp.stack(wo)                                  # (L, H, H)  bf16
    p["bo"] = jnp.zeros((L, 1, H), jnp.float32)
    p["ln1_g"] = jnp.ones((L, 1, H), jnp.float32)
    p["ln1_b"] = jnp.zeros((L, 1, H), jnp.float32)
    p["w1"] = jnp.stack(w1)                                  # (L, H, I)  bf16
    p["b1"] = jnp.zeros((L, 1, I), jnp.float32)
    p["w2"] = jnp.stack(w2)                                  # (L, I, H)  bf16
    p["b2"] = jnp.zeros((L, 1, H), jnp.float32)
    p["ln2_g"] = jnp.ones((L, 1, H), jnp.float32)
    p["ln2_b"] = jnp.zeros((L, 1, H), jnp.float32)
    return p


# ----------------------------- forward pass ----------------------------------
def bert_tiny_forward(params, input_ids):
    """Returns MLM prediction logits of shape (B, S, V)."""
    b, s = input_ids.shape

    # Embedding lookup is a gather: plain JAX glue (one XLA fusion).
    # TODO(synk): dropout layers are identity (eval mode), intentionally omitted.
    x = (jnp.take(params["word_emb"], input_ids.reshape(-1), axis=0)
         + jnp.tile(params["pos_emb"][:s], (b, 1))
         + params["type_emb"][0][None, :]).astype(jnp.float32)    # (B*S, H)

    inputs = (
        x,
        params["ln_emb_g"], params["ln_emb_b"],
        params["wqkv"], params["bqkv"], params["wo"], params["bo"],
        params["ln1_g"], params["ln1_b"],
        params["w1"], params["b1"], params["w2"], params["b2"],
        params["ln2_g"], params["ln2_b"],
        params["head_w"], params["head_b"],
        params["ln_head_g"], params["ln_head_b"],
        params["word_emb"], params["decoder_bias"],
    )

    vmem_spec = pl.BlockSpec(memory_space=pltpu.MemorySpace.VMEM)
    logits = pl.pallas_call(
        _bert_fused_kernel,
        out_shape=jax.ShapeDtypeStruct((b * s, V), jnp.float32),
        in_specs=[vmem_spec] * len(inputs),
        out_specs=vmem_spec,
    )(*inputs)
    return logits.reshape(b, s, V)


# ----------------------------- main ------------------------------------------
if __name__ == "__main__":
    key = jax.random.PRNGKey(0)
    k_params, k_data = jax.random.split(key)
    params = make_params(k_params)
    input_ids = jax.random.randint(k_data, (B, S), 0, V, dtype=jnp.int32)

    fwd = jax.jit(bert_tiny_forward)
    logits = fwd(params, input_ids)
    logits = jax.block_until_ready(logits)

    assert logits.shape == (B, S, V), logits.shape
    assert logits.dtype == jnp.float32
    assert bool(jnp.all(jnp.isfinite(logits)))
    print("KERNEL_OK")
</pallas_src>

<mosaic_0001>
module attributes {stable_mosaic.version = 11 : i64} {
  func.func @_bert_fused_kernel(%arg0: memref<32x128xf32, #tpu.memory_space<vmem>>, %arg1: memref<1x128xf32, #tpu.memory_space<vmem>>, %arg2: memref<1x128xf32, #tpu.memory_space<vmem>>, %arg3: memref<2x128x384xbf16, #tpu.memory_space<vmem>>, %arg4: memref<2x1x384xf32, #tpu.memory_space<vmem>>, %arg5: memref<2x128x128xbf16, #tpu.memory_space<vmem>>, %arg6: memref<2x1x128xf32, #tpu.memory_space<vmem>>, %arg7: memref<2x1x128xf32, #tpu.memory_space<vmem>>, %arg8: memref<2x1x128xf32, #tpu.memory_space<vmem>>, %arg9: memref<2x128x512xbf16, #tpu.memory_space<vmem>>, %arg10: memref<2x1x512xf32, #tpu.memory_space<vmem>>, %arg11: memref<2x512x128xbf16, #tpu.memory_space<vmem>>, %arg12: memref<2x1x128xf32, #tpu.memory_space<vmem>>, %arg13: memref<2x1x128xf32, #tpu.memory_space<vmem>>, %arg14: memref<2x1x128xf32, #tpu.memory_space<vmem>>, %arg15: memref<128x128xbf16, #tpu.memory_space<vmem>>, %arg16: memref<1x128xf32, #tpu.memory_space<vmem>>, %arg17: memref<1x128xf32, #tpu.memory_space<vmem>>, %arg18: memref<1x128xf32, #tpu.memory_space<vmem>>, %arg19: memref<1024x128xf32, #tpu.memory_space<vmem>>, %arg20: memref<1x1024xf32, #tpu.memory_space<vmem>>, %arg21: memref<32x1024xf32, #tpu.memory_space<vmem>>) attributes {dimension_semantics = [], scalar_prefetch = 0 : i64, scratch_operands = 0 : i64, tpu.core_type = #tpu.core_type<tc>} {
    %c0 = arith.constant 0 : index
    %c0_0 = arith.constant 0 : index
    %0 = vector.load %arg0[%c0, %c0_0] : memref<32x128xf32, #tpu.memory_space<vmem>>, vector<32x128xf32>
    %c0_1 = arith.constant 0 : index
    %c0_2 = arith.constant 0 : index
    %1 = vector.load %arg1[%c0_1, %c0_2] : memref<1x128xf32, #tpu.memory_space<vmem>>, vector<1x128xf32>
    %c0_3 = arith.constant 0 : index
    %c0_4 = arith.constant 0 : index
    %2 = vector.load %arg2[%c0_3, %c0_4] : memref<1x128xf32, #tpu.memory_space<vmem>>, vector<1x128xf32>
    %cst = arith.constant dense<0.000000e+00> : vector<32xf32>
    %3 = vector.multi_reduction <add>, %0, %cst [1] : vector<32x128xf32> to vector<32xf32>
    %4 = vector.shape_cast %3 : vector<32xf32> to vector<32x1xf32>
    %cst_5 = arith.constant 1.280000e+02 : f32
    %5 = vector.broadcast %cst_5 : f32 to vector<32x1xf32>
    %6 = arith.divf %4, %5 : vector<32x1xf32>
    %7 = vector.broadcast %6 : vector<32x1xf32> to vector<32x128xf32>
    %8 = arith.subf %0, %7 : vector<32x128xf32>
    %9 = arith.mulf %8, %8 : vector<32x128xf32>
    %cst_6 = arith.constant dense<0.000000e+00> : vector<32xf32>
    %10 = vector.multi_reduction <add>, %9, %cst_6 [1] : vector<32x128xf32> to vector<32xf32>
    %11 = vector.shape_cast %10 : vector<32xf32> to vector<32x1xf32>
    %cst_7 = arith.constant 1.280000e+02 : f32
    %12 = vector.broadcast %cst_7 : f32 to vector<32x1xf32>
    %13 = arith.divf %11, %12 : vector<32x1xf32>
    %cst_8 = arith.constant 9.99999996E-13 : f32
    %14 = vector.broadcast %cst_8 : f32 to vector<32x1xf32>
    %15 = arith.addf %13, %14 : vector<32x1xf32>
    %16 = math.rsqrt %15 : vector<32x1xf32>
    %17 = vector.broadcast %16 : vector<32x1xf32> to vector<32x128xf32>
    %18 = arith.mulf %8, %17 : vector<32x128xf32>
    %19 = vector.broadcast %1 : vector<1x128xf32> to vector<32x128xf32>
    %20 = arith.mulf %18, %19 : vector<32x128xf32>
    %21 = vector.broadcast %2 : vector<1x128xf32> to vector<32x128xf32>
    %22 = arith.addf %20, %21 : vector<32x128xf32>
    %c0_9 = arith.constant 0 : index
    %c0_10 = arith.constant 0 : index
    %c0_11 = arith.constant 0 : index
    %23 = vector.load %arg3[%c0_9, %c0_10, %c0_11] : memref<2x128x384xbf16, #tpu.memory_space<vmem>>, vector<1x128x384xbf16>
    %24 = vector.shape_cast %23 : vector<1x128x384xbf16> to vector<128x384xbf16>
    %25 = arith.truncf %22 : vector<32x128xf32> to vector<32x128xbf16>
    %cst_12 = arith.constant dense<0.000000e+00> : vector<32x384xf32>
    %26 = tpu.matmul %25, %24, %cst_12 {dimension_numbers = #tpu.dot_dimension_numbers<[1], [0], [0], [1], [0, 0, 1, 1], [], []>} : vector<32x128xbf16>, vector<128x384xbf16>, vector<32x384xf32> -> vector<32x384xf32>
    %c0_13 = arith.constant 0 : index
    %c0_14 = arith.constant 0 : index
    %c0_15 = arith.constant 0 : index
    %27 = vector.load %arg4[%c0_13, %c0_14, %c0_15] : memref<2x1x384xf32, #tpu.memory_space<vmem>>, vector<1x1x384xf32>
    %28 = vector.shape_cast %27 : vector<1x1x384xf32> to vector<1x384xf32>
    %29 = vector.broadcast %28 : vector<1x384xf32> to vector<32x384xf32>
    %30 = arith.addf %26, %29 : vector<32x384xf32>
    %31 = vector.extract_strided_slice %30 {offsets = [0, 0], sizes = [32, 128], strides = [1, 1]} : vector<32x384xf32> to vector<32x128xf32>
    %cst_16 = arith.constant 1.250000e-01 : f32
    %32 = vector.broadcast %cst_16 : f32 to vector<32x128xf32>
    %33 = arith.mulf %31, %32 : vector<32x128xf32>
    %34 = vector.extract_strided_slice %30 {offsets = [0, 128], sizes = [32, 128], strides = [1, 1]} : vector<32x384xf32> to vector<32x128xf32>
    %35 = vector.extract_strided_slice %30 {offsets = [0, 256], sizes = [32, 128], strides = [1, 1]} : vector<32x384xf32> to vector<32x128xf32>
    %36 = vector.extract_strided_slice %33 {offsets = [0, 0], sizes = [16, 64], strides = [1, 1]} : vector<32x128xf32> to vector<16x64xf32>
    %37 = vector.extract_strided_slice %34 {offsets = [0, 0], sizes = [16, 64], strides = [1, 1]} : vector<32x128xf32> to vector<16x64xf32>
    %38 = vector.extract_strided_slice %35 {offsets = [0, 0], sizes = [16, 64], strides = [1, 1]} : vector<32x128xf32> to vector<16x64xf32>
    %cst_17 = arith.constant dense<0.000000e+00> : vector<16x16xf32>
    %39 = tpu.matmul %36, %37, %cst_17 {dimension_numbers = #tpu.dot_dimension_numbers<[1], [1], [0], [0], [0, 0, 1, 0], [], []>} : vector<16x64xf32>, vector<16x64xf32>, vector<16x16xf32> -> vector<16x16xf32>
    %cst_18 = arith.constant dense<0xFF800000> : vector<16xf32>
    %40 = vector.multi_reduction <maximumf>, %39, %cst_18 [1] : vector<16x16xf32> to vector<16xf32>
    %41 = vector.shape_cast %40 : vector<16xf32> to vector<16x1xf32>
    %42 = vector.broadcast %41 : vector<16x1xf32> to vector<16x16xf32>
    %43 = arith.subf %39, %42 : vector<16x16xf32>
    %44 = math.exp %43 : vector<16x16xf32>
    %cst_19 = arith.constant dense<0.000000e+00> : vector<16xf32>
    %45 = vector.multi_reduction <add>, %44, %cst_19 [1] : vector<16x16xf32> to vector<16xf32>
    %46 = vector.shape_cast %45 : vector<16xf32> to vector<16x1xf32>
    %47 = tpu.reciprocal %46 {approx = true} : vector<16x1xf32> -> vector<16x1xf32>
    %48 = vector.broadcast %47 : vector<16x1xf32> to vector<16x16xf32>
    %49 = arith.mulf %44, %48 : vector<16x16xf32>
    %cst_20 = arith.constant dense<0.000000e+00> : vector<16x64xf32>
    %50 = tpu.matmul %49, %38, %cst_20 {dimension_numbers = #tpu.dot_dimension_numbers<[1], [0], [0], [1], [0, 0, 1, 1], [], []>} : vector<16x16xf32>, vector<16x64xf32>, vector<16x64xf32> -> vector<16x64xf32>
    %51 = vector.extract_strided_slice %33 {offsets = [0, 64], sizes = [16, 64], strides = [1, 1]} : vector<32x128xf32> to vector<16x64xf32>
    %52 = vector.extract_strided_slice %34 {offsets = [0, 64], sizes = [16, 64], strides = [1, 1]} : vector<32x128xf32> to vector<16x64xf32>
    %53 = vector.extract_strided_slice %35 {offsets = [0, 64], sizes = [16, 64], strides = [1, 1]} : vector<32x128xf32> to vector<16x64xf32>
    %cst_21 = arith.constant dense<0.000000e+00> : vector<16x16xf32>
    %54 = tpu.matmul %51, %52, %cst_21 {dimension_numbers = #tpu.dot_dimension_numbers<[1], [1], [0], [0], [0, 0, 1, 0], [], []>} : vector<16x64xf32>, vector<16x64xf32>, vector<16x16xf32> -> vector<16x16xf32>
    %cst_22 = arith.constant dense<0xFF800000> : vector<16xf32>
    %55 = vector.multi_reduction <maximumf>, %54, %cst_22 [1] : vector<16x16xf32> to vector<16xf32>
    %56 = vector.shape_cast %55 : vector<16xf32> to vector<16x1xf32>
    %57 = vector.broadcast %56 : vector<16x1xf32> to vector<16x16xf32>
    %58 = arith.subf %54, %57 : vector<16x16xf32>
    %59 = math.exp %58 : vector<16x16xf32>
    %cst_23 = arith.constant dense<0.000000e+00> : vector<16xf32>
    %60 = vector.multi_reduction <add>, %59, %cst_23 [1] : vector<16x16xf32> to vector<16xf32>
    %61 = vector.shape_cast %60 : vector<16xf32> to vector<16x1xf32>
    %62 = tpu.reciprocal %61 {approx = true} : vector<16x1xf32> -> vector<16x1xf32>
    %63 = vector.broadcast %62 : vector<16x1xf32> to vector<16x16xf32>
    %64 = arith.mulf %59, %63 : vector<16x16xf32>
    %cst_24 = arith.constant dense<0.000000e+00> : vector<16x64xf32>
    %65 = tpu.matmul %64, %53, %cst_24 {dimension_numbers = #tpu.dot_dimension_numbers<[1], [0], [0], [1], [0, 0, 1, 1], [], []>} : vector<16x16xf32>, vector<16x64xf32>, vector<16x64xf32> -> vector<16x64xf32>
    %66 = tpu.concatenate %50, %65 in 1 : vector<16x64xf32>, vector<16x64xf32> -> vector<16x128xf32>
    %67 = vector.extract_strided_slice %33 {offsets = [16, 0], sizes = [16, 64], strides = [1, 1]} : vector<32x128xf32> to vector<16x64xf32>
    %68 = vector.extract_strided_slice %34 {offsets = [16, 0], sizes = [16, 64], strides = [1, 1]} : vector<32x128xf32> to vector<16x64xf32>
    %69 = vector.extract_strided_slice %35 {offsets = [16, 0], sizes = [16, 64], strides = [1, 1]} : vector<32x128xf32> to vector<16x64xf32>
    %cst_25 = arith.constant dense<0.000000e+00> : vector<16x16xf32>
    %70 = tpu.matmul %67, %68, %cst_25 {dimension_numbers = #tpu.dot_dimension_numbers<[1], [1], [0], [0], [0, 0, 1, 0], [], []>} : vector<16x64xf32>, vector<16x64xf32>, vector<16x16xf32> -> vector<16x16xf32>
    %cst_26 = arith.constant dense<0xFF800000> : vector<16xf32>
    %71 = vector.multi_reduction <maximumf>, %70, %cst_26 [1] : vector<16x16xf32> to vector<16xf32>
    %72 = vector.shape_cast %71 : vector<16xf32> to vector<16x1xf32>
    %73 = vector.broadcast %72 : vector<16x1xf32> to vector<16x16xf32>
    %74 = arith.subf %70, %73 : vector<16x16xf32>
    %75 = math.exp %74 : vector<16x16xf32>
    %cst_27 = arith.constant dense<0.000000e+00> : vector<16xf32>
    %76 = vector.multi_reduction <add>, %75, %cst_27 [1] : vector<16x16xf32> to vector<16xf32>
    %77 = vector.shape_cast %76 : vector<16xf32> to vector<16x1xf32>
    %78 = tpu.reciprocal %77 {approx = true} : vector<16x1xf32> -> vector<16x1xf32>
    %79 = vector.broadcast %78 : vector<16x1xf32> to vector<16x16xf32>
    %80 = arith.mulf %75, %79 : vector<16x16xf32>
    %cst_28 = arith.constant dense<0.000000e+00> : vector<16x64xf32>
    %81 = tpu.matmul %80, %69, %cst_28 {dimension_numbers = #tpu.dot_dimension_numbers<[1], [0], [0], [1], [0, 0, 1, 1], [], []>} : vector<16x16xf32>, vector<16x64xf32>, vector<16x64xf32> -> vector<16x64xf32>
    %82 = vector.extract_strided_slice %33 {offsets = [16, 64], sizes = [16, 64], strides = [1, 1]} : vector<32x128xf32> to vector<16x64xf32>
    %83 = vector.extract_strided_slice %34 {offsets = [16, 64], sizes = [16, 64], strides = [1, 1]} : vector<32x128xf32> to vector<16x64xf32>
    %84 = vector.extract_strided_slice %35 {offsets = [16, 64], sizes = [16, 64], strides = [1, 1]} : vector<32x128xf32> to vector<16x64xf32>
    %cst_29 = arith.constant dense<0.000000e+00> : vector<16x16xf32>
    %85 = tpu.matmul %82, %83, %cst_29 {dimension_numbers = #tpu.dot_dimension_numbers<[1], [1], [0], [0], [0, 0, 1, 0], [], []>} : vector<16x64xf32>, vector<16x64xf32>, vector<16x16xf32> -> vector<16x16xf32>
    %cst_30 = arith.constant dense<0xFF800000> : vector<16xf32>
    %86 = vector.multi_reduction <maximumf>, %85, %cst_30 [1] : vector<16x16xf32> to vector<16xf32>
    %87 = vector.shape_cast %86 : vector<16xf32> to vector<16x1xf32>
    %88 = vector.broadcast %87 : vector<16x1xf32> to vector<16x16xf32>
    %89 = arith.subf %85, %88 : vector<16x16xf32>
    %90 = math.exp %89 : vector<16x16xf32>
    %cst_31 = arith.constant dense<0.000000e+00> : vector<16xf32>
    %91 = vector.multi_reduction <add>, %90, %cst_31 [1] : vector<16x16xf32> to vector<16xf32>
    %92 = vector.shape_cast %91 : vector<16xf32> to vector<16x1xf32>
    %93 = tpu.reciprocal %92 {approx = true} : vector<16x1xf32> -> vector<16x1xf32>
    %94 = vector.broadcast %93 : vector<16x1xf32> to vector<16x16xf32>
    %95 = arith.mulf %90, %94 : vector<16x16xf32>
    %cst_32 = arith.constant dense<0.000000e+00> : vector<16x64xf32>
    %96 = tpu.matmul %95, %84, %cst_32 {dimension_numbers = #tpu.dot_dimension_numbers<[1], [0], [0], [1], [0, 0, 1, 1], [], []>} : vector<16x16xf32>, vector<16x64xf32>, vector<16x64xf32> -> vector<16x64xf32>
    %97 = tpu.concatenate %81, %96 in 1 : vector<16x64xf32>, vector<16x64xf32> -> vector<16x128xf32>
    %98 = tpu.concatenate %66, %97 in 0 : vector<16x128xf32>, vector<16x128xf32> -> vector<32x128xf32>
    %c0_33 = arith.constant 0 : index
    %c0_34 = arith.constant 0 : index
    %c0_35 = arith.constant 0 : index
    %99 = vector.load %arg5[%c0_33, %c0_34, %c0_35] : memref<2x128x128xbf16, #tpu.memory_space<vmem>>, vector<1x128x128xbf16>
    %100 = vector.shape_cast %99 : vector<1x128x128xbf16> to vector<128x128xbf16>
    %101 = arith.truncf %98 : vector<32x128xf32> to vector<32x128xbf16>
    %cst_36 = arith.constant dense<0.000000e+00> : vector<32x128xf32>
    %102 = tpu.matmul %101, %100, %cst_36 {dimension_numbers = #tpu.dot_dimension_numbers<[1], [0], [0], [1], [0, 0, 1, 1], [], []>} : vector<32x128xbf16>, vector<128x128xbf16>, vector<32x128xf32> -> vector<32x128xf32>
    %c0_37 = arith.constant 0 : index
    %c0_38 = arith.constant 0 : index
    %c0_39 = arith.constant 0 : index
    %103 = vector.load %arg6[%c0_37, %c0_38, %c0_39] : memref<2x1x128xf32, #tpu.memory_space<vmem>>, vector<1x1x128xf32>
    %104 = vector.shape_cast %103 : vector<1x1x128xf32> to vector<1x128xf32>
    %105 = vector.broadcast %104 : vector<1x128xf32> to vector<32x128xf32>
    %106 = arith.addf %102, %105 : vector<32x128xf32>
    %107 = arith.addf %106, %22 : vector<32x128xf32>
    %c0_40 = arith.constant 0 : index
    %c0_41 = arith.constant 0 : index
    %c0_42 = arith.constant 0 : index
    %108 = vector.load %arg7[%c0_40, %c0_41, %c0_42] : memref<2x1x128xf32, #tpu.memory_space<vmem>>, vector<1x1x128xf32>
    %109 = vector.shape_cast %108 : vector<1x1x128xf32> to vector<1x128xf32>
    %c0_43 = arith.constant 0 : index
    %c0_44 = arith.constant 0 : index
    %c0_45 = arith.constant 0 : index
    %110 = vector.load %arg8[%c0_43, %c0_44, %c0_45] : memref<2x1x128xf32, #tpu.memory_space<vmem>>, vector<1x1x128xf32>
    %111 = vector.shape_cast %110 : vector<1x1x128xf32> to vector<1x128xf32>
    %cst_46 = arith.constant dense<0.000000e+00> : vector<32xf32>
    %112 = vector.multi_reduction <add>, %107, %cst_46 [1] : vector<32x128xf32> to vector<32xf32>
    %113 = vector.shape_cast %112 : vector<32xf32> to vector<32x1xf32>
    %cst_47 = arith.constant 1.280000e+02 : f32
    %114 = vector.broadcast %cst_47 : f32 to vector<32x1xf32>
    %115 = arith.divf %113, %114 : vector<32x1xf32>
    %116 = vector.broadcast %115 : vector<32x1xf32> to vector<32x128xf32>
    %117 = arith.subf %107, %116 : vector<32x128xf32>
    %118 = arith.mulf %117, %117 : vector<32x128xf32>
    %cst_48 = arith.constant dense<0.000000e+00> : vector<32xf32>
    %119 = vector.multi_reduction <add>, %118, %cst_48 [1] : vector<32x128xf32> to vector<32xf32>
    %120 = vector.shape_cast %119 : vector<32xf32> to vector<32x1xf32>
    %cst_49 = arith.constant 1.280000e+02 : f32
    %121 = vector.broadcast %cst_49 : f32 to vector<32x1xf32>
    %122 = arith.divf %120, %121 : vector<32x1xf32>
    %cst_50 = arith.constant 9.99999996E-13 : f32
    %123 = vector.broadcast %cst_50 : f32 to vector<32x1xf32>
    %124 = arith.addf %122, %123 : vector<32x1xf32>
    %125 = math.rsqrt %124 : vector<32x1xf32>
    %126 = vector.broadcast %125 : vector<32x1xf32> to vector<32x128xf32>
    %127 = arith.mulf %117, %126 : vector<32x128xf32>
    %128 = vector.broadcast %109 : vector<1x128xf32> to vector<32x128xf32>
    %129 = arith.mulf %127, %128 : vector<32x128xf32>
    %130 = vector.broadcast %111 : vector<1x128xf32> to vector<32x128xf32>
    %131 = arith.addf %129, %130 : vector<32x128xf32>
    %c0_51 = arith.constant 0 : index
    %c0_52 = arith.constant 0 : index
    %c0_53 = arith.constant 0 : index
    %132 = vector.load %arg9[%c0_51, %c0_52, %c0_53] : memref<2x128x512xbf16, #tpu.memory_space<vmem>>, vector<1x128x512xbf16>
    %133 = vector.shape_cast %132 : vector<1x128x512xbf16> to vector<128x512xbf16>
    %134 = arith.truncf %131 : vector<32x128xf32> to vector<32x128xbf16>
    %cst_54 = arith.constant dense<0.000000e+00> : vector<32x512xf32>
    %135 = tpu.matmul %134, %133, %cst_54 {dimension_numbers = #tpu.dot_dimension_numbers<[1], [0], [0], [1], [0, 0, 1, 1], [], []>} : vector<32x128xbf16>, vector<128x512xbf16>, vector<32x512xf32> -> vector<32x512xf32>
    %c0_55 = arith.constant 0 : index
    %c0_56 = arith.constant 0 : index
    %c0_57 = arith.constant 0 : index
    %136 = vector.load %arg10[%c0_55, %c0_56, %c0_57] : memref<2x1x512xf32, #tpu.memory_space<vmem>>, vector<1x1x512xf32>
    %137 = vector.shape_cast %136 : vector<1x1x512xf32> to vector<1x512xf32>
    %138 = vector.broadcast %137 : vector<1x512xf32> to vector<32x512xf32>
    %139 = arith.addf %135, %138 : vector<32x512xf32>
    %cst_58 = arith.constant 5.000000e-01 : f32
    %140 = vector.broadcast %cst_58 : f32 to vector<32x512xf32>
    %141 = arith.mulf %140, %139 : vector<32x512xf32>
    %cst_59 = arith.constant 0.707106769 : f32
    %142 = vector.broadcast %cst_59 : f32 to vector<32x512xf32>
    %143 = arith.mulf %139, %142 : vector<32x512xf32>
    %144 = math.erf %143 : vector<32x512xf32>
    %cst_60 = arith.constant 1.000000e+00 : f32
    %145 = vector.broadcast %cst_60 : f32 to vector<32x512xf32>
    %146 = arith.addf %145, %144 : vector<32x512xf32>
    %147 = arith.mulf %141, %146 : vector<32x512xf32>
    %c0_61 = arith.constant 0 : index
    %c0_62 = arith.constant 0 : index
    %c0_63 = arith.constant 0 : index
    %148 = vector.load %arg11[%c0_61, %c0_62, %c0_63] : memref<2x512x128xbf16, #tpu.memory_space<vmem>>, vector<1x512x128xbf16>
    %149 = vector.shape_cast %148 : vector<1x512x128xbf16> to vector<512x128xbf16>
    %150 = arith.truncf %147 : vector<32x512xf32> to vector<32x512xbf16>
    %cst_64 = arith.constant dense<0.000000e+00> : vector<32x128xf32>
    %151 = tpu.matmul %150, %149, %cst_64 {dimension_numbers = #tpu.dot_dimension_numbers<[1], [0], [0], [1], [0, 0, 1, 1], [], []>} : vector<32x512xbf16>, vector<512x128xbf16>, vector<32x128xf32> -> vector<32x128xf32>
    %c0_65 = arith.constant 0 : index
    %c0_66 = arith.constant 0 : index
    %c0_67 = arith.constant 0 : index
    %152 = vector.load %arg12[%c0_65, %c0_66, %c0_67] : memref<2x1x128xf32, #tpu.memory_space<vmem>>, vector<1x1x128xf32>
    %153 = vector.shape_cast %152 : vector<1x1x128xf32> to vector<1x128xf32>
    %154 = vector.broadcast %153 : vector<1x128xf32> to vector<32x128xf32>
    %155 = arith.addf %151, %154 : vector<32x128xf32>
    %156 = arith.addf %155, %131 : vector<32x128xf32>
    %c0_68 = arith.constant 0 : index
    %c0_69 = arith.constant 0 : index
    %c0_70 = arith.constant 0 : index
    %157 = vector.load %arg13[%c0_68, %c0_69, %c0_70] : memref<2x1x128xf32, #tpu.memory_space<vmem>>, vector<1x1x128xf32>
    %158 = vector.shape_cast %157 : vector<1x1x128xf32> to vector<1x128xf32>
    %c0_71 = arith.constant 0 : index
    %c0_72 = arith.constant 0 : index
    %c0_73 = arith.constant 0 : index
    %159 = vector.load %arg14[%c0_71, %c0_72, %c0_73] : memref<2x1x128xf32, #tpu.memory_space<vmem>>, vector<1x1x128xf32>
    %160 = vector.shape_cast %159 : vector<1x1x128xf32> to vector<1x128xf32>
    %cst_74 = arith.constant dense<0.000000e+00> : vector<32xf32>
    %161 = vector.multi_reduction <add>, %156, %cst_74 [1] : vector<32x128xf32> to vector<32xf32>
    %162 = vector.shape_cast %161 : vector<32xf32> to vector<32x1xf32>
    %cst_75 = arith.constant 1.280000e+02 : f32
    %163 = vector.broadcast %cst_75 : f32 to vector<32x1xf32>
    %164 = arith.divf %162, %163 : vector<32x1xf32>
    %165 = vector.broadcast %164 : vector<32x1xf32> to vector<32x128xf32>
    %166 = arith.subf %156, %165 : vector<32x128xf32>
    %167 = arith.mulf %166, %166 : vector<32x128xf32>
    %cst_76 = arith.constant dense<0.000000e+00> : vector<32xf32>
    %168 = vector.multi_reduction <add>, %167, %cst_76 [1] : vector<32x128xf32> to vector<32xf32>
    %169 = vector.shape_cast %168 : vector<32xf32> to vector<32x1xf32>
    %cst_77 = arith.constant 1.280000e+02 : f32
    %170 = vector.broadcast %cst_77 : f32 to vector<32x1xf32>
    %171 = arith.divf %169, %170 : vector<32x1xf32>
    %cst_78 = arith.constant 9.99999996E-13 : f32
    %172 = vector.broadcast %cst_78 : f32 to vector<32x1xf32>
    %173 = arith.addf %171, %172 : vector<32x1xf32>
    %174 = math.rsqrt %173 : vector<32x1xf32>
    %175 = vector.broadcast %174 : vector<32x1xf32> to vector<32x128xf32>
    %176 = arith.mulf %166, %175 : vector<32x128xf32>
    %177 = vector.broadcast %158 : vector<1x128xf32> to vector<32x128xf32>
    %178 = arith.mulf %176, %177 : vector<32x128xf32>
    %179 = vector.broadcast %160 : vector<1x128xf32> to vector<32x128xf32>
    %180 = arith.addf %178, %179 : vector<32x128xf32>
    %c1 = arith.constant 1 : index
    %c0_79 = arith.constant 0 : index
    %c0_80 = arith.constant 0 : index
    %181 = vector.load %arg3[%c1, %c0_79, %c0_80] : memref<2x128x384xbf16, #tpu.memory_space<vmem>>, vector<1x128x384xbf16>
    %182 = vector.shape_cast %181 : vector<1x128x384xbf16> to vector<128x384xbf16>
    %183 = arith.truncf %180 : vector<32x128xf32> to vector<32x128xbf16>
    %cst_81 = arith.constant dense<0.000000e+00> : vector<32x384xf32>
    %184 = tpu.matmul %183, %182, %cst_81 {dimension_numbers = #tpu.dot_dimension_numbers<[1], [0], [0], [1], [0, 0, 1, 1], [], []>} : vector<32x128xbf16>, vector<128x384xbf16>, vector<32x384xf32> -> vector<32x384xf32>
    %c1_82 = arith.constant 1 : index
    %c0_83 = arith.constant 0 : index
    %c0_84 = arith.constant 0 : index
    %185 = vector.load %arg4[%c1_82, %c0_83, %c0_84] : memref<2x1x384xf32, #tpu.memory_space<vmem>>, vector<1x1x384xf32>
    %186 = vector.shape_cast %185 : vector<1x1x384xf32> to vector<1x384xf32>
    %187 = vector.broadcast %186 : vector<1x384xf32> to vector<32x384xf32>
    %188 = arith.addf %184, %187 : vector<32x384xf32>
    %189 = vector.extract_strided_slice %188 {offsets = [0, 0], sizes = [32, 128], strides = [1, 1]} : vector<32x384xf32> to vector<32x128xf32>
    %cst_85 = arith.constant 1.250000e-01 : f32
    %190 = vector.broadcast %cst_85 : f32 to vector<32x128xf32>
    %191 = arith.mulf %189, %190 : vector<32x128xf32>
    %192 = vector.extract_strided_slice %188 {offsets = [0, 128], sizes = [32, 128], strides = [1, 1]} : vector<32x384xf32> to vector<32x128xf32>
    %193 = vector.extract_strided_slice %188 {offsets = [0, 256], sizes = [32, 128], strides = [1, 1]} : vector<32x384xf32> to vector<32x128xf32>
    %194 = vector.extract_strided_slice %191 {offsets = [0, 0], sizes = [16, 64], strides = [1, 1]} : vector<32x128xf32> to vector<16x64xf32>
    %195 = vector.extract_strided_slice %192 {offsets = [0, 0], sizes = [16, 64], strides = [1, 1]} : vector<32x128xf32> to vector<16x64xf32>
    %196 = vector.extract_strided_slice %193 {offsets = [0, 0], sizes = [16, 64], strides = [1, 1]} : vector<32x128xf32> to vector<16x64xf32>
    %cst_86 = arith.constant dense<0.000000e+00> : vector<16x16xf32>
    %197 = tpu.matmul %194, %195, %cst_86 {dimension_numbers = #tpu.dot_dimension_numbers<[1], [1], [0], [0], [0, 0, 1, 0], [], []>} : vector<16x64xf32>, vector<16x64xf32>, vector<16x16xf32> -> vector<16x16xf32>
    %cst_87 = arith.constant dense<0xFF800000> : vector<16xf32>
    %198 = vector.multi_reduction <maximumf>, %197, %cst_87 [1] : vector<16x16xf32> to vector<16xf32>
    %199 = vector.shape_cast %198 : vector<16xf32> to vector<16x1xf32>
    %200 = vector.broadcast %199 : vector<16x1xf32> to vector<16x16xf32>
    %201 = arith.subf %197, %200 : vector<16x16xf32>
    %202 = math.exp %201 : vector<16x16xf32>
    %cst_88 = arith.constant dense<0.000000e+00> : vector<16xf32>
    %203 = vector.multi_reduction <add>, %202, %cst_88 [1] : vector<16x16xf32> to vector<16xf32>
    %204 = vector.shape_cast %203 : vector<16xf32> to vector<16x1xf32>
    %205 = tpu.reciprocal %204 {approx = true} : vector<16x1xf32> -> vector<16x1xf32>
    %206 = vector.broadcast %205 : vector<16x1xf32> to vector<16x16xf32>
    %207 = arith.mulf %202, %206 : vector<16x16xf32>
    %cst_89 = arith.constant dense<0.000000e+00> : vector<16x64xf32>
    %208 = tpu.matmul %207, %196, %cst_89 {dimension_numbers = #tpu.dot_dimension_numbers<[1], [0], [0], [1], [0, 0, 1, 1], [], []>} : vector<16x16xf32>, vector<16x64xf32>, vector<16x64xf32> -> vector<16x64xf32>
    %209 = vector.extract_strided_slice %191 {offsets = [0, 64], sizes = [16, 64], strides = [1, 1]} : vector<32x128xf32> to vector<16x64xf32>
    %210 = vector.extract_strided_slice %192 {offsets = [0, 64], sizes = [16, 64], strides = [1, 1]} : vector<32x128xf32> to vector<16x64xf32>
    %211 = vector.extract_strided_slice %193 {offsets = [0, 64], sizes = [16, 64], strides = [1, 1]} : vector<32x128xf32> to vector<16x64xf32>
    %cst_90 = arith.constant dense<0.000000e+00> : vector<16x16xf32>
    %212 = tpu.matmul %209, %210, %cst_90 {dimension_numbers = #tpu.dot_dimension_numbers<[1], [1], [0], [0], [0, 0, 1, 0], [], []>} : vector<16x64xf32>, vector<16x64xf32>, vector<16x16xf32> -> vector<16x16xf32>
    %cst_91 = arith.constant dense<0xFF800000> : vector<16xf32>
    %213 = vector.multi_reduction <maximumf>, %212, %cst_91 [1] : vector<16x16xf32> to vector<16xf32>
    %214 = vector.shape_cast %213 : vector<16xf32> to vector<16x1xf32>
    %215 = vector.broadcast %214 : vector<16x1xf32> to vector<16x16xf32>
    %216 = arith.subf %212, %215 : vector<16x16xf32>
    %217 = math.exp %216 : vector<16x16xf32>
    %cst_92 = arith.constant dense<0.000000e+00> : vector<16xf32>
    %218 = vector.multi_reduction <add>, %217, %cst_92 [1] : vector<16x16xf32> to vector<16xf32>
    %219 = vector.shape_cast %218 : vector<16xf32> to vector<16x1xf32>
    %220 = tpu.reciprocal %219 {approx = true} : vector<16x1xf32> -> vector<16x1xf32>
    %221 = vector.broadcast %220 : vector<16x1xf32> to vector<16x16xf32>
    %222 = arith.mulf %217, %221 : vector<16x16xf32>
    %cst_93 = arith.constant dense<0.000000e+00> : vector<16x64xf32>
    %223 = tpu.matmul %222, %211, %cst_93 {dimension_numbers = #tpu.dot_dimension_numbers<[1], [0], [0], [1], [0, 0, 1, 1], [], []>} : vector<16x16xf32>, vector<16x64xf32>, vector<16x64xf32> -> vector<16x64xf32>
    %224 = tpu.concatenate %208, %223 in 1 : vector<16x64xf32>, vector<16x64xf32> -> vector<16x128xf32>
    %225 = vector.extract_strided_slice %191 {offsets = [16, 0], sizes = [16, 64], strides = [1, 1]} : vector<32x128xf32> to vector<16x64xf32>
    %226 = vector.extract_strided_slice %192 {offsets = [16, 0], sizes = [16, 64], strides = [1, 1]} : vector<32x128xf32> to vector<16x64xf32>
    %227 = vector.extract_strided_slice %193 {offsets = [16, 0], sizes = [16, 64], strides = [1, 1]} : vector<32x128xf32> to vector<16x64xf32>
    %cst_94 = arith.constant dense<0.000000e+00> : vector<16x16xf32>
    %228 = tpu.matmul %225, %226, %cst_94 {dimension_numbers = #tpu.dot_dimension_numbers<[1], [1], [0], [0], [0, 0, 1, 0], [], []>} : vector<16x64xf32>, vector<16x64xf32>, vector<16x16xf32> -> vector<16x16xf32>
    %cst_95 = arith.constant dense<0xFF800000> : vector<16xf32>
    %229 = vector.multi_reduction <maximumf>, %228, %cst_95 [1] : vector<16x16xf32> to vector<16xf32>
    %230 = vector.shape_cast %229 : vector<16xf32> to vector<16x1xf32>
    %231 = vector.broadcast %230 : vector<16x1xf32> to vector<16x16xf32>
    %232 = arith.subf %228, %231 : vector<16x16xf32>
    %233 = math.exp %232 : vector<16x16xf32>
    %cst_96 = arith.constant dense<0.000000e+00> : vector<16xf32>
    %234 = vector.multi_reduction <add>, %233, %cst_96 [1] : vector<16x16xf32> to vector<16xf32>
    %235 = vector.shape_cast %234 : vector<16xf32> to vector<16x1xf32>
    %236 = tpu.reciprocal %235 {approx = true} : vector<16x1xf32> -> vector<16x1xf32>
    %237 = vector.broadcast %236 : vector<16x1xf32> to vector<16x16xf32>
    %238 = arith.mulf %233, %237 : vector<16x16xf32>
    %cst_97 = arith.constant dense<0.000000e+00> : vector<16x64xf32>
    %239 = tpu.matmul %238, %227, %cst_97 {dimension_numbers = #tpu.dot_dimension_numbers<[1], [0], [0], [1], [0, 0, 1, 1], [], []>} : vector<16x16xf32>, vector<16x64xf32>, vector<16x64xf32> -> vector<16x64xf32>
    %240 = vector.extract_strided_slice %191 {offsets = [16, 64], sizes = [16, 64], strides = [1, 1]} : vector<32x128xf32> to vector<16x64xf32>
    %241 = vector.extract_strided_slice %192 {offsets = [16, 64], sizes = [16, 64], strides = [1, 1]} : vector<32x128xf32> to vector<16x64xf32>
    %242 = vector.extract_strided_slice %193 {offsets = [16, 64], sizes = [16, 64], strides = [1, 1]} : vector<32x128xf32> to vector<16x64xf32>
    %cst_98 = arith.constant dense<0.000000e+00> : vector<16x16xf32>
    %243 = tpu.matmul %240, %241, %cst_98 {dimension_numbers = #tpu.dot_dimension_numbers<[1], [1], [0], [0], [0, 0, 1, 0], [], []>} : vector<16x64xf32>, vector<16x64xf32>, vector<16x16xf32> -> vector<16x16xf32>
    %cst_99 = arith.constant dense<0xFF800000> : vector<16xf32>
    %244 = vector.multi_reduction <maximumf>, %243, %cst_99 [1] : vector<16x16xf32> to vector<16xf32>
    %245 = vector.shape_cast %244 : vector<16xf32> to vector<16x1xf32>
    %246 = vector.broadcast %245 : vector<16x1xf32> to vector<16x16xf32>
    %247 = arith.subf %243, %246 : vector<16x16xf32>
    %248 = math.exp %247 : vector<16x16xf32>
    %cst_100 = arith.constant dense<0.000000e+00> : vector<16xf32>
    %249 = vector.multi_reduction <add>, %248, %cst_100 [1] : vector<16x16xf32> to vector<16xf32>
    %250 = vector.shape_cast %249 : vector<16xf32> to vector<16x1xf32>
    %251 = tpu.reciprocal %250 {approx = true} : vector<16x1xf32> -> vector<16x1xf32>
    %252 = vector.broadcast %251 : vector<16x1xf32> to vector<16x16xf32>
    %253 = arith.mulf %248, %252 : vector<16x16xf32>
    %cst_101 = arith.constant dense<0.000000e+00> : vector<16x64xf32>
    %254 = tpu.matmul %253, %242, %cst_101 {dimension_numbers = #tpu.dot_dimension_numbers<[1], [0], [0], [1], [0, 0, 1, 1], [], []>} : vector<16x16xf32>, vector<16x64xf32>, vector<16x64xf32> -> vector<16x64xf32>
    %255 = tpu.concatenate %239, %254 in 1 : vector<16x64xf32>, vector<16x64xf32> -> vector<16x128xf32>
    %256 = tpu.concatenate %224, %255 in 0 : vector<16x128xf32>, vector<16x128xf32> -> vector<32x128xf32>
    %c1_102 = arith.constant 1 : index
    %c0_103 = arith.constant 0 : index
    %c0_104 = arith.constant 0 : index
    %257 = vector.load %arg5[%c1_102, %c0_103, %c0_104] : memref<2x128x128xbf16, #tpu.memory_space<vmem>>, vector<1x128x128xbf16>
    %258 = vector.shape_cast %257 : vector<1x128x128xbf16> to vector<128x128xbf16>
    %259 = arith.truncf %256 : vector<32x128xf32> to vector<32x128xbf16>
    %cst_105 = arith.constant dense<0.000000e+00> : vector<32x128xf32>
    %260 = tpu.matmul %259, %258, %cst_105 {dimension_numbers = #tpu.dot_dimension_numbers<[1], [0], [0], [1], [0, 0, 1, 1], [], []>} : vector<32x128xbf16>, vector<128x128xbf16>, vector<32x128xf32> -> vector<32x128xf32>
    %c1_106 = arith.constant 1 : index
    %c0_107 = arith.constant 0 : index
    %c0_108 = arith.constant 0 : index
    %261 = vector.load %arg6[%c1_106, %c0_107, %c0_108] : memref<2x1x128xf32, #tpu.memory_space<vmem>>, vector<1x1x128xf32>
    %262 = vector.shape_cast %261 : vector<1x1x128xf32> to vector<1x128xf32>
    %263 = vector.broadcast %262 : vector<1x128xf32> to vector<32x128xf32>
    %264 = arith.addf %260, %263 : vector<32x128xf32>
    %265 = arith.addf %264, %180 : vector<32x128xf32>
    %c1_109 = arith.constant 1 : index
    %c0_110 = arith.constant 0 : index
    %c0_111 = arith.constant 0 : index
    %266 = vector.load %arg7[%c1_109, %c0_110, %c0_111] : memref<2x1x128xf32, #tpu.memory_space<vmem>>, vector<1x1x128xf32>
    %267 = vector.shape_cast %266 : vector<1x1x128xf32> to vector<1x128xf32>
    %c1_112 = arith.constant 1 : index
    %c0_113 = arith.constant 0 : index
    %c0_114 = arith.constant 0 : index
    %268 = vector.load %arg8[%c1_112, %c0_113, %c0_114] : memref<2x1x128xf32, #tpu.memory_space<vmem>>, vector<1x1x128xf32>
    %269 = vector.shape_cast %268 : vector<1x1x128xf32> to vector<1x128xf32>
    %cst_115 = arith.constant dense<0.000000e+00> : vector<32xf32>
    %270 = vector.multi_reduction <add>, %265, %cst_115 [1] : vector<32x128xf32> to vector<32xf32>
    %271 = vector.shape_cast %270 : vector<32xf32> to vector<32x1xf32>
    %cst_116 = arith.constant 1.280000e+02 : f32
    %272 = vector.broadcast %cst_116 : f32 to vector<32x1xf32>
    %273 = arith.divf %271, %272 : vector<32x1xf32>
    %274 = vector.broadcast %273 : vector<32x1xf32> to vector<32x128xf32>
    %275 = arith.subf %265, %274 : vector<32x128xf32>
    %276 = arith.mulf %275, %275 : vector<32x128xf32>
    %cst_117 = arith.constant dense<0.000000e+00> : vector<32xf32>
    %277 = vector.multi_reduction <add>, %276, %cst_117 [1] : vector<32x128xf32> to vector<32xf32>
    %278 = vector.shape_cast %277 : vector<32xf32> to vector<32x1xf32>
    %cst_118 = arith.constant 1.280000e+02 : f32
    %279 = vector.broadcast %cst_118 : f32 to vector<32x1xf32>
    %280 = arith.divf %278, %279 : vector<32x1xf32>
    %cst_119 = arith.constant 9.99999996E-13 : f32
    %281 = vector.broadcast %cst_119 : f32 to vector<32x1xf32>
    %282 = arith.addf %280, %281 : vector<32x1xf32>
    %283 = math.rsqrt %282 : vector<32x1xf32>
    %284 = vector.broadcast %283 : vector<32x1xf32> to vector<32x128xf32>
    %285 = arith.mulf %275, %284 : vector<32x128xf32>
    %286 = vector.broadcast %267 : vector<1x128xf32> to vector<32x128xf32>
    %287 = arith.mulf %285, %286 : vector<32x128xf32>
    %288 = vector.broadcast %269 : vector<1x128xf32> to vector<32x128xf32>
    %289 = arith.addf %287, %288 : vector<32x128xf32>
    %c1_120 = arith.constant 1 : index
    %c0_121 = arith.constant 0 : index
    %c0_122 = arith.constant 0 : index
    %290 = vector.load %arg9[%c1_120, %c0_121, %c0_122] : memref<2x128x512xbf16, #tpu.memory_space<vmem>>, vector<1x128x512xbf16>
    %291 = vector.shape_cast %290 : vector<1x128x512xbf16> to vector<128x512xbf16>
    %292 = arith.truncf %289 : vector<32x128xf32> to vector<32x128xbf16>
    %cst_123 = arith.constant dense<0.000000e+00> : vector<32x512xf32>
    %293 = tpu.matmul %292, %291, %cst_123 {dimension_numbers = #tpu.dot_dimension_numbers<[1], [0], [0], [1], [0, 0, 1, 1], [], []>} : vector<32x128xbf16>, vector<128x512xbf16>, vector<32x512xf32> -> vector<32x512xf32>
    %c1_124 = arith.constant 1 : index
    %c0_125 = arith.constant 0 : index
    %c0_126 = arith.constant 0 : index
    %294 = vector.load %arg10[%c1_124, %c0_125, %c0_126] : memref<2x1x512xf32, #tpu.memory_space<vmem>>, vector<1x1x512xf32>
    %295 = vector.shape_cast %294 : vector<1x1x512xf32> to vector<1x512xf32>
    %296 = vector.broadcast %295 : vector<1x512xf32> to vector<32x512xf32>
    %297 = arith.addf %293, %296 : vector<32x512xf32>
    %cst_127 = arith.constant 5.000000e-01 : f32
    %298 = vector.broadcast %cst_127 : f32 to vector<32x512xf32>
    %299 = arith.mulf %298, %297 : vector<32x512xf32>
    %cst_128 = arith.constant 0.707106769 : f32
    %300 = vector.broadcast %cst_128 : f32 to vector<32x512xf32>
    %301 = arith.mulf %297, %300 : vector<32x512xf32>
    %302 = math.erf %301 : vector<32x512xf32>
    %cst_129 = arith.constant 1.000000e+00 : f32
    %303 = vector.broadcast %cst_129 : f32 to vector<32x512xf32>
    %304 = arith.addf %303, %302 : vector<32x512xf32>
    %305 = arith.mulf %299, %304 : vector<32x512xf32>
    %c1_130 = arith.constant 1 : index
    %c0_131 = arith.constant 0 : index
    %c0_132 = arith.constant 0 : index
    %306 = vector.load %arg11[%c1_130, %c0_131, %c0_132] : memref<2x512x128xbf16, #tpu.memory_space<vmem>>, vector<1x512x128xbf16>
    %307 = vector.shape_cast %306 : vector<1x512x128xbf16> to vector<512x128xbf16>
    %308 = arith.truncf %305 : vector<32x512xf32> to vector<32x512xbf16>
    %cst_133 = arith.constant dense<0.000000e+00> : vector<32x128xf32>
    %309 = tpu.matmul %308, %307, %cst_133 {dimension_numbers = #tpu.dot_dimension_numbers<[1], [0], [0], [1], [0, 0, 1, 1], [], []>} : vector<32x512xbf16>, vector<512x128xbf16>, vector<32x128xf32> -> vector<32x128xf32>
    %c1_134 = arith.constant 1 : index
    %c0_135 = arith.constant 0 : index
    %c0_136 = arith.constant 0 : index
    %310 = vector.load %arg12[%c1_134, %c0_135, %c0_136] : memref<2x1x128xf32, #tpu.memory_space<vmem>>, vector<1x1x128xf32>
    %311 = vector.shape_cast %310 : vector<1x1x128xf32> to vector<1x128xf32>
    %312 = vector.broadcast %311 : vector<1x128xf32> to vector<32x128xf32>
    %313 = arith.addf %309, %312 : vector<32x128xf32>
    %314 = arith.addf %313, %289 : vector<32x128xf32>
    %c1_137 = arith.constant 1 : index
    %c0_138 = arith.constant 0 : index
    %c0_139 = arith.constant 0 : index
    %315 = vector.load %arg13[%c1_137, %c0_138, %c0_139] : memref<2x1x128xf32, #tpu.memory_space<vmem>>, vector<1x1x128xf32>
    %316 = vector.shape_cast %315 : vector<1x1x128xf32> to vector<1x128xf32>
    %c1_140 = arith.constant 1 : index
    %c0_141 = arith.constant 0 : index
    %c0_142 = arith.constant 0 : index
    %317 = vector.load %arg14[%c1_140, %c0_141, %c0_142] : memref<2x1x128xf32, #tpu.memory_space<vmem>>, vector<1x1x128xf32>
    %318 = vector.shape_cast %317 : vector<1x1x128xf32> to vector<1x128xf32>
    %cst_143 = arith.constant dense<0.000000e+00> : vector<32xf32>
    %319 = vector.multi_reduction <add>, %314, %cst_143 [1] : vector<32x128xf32> to vector<32xf32>
    %320 = vector.shape_cast %319 : vector<32xf32> to vector<32x1xf32>
    %cst_144 = arith.constant 1.280000e+02 : f32
    %321 = vector.broadcast %cst_144 : f32 to vector<32x1xf32>
    %322 = arith.divf %320, %321 : vector<32x1xf32>
    %323 = vector.broadcast %322 : vector<32x1xf32> to vector<32x128xf32>
    %324 = arith.subf %314, %323 : vector<32x128xf32>
    %325 = arith.mulf %324, %324 : vector<32x128xf32>
    %cst_145 = arith.constant dense<0.000000e+00> : vector<32xf32>
    %326 = vector.multi_reduction <add>, %325, %cst_145 [1] : vector<32x128xf32> to vector<32xf32>
    %327 = vector.shape_cast %326 : vector<32xf32> to vector<32x1xf32>
    %cst_146 = arith.constant 1.280000e+02 : f32
    %328 = vector.broadcast %cst_146 : f32 to vector<32x1xf32>
    %329 = arith.divf %327, %328 : vector<32x1xf32>
    %cst_147 = arith.constant 9.99999996E-13 : f32
    %330 = vector.broadcast %cst_147 : f32 to vector<32x1xf32>
    %331 = arith.addf %329, %330 : vector<32x1xf32>
    %332 = math.rsqrt %331 : vector<32x1xf32>
    %333 = vector.broadcast %332 : vector<32x1xf32> to vector<32x128xf32>
    %334 = arith.mulf %324, %333 : vector<32x128xf32>
    %335 = vector.broadcast %316 : vector<1x128xf32> to vector<32x128xf32>
    %336 = arith.mulf %334, %335 : vector<32x128xf32>
    %337 = vector.broadcast %318 : vector<1x128xf32> to vector<32x128xf32>
    %338 = arith.addf %336, %337 : vector<32x128xf32>
    %c0_148 = arith.constant 0 : index
    %c0_149 = arith.constant 0 : index
    %339 = vector.load %arg15[%c0_148, %c0_149] : memref<128x128xbf16, #tpu.memory_space<vmem>>, vector<128x128xbf16>
    %340 = arith.truncf %338 : vector<32x128xf32> to vector<32x128xbf16>
    %cst_150 = arith.constant dense<0.000000e+00> : vector<32x128xf32>
    %341 = tpu.matmul %340, %339, %cst_150 {dimension_numbers = #tpu.dot_dimension_numbers<[1], [0], [0], [1], [0, 0, 1, 1], [], []>} : vector<32x128xbf16>, vector<128x128xbf16>, vector<32x128xf32> -> vector<32x128xf32>
    %c0_151 = arith.constant 0 : index
    %c0_152 = arith.constant 0 : index
    %342 = vector.load %arg16[%c0_151, %c0_152] : memref<1x128xf32, #tpu.memory_space<vmem>>, vector<1x128xf32>
    %343 = vector.broadcast %342 : vector<1x128xf32> to vector<32x128xf32>
    %344 = arith.addf %341, %343 : vector<32x128xf32>
    %cst_153 = arith.constant 5.000000e-01 : f32
    %345 = vector.broadcast %cst_153 : f32 to vector<32x128xf32>
    %346 = arith.mulf %345, %344 : vector<32x128xf32>
    %cst_154 = arith.constant 0.707106769 : f32
    %347 = vector.broadcast %cst_154 : f32 to vector<32x128xf32>
    %348 = arith.mulf %344, %347 : vector<32x128xf32>
    %349 = math.erf %348 : vector<32x128xf32>
    %cst_155 = arith.constant 1.000000e+00 : f32
    %350 = vector.broadcast %cst_155 : f32 to vector<32x128xf32>
    %351 = arith.addf %350, %349 : vector<32x128xf32>
    %352 = arith.mulf %346, %351 : vector<32x128xf32>
    %c0_156 = arith.constant 0 : index
    %c0_157 = arith.constant 0 : index
    %353 = vector.load %arg17[%c0_156, %c0_157] : memref<1x128xf32, #tpu.memory_space<vmem>>, vector<1x128xf32>
    %c0_158 = arith.constant 0 : index
    %c0_159 = arith.constant 0 : index
    %354 = vector.load %arg18[%c0_158, %c0_159] : memref<1x128xf32, #tpu.memory_space<vmem>>, vector<1x128xf32>
    %cst_160 = arith.constant dense<0.000000e+00> : vector<32xf32>
    %355 = vector.multi_reduction <add>, %352, %cst_160 [1] : vector<32x128xf32> to vector<32xf32>
    %356 = vector.shape_cast %355 : vector<32xf32> to vector<32x1xf32>
    %cst_161 = arith.constant 1.280000e+02 : f32
    %357 = vector.broadcast %cst_161 : f32 to vector<32x1xf32>
    %358 = arith.divf %356, %357 : vector<32x1xf32>
    %359 = vector.broadcast %358 : vector<32x1xf32> to vector<32x128xf32>
    %360 = arith.subf %352, %359 : vector<32x128xf32>
    %361 = arith.mulf %360, %360 : vector<32x128xf32>
    %cst_162 = arith.constant dense<0.000000e+00> : vector<32xf32>
    %362 = vector.multi_reduction <add>, %361, %cst_162 [1] : vector<32x128xf32> to vector<32xf32>
    %363 = vector.shape_cast %362 : vector<32xf32> to vector<32x1xf32>
    %cst_163 = arith.constant 1.280000e+02 : f32
    %364 = vector.broadcast %cst_163 : f32 to vector<32x1xf32>
    %365 = arith.divf %363, %364 : vector<32x1xf32>
    %cst_164 = arith.constant 9.99999996E-13 : f32
    %366 = vector.broadcast %cst_164 : f32 to vector<32x1xf32>
    %367 = arith.addf %365, %366 : vector<32x1xf32>
    %368 = math.rsqrt %367 : vector<32x1xf32>
    %369 = vector.broadcast %368 : vector<32x1xf32> to vector<32x128xf32>
    %370 = arith.mulf %360, %369 : vector<32x128xf32>
    %371 = vector.broadcast %353 : vector<1x128xf32> to vector<32x128xf32>
    %372 = arith.mulf %370, %371 : vector<32x128xf32>
    %373 = vector.broadcast %354 : vector<1x128xf32> to vector<32x128xf32>
    %374 = arith.addf %372, %373 : vector<32x128xf32>
    %c0_165 = arith.constant 0 : index
    %c0_166 = arith.constant 0 : index
    %375 = vector.load %arg19[%c0_165, %c0_166] : memref<1024x128xf32, #tpu.memory_space<vmem>>, vector<1024x128xf32>
    %376 = arith.truncf %374 : vector<32x128xf32> to vector<32x128xbf16>
    %377 = arith.truncf %375 : vector<1024x128xf32> to vector<1024x128xbf16>
    %cst_167 = arith.constant dense<0.000000e+00> : vector<32x1024xf32>
    %378 = tpu.matmul %376, %377, %cst_167 {dimension_numbers = #tpu.dot_dimension_numbers<[1], [1], [0], [0], [0, 0, 1, 0], [], []>} : vector<32x128xbf16>, vector<1024x128xbf16>, vector<32x1024xf32> -> vector<32x1024xf32>
    %c0_168 = arith.constant 0 : index
    %c0_169 = arith.constant 0 : index
    %379 = vector.load %arg20[%c0_168, %c0_169] : memref<1x1024xf32, #tpu.memory_space<vmem>>, vector<1x1024xf32>
    %380 = vector.broadcast %379 : vector<1x1024xf32> to vector<32x1024xf32>
    %381 = arith.addf %378, %380 : vector<32x1024xf32>
    %c0_170 = arith.constant 0 : index
    %c0_171 = arith.constant 0 : index
    %382 = vector.load %arg21[%c0_170, %c0_171] : memref<32x1024xf32, #tpu.memory_space<vmem>>, vector<32x1024xf32>
    tpu.vector_store %arg21[%c0_170, %c0_171], %381 {strides = array<i32>} : memref<32x1024xf32, #tpu.memory_space<vmem>>, vector<32x1024xf32>,
    return
  }
}

</mosaic_0001>

<bundles_post_ra>
// kernel: bert_tiny_forward.1
= control target key start
LH: loop header
LB: loop body
LE: loop exit
PB: predicated region body
PF: predicated region fallthrough
CT: control target
= control target key end

     0   :  { %s9537_s0 = inlined_call_operand.vmem [shape: f32[32,128], index: 0, kind: input, shape index: {}]   ;;  %s9538_s1 = inlined_call_operand.vmem [shape: f32[1,128], index: 1, kind: input, shape index: {}]   ;;  %s9539_s2 = inlined_call_operand.vmem [shape: f32[1,128], index: 2, kind: input, shape index: {}]   ;;  %s9540_s3 = inlined_call_operand.vmem [shape: bf16[2,128,384], index: 3, kind: input, shape index: {}]   ;;  %s9541_s4 = inlined_call_operand.vmem [shape: f32[2,1,384], index: 4, kind: input, shape index: {}]   ;;  %s9542_s5 = inlined_call_operand.hbm [shape: bf16[2,128,128], index: 5, kind: input, shape index: {}]   ;;  %s9543_s6 = inlined_call_operand.vmem [shape: f32[2,1,128], index: 6, kind: input, shape index: {}]   ;;  %s9544_s7 = inlined_call_operand.vmem [shape: f32[2,1,128], index: 7, kind: input, shape index: {}]   ;;  %s9545_s8 = inlined_call_operand.vmem [shape: f32[2,1,128], index: 8, kind: input, shape index: {}]   ;;  %s9546_s9 = inlined_call_operand.hbm [shape: bf16[2,128,512], index: 9, kind: input, shape index: {}]   ;;  %s9547_s10 = inlined_call_operand.vmem [shape: f32[2,1,512], index: 10, kind: input, shape index: {}]   ;;  %s9548_s11 = inlined_call_operand.hbm [shape: bf16[2,512,128], index: 11, kind: input, shape index: {}]   ;;  %s9549_s12 = inlined_call_operand.vmem [shape: f32[2,1,128], index: 12, kind: input, shape index: {}]   ;;  %s9550_s13 = inlined_call_operand.vmem [shape: f32[2,1,128], index: 13, kind: input, shape index: {}]   ;;  %s9551_s14 = inlined_call_operand.vmem [shape: f32[2,1,128], index: 14, kind: input, shape index: {}]   ;;  %s9552_s15 = inlined_call_operand.hbm [shape: bf16[128,128], index: 15, kind: input, shape index: {}]   ;;  %s9553_s16 = inlined_call_operand.vmem [shape: f32[1,128], index: 16, kind: input, shape index: {}]   ;;  %s9554_s17 = inlined_call_operand.vmem [shape: f32[1,128], index: 17, kind: input, shape index: {}]   ;;  %s9555_s18 = inlined_call_operand.vmem [shape: f32[1,128], index: 18, kind: input, shape index: {}]   ;;  %s9556_s19 = inlined_call_operand.hbm [shape: f32[1024,128], index: 19, kind: input, shape index: {}]   ;;  %s9557_s20 = inlined_call_operand.vmem [shape: f32[1,1024], index: 20, kind: input, shape index: {}]   ;;  %s9558_s21 = inlined_call_operand.hbm [shape: f32[32,1024], index: 21, kind: output, shape index: {}]  }
   0x1   :  { %9562 = sst [smem:[#allocation16_spill]] %s9537_s0 }
   0x2   :  { %9563 = sst [smem:[#allocation17_spill]] %s9538_s1 }
   0x3   :  { %9564 = sst [smem:[#allocation18_spill]] %s9539_s2 }
   0x4   :  { %9565 = sst [smem:[#allocation19_spill]] %s9540_s3 }
   0x5   :  { %9566 = sst [smem:[#allocation20_spill]] %s9541_s4 }
   0x6   :  { %9567 = sst [smem:[#allocation21_spill]] %s9542_s5 }
   0x7   :  { %26 = vsyncpa [#allocation3], 0 }
   0x8   :  { %27 = vsyncpa [#allocation6], 0 }
   0x9   :  { %28 = vsyncpa [#allocation9], 0  ;;  %s63_s26 = sshll.u32 %s9546_s9, 4  ;;  %s64_s26 = int_to_ptr.hbm [resolvable:$true] %s63_s26 }
   0xa   :  { %29 = vsyncpa [#allocation4], 0  ;;  %s7059_s27 = smov [#allocation5]   ;;  %s7060_s28 = smov 256  }
   0xb   :  { %s65_s3 = sshll.u32 %s7059_s27, 4  ;;  %s7061_s29 = smov 16   ;;  %s66_s3 = int_to_ptr.vmem [resolvable:$true] %s65_s3 }
   0xc   :  { %71 = dma.hbm_to_vmem [thread:$0]  %s64_s26, 8192, %s66_s3, [#allocation6], %s7060_s28, %s7060_s28, %s7061_s29  }
   0xd   :  { %s97_s30 = sshll.u32 %s9552_s15, 4  ;;  %s7062_s5 = smov [#allocation8]   ;;  %s98_s30 = int_to_ptr.hbm [resolvable:$true] %s97_s30 }
   0xe   :  { %s99_s22 = sshll.u32 %s7062_s5, 4  ;;  %s9568_s24 = sld [smem:[#allocation21_spill]]  ;;  %s100_s22 = int_to_ptr.vmem [resolvable:$true] %s99_s22 }
   0xf   :  { %s7063_s9 = smov 64   ;;  %s7064_s25 = smov 4  }
  0x10   :  { %105 = dma.hbm_to_vmem [thread:$0]  %s98_s30, 1024, %s100_s22, [#allocation9], %s7063_s9, %s7063_s9, %s7064_s25  }
  0x11   :  { %s78_s3 = sshll.u32 %s9548_s11, 4  ;;  %s7065_s28 = smov [#allocation2]   ;;  %s79_s3 = int_to_ptr.hbm [resolvable:$true] %s78_s3 }
  0x12   :  { %s46_s15 = sshll.u32 %s7065_s28, 4  ;;  %s7066_s29 = smov [#allocation7]   ;;  %s47_s15 = int_to_ptr.vmem [resolvable:$true] %s46_s15 }
  0x13   :  { %s80_s0 = sshll.u32 %s7066_s29, 4  ;;  %s116_s23 = sshll.u32 %s9556_s19, 4  ;;  %s81_s0 = int_to_ptr.vmem [resolvable:$true] %s80_s0  ;;  %s117_s23 = int_to_ptr.hbm [resolvable:$true] %s116_s23 }
  0x14   :  { %s44_s2 = sshll.u32 %s9568_s24, 4  ;;  %s7067_s30 = smov [#allocation10]   ;;  %s45_s2 = int_to_ptr.hbm [resolvable:$true] %s44_s2 }
  0x15   :  { %52 = dma.hbm_to_vmem [thread:$0]  %s45_s2, 2048, %s47_s15, [#allocation3], %s7063_s9, %s7063_s9, %s7064_s25  }
  0x16   :  { %86 = dma.hbm_to_vmem [thread:$0]  %s79_s3, 8192, %s81_s0, [#allocation6], %s7063_s9, %s7063_s9, %s7064_s25  }
  0x17   :  { %s118_s11 = sshll.u32 %s7067_s30, 4  ;;  %s7068_s22 = smov 128   ;;  %s119_s11 = int_to_ptr.vmem [resolvable:$true] %s118_s11 }
  0x18   :  { %s7069_s1 = smov 8  }
  0x19   :  { %124 = dma.hbm_to_vmem [thread:$0]  %s117_s23, 16384, %s119_s11, [#allocation9], %s7068_s22, %s7068_s22, %s7069_s1  }
  0x1a   :  { %7051 = dma.done.wait [#allocation3], 2048  }
  0x1b   :  { %7052 = vsyncadd [#allocation3], 4294965248 }
  0x1c   :  { %7053 = dma.done.wait [#allocation6], 16384  }
  0x1d   :  { %7054 = vsyncadd [#allocation6], 4294950912 }
  0x1e   :  { %7055 = dma.done.wait [#allocation9], 17408  }
  0x1f   :  { %7056 = vsyncadd [#allocation9], 4294949888  ;;  %s9569_s19 = sld [smem:[#allocation16_spill]]  ;;  %v7070_v2 = vmov 128.0   ;;  %vm485_vm13 = vcmask 523264   ;;  %vm521_vm14 = vcmask 130048  }
  0x20   :  { %6721 = vrcp.f32 %v7070_v2  ;;  %s9570_s4 = sld [smem:[#allocation19_spill]] }
  0x21   :  { %s9571_s25 = sld [smem:[#allocation17_spill]] }
  0x22   :  { %s9572_s15 = sld [smem:[#allocation18_spill]] }
  0x23   :  { %s9573_s5 = sld [smem:[#allocation20_spill]] }
  0x25   :  { %v147_v0 = vld [vmem:[%s9569_s19] sm:$0xff]  ;;  %v148_v1 = vld [vmem:[%s9569_s19 + $0x8] sm:$0xff]  ;;  %v7213_v5 = vld [vmem:[%s9569_s19 + $0x10] sm:$0xff] }
  0x26   :  { %153 = vadd.xlane.f32.xlu0 %v147_v0  ;;  %v6722_v3 = vpop.eup %6721  ;;  %157 = vadd.xlane.f32.xlu2 %v7213_v5  ;;  %v7219_v7 = vld [vmem:[%s9569_s19 + $0x18] sm:$0xff]  ;;  %v5604_v19 = vld [vmem:[%s9570_s4 + $0xa8] sm:$0xf]  ;;  %v6464_v20 = vld [vmem:[%s9570_s4 + $0xb0] sm:$0xf0] }
  0x27   :  { %v162_v4 = vmul.f32 128.0, %v6722_v3  ;;  %vm166_vm0 = vweird.f32 %v6722_v3  ;;  %v6463_v21 = vld [vmem:[%s9570_s4 + $0xac] sm:$0xf]  ;;  %v5605_v22 = vor.u32 %v6464_v20, %v5604_v19  ;;  %v5606_v23 = vld [vmem:[%s9570_s4 + $0xb4] sm:$0xf0] }
  0x28   :  { %v5612_v24 = vld [vmem:[%s9570_s4 + $0xb0] sm:$0xf]  ;;  %v6465_v25 = vld [vmem:[%s9570_s4 + $0xb8] sm:$0xf0]  ;;  %v5609_v26 = vor.u32 %v6463_v21, %v5606_v23  ;;  %v6460_v30 = vld [vmem:[%s9570_s4 + $0x94] sm:$0xf] }
  0x29   :  { %v163_v6 = vsub.f32 1.0, %v162_v4  ;;  %v5613_v27 = vor.u32 %v6465_v25, %v5612_v24  ;;  %424 = vmatpush.bf16.msra.mxu0 %v5605_v22  ;;  %v5592_v28 = vld [vmem:[%s9570_s4 + $0x90] sm:$0xf]  ;;  %v6461_v29 = vld [vmem:[%s9570_s4 + $0x98] sm:$0xf0] }
  0x2a   :  { %443 = vmatpush.bf16.msra.mxu1 %v5609_v26  ;;  %v5593_v32 = vor.u32 %v6461_v29, %v5592_v28  ;;  %v5594_v33 = vld [vmem:[%s9570_s4 + $0x9c] sm:$0xf0]  ;;  %v5600_v34 = vld [vmem:[%s9570_s4 + $0x98] sm:$0xf]  ;;  %v6462_v35 = vld [vmem:[%s9570_s4 + $0xa0] sm:$0xf0] }
  0x2b   :  { %v164_v8 = vmul.f32 %v6722_v3, %v163_v6  ;;  %462 = vmatpush.bf16.msra.mxu2 %v5613_v27  ;;  %v5597_v36 = vor.u32 %v6460_v30, %v5594_v33  ;;  %v5601_v37 = vor.u32 %v6462_v35, %v5600_v34  ;;  %v5580_v38 = vld [vmem:[%s9570_s4 + $0x78] sm:$0xf]  ;;  %v6458_v39 = vld [vmem:[%s9570_s4 + $0x80] sm:$0xf0]  ;;  %v6457_v40 = vld [vmem:[%s9570_s4 + $0x7c] sm:$0xf] }
  0x2c   :  { %v5581_v41 = vor.u32 %v6458_v39, %v5580_v38  ;;  %v5582_v42 = vld [vmem:[%s9570_s4 + $0x84] sm:$0xf0]  ;;  %v5588_v43 = vld [vmem:[%s9570_s4 + $0x80] sm:$0xf]  ;;  %v6459_v44 = vld [vmem:[%s9570_s4 + $0x88] sm:$0xf0] }
  0x2d   :  { %v165_v9 = vadd.f32 %v6722_v3, %v164_v8  ;;  %425 = vmatpush.bf16.msra.mxu0 %v5593_v32  ;;  %v5585_v45 = vor.u32 %v6457_v40, %v5582_v42  ;;  %v5589_v46 = vor.u32 %v6459_v44, %v5588_v43  ;;  %v5568_v47 = vld [vmem:[%s9570_s4 + $0x60] sm:$0xf]  ;;  %v6455_v48 = vld [vmem:[%s9570_s4 + $0x68] sm:$0xf0]  ;;  %v6454_v49 = vld [vmem:[%s9570_s4 + $0x64] sm:$0xf] }
  0x2e   :  { %155 = vadd.xlane.f32.xlu0 %v148_v1  ;;  %159 = vadd.xlane.f32.xlu2 %v7219_v7  ;;  %v5569_v51 = vor.u32 %v6455_v48, %v5568_v47  ;;  %v5570_v52 = vld [vmem:[%s9570_s4 + $0x6c] sm:$0xf0]  ;;  %v5576_v53 = vld [vmem:[%s9570_s4 + $0x68] sm:$0xf]  ;;  %v6456_v54 = vld [vmem:[%s9570_s4 + $0x70] sm:$0xf0] }
  0x2f   :  { %v7222_v10 = vsel %vm166_vm0, %v6722_v3, %v165_v9  ;;  %444 = vmatpush.bf16.msra.mxu1 %v5597_v36  ;;  %463 = vmatpush.bf16.msra.mxu2 %v5601_v37  ;;  %v5573_v57 = vor.u32 %v6454_v49, %v5570_v52  ;;  %v5577_v58 = vor.u32 %v6456_v54, %v5576_v53  ;;  %v5556_v61 = vld [vmem:[%s9570_s4 + $0x48] sm:$0xf]  ;;  %v6452_v62 = vld [vmem:[%s9570_s4 + $0x50] sm:$0xf0]  ;;  %v6451_v63 = vld [vmem:[%s9570_s4 + $0x4c] sm:$0xf] }
  0x30   :  { %v5564_v2 = vld [vmem:[%s9570_s4 + $0x50] sm:$0xf]  ;;  %v6453_v3 = vld [vmem:[%s9570_s4 + $0x58] sm:$0xf0]  ;;  %v5532_v20 = vld [vmem:[%s9570_s4 + $0x18] sm:$0xf] }
  0x31   :  { %426 = vmatpush.bf16.msra.mxu0 %v5581_v41  ;;  %v5544_v8 = vld [vmem:[%s9570_s4 + $0x30] sm:$0xf]  ;;  %v6449_v9 = vld [vmem:[%s9570_s4 + $0x38] sm:$0xf0]  ;;  %v6446_v21 = vld [vmem:[%s9570_s4 + $0x20] sm:$0xf0] }
  0x32   :  { %v6445_v22 = vld [vmem:[%s9570_s4 + $0x1c] sm:$0xf]  ;;  %v5533_v23 = vor.u32 %v6446_v21, %v5532_v20  ;;  %v5534_v24 = vld [vmem:[%s9570_s4 + $0x24] sm:$0xf0]  ;;  %v5540_v25 = vld [vmem:[%s9570_s4 + $0x20] sm:$0xf] }
  0x33   :  { %445 = vmatpush.bf16.msra.mxu1 %v5585_v45  ;;  %464 = vmatpush.bf16.msra.mxu2 %v5589_v46  ;;  %v6447_v26 = vld [vmem:[%s9570_s4 + $0x28] sm:$0xf0]  ;;  %v5537_v27 = vor.u32 %v6445_v22, %v5534_v24  ;;  %v5520_v29 = vld [vmem:[%s9570_s4] sm:$0xf]  ;;  %v5522_v34 = vld [vmem:[%s9570_s4 + $0xc] sm:$0xf0] }
  0x34   :  { %v5541_v28 = vor.u32 %v6447_v26, %v5540_v25  ;;  %v6443_v30 = vld [vmem:[%s9570_s4 + $0x8] sm:$0xf0]  ;;  %v5528_v35 = vld [vmem:[%s9570_s4 + $0x8] sm:$0xf]  ;;  %v6444_v36 = vld [vmem:[%s9570_s4 + $0x10] sm:$0xf0] }
  0x35   :  { %427 = vmatpush.bf16.msra.mxu0 %v5569_v51  ;;  %v5521_v33 = vor.u32 %v6443_v30, %v5520_v29  ;;  %v5529_v39 = vor.u32 %v6444_v36, %v5528_v35 }
  0x37   :  { %446 = vmatpush.bf16.msra.mxu1 %v5573_v57  ;;  %465 = vmatpush.bf16.msra.mxu2 %v5577_v58  ;;  %v6704_v57 = vld [vmem:[%s9571_s25] ss:$0 sm:$0xff] }
  0x99   :  { %v154_v11 = vpop.xlane.xlu0 %153  ;;  %v158_v31 = vpop.xlane.xlu2 %157 }
  0x9a   :  { %v168_v12 = vmul.f32 %v7222_v10, %v154_v11  ;;  %v170_v55 = vmul.f32 %v7222_v10, %v158_v31  ;;  %v6448_v11 = vld [vmem:[%s9570_s4 + $0x34] sm:$0xf]  ;;  %v6442_v31 = vld [vmem:[%s9570_s4 + $0x4] sm:$0xf] }
  0x9b   :  { %v5525_v38 = vor.u32 %v6442_v31, %v5522_v34 }
  0x9c   :  { %v7225_v13 = vsub.f32 %v147_v0, %v168_v12  ;;  %v7309_v59 = vsub.f32 %v7213_v5, %v170_v55  ;;  %v5557_v0 = vor.u32 %v6452_v62, %v5556_v61  ;;  %v5565_v5 = vor.u32 %v6453_v3, %v5564_v2 }
  0x9d   :  { %v5545_v12 = vor.u32 %v6449_v9, %v5544_v8 }
  0x9e   :  { %v176_v14 = vmul.f32 %v7225_v13, %v7225_v13  ;;  %v178_v6 = vmul.f32 %v7309_v59, %v7309_v59  ;;  %428 = vmatpush.bf16.msra.mxu0 %v5557_v0  ;;  %466 = vmatpush.bf16.msra.mxu2 %v5565_v5  ;;  %v6705_v0 = vld [vmem:[%s9572_s15] ss:$0 sm:$0xff]  ;;  %s5503_s15 = sshll.u32 %s9558_s21, 4  ;;  %s5504_s15 = int_to_ptr.hbm [resolvable:$true] %s5503_s15 }
  0xa0   :  { %180 = vadd.xlane.f32.xlu1 %v176_v14  ;;  %184 = vadd.xlane.f32.xlu0 %v178_v6  ;;  %v5546_v14 = vld [vmem:[%s9570_s4 + $0x3c] sm:$0xf0] }
  0xa1   :  { %v156_v15 = vpop.xlane.xlu0 %155  ;;  %v160_v50 = vpop.xlane.xlu2 %159 }
  0xa2   :  { %v169_v16 = vmul.f32 %v7222_v10, %v156_v15  ;;  %v171_v56 = vmul.f32 %v7222_v10, %v160_v50  ;;  %v5552_v15 = vld [vmem:[%s9570_s4 + $0x38] sm:$0xf]  ;;  %429 = vmatpush.bf16.msra.mxu0 %v5545_v12 }
  0xa4   :  { %v7230_v17 = vsub.f32 %v148_v1, %v169_v16  ;;  %v7312_v60 = vsub.f32 %v7219_v7, %v171_v56  ;;  %v5558_v1 = vld [vmem:[%s9570_s4 + $0x54] sm:$0xf0]  ;;  %v6450_v16 = vld [vmem:[%s9570_s4 + $0x40] sm:$0xf0] }
  0xa5   :  { %v5561_v4 = vor.u32 %v6451_v63, %v5558_v1  ;;  %v5553_v19 = vor.u32 %v6450_v16, %v5552_v15 }
  0xa6   :  { %v177_v18 = vmul.f32 %v7230_v17, %v7230_v17  ;;  %v179_v7 = vmul.f32 %v7312_v60, %v7312_v60  ;;  %430 = vmatpush.bf16.msra.mxu0 %v5533_v23 }
  0xa7   :  { %447 = vmatpush.bf16.msra.mxu1 %v5561_v4  ;;  %467 = vmatpush.bf16.msra.mxu2 %v5553_v19 }
  0xa8   :  { %182 = vadd.xlane.f32.xlu1 %v177_v18  ;;  %v5549_v18 = vor.u32 %v6448_v11, %v5546_v14 }
  0xaa   :  { %431 = vmatpush.bf16.msra.mxu0 %v5521_v33  ;;  %v288_v33 = vld [vmem:[%s9573_s5] sm:$0x7] }
  0xab   :  { %448 = vmatpush.bf16.msra.mxu1 %v5549_v18  ;;  %468 = vmatpush.bf16.msra.mxu2 %v5541_v28 }
  0xaf   :  { %449 = vmatpush.bf16.msra.mxu1 %v5537_v27  ;;  %469 = vmatpush.bf16.msra.mxu2 %v5529_v39 }
  0xb0   :  { %186 = vadd.xlane.f32.xlu1 %v179_v7 }
  0xb3   :  { %450 = vmatpush.bf16.msra.mxu1 %v5525_v38  ;;  %v290_v38 = vperm.slane %v288_v33, 0 }
 0x113   :  { %v181_v32 = vpop.xlane.xlu1 %180  ;;  %v185_v5 = vpop.xlane.xlu0 %184 }
 0x114   :  { %v188_v37 = vmul.f32 %v181_v32, %v7222_v10  ;;  %v190_v6 = vmul.f32 %v185_v5, %v7222_v10 }
 0x116   :  { %v192_v40 = vadd.f32 1e-12, %v188_v37  ;;  %v194_v8 = vadd.f32 1e-12, %v190_v6 }
 0x118   :  { %6723 = vrsqrt.f32 %v192_v40  ;;  %vm202_vm2 = vweird.f32 %v192_v40  ;;  %vm222_vm9 = vweird.f32 %v194_v8 }
 0x11b   :  { %v183_v41 = vpop.xlane.xlu1 %182 }
 0x11c   :  { %v189_v42 = vmul.f32 %v183_v41, %v7222_v10 }
 0x11e   :  { %v6724_v43 = vpop.eup %6723  ;;  %v193_v44 = vadd.f32 1e-12, %v189_v42 }
 0x11f   :  { %v197_v45 = vmul.f32 %v6724_v43, %v192_v40  ;;  %vm203_vm1 = vweird.f32 %v6724_v43  ;;  %v292_v40 = vperm.slane %v288_v33, 2 }
 0x120   :  { %6725 = vrsqrt.f32 %v193_v44  ;;  %vm204_vm3 = vmor %vm202_vm2, %vm203_vm1  ;;  %vm212_vm5 = vweird.f32 %v193_v44 }
 0x121   :  { %v198_v46 = vmul.f32 %v6724_v43, %v197_v45 }
 0x123   :  { %v199_v47 = vmul.f32 0.5, %v198_v46  ;;  %v187_v4 = vpop.xlane.xlu1 %186 }
 0x125   :  { %v200_v48 = vsub.f32 1.5, %v199_v47 }
 0x126   :  { %v6726_v49 = vpop.eup %6725 }
 0x127   :  { %v201_v50 = vmul.f32 %v6724_v43, %v200_v48  ;;  %v207_v51 = vmul.f32 %v6726_v49, %v193_v44  ;;  %vm213_vm4 = vweird.f32 %v6726_v49 }
 0x128   :  { %vm214_vm6 = vmor %vm212_vm5, %vm213_vm4 }
 0x129   :  { %v208_v52 = vmul.f32 %v6726_v49, %v207_v51  ;;  %v205_v53 = vsel %vm204_vm3, %v6724_v43, %v201_v50 }
 0x12a   :  { %v236_v56 = vmul.f32 %v205_v53, %v7225_v13 }
 0x12b   :  { %v209_v54 = vmul.f32 0.5, %v208_v52 }
 0x12c   :  { %v243_v63 = vmul.f32 %v6704_v57, %v236_v56 }
 0x12d   :  { %v210_v55 = vsub.f32 1.5, %v209_v54 }
 0x12e   :  { %v7400_v2 = vadd.f32 %v6705_v0, %v243_v63 }
 0x12f   :  { %v211_v58 = vmul.f32 %v6726_v49, %v210_v55 }
 0x131   :  { %v215_v61 = vsel %vm214_vm6, %v6726_v49, %v211_v58 }
 0x132   :  { %v237_v62 = vmul.f32 %v215_v61, %v7230_v17  ;;  %v191_v17 = vmul.f32 %v187_v4, %v7222_v10 }
 0x134   :  { %v244_v1 = vmul.f32 %v6704_v57, %v237_v62  ;;  %v195_v7 = vadd.f32 1e-12, %v191_v17 }
 0x136   :  { %v7402_v3 = vadd.f32 %v6705_v0, %v244_v1  ;;  %6727 = vrsqrt.f32 %v195_v7  ;;  %vm232_vm7 = vweird.f32 %v195_v7 }
 0x137   :  { %6729 = vrsqrt.f32 %v194_v8 }
 0x138   :  { %v286_v13 = vpack.c.bf16 %v7402_v3, %v7400_v2 }
 0x13a   :  { %432 = vmatmul.bf16.vlgmr.msra.gmra.mxu0 %v286_v13  ;;  %451 = vmatmul.bf16.vlgmr.msra.gmra.mxu1 %v286_v13 }
 0x13b   :  { %470 = vmatmul.bf16.vlgmr.msra.gmra.mxu2 %v286_v13 }
 0x13c   :  { %v6728_v9 = vpop.eup %6727 }
 0x13d   :  { %v6730_v11 = vpop.eup %6729  ;;  %v227_v12 = vmul.f32 %v6728_v9, %v195_v7  ;;  %vm233_vm8 = vweird.f32 %v6728_v9 }
 0x13e   :  { %v217_v14 = vmul.f32 %v6730_v11, %v194_v8  ;;  %vm223_vm10 = vweird.f32 %v6730_v11  ;;  %vm234_vm11 = vmor %vm232_vm7, %vm233_vm8 }
 0x13f   :  { %v228_v15 = vmul.f32 %v6728_v9, %v227_v12  ;;  %vm224_vm12 = vmor %vm222_vm9, %vm223_vm10 }
 0x140   :  { %v218_v16 = vmul.f32 %v6730_v11, %v217_v14 }
 0x141   :  { %v229_v18 = vmul.f32 0.5, %v228_v15 }
 0x142   :  { %v219_v19 = vmul.f32 0.5, %v218_v16 }
 0x143   :  { %v230_v20 = vsub.f32 1.5, %v229_v18 }
 0x144   :  { %v220_v21 = vsub.f32 1.5, %v219_v19 }
 0x145   :  { %v231_v22 = vmul.f32 %v6728_v9, %v230_v20 }
 0x146   :  { %v221_v23 = vmul.f32 %v6730_v11, %v220_v21 }
 0x147   :  { %v235_v24 = vsel %vm234_vm11, %v6728_v9, %v231_v22 }
 0x148   :  { %v239_v25 = vmul.f32 %v235_v24, %v7312_v60  ;;  %v225_v26 = vsel %vm224_vm12, %v6730_v11, %v221_v23  ;;  %v291_v60 = vperm.slane %v288_v33, 1 }
 0x149   :  { %v238_v27 = vmul.f32 %v225_v26, %v7309_v59 }
 0x14a   :  { %v246_v28 = vmul.f32 %v6704_v57, %v239_v25 }
 0x14b   :  { %v245_v29 = vmul.f32 %v6704_v57, %v238_v27 }
 0x14c   :  { %v7410_v30 = vadd.f32 %v6705_v0, %v246_v28 }
 0x14d   :  { %v7412_v31 = vadd.f32 %v6705_v0, %v245_v29 }
 0x14f   :  { %v287_v32 = vpack.c.bf16 %v7410_v30, %v7412_v31 }
 0x151   :  { %456 = vmatmul.bf16.gmra.mxu1 %v287_v32  ;;  %475 = vmatmul.bf16.gmra.mxu2 %v287_v32 }
 0x152   :  { %437 = vmatmul.bf16.gmra.mxu0 %v287_v32 }
 0x1b7   :  { %v452_v34 = vpop.f32.mrf.mxu1  ;;  %v433_v36 = vpop.f32.mrf.mxu0 }
 0x1b8   :  { %v453_v35 = vadd.f32 %v452_v34, %v291_v60  ;;  %v434_v41 = vadd.f32 %v433_v36, %v290_v38 }
 0x1ba   :  { %577 = vrot.lane.b32.xlu1 %v453_v35, %s7063_s9  ;;  %v481_v45 = vmul.f32 0.125, %v434_v41 }
 0x1be   :  { %v471_v59 = vpop.f32.mrf.mxu2 }
 0x1bf   :  { %v454_v37 = vpop.f32.mrf.mxu1  ;;  %v7422_v43 = vadd.f32 %v471_v59, %v292_v40  ;;  %v435_v46 = vpop.f32.mrf.mxu0 }
 0x1c0   :  { %v455_v39 = vadd.f32 %v454_v37, %v291_v60  ;;  %v436_v48 = vadd.f32 %v435_v46, %v290_v38 }
 0x1c2   :  { %5614 = vmatpush.xpose.msk.msra.mxu3 %vm485_vm13, %v455_v39  ;;  %v482_v49 = vmul.f32 0.125, %v436_v48 }
 0x1c6   :  { %v473_v42 = vpop.f32.mrf.mxu2  ;;  %5615 = vmatpush.xpose.msk.msra.mxu3 %vm485_vm13, %v453_v35 }
 0x1c7   :  { %v7424_v44 = vadd.f32 %v473_v42, %v292_v40 }
 0x1c9   :  { %v6664_v47 = vpack.i.bf16 %v7422_v43, %v7424_v44  ;;  %5616 = vmatmul.msk.f32.vlgmr.msra.gmra.mxu3 %vm485_vm13, %v481_v45 }
 0x1ca   :  { %564 = vmatpush.msrb.mxu3 %v7424_v44 }
 0x1cc   :  { %565 = vmatpush.msrb.mxu3 %v7422_v43 }
 0x1ce   :  { %v457_v50 = vpop.f32.mrf.mxu1 }
 0x1cf   :  { %v438_v51 = vpop.f32.mrf.mxu0  ;;  %v458_v55 = vadd.f32 %v457_v50, %v291_v60 }
 0x1d0   :  { %v439_v54 = vadd.f32 %v438_v51, %v290_v38 }
 0x1d1   :  { %5617 = vmatmul.msk.f32.gmra.mxu3 %vm485_vm13, %v482_v49 }
 0x1d2   :  { %v483_v57 = vmul.f32 0.125, %v439_v54 }
 0x1d4   :  { %v476_v56 = vpop.f32.mrf.mxu2 }
 0x1d5   :  { %v7435_v0 = vadd.f32 %v476_v56, %v292_v40 }
 0x1d6   :  { %v459_v52 = vpop.f32.mrf.mxu1 }
 0x1d7   :  { %v460_v53 = vadd.f32 %v459_v52, %v291_v60  ;;  %v440_v58 = vpop.f32.mrf.mxu0 }
 0x1d8   :  { %v441_v61 = vadd.f32 %v440_v58, %v290_v38 }
 0x1d9   :  { %5626 = vmatpush.xpose.msk.msrb.mxu2 %vm485_vm13, %v460_v53 }
 0x1da   :  { %v484_v62 = vmul.f32 0.125, %v441_v61 }
 0x1dc   :  { %v478_v63 = vpop.f32.mrf.mxu2 }
 0x1dd   :  { %5627 = vmatpush.xpose.msk.msrb.mxu2 %vm485_vm13, %v458_v55  ;;  %v7437_v1 = vadd.f32 %v478_v63, %v292_v40 }
 0x1df   :  { %758 = vmatpush.msrb.mxu1 %v7437_v1  ;;  %v6669_v13 = vpack.i.bf16 %v7435_v0, %v7437_v1 }
 0x1e0   :  { %5628 = vmatmul.msk.f32.vlgmr.msrb.gmra.mxu2 %vm485_vm13, %v483_v57 }
 0x1e1   :  { %759 = vmatpush.msrb.mxu1 %v7435_v0 }
 0x1e8   :  { %5629 = vmatmul.msk.f32.gmra.mxu2 %vm485_vm13, %v484_v62 }
 0x22c   :  { %v578_v21 = vpop.permute.xlu1 %577 }
 0x24c   :  { %v515_v4 = vpop.f32.mrf.mxu3 }
 0x24d   :  { %v522_v5 = vsel %vm521_vm14, %v515_v4, -inf }
 0x24e   :  { %523 = vmax.xlane.f32.xlu2 %v522_v5 }
 0x254   :  { %v518_v17 = vpop.f32.mrf.mxu3 }
 0x255   :  { %v525_v6 = vsel %vm521_vm14, %v518_v17, -inf }
 0x256   :  { %526 = vmax.xlane.f32.xlu0 %v525_v6 }
 0x263   :  { %v7465_v35 = vpop.f32.mrf.mxu2 }
 0x264   :  { %v716_v6 = vsel %vm521_vm14, %v7465_v35, -inf }
 0x266   :  { %573 = vrot.lane.b32.xlu2 %v481_v45, %s7063_s9 }
 0x26a   :  { %579 = vrot.lane.b32.xlu0 %v455_v39, %s7063_s9 }
 0x26b   :  { %v7471_v37 = vpop.f32.mrf.mxu2 }
 0x272   :  { %575 = vrot.lane.b32.xlu0 %v482_v49, %s7063_s9 }
 0x27a   :  { %767 = vrot.lane.b32.xlu0 %v483_v57, %s7063_s9 }
 0x2c1   :  { %v524_v7 = vpop.xlane.xlu2 %523 }
 0x2c2   :  { %v528_v8 = vsub.f32 %v515_v4, %v524_v7 }
 0x2c4   :  { %v530_v9 = vmul.f32 1.442695, %v528_v8 }
 0x2c6   :  { %6731 = vpow2.f32 %v530_v9  ;;  %v719_v9 = vsel %vm521_vm14, %v7471_v37, -inf }
 0x2c9   :  { %v527_v11 = vpop.xlane.xlu0 %526  ;;  %v574_v22 = vpop.permute.xlu2 %573 }
 0x2ca   :  { %v529_v12 = vsub.f32 %v518_v17, %v527_v11 }
 0x2cc   :  { %v6732_v14 = vpop.eup %6731  ;;  %v532_v15 = vmul.f32 1.442695, %v529_v12 }
 0x2cd   :  { %v534_v16 = vsel %vm521_vm14, %v6732_v14, 0.0 }
 0x2ce   :  { %6733 = vpow2.f32 %v532_v15  ;;  %535 = vadd.xlane.f32.xlu1 %v534_v16 }
 0x2d4   :  { %v6734_v18 = vpop.eup %6733 }
 0x2d5   :  { %v537_v19 = vsel %vm521_vm14, %v6734_v18, 0.0 }
 0x2d6   :  { %538 = vadd.xlane.f32.xlu2 %v537_v19 }
 0x2dc   :  { %v580_v20 = vpop.permute.xlu0 %579 }
 0x2dd   :  { %5620 = vmatpush.xpose.msk.msra.mxu3 %vm485_vm13, %v580_v20 }
 0x2e1   :  { %5621 = vmatpush.xpose.msk.msra.mxu3 %vm485_vm13, %v578_v21 }
 0x2e4   :  { %v576_v32 = vpop.permute.xlu0 %575 }
 0x2e7   :  { %771 = vrot.lane.b32.xlu1 %v458_v55, %s7063_s9 }
 0x2ec   :  { %v768_v60 = vpop.permute.xlu0 %767 }
 0x2ee   :  { %773 = vrot.lane.b32.xlu2 %v460_v53, %s7063_s9 }
 0x2f6   :  { %769 = vrot.lane.b32.xlu2 %v484_v62, %s7063_s9 }
 0x341   :  { %v536_v23 = vpop.xlane.xlu1 %535 }
 0x342   :  { %6735 = vrcp.f32 %v536_v23 }
 0x348   :  { %v6736_v24 = vpop.eup %6735 }
 0x349   :  { %v539_v25 = vpop.xlane.xlu2 %538  ;;  %v542_v26 = vmul.f32 %v6736_v24, %v6732_v14 }
 0x34a   :  { %6737 = vrcp.f32 %v539_v25 }
 0x34b   :  { %5618 = vmatmul.msk.f32.vlgmr.msrb.gmra.mxu3 %vm521_vm14, %v542_v26 }
 0x350   :  { %v6738_v27 = vpop.eup %6737 }
 0x351   :  { %v774_v28 = vpop.permute.xlu2 %773  ;;  %v543_v29 = vmul.f32 %v6738_v27, %v6734_v18 }
 0x352   :  { %5632 = vmatpush.xpose.msk.msra.mxu2 %vm485_vm13, %v774_v28 }
 0x353   :  { %5619 = vmatmul.msk.f32.gmra.mxu3 %vm521_vm14, %v543_v29 }
 0x359   :  { %v772_v33 = vpop.permute.xlu1 %771  ;;  %v770_v34 = vpop.permute.xlu2 %769 }
 0x35a   :  { %5633 = vmatpush.xpose.msk.msra.mxu2 %vm485_vm13, %v772_v33 }
 0x35b   :  { %5622 = vmatmul.msk.f32.vlgmr.msra.gmra.mxu3 %vm485_vm13, %v574_v22 }
 0x35d   :  { %5634 = vmatmul.msk.f32.vlgmr.msra.gmra.mxu2 %vm485_vm13, %v768_v60 }
 0x363   :  { %5623 = vmatmul.msk.f32.gmra.mxu3 %vm485_vm13, %v576_v32 }
 0x365   :  { %5635 = vmatmul.msk.f32.gmra.mxu2 %vm485_vm13, %v770_v34 }
 0x3ce   :  { %v7467_v59 = vpop.f32.mrf.mxu3 }
 0x3d6   :  { %v7469_v36 = vpop.f32.mrf.mxu3 }
 0x3de   :  { %v606_v38 = vpop.f32.mrf.mxu3 }
 0x3df   :  { %v612_v39 = vsel %vm521_vm14, %v606_v38, -inf }
 0x3e0   :  { %613 = vmax.xlane.f32.xlu1 %v612_v39  ;;  %v800_v40 = vpop.f32.mrf.mxu2 }
 0x3e1   :  { %v806_v41 = vsel %vm521_vm14, %v800_v40, -inf }
 0x3e2   :  { %807 = vmax.xlane.f32.xlu2 %v806_v41 }
 0x3e6   :  { %v609_v42 = vpop.f32.mrf.mxu3 }
 0x3e7   :  { %v615_v45 = vsel %vm521_vm14, %v609_v42, -inf }
 0x3e8   :  { %616 = vmax.xlane.f32.xlu0 %v615_v45  ;;  %v803_v46 = vpop.f32.mrf.mxu2 }
 0x3e9   :  { %v809_v48 = vsel %vm521_vm14, %v803_v46, -inf }
 0x3ea   :  { %810 = vmax.xlane.f32.xlu1 %v809_v48 }
 0x3fa   :  { %6665 = vrot.lane.b32.xlu2 %v6664_v47, %s7063_s9 }
 0x453   :  { %v614_v49 = vpop.xlane.xlu1 %613 }
 0x454   :  { %v618_v50 = vsub.f32 %v606_v38, %v614_v49 }
 0x455   :  { %v808_v51 = vpop.xlane.xlu2 %807 }
 0x456   :  { %v620_v52 = vmul.f32 1.442695, %v618_v50  ;;  %v812_v53 = vsub.f32 %v800_v40, %v808_v51 }
 0x458   :  { %6739 = vpow2.f32 %v620_v52  ;;  %v814_v54 = vmul.f32 1.442695, %v812_v53  ;;  %v6472_v52 = vld [vmem:[#allocation2 + $0x30] sm:$0xff]  ;;  %v6471_v53 = vld [vmem:[#allocation2 + $0x28] sm:$0xff] }
 0x45a   :  { %6741 = vpow2.f32 %v814_v54  ;;  %v6470_v54 = vld [vmem:[#allocation2 + $0x20] sm:$0xff] }
 0x45b   :  { %v617_v55 = vpop.xlane.xlu0 %616 }
 0x45c   :  { %v619_v56 = vsub.f32 %v609_v42, %v617_v55  ;;  %v6469_v55 = vld [vmem:[#allocation2 + $0x18] sm:$0xff] }
 0x45d   :  { %v6666_v57 = vpop.permute.xlu2 %6665  ;;  %v811_v47 = vpop.xlane.xlu1 %810 }
 0x45e   :  { %v6740_v58 = vpop.eup %6739  ;;  %v622_v61 = vmul.f32 1.442695, %v619_v56  ;;  %v6667_v62 = vunpack.i.l.bf16 %v6666_v57  ;;  %v6668_v43 = vunpack.i.h.bf16 %v6666_v57  ;;  %v813_v17 = vsub.f32 %v803_v46, %v811_v47  ;;  %v6473_v46 = vld [vmem:[#allocation2 + $0x38] sm:$0xff]  ;;  %v6468_v56 = vld [vmem:[#allocation2 + $0x10] sm:$0xff] }
 0x45f   :  { %v624_v63 = vsel %vm521_vm14, %v6740_v58, 0.0  ;;  %945 = vmatpush.bf16.msrb.mxu0 %v6473_v46  ;;  %v5792_v46 = vld [vmem:[#allocation5 + $0xe8] sm:$0xf] }
 0x460   :  { %v6742_v4 = vpop.eup %6741  ;;  %6743 = vpow2.f32 %v622_v61  ;;  %625 = vadd.xlane.f32.xlu0 %v624_v63  ;;  %662 = vmatpush.msrb.mxu3 %v6667_v62  ;;  %v816_v8 = vmul.f32 1.442695, %v813_v17  ;;  %v6466_v63 = vld [vmem:[#allocation2] sm:$0xff] }
 0x461   :  { %v818_v44 = vsel %vm521_vm14, %v6742_v4, 0.0 }
 0x462   :  { %663 = vmatpush.msrb.mxu3 %v6668_v43  ;;  %819 = vadd.xlane.f32.xlu1 %v818_v44  ;;  %6745 = vpow2.f32 %v816_v8 }
 0x463   :  { %946 = vmatpush.bf16.msrb.mxu0 %v6472_v52  ;;  %v5794_v52 = vld [vmem:[#allocation5 + $0xf8] sm:$0xf0] }
 0x466   :  { %v6744_v5 = vpop.eup %6743 }
 0x467   :  { %v627_v7 = vsel %vm521_vm14, %v6744_v5, 0.0  ;;  %947 = vmatpush.bf16.msrb.mxu0 %v6471_v53 }
 0x468   :  { %717 = vmax.xlane.f32.xlu0 %v716_v6  ;;  %v6746_v11 = vpop.eup %6745 }
 0x469   :  { %v821_v12 = vsel %vm521_vm14, %v6746_v11, 0.0 }
 0x46a   :  { %628 = vadd.xlane.f32.xlu1 %v627_v7 }
 0x46b   :  { %948 = vmatpush.bf16.msrb.mxu0 %v6470_v54  ;;  %v5768_v54 = vld [vmem:[#allocation5 + $0xc0] sm:$0xf] }
 0x46f   :  { %949 = vmatpush.bf16.msrb.mxu0 %v6469_v55  ;;  %v6500_v55 = vld [vmem:[#allocation5 + $0xcc] sm:$0xf0] }
 0x470   :  { %720 = vmax.xlane.f32.xlu0 %v719_v9 }
 0x473   :  { %950 = vmatpush.bf16.msrb.mxu0 %v6468_v56  ;;  %v6498_v56 = vld [vmem:[#allocation5 + $0xc4] sm:$0xf] }
 0x478   :  { %822 = vadd.xlane.f32.xlu0 %v821_v12 }
 0x483   :  { %6670 = vrot.lane.b32.xlu1 %v6669_v13, %s7063_s9 }
 0x4d3   :  { %v626_v14 = vpop.xlane.xlu0 %625 }
 0x4d4   :  { %6747 = vrcp.f32 %v626_v14 }
 0x4d5   :  { %v820_v15 = vpop.xlane.xlu1 %819 }
 0x4da   :  { %v6748_v16 = vpop.eup %6747 }
 0x4db   :  { %v632_v18 = vmul.f32 %v6748_v16, %v6740_v58  ;;  %v718_v19 = vpop.xlane.xlu0 %717  ;;  %v6467_v58 = vld [vmem:[#allocation2 + $0x8] sm:$0xff] }
 0x4dc   :  { %v722_v20 = vsub.f32 %v7465_v35, %v718_v19  ;;  %951 = vmatpush.bf16.msrb.mxu0 %v6467_v58  ;;  %v5770_v58 = vld [vmem:[#allocation5 + $0xd0] sm:$0xf0] }
 0x4dd   :  { %v629_v21 = vpop.xlane.xlu1 %628  ;;  %5624 = vmatmul.msk.f32.vlgmr.msrb.gmra.mxu3 %vm521_vm14, %v632_v18 }
 0x4de   :  { %v724_v22 = vmul.f32 1.442695, %v722_v20  ;;  %6749 = vrcp.f32 %v629_v21 }
 0x4e0   :  { %6751 = vpow2.f32 %v724_v22  ;;  %952 = vmatpush.bf16.msrb.mxu0 %v6466_v63  ;;  %v5773_v63 = vor.u32 %v6498_v56, %v5770_v58  ;;  %v6480_v56 = vld [vmem:[#allocation5 + $0x2c] sm:$0xf0] }
 0x4e3   :  { %v721_v23 = vpop.xlane.xlu0 %720 }
 0x4e4   :  { %v6750_v24 = vpop.eup %6749  ;;  %v723_v25 = vsub.f32 %v7471_v37, %v721_v23 }
 0x4e5   :  { %v633_v0 = vmul.f32 %v6750_v24, %v6744_v5 }
 0x4e6   :  { %v6752_v1 = vpop.eup %6751  ;;  %v726_v13 = vmul.f32 1.442695, %v723_v25 }
 0x4e7   :  { %5625 = vmatmul.msk.f32.gmra.mxu3 %vm521_vm14, %v633_v0  ;;  %v728_v26 = vsel %vm521_vm14, %v6752_v1, 0.0 }
 0x4e8   :  { %6753 = vpow2.f32 %v726_v13  ;;  %729 = vadd.xlane.f32.xlu2 %v728_v26 }
 0x4e9   :  { %6755 = vrcp.f32 %v820_v15 }
 0x4eb   :  { %v823_v29 = vpop.xlane.xlu0 %822 }
 0x4ec   :  { %6757 = vrcp.f32 %v823_v29 }
 0x4ee   :  { %v6754_v27 = vpop.eup %6753 }
 0x4ef   :  { %v731_v28 = vsel %vm521_vm14, %v6754_v27, 0.0  ;;  %v6756_v33 = vpop.eup %6755 }
 0x4f0   :  { %732 = vadd.xlane.f32.xlu0 %v731_v28  ;;  %v826_v35 = vmul.f32 %v6756_v33, %v6742_v4 }
 0x4f2   :  { %v6758_v37 = vpop.eup %6757 }
 0x4f3   :  { %v827_v38 = vmul.f32 %v6758_v37, %v6746_v11 }
 0x4f5   :  { %v6671_v32 = vpop.permute.xlu1 %6670 }
 0x4f6   :  { %v6672_v60 = vunpack.i.l.bf16 %v6671_v32  ;;  %v6673_v34 = vunpack.i.h.bf16 %v6671_v32 }
 0x4f8   :  { %856 = vmatpush.msra.mxu3 %v6672_v60 }
 0x4fa   :  { %857 = vmatpush.msra.mxu3 %v6673_v34 }
 0x4fb   :  { %5636 = vmatmul.msk.f32.vlgmr.msra.gmra.mxu3 %vm521_vm14, %v826_v35 }
 0x503   :  { %5637 = vmatmul.msk.f32.gmra.mxu3 %vm521_vm14, %v827_v38 }
 0x55b   :  { %v730_v39 = vpop.xlane.xlu2 %729 }
 0x55c   :  { %6759 = vrcp.f32 %v730_v39  ;;  %v5784_v39 = vld [vmem:[#allocation5 + $0xe0] sm:$0xf] }
 0x560   :  { %v665_v41 = vpop.f32.mrf.mxu3 }
 0x562   :  { %v6760_v40 = vpop.eup %6759 }
 0x563   :  { %v733_v42 = vpop.xlane.xlu0 %732  ;;  %v736_v45 = vmul.f32 %v6760_v40, %v6752_v1  ;;  %v6504_v40 = vld [vmem:[#allocation5 + $0xec] sm:$0xf0] }
 0x564   :  { %6761 = vrcp.f32 %v733_v42  ;;  %v5785_v42 = vor.u32 %v6504_v40, %v5784_v39  ;;  %v5704_v40 = vld [vmem:[#allocation5 + $0x40] sm:$0xf] }
 0x565   :  { %5630 = vmatmul.msk.f32.vlgmr.msrb.gmra.mxu1 %vm521_vm14, %v736_v45  ;;  %v5786_v45 = vld [vmem:[#allocation5 + $0xf0] sm:$0xf0] }
 0x566   :  { %1268 = vmatpush.bf16.msra.mxu1 %v5785_v42  ;;  %v6482_v42 = vld [vmem:[#allocation5 + $0x44] sm:$0xf] }
 0x56a   :  { %v6762_v48 = vpop.eup %6761  ;;  %v668_v49 = vpop.f32.mrf.mxu3 }
 0x56b   :  { %v6674_v50 = vpack.i.bf16 %v668_v49, %v665_v41  ;;  %v737_v51 = vmul.f32 %v6762_v48, %v6754_v27  ;;  %v6502_v41 = vld [vmem:[#allocation5 + $0xe4] sm:$0xf]  ;;  %v6505_v48 = vld [vmem:[#allocation5 + $0xf4] sm:$0xf0] }
 0x56c   :  { %v5789_v49 = vor.u32 %v6502_v41, %v5786_v45  ;;  %v6484_v41 = vld [vmem:[#allocation5 + $0x4c] sm:$0xf0] }
 0x56d   :  { %6675 = vrot.lane.b32.xlu0 %v6674_v50, %s7063_s9  ;;  %5631 = vmatmul.msk.f32.gmra.mxu1 %vm521_vm14, %v737_v51  ;;  %v5793_v50 = vor.u32 %v6505_v48, %v5792_v46  ;;  %v6503_v51 = vld [vmem:[#allocation5 + $0xec] sm:$0xf]  ;;  %v5705_v45 = vor.u32 %v6484_v41, %v5704_v40  ;;  %v5706_v46 = vld [vmem:[#allocation5 + $0x50] sm:$0xf0]  ;;  %v5712_v48 = vld [vmem:[#allocation5 + $0x48] sm:$0xf] }
 0x56e   :  { %v5797_v53 = vor.u32 %v6503_v51, %v5794_v52  ;;  %1287 = vmatpush.bf16.msrb.mxu2 %v5789_v49  ;;  %v6485_v49 = vld [vmem:[#allocation5 + $0x54] sm:$0xf0]  ;;  %v6483_v52 = vld [vmem:[#allocation5 + $0x4c] sm:$0xf] }
 0x56f   :  { %1306 = vmatpush.bf16.msrb.mxu3 %v5793_v50  ;;  %v5709_v50 = vor.u32 %v6482_v42, %v5706_v46  ;;  %v5713_v51 = vor.u32 %v6485_v49, %v5712_v48  ;;  %v6708_v46 = vld [vmem:[%s9545_s8] ss:$0 sm:$0xff] }
 0x570   :  { %1325 = vmatpush.bf16.msra.mxu0 %v5797_v53  ;;  %v5714_v53 = vld [vmem:[#allocation5 + $0x58] sm:$0xf0] }
 0x572   :  { %1288 = vmatpush.bf16.msrb.mxu2 %v5773_v63  ;;  %v6481_v63 = vld [vmem:[#allocation5 + $0x34] sm:$0xf0] }
 0x57e   :  { %v859_v57 = vpop.f32.mrf.mxu3 }
 0x586   :  { %v862_v61 = vpop.f32.mrf.mxu3 }
 0x587   :  { %v6679_v62 = vpack.i.bf16 %v862_v61, %v859_v57  ;;  %v5769_v57 = vor.u32 %v6500_v55, %v5768_v54  ;;  %v5776_v61 = vld [vmem:[#allocation5 + $0xc8] sm:$0xf]  ;;  %v5717_v54 = vor.u32 %v6483_v52, %v5714_v53  ;;  %v5688_v55 = vld [vmem:[#allocation5 + $0x20] sm:$0xf] }
 0x588   :  { %v5689_v58 = vor.u32 %v6480_v56, %v5688_v55 }
 0x589   :  { %6680 = vrot.lane.b32.xlu1 %v6679_v62, %s7063_s9  ;;  %v6501_v62 = vld [vmem:[#allocation5 + $0xd4] sm:$0xf0]  ;;  %1269 = vmatpush.bf16.msra.mxu1 %v5769_v57  ;;  %v6478_v57 = vld [vmem:[#allocation5 + $0x24] sm:$0xf] }
 0x5df   :  { %v6676_v4 = vpop.permute.xlu0 %6675 }
 0x5e0   :  { %v6678_v43 = vunpack.i.h.bf16 %v6676_v4  ;;  %v6677_v44 = vunpack.i.l.bf16 %v6676_v4  ;;  %v5777_v4 = vor.u32 %v6501_v62, %v5776_v61  ;;  %v5690_v61 = vld [vmem:[#allocation5 + $0x30] sm:$0xf0]  ;;  %v5696_v62 = vld [vmem:[#allocation5 + $0x28] sm:$0xf] }
 0x5e2   :  { %v679_v47 = vsel %vm485_vm13, %v7467_v59, %v6677_v44  ;;  %v680_v5 = vsel %vm485_vm13, %v7469_v36, %v6678_v43  ;;  %v761_v6 = vpop.f32.mrf.mxu1  ;;  %v6706_v59 = vld [vmem:[%s9543_s6] ss:$0 sm:$0xff]  ;;  %v6499_v43 = vld [vmem:[#allocation5 + $0xcc] sm:$0xf]  ;;  %v5778_v44 = vld [vmem:[#allocation5 + $0xd8] sm:$0xf0]  ;;  %1307 = vmatpush.bf16.msrb.mxu3 %v5777_v4  ;;  %v5693_v4 = vor.u32 %v6478_v57, %v5690_v61 }
 0x5e3   :  { %v891_v17 = vpack.c.bf16 %v680_v5, %v679_v47  ;;  %v5781_v47 = vor.u32 %v6499_v43, %v5778_v44  ;;  %v5752_v5 = vld [vmem:[#allocation5 + $0xa0] sm:$0xf]  ;;  %v5697_v43 = vor.u32 %v6481_v63, %v5696_v62  ;;  %v6479_v44 = vld [vmem:[#allocation5 + $0x2c] sm:$0xf] }
 0x5e5   :  { %953 = vmatmul.bf16.vlgmr.msrb.gmra.mxu0 %v891_v17  ;;  %v6496_v17 = vld [vmem:[#allocation5 + $0xac] sm:$0xf0] }
 0x5e6   :  { %1326 = vmatpush.bf16.msra.mxu0 %v5781_v47  ;;  %v5698_v47 = vld [vmem:[#allocation5 + $0x38] sm:$0xf0] }
 0x5ea   :  { %v764_v11 = vpop.f32.mrf.mxu1 }
 0x5fb   :  { %v6681_v7 = vpop.permute.xlu1 %6680 }
 0x5fc   :  { %v6683_v8 = vunpack.i.h.bf16 %v6681_v7  ;;  %v6682_v9 = vunpack.i.l.bf16 %v6681_v7  ;;  %v5753_v7 = vor.u32 %v6496_v17, %v5752_v5  ;;  %v5701_v17 = vor.u32 %v6479_v44, %v5698_v47 }
 0x5fe   :  { %v873_v12 = vsel %vm485_vm13, %v761_v6, %v6682_v9  ;;  %v874_v14 = vsel %vm485_vm13, %v764_v11, %v6683_v8  ;;  %v6494_v6 = vld [vmem:[#allocation5 + $0xa4] sm:$0xf]  ;;  %v5754_v8 = vld [vmem:[#allocation5 + $0xb0] sm:$0xf0]  ;;  %v5760_v9 = vld [vmem:[#allocation5 + $0xa8] sm:$0xf]  ;;  %1270 = vmatpush.bf16.msra.mxu1 %v5753_v7 }
 0x5ff   :  { %v892_v15 = vpack.c.bf16 %v874_v14, %v873_v12  ;;  %v6497_v11 = vld [vmem:[#allocation5 + $0xb4] sm:$0xf0]  ;;  %v5757_v12 = vor.u32 %v6494_v6, %v5754_v8  ;;  %v5672_v7 = vld [vmem:[#allocation5] sm:$0xf]  ;;  %v6476_v8 = vld [vmem:[#allocation5 + $0xc] sm:$0xf0] }
 0x600   :  { %v5761_v14 = vor.u32 %v6497_v11, %v5760_v9  ;;  %v6474_v9 = vld [vmem:[#allocation5 + $0x4] sm:$0xf]  ;;  %v5673_v11 = vor.u32 %v6476_v8, %v5672_v7 }
 0x601   :  { %958 = vmatmul.bf16.gmra.mxu0 %v892_v15  ;;  %v6495_v15 = vld [vmem:[#allocation5 + $0xac] sm:$0xf]  ;;  %1289 = vmatpush.bf16.msrb.mxu2 %v5757_v12  ;;  %v5674_v12 = vld [vmem:[#allocation5 + $0x10] sm:$0xf0] }
 0x602   :  { %1308 = vmatpush.bf16.msrb.mxu3 %v5761_v14  ;;  %v5680_v14 = vld [vmem:[#allocation5 + $0x8] sm:$0xf] }
 0x662   :  { %v954_v16 = vpop.f32.mrf.mxu0 }
 0x663   :  { %v955_v18 = vadd.f32 %v6706_v59, %v954_v16 }
 0x665   :  { %v964_v36 = vadd.f32 %v955_v18, %v7400_v2  ;;  %v5736_v18 = vld [vmem:[#allocation5 + $0x80] sm:$0xf] }
 0x667   :  { %970 = vadd.xlane.f32.xlu1 %v964_v36 }
 0x66a   :  { %v956_v19 = vpop.f32.mrf.mxu0 }
 0x66b   :  { %v957_v20 = vadd.f32 %v6706_v59, %v956_v19  ;;  %v6490_v19 = vld [vmem:[#allocation5 + $0x84] sm:$0xf] }
 0x66d   :  { %v965_v21 = vadd.f32 %v957_v20, %v7402_v3 }
 0x66f   :  { %972 = vadd.xlane.f32.xlu0 %v965_v21 }
 0x67e   :  { %v959_v22 = vpop.f32.mrf.mxu0 }
 0x67f   :  { %v960_v23 = vadd.f32 %v6706_v59, %v959_v22  ;;  %v5744_v22 = vld [vmem:[#allocation5 + $0x88] sm:$0xf] }
 0x681   :  { %v966_v24 = vadd.f32 %v960_v23, %v7412_v31  ;;  %v6493_v23 = vld [vmem:[#allocation5 + $0x94] sm:$0xf0] }
 0x683   :  { %974 = vadd.xlane.f32.xlu2 %v966_v24 }
 0x686   :  { %v961_v25 = vpop.f32.mrf.mxu0 }
 0x687   :  { %v962_v0 = vadd.f32 %v6706_v59, %v961_v25  ;;  %v5762_v59 = vld [vmem:[#allocation5 + $0xb8] sm:$0xf0]  ;;  %v5745_v25 = vor.u32 %v6493_v23, %v5744_v22 }
 0x688   :  { %v5765_v16 = vor.u32 %v6495_v15, %v5762_v59  ;;  %v6477_v15 = vld [vmem:[#allocation5 + $0x14] sm:$0xf0] }
 0x689   :  { %v967_v1 = vadd.f32 %v962_v0, %v7410_v30  ;;  %v6491_v0 = vld [vmem:[#allocation5 + $0x8c] sm:$0xf]  ;;  %1309 = vmatpush.bf16.msrb.mxu3 %v5745_v25 }
 0x68a   :  { %1327 = vmatpush.bf16.msra.mxu0 %v5765_v16  ;;  %v5677_v16 = vor.u32 %v6474_v9, %v5674_v12 }
 0x68b   :  { %976 = vadd.xlane.f32.xlu2 %v967_v1 }
 0x6da   :  { %v971_v13 = vpop.xlane.xlu1 %970 }
 0x6db   :  { %v978_v26 = vmul.f32 %v971_v13, %v7222_v10 }
 0x6dd   :  { %v7519_v2 = vsub.f32 %v964_v36, %v978_v26  ;;  %v6492_v36 = vld [vmem:[#allocation5 + $0x8c] sm:$0xf0]  ;;  %v5720_v26 = vld [vmem:[#allocation5 + $0x60] sm:$0xf] }
 0x6de   :  { %v5737_v20 = vor.u32 %v6492_v36, %v5736_v18  ;;  %v5681_v18 = vor.u32 %v6477_v15, %v5680_v14  ;;  %v6475_v36 = vld [vmem:[#allocation5 + $0xc] sm:$0xf] }
 0x6df   :  { %v986_v27 = vmul.f32 %v7519_v2, %v7519_v2 }
 0x6e0   :  { %1271 = vmatpush.bf16.msra.mxu1 %v5737_v20 }
 0x6e1   :  { %990 = vadd.xlane.f32.xlu2 %v986_v27  ;;  %v6488_v27 = vld [vmem:[#allocation5 + $0x6c] sm:$0xf0] }
 0x6e2   :  { %v973_v3 = vpop.xlane.xlu0 %972 }
 0x6e3   :  { %v979_v28 = vmul.f32 %v973_v3, %v7222_v10  ;;  %v6486_v3 = vld [vmem:[#allocation5 + $0x64] sm:$0xf] }
 0x6e5   :  { %v7524_v29 = vsub.f32 %v965_v21, %v979_v28  ;;  %v5738_v21 = vld [vmem:[#allocation5 + $0x90] sm:$0xf0]  ;;  %v5721_v28 = vor.u32 %v6488_v27, %v5720_v26 }
 0x6e7   :  { %v987_v31 = vmul.f32 %v7524_v29, %v7524_v29  ;;  %1272 = vmatpush.bf16.msra.mxu1 %v5721_v28 }
 0x6e9   :  { %992 = vadd.xlane.f32.xlu2 %v987_v31  ;;  %v5722_v31 = vld [vmem:[#allocation5 + $0x70] sm:$0xf0] }
 0x6eb   :  { %1273 = vmatpush.bf16.msra.mxu1 %v5705_v45 }
 0x6ef   :  { %1274 = vmatpush.bf16.msra.mxu1 %v5689_v58 }
 0x6f3   :  { %1275 = vmatpush.bf16.msra.mxu1 %v5673_v11 }
 0x6f6   :  { %v975_v30 = vpop.xlane.xlu2 %974 }
 0x6f7   :  { %v980_v32 = vmul.f32 %v975_v30, %v7222_v10  ;;  %v5728_v30 = vld [vmem:[#allocation5 + $0x68] sm:$0xf] }
 0x6f9   :  { %v7529_v33 = vsub.f32 %v966_v24, %v980_v32  ;;  %v5741_v24 = vor.u32 %v6490_v19, %v5738_v21  ;;  %v6489_v32 = vld [vmem:[#allocation5 + $0x74] sm:$0xf0]  ;;  %v5682_v19 = vld [vmem:[#allocation5 + $0x18] sm:$0xf0] }
 0x6fa   :  { %v5685_v20 = vor.u32 %v6475_v36, %v5682_v19 }
 0x6fb   :  { %v988_v60 = vmul.f32 %v7529_v33, %v7529_v33  ;;  %1290 = vmatpush.bf16.msrb.mxu2 %v5741_v24 }
 0x6fd   :  { %994 = vadd.xlane.f32.xlu1 %v988_v60  ;;  %v5725_v60 = vor.u32 %v6486_v3, %v5722_v31 }
 0x6fe   :  { %v977_v34 = vpop.xlane.xlu2 %976 }
 0x6ff   :  { %v981_v35 = vmul.f32 %v977_v34, %v7222_v10  ;;  %v5729_v34 = vor.u32 %v6489_v32, %v5728_v30  ;;  %1291 = vmatpush.bf16.msrb.mxu2 %v5725_v60 }
 0x701   :  { %v7534_v37 = vsub.f32 %v967_v1, %v981_v35  ;;  %v5746_v1 = vld [vmem:[#allocation5 + $0x98] sm:$0xf0]  ;;  %v6487_v35 = vld [vmem:[#allocation5 + $0x6c] sm:$0xf]  ;;  %1310 = vmatpush.bf16.msrb.mxu3 %v5729_v34  ;;  %v6707_v34 = vld [vmem:[%s9544_s7] ss:$0 sm:$0xff] }
 0x702   :  { %v5749_v13 = vor.u32 %v6491_v0, %v5746_v1 }
 0x703   :  { %v989_v38 = vmul.f32 %v7534_v37, %v7534_v37  ;;  %1292 = vmatpush.bf16.msrb.mxu2 %v5709_v50 }
 0x704   :  { %1328 = vmatpush.bf16.msra.mxu0 %v5749_v13 }
 0x705   :  { %996 = vadd.xlane.f32.xlu2 %v989_v38  ;;  %v5730_v38 = vld [vmem:[#allocation5 + $0x78] sm:$0xf0]  ;;  %1311 = vmatpush.bf16.msrb.mxu3 %v5713_v51 }
 0x706   :  { %v5733_v39 = vor.u32 %v6487_v35, %v5730_v38 }
 0x707   :  { %1293 = vmatpush.bf16.msrb.mxu2 %v5693_v4 }
 0x708   :  { %1329 = vmatpush.bf16.msra.mxu0 %v5733_v39 }
 0x709   :  { %1312 = vmatpush.bf16.msrb.mxu3 %v5697_v43 }
 0x70b   :  { %1294 = vmatpush.bf16.msrb.mxu2 %v5677_v16 }
 0x70c   :  { %1330 = vmatpush.bf16.msra.mxu0 %v5717_v54 }
 0x70d   :  { %1313 = vmatpush.bf16.msrb.mxu3 %v5681_v18 }
 0x710   :  { %1331 = vmatpush.bf16.msra.mxu0 %v5701_v17 }
 0x714   :  { %1332 = vmatpush.bf16.msra.mxu0 %v5685_v20 }
 0x754   :  { %v991_v5 = vpop.xlane.xlu2 %990 }
 0x755   :  { %v998_v6 = vmul.f32 %v991_v5, %v7222_v10 }
 0x757   :  { %v1002_v59 = vadd.f32 1e-12, %v998_v6 }
 0x759   :  { %6763 = vrsqrt.f32 %v1002_v59  ;;  %vm1012_vm0 = vweird.f32 %v1002_v59 }
 0x75c   :  { %v993_v21 = vpop.xlane.xlu2 %992 }
 0x75d   :  { %v999_v22 = vmul.f32 %v993_v21, %v7222_v10 }
 0x75f   :  { %v6764_v23 = vpop.eup %6763  ;;  %v1003_v24 = vadd.f32 1e-12, %v999_v22 }
 0x760   :  { %v1007_v25 = vmul.f32 %v6764_v23, %v1002_v59  ;;  %vm1013_vm15 = vweird.f32 %v6764_v23 }
 0x761   :  { %6765 = vrsqrt.f32 %v1003_v24  ;;  %vm1014_vm1 = vmor %vm1012_vm0, %vm1013_vm15  ;;  %vm1022_vm3 = vweird.f32 %v1003_v24 }
 0x762   :  { %v1008_v0 = vmul.f32 %v6764_v23, %v1007_v25 }
 0x764   :  { %v1009_v1 = vmul.f32 0.5, %v1008_v0 }
 0x766   :  { %v1010_v13 = vsub.f32 1.5, %v1009_v1 }
 0x767   :  { %v6766_v26 = vpop.eup %6765 }
 0x768   :  { %v1011_v27 = vmul.f32 %v6764_v23, %v1010_v13  ;;  %v1017_v3 = vmul.f32 %v6766_v26, %v1003_v24  ;;  %vm1023_vm2 = vweird.f32 %v6766_v26 }
 0x769   :  { %vm1024_vm4 = vmor %vm1022_vm3, %vm1023_vm2 }
 0x76a   :  { %v1018_v28 = vmul.f32 %v6766_v26, %v1017_v3  ;;  %v1015_v31 = vsel %vm1014_vm1, %v6764_v23, %v1011_v27 }
 0x76b   :  { %v1046_v60 = vmul.f32 %v1015_v31, %v7519_v2 }
 0x76c   :  { %v1019_v30 = vmul.f32 0.5, %v1018_v28 }
 0x76d   :  { %v1053_v45 = vmul.f32 %v6707_v34, %v1046_v60 }
 0x76e   :  { %v1020_v32 = vsub.f32 1.5, %v1019_v30 }
 0x76f   :  { %v7549_v48 = vadd.f32 %v6708_v46, %v1053_v45 }
 0x770   :  { %v1021_v35 = vmul.f32 %v6766_v26, %v1020_v32  ;;  %v995_v38 = vpop.xlane.xlu1 %994 }
 0x771   :  { %v1000_v39 = vmul.f32 %v995_v38, %v7222_v10 }
 0x772   :  { %v1025_v40 = vsel %vm1024_vm4, %v6766_v26, %v1021_v35 }
 0x773   :  { %v1047_v41 = vmul.f32 %v1025_v40, %v7524_v29  ;;  %v1004_v42 = vadd.f32 1e-12, %v1000_v39 }
 0x775   :  { %6767 = vrsqrt.f32 %v1004_v42  ;;  %v1054_v2 = vmul.f32 %v6707_v34, %v1047_v41  ;;  %vm1032_vm6 = vweird.f32 %v1004_v42 }
 0x777   :  { %v7551_v49 = vadd.f32 %v6708_v46, %v1054_v2 }
 0x778   :  { %v997_v50 = vpop.xlane.xlu2 %996 }
 0x779   :  { %v1001_v51 = vmul.f32 %v997_v50, %v7222_v10  ;;  %v1096_v52 = vpack.c.bf16 %v7551_v49, %v7549_v48 }
 0x77b   :  { %v6768_v53 = vpop.eup %6767  ;;  %v1005_v29 = vadd.f32 1e-12, %v1001_v51  ;;  %1276 = vmatmul.bf16.vlgmr.msra.gmra.mxu1 %v1096_v52  ;;  %1295 = vmatmul.bf16.vlgmr.msrb.gmra.mxu2 %v1096_v52 }
 0x77c   :  { %v1027_v54 = vmul.f32 %v6768_v53, %v1004_v42  ;;  %1314 = vmatmul.bf16.vlgmr.msrb.gmra.mxu3 %v1096_v52  ;;  %1333 = vmatmul.bf16.vlgmr.msra.gmra.mxu0 %v1096_v52  ;;  %vm1033_vm5 = vweird.f32 %v6768_v53 }
 0x77d   :  { %6769 = vrsqrt.f32 %v1005_v29  ;;  %vm1034_vm7 = vmor %vm1032_vm6, %vm1033_vm5  ;;  %vm1042_vm9 = vweird.f32 %v1005_v29 }
 0x77e   :  { %v1028_v55 = vmul.f32 %v6768_v53, %v1027_v54 }
 0x780   :  { %v1029_v56 = vmul.f32 0.5, %v1028_v55 }
 0x782   :  { %v1030_v57 = vsub.f32 1.5, %v1029_v56 }
 0x783   :  { %v6770_v58 = vpop.eup %6769 }
 0x784   :  { %v1031_v61 = vmul.f32 %v6768_v53, %v1030_v57  ;;  %v1037_v62 = vmul.f32 %v6770_v58, %v1005_v29  ;;  %vm1043_vm8 = vweird.f32 %v6770_v58 }
 0x785   :  { %vm1044_vm10 = vmor %vm1042_vm9, %vm1043_vm8 }
 0x786   :  { %v1038_v63 = vmul.f32 %v6770_v58, %v1037_v62  ;;  %v1035_v4 = vsel %vm1034_vm7, %v6768_v53, %v1031_v61 }
 0x787   :  { %v1048_v47 = vmul.f32 %v1035_v4, %v7529_v33  ;;  %v1098_v33 = vld [vmem:[%s9547_s10] sm:$0xf] }
 0x788   :  { %v1039_v43 = vmul.f32 0.5, %v1038_v63  ;;  %v7567_v14 = vperm.slane %v1098_v33, 0  ;;  %v7580_v19 = vperm.slane %v1098_v33, 1  ;;  %v7585_v21 = vperm.slane %v1098_v33, 2 }
 0x789   :  { %v1055_v7 = vmul.f32 %v6707_v34, %v1048_v47 }
 0x78a   :  { %v1040_v44 = vsub.f32 1.5, %v1039_v43 }
 0x78b   :  { %v7558_v9 = vadd.f32 %v6708_v46, %v1055_v7 }
 0x78c   :  { %v1041_v5 = vmul.f32 %v6770_v58, %v1040_v44 }
 0x78e   :  { %v1045_v17 = vsel %vm1044_vm10, %v6770_v58, %v1041_v5 }
 0x78f   :  { %v1049_v6 = vmul.f32 %v1045_v17, %v7534_v37  ;;  %v7569_v37 = vperm.slane %v1098_v33, 3 }
 0x791   :  { %v1056_v8 = vmul.f32 %v6707_v34, %v1049_v6 }
 0x793   :  { %v7560_v11 = vadd.f32 %v6708_v46, %v1056_v8 }
 0x795   :  { %v1097_v12 = vpack.c.bf16 %v7560_v11, %v7558_v9 }
 0x797   :  { %1281 = vmatmul.bf16.gmra.mxu1 %v1097_v12  ;;  %1300 = vmatmul.bf16.gmra.mxu2 %v1097_v12 }
 0x798   :  { %1319 = vmatmul.bf16.gmra.mxu3 %v1097_v12  ;;  %1338 = vmatmul.bf16.gmra.mxu0 %v1097_v12 }
 0x7f8   :  { %v1277_v15 = vpop.f32.mrf.mxu1 }
 0x7f9   :  { %v7572_v59 = vadd.f32 %v1277_v15, %v7567_v14  ;;  %v1334_v16 = vpop.f32.mrf.mxu0 }
 0x7fa   :  { %v7575_v18 = vadd.f32 %v1334_v16, %v7569_v37 }
 0x7fb   :  { %v7578_v36 = vmul.f32 0.70710677, %v7572_v59 }
 0x7fc   :  { %v7583_v20 = vmul.f32 0.70710677, %v7575_v18 }
 0x7fd   :  { %v1376_v22 = vmul.f32 %v7578_v36, %v7578_v36 }
 0x7fe   :  { %v1496_v23 = vmul.f32 %v7583_v20, %v7583_v20  ;;  %v1296_v24 = vpop.f32.mrf.mxu2 }
 0x7ff   :  { %v7591_v25 = vmin.f32 %v1376_v22, 16.0  ;;  %v7594_v0 = vadd.f32 %v1296_v24, %v7580_v19  ;;  %v1315_v1 = vpop.f32.mrf.mxu3 }
 0x800   :  { %v7596_v13 = vmin.f32 %v1496_v23, 16.0  ;;  %v7599_v26 = vadd.f32 %v1315_v1, %v7585_v21  ;;  %v1279_v52 = vpop.f32.mrf.mxu1 }
 0x801   :  { %v1378_v27 = vmul.f32 2.1237322e-06, %v7591_v25  ;;  %v1389_v3 = vmul.f32 3.8918573e-05, %v7591_v25  ;;  %v7606_v30 = vmul.f32 0.70710677, %v7594_v0  ;;  %v1280_v61 = vadd.f32 %v1279_v52, %v7567_v14 }
 0x802   :  { %v1498_v28 = vmul.f32 2.1237322e-06, %v7596_v13  ;;  %v1509_v31 = vmul.f32 3.8918573e-05, %v7596_v13  ;;  %v7611_v39 = vmul.f32 0.70710677, %v7599_v26 }
 0x803   :  { %v1379_v32 = vadd.f32 0.00028619796, %v1378_v27  ;;  %v1390_v60 = vadd.f32 0.001143296, %v1389_v3  ;;  %v1416_v38 = vmul.f32 %v7606_v30, %v7606_v30  ;;  %v7635_v12 = vmul.f32 0.70710677, %v1280_v61 }
 0x804   :  { %v1499_v34 = vadd.f32 0.00028619796, %v1498_v28  ;;  %v1510_v35 = vadd.f32 0.001143296, %v1509_v31  ;;  %v1456_v2 = vmul.f32 %v7611_v39, %v7611_v39 }
 0x805   :  { %v1380_v40 = vmul.f32 %v1379_v32, %v7591_v25  ;;  %v1391_v41 = vmul.f32 %v1390_v60, %v7591_v25  ;;  %v7617_v46 = vmin.f32 %v1416_v38, 16.0  ;;  %v1536_v32 = vmul.f32 %v7635_v12, %v7635_v12  ;;  %v1336_v38 = vpop.f32.mrf.mxu0 }
 0x806   :  { %v1500_v42 = vmul.f32 %v1499_v34, %v7596_v13  ;;  %v1511_v45 = vmul.f32 %v1510_v35, %v7596_v13  ;;  %v7624_v57 = vmin.f32 %v1456_v2, 16.0 }
 0x807   :  { %v1381_v50 = vadd.f32 0.0036580483, %v1380_v40  ;;  %v1392_v51 = vadd.f32 0.014752088, %v1391_v41  ;;  %v1418_v54 = vmul.f32 2.1237322e-06, %v7617_v46 }
 0x808   :  { %v1501_v53 = vadd.f32 0.0036580483, %v1500_v42  ;;  %v1512_v29 = vadd.f32 0.014752088, %v1511_v45  ;;  %v1429_v56 = vmul.f32 3.8918573e-05, %v7617_v46 }
 0x809   :  { %v1393_v55 = vmul.f32 %v1392_v51, %v7591_v25  ;;  %v1382_v62 = vmul.f32 %v1381_v50, %v7591_v25  ;;  %v1419_v4 = vadd.f32 0.00028619796, %v1418_v54  ;;  %v1458_v6 = vmul.f32 2.1237322e-06, %v7624_v57 }
 0x80a   :  { %v1513_v58 = vmul.f32 %v1512_v29, %v7596_v13  ;;  %v1430_v43 = vadd.f32 0.001143296, %v1429_v56  ;;  %v1502_v44 = vmul.f32 %v1501_v53, %v7596_v13  ;;  %v1469_v7 = vmul.f32 3.8918573e-05, %v7624_v57 }
 0x80b   :  { %v1394_v63 = vadd.f32 0.112945676, %v1393_v55  ;;  %v1383_v33 = vadd.f32 0.05243302, %v1382_v62  ;;  %v1420_v16 = vmul.f32 %v1419_v4, %v7617_v46  ;;  %v1459_v3 = vadd.f32 0.00028619796, %v1458_v6 }
 0x80c   :  { %v1514_v47 = vadd.f32 0.112945676, %v1513_v58  ;;  %v1431_v17 = vmul.f32 %v1430_v43, %v7617_v46  ;;  %v1503_v23 = vadd.f32 0.05243302, %v1502_v44  ;;  %v1470_v28 = vadd.f32 0.001143296, %v1469_v7 }
 0x80d   :  { %v1395_v5 = vmul.f32 %v1394_v63, %v7591_v25  ;;  %v1384_v60 = vmul.f32 %v1383_v33, %v7591_v25  ;;  %v1421_v35 = vadd.f32 0.0036580483, %v1420_v16  ;;  %v1460_v2 = vmul.f32 %v1459_v3, %v7624_v57 }
 0x80e   :  { %v1515_v8 = vmul.f32 %v1514_v47, %v7596_v13  ;;  %v1432_v22 = vadd.f32 0.014752088, %v1431_v17  ;;  %v1504_v40 = vmul.f32 %v1503_v23, %v7596_v13  ;;  %v1471_v45 = vmul.f32 %v1470_v28, %v7624_v57 }
 0x80f   :  { %v1396_v15 = vadd.f32 0.4994258, %v1395_v5  ;;  %v7653_v50 = vmin.f32 %v1536_v32, 16.0  ;;  %v1337_v51 = vadd.f32 %v1336_v38, %v7569_v37  ;;  %v1385_v52 = vadd.f32 0.18741608, %v1384_v60  ;;  %v1298_v32 = vpop.f32.mrf.mxu2 }
 0x810   :  { %v1516_v24 = vadd.f32 0.4994258, %v1515_v8  ;;  %v1433_v27 = vmul.f32 %v1432_v22, %v7617_v46  ;;  %v1422_v53 = vmul.f32 %v1421_v35, %v7617_v46  ;;  %v1505_v29 = vadd.f32 0.18741608, %v1504_v40 }
 0x811   :  { %v1397_v1 = vmul.f32 %v1396_v15, %v7591_v25  ;;  %v1472_v55 = vadd.f32 0.014752088, %v1471_v45  ;;  %v7659_v56 = vmul.f32 0.5, %v7572_v59  ;;  %v1461_v58 = vadd.f32 0.0036580483, %v1460_v2 }
 0x812   :  { %v1517_v31 = vmul.f32 %v1516_v24, %v7596_v13  ;;  %v1434_v42 = vadd.f32 0.112945676, %v1433_v27  ;;  %v1538_v4 = vmul.f32 2.1237322e-06, %v7653_v50  ;;  %v7663_v43 = vmul.f32 0.70710677, %v1337_v51 }
 0x813   :  { %v7644_v34 = vadd.f32 1.0, %v1397_v1  ;;  %v1473_v63 = vmul.f32 %v1472_v55, %v7624_v57  ;;  %v1386_v47 = vmul.f32 %v1385_v52, %v7591_v25  ;;  %v7669_v5 = vmul.f32 0.5, %v7575_v18 }
 0x814   :  { %v7647_v41 = vadd.f32 1.0, %v1517_v31  ;;  %v1435_v54 = vmul.f32 %v1434_v42, %v7617_v46  ;;  %v1423_v17 = vadd.f32 0.05243302, %v1422_v53  ;;  %v1549_v6 = vmul.f32 3.8918573e-05, %v7653_v50 }
 0x815   :  { %6771 = vrcp.f32 %v7644_v34  ;;  %v1506_v8 = vmul.f32 %v1505_v29, %v7596_v13  ;;  %v7678_v33 = vmul.f32 0.5, %v7594_v0  ;;  %v7682_v25 = vmul.f32 0.5, %v7599_v26 }
 0x816   :  { %6773 = vrcp.f32 %v7647_v41  ;;  %v1436_v62 = vadd.f32 0.4994258, %v1435_v54  ;;  %v1462_v18 = vmul.f32 %v1461_v58, %v7624_v57  ;;  %v1474_v16 = vadd.f32 0.112945676, %v1473_v63 }
 0x817   :  { %v7685_v22 = vmul.f32 0.5, %v1280_v61  ;;  %v1539_v1 = vadd.f32 0.00028619796, %v1538_v4  ;;  %v1656_v0 = vmul.f32 %v7663_v43, %v7663_v43  ;;  %v1387_v13 = vadd.f32 1.1283791, %v1386_v47 }
 0x818   :  { %v1437_v15 = vmul.f32 %v1436_v62, %v7617_v46  ;;  %v1424_v27 = vmul.f32 %v1423_v17, %v7617_v46  ;;  %v1475_v26 = vmul.f32 %v1474_v16, %v7624_v57  ;;  %v1550_v3 = vadd.f32 0.001143296, %v1549_v6 }
 0x819   :  { %v1507_v31 = vadd.f32 1.1283791, %v1506_v8  ;;  %v7696_v61 = vmul.f32 0.5, %v1337_v51  ;;  %v1408_v60 = vand.u32 2147483647, %v7644_v34  ;;  %v1540_v42 = vmul.f32 %v1539_v1, %v7653_v50 }
 0x81a   :  { %v7689_v24 = vadd.f32 1.0, %v1437_v15  ;;  %v1463_v35 = vadd.f32 0.05243302, %v1462_v18  ;;  %v1476_v38 = vadd.f32 0.4994258, %v1475_v26  ;;  %v1551_v45 = vmul.f32 %v1550_v3, %v7653_v50 }
 0x81b   :  { %v7665_v44 = vpop.eup %6771  ;;  %v7701_v2 = vmin.f32 %v1656_v0, 16.0  ;;  %v7704_v52 = vmul.f32 %v1387_v13, %v7578_v36  ;;  %v1425_v53 = vadd.f32 0.18741608, %v1424_v27  ;;  %v1299_v51 = vadd.f32 %v1298_v32, %v7580_v19  ;;  %v6512_v13 = vld [vmem:[#allocation7 + $0x30] sm:$0xff] }
 0x81c   :  { %v7672_v59 = vpop.eup %6773  ;;  %v1400_v7 = vmul.f32 %v7665_v44, %v7644_v34  ;;  %6775 = vrcp.f32 %v7689_v24  ;;  %v1477_v29 = vmul.f32 %v1476_v38, %v7624_v57  ;;  %vm1404_vm11 = vweird.f32 %v7644_v34 }
 0x81d   :  { %v1520_v23 = vmul.f32 %v7672_v59, %v7647_v41  ;;  %v1410_v55 = vand.u32 2147483648, %v7644_v34  ;;  %v1552_v58 = vadd.f32 0.014752088, %v1551_v45  ;;  %v7712_v62 = vmul.f32 %v1507_v31, %v7583_v20 }
 0x81e   :  { %v1401_v28 = vsub.f32 1.0, %v1400_v7  ;;  %vm1524_vm12 = vweird.f32 %v7647_v41  ;;  %v1528_v36 = vand.u32 2147483647, %v7647_v41  ;;  %v1464_v63 = vmul.f32 %v1463_v35, %v7624_v57 }
 0x81f   :  { %v1521_v40 = vsub.f32 1.0, %v1520_v23  ;;  %vm7719_vm15 = vcmp.eq.f32.partialorder %v1408_v60, 8.507059e+37  ;;  %v1541_v6 = vadd.f32 0.0036580483, %v1540_v42  ;;  %v1553_v7 = vmul.f32 %v1552_v58, %v7653_v50  ;;  %v6537_v42 = vld [vmem:[#allocation7 + $0xf8] sm:$0xff] }
 0x820   :  { %v1402_v54 = vmul.f32 %v7665_v44, %v1401_v28  ;;  %v1658_v20 = vmul.f32 2.1237322e-06, %v7701_v2  ;;  %v1530_v8 = vand.u32 2147483648, %v7647_v41  ;;  %v1426_v15 = vmul.f32 %v1425_v53, %v7617_v46  ;;  %2373 = vmatpush.bf16.msrb.mxu0 %v6537_v42 }
 0x821   :  { %v1522_v17 = vmul.f32 %v7672_v59, %v1521_v40  ;;  %v7730_v16 = vadd.f32 1.0, %v1477_v29  ;;  %vm1405_vm0 = vweird.f32 %v7665_v44  ;;  %v1411_v1 = vor.u32 1.1754944e-38, %v1410_v55  ;;  %v6513_v40 = vld [vmem:[#allocation7 + $0x38] sm:$0xff] }
 0x822   :  { %v7717_v4 = vpop.eup %6775  ;;  %v1403_v23 = vadd.f32 %v7665_v44, %v1402_v54  ;;  %v1669_v0 = vmul.f32 3.8918573e-05, %v7701_v2  ;;  %vm7735_vm1 = vcmp.eq.f32.partialorder %v1528_v36, 8.507059e+37  ;;  %v1465_v26 = vadd.f32 0.18741608, %v1464_v63  ;;  %vm7744_vm3 = vmor %vm1404_vm11, %vm1405_vm0  ;;  %2316 = vmatpush.bf16.msrb.mxu1 %v6513_v40 }
 0x823   :  { %v1440_v18 = vmul.f32 %v7717_v4, %v7689_v24  ;;  %v1554_v3 = vadd.f32 0.112945676, %v1553_v7  ;;  %v1523_v46 = vadd.f32 %v7672_v59, %v1522_v17  ;;  %vm1525_vm2 = vweird.f32 %v7672_v59 }
 0x824   :  { %v1542_v28 = vmul.f32 %v1541_v6, %v7653_v50  ;;  %v1659_v31 = vadd.f32 0.00028619796, %v1658_v20  ;;  %v1531_v60 = vor.u32 1.1754944e-38, %v1530_v8  ;;  %v1427_v35 = vadd.f32 1.1283791, %v1426_v15  ;;  %vm7758_vm4 = vmor %vm1524_vm12, %vm1525_vm2 }
 0x825   :  { %v1441_v27 = vsub.f32 1.0, %v1440_v18  ;;  %6777 = vrcp.f32 %v7730_v16  ;;  %v1555_v38 = vmul.f32 %v1554_v3, %v7653_v50  ;;  %v1407_v45 = vsel %vm7744_vm3, %v7665_v44, %v1403_v23  ;;  %v1317_v3 = vpop.f32.mrf.mxu3 }
 0x826   :  { %v1670_v29 = vadd.f32 0.001143296, %v1669_v0  ;;  %v7754_v34 = vmul.f32 0.70710677, %v1299_v51  ;;  %v1448_v55 = vand.u32 2147483647, %v7689_v24  ;;  %v1466_v58 = vmul.f32 %v1465_v26, %v7624_v57  ;;  %2317 = vmatpush.bf16.msrb.mxu1 %v6512_v13 }
 0x827   :  { %v1442_v53 = vmul.f32 %v7717_v4, %v1441_v27  ;;  %v1556_v36 = vadd.f32 0.4994258, %v1555_v38  ;;  %v7764_v63 = vmul.f32 0.5, %v1299_v51  ;;  %v1527_v44 = vsel %vm7758_vm4, %v7672_v59, %v1523_v46  ;;  %v6528_v13 = vld [vmem:[#allocation7 + $0xb0] sm:$0xff] }
 0x828   :  { %v1543_v17 = vadd.f32 0.05243302, %v1542_v28  ;;  %v1660_v41 = vmul.f32 %v1659_v31, %v7701_v2  ;;  %v1671_v6 = vmul.f32 %v1670_v29, %v7701_v2  ;;  %v1412_v7 = vsel %vm7719_vm15, %v1411_v1, %v1407_v45  ;;  %v1282_v29 = vpop.f32.mrf.mxu1 }
 0x829   :  { %v1450_v20 = vand.u32 2147483648, %v7689_v24  ;;  %v1557_v57 = vmul.f32 %v1556_v36, %v7653_v50  ;;  %v1576_v51 = vmul.f32 %v7754_v34, %v7754_v34  ;;  %v1443_v8 = vadd.f32 %v7717_v4, %v1442_v53 }
 0x82a   :  { %vm1444_vm5 = vweird.f32 %v7689_v24  ;;  %vm1445_vm6 = vweird.f32 %v7717_v4  ;;  %v1672_v59 = vadd.f32 0.014752088, %v1671_v6  ;;  %v1532_v47 = vsel %vm7735_vm1, %v1531_v60, %v1527_v44 }
 0x82b   :  { %v7780_v15 = vpop.eup %6777  ;;  %v1467_v18 = vadd.f32 1.1283791, %v1466_v58  ;;  %v7784_v23 = vadd.f32 1.0, %v1557_v57  ;;  %v7786_v1 = vmin.f32 %v1576_v51, 16.0  ;;  %v1413_v0 = vmul.f32 %v1412_v7, %v7704_v52  ;;  %vm7792_vm7 = vmor %vm1444_vm5, %vm1445_vm6 }
 0x82c   :  { %v1544_v27 = vmul.f32 %v1543_v17, %v7653_v50  ;;  %v1661_v26 = vadd.f32 0.0036580483, %v1660_v41  ;;  %v1673_v24 = vmul.f32 %v1672_v59, %v7701_v2  ;;  %v1428_v46 = vmul.f32 %v1427_v35, %v7606_v30 }
 0x82d   :  { %vm7796_vm8 = vcmp.eq.f32.partialorder %v1448_v55, 8.507059e+37  ;;  %v1451_v31 = vor.u32 1.1754944e-38, %v1450_v20  ;;  %6779 = vrcp.f32 %v7784_v23  ;;  %v7802_v52 = vmul.f32 %v1532_v47, %v7712_v62 }
 0x82e   :  { %v1447_v32 = vsel %vm7792_vm7, %v7717_v4, %v1443_v8  ;;  %v1480_v30 = vmul.f32 %v7780_v15, %v7730_v16  ;;  %v1674_v60 = vadd.f32 0.112945676, %v1673_v24  ;;  %v7810_v35 = vmul.f32 %v1467_v18, %v7611_v39 }
 0x82f   :  { %v1578_v38 = vmul.f32 2.1237322e-06, %v7786_v1  ;;  %v1589_v40 = vmul.f32 3.8918573e-05, %v7786_v1  ;;  %v7815_v42 = vadd.f32 %v1317_v3, %v7585_v21  ;;  %v5798_v62 = vclamps-f32 %v1413_v0, 1.0 }
 0x830   :  { %v1545_v45 = vadd.f32 0.18741608, %v1544_v27  ;;  %v1662_v53 = vmul.f32 %v1661_v26, %v7701_v2  ;;  %v1675_v4 = vmul.f32 %v1674_v60, %v7701_v2  ;;  %v1452_v54 = vsel %vm7796_vm8, %v1451_v31, %v1447_v32 }
 0x831   :  { %v1488_v39 = vand.u32 2147483647, %v7730_v16  ;;  %v1579_v55 = vadd.f32 0.00028619796, %v1578_v38  ;;  %v1590_v58 = vadd.f32 0.001143296, %v1589_v40  ;;  %v7832_v51 = vadd.f32 %v1282_v29, %v7567_v14 }
 0x832   :  { %v1481_v44 = vsub.f32 1.0, %v1480_v30  ;;  %v1490_v17 = vand.u32 2147483648, %v7730_v16  ;;  %v1676_v41 = vadd.f32 0.4994258, %v1675_v4  ;;  %v7829_v57 = vmul.f32 0.70710677, %v7815_v42 }
 0x833   :  { %v7824_v6 = vpop.eup %6779  ;;  %v1580_v7 = vmul.f32 %v1579_v55, %v7786_v1  ;;  %v1591_v20 = vmul.f32 %v1590_v58, %v7786_v1  ;;  %v7834_v8 = vmul.f32 %v1452_v54, %v1428_v46  ;;  %v1546_v59 = vmul.f32 %v1545_v45, %v7653_v50  ;;  %v6536_v38 = vld [vmem:[#allocation7 + $0xf0] sm:$0xff]  ;;  %v6521_v4 = vld [vmem:[#allocation7 + $0x78] sm:$0xff] }
 0x834   :  { %v1560_v47 = vmul.f32 %v7824_v6, %v7784_v23  ;;  %v1663_v18 = vadd.f32 0.05243302, %v1662_v53  ;;  %vm1484_vm9 = vweird.f32 %v7730_v16  ;;  %v1677_v0 = vmul.f32 %v1676_v41, %v7701_v2  ;;  %v1339_v53 = vpop.f32.mrf.mxu0  ;;  %v6529_v29 = vld [vmem:[#allocation7 + $0xb8] sm:$0xff]  ;;  %2374 = vmatpush.bf16.msrb.mxu0 %v6536_v38  ;;  %2335 = vmatpush.bf16.msra.mxu2 %v6521_v4 }
 0x835   :  { %v1581_v27 = vadd.f32 0.0036580483, %v1580_v7  ;;  %v1592_v26 = vadd.f32 0.014752088, %v1591_v20  ;;  %v1616_v24 = vmul.f32 %v7829_v57, %v7829_v57  ;;  %v7843_v3 = vadd.f32 1.0, %v5798_v62  ;;  %2354 = vmatpush.bf16.msra.mxu3 %v6529_v29 }
 0x836   :  { %v1482_v46 = vmul.f32 %v7780_v15, %v1481_v44  ;;  %v1561_v28 = vsub.f32 1.0, %v1560_v47  ;;  %v7847_v50 = vmul.f32 0.70710677, %v7832_v51  ;;  %v7849_v31 = vor.u32 1.1754944e-38, %v1490_v17 }
 0x837   :  { %v7851_v32 = vadd.f32 1.0, %v1677_v0  ;;  %v1593_v30 = vmul.f32 %v1592_v26, %v7786_v1  ;;  %v7854_v60 = vmin.f32 %v1616_v24, 16.0  ;;  %vm1485_vm10 = vweird.f32 %v7780_v15  ;;  %v6511_v0 = vld [vmem:[#allocation7 + $0x28] sm:$0xff] }
 0x838   :  { %v1547_v40 = vadd.f32 1.1283791, %v1546_v59  ;;  %v1562_v62 = vmul.f32 %v7824_v6, %v1561_v28  ;;  %v1696_v45 = vmul.f32 %v7847_v50, %v7847_v50  ;;  %v1664_v55 = vmul.f32 %v1663_v18, %v7701_v2  ;;  %v6520_v28 = vld [vmem:[#allocation7 + $0x70] sm:$0xff]  ;;  %2318 = vmatpush.bf16.msrb.mxu1 %v6511_v0  ;;  %vm7887_vm12 = vmor %vm1484_vm9, %vm1485_vm10 }
 0x839   :  { %6781 = vrcp.f32 %v7851_v32  ;;  %v1582_v58 = vmul.f32 %v1581_v27, %v7786_v1  ;;  %v7865_v44 = vadd.f32 %v7780_v15, %v1482_v46  ;;  %v1568_v17 = vand.u32 2147483647, %v7784_v23  ;;  %v6535_v46 = vld [vmem:[#allocation7 + $0xe8] sm:$0xff]  ;;  %2336 = vmatpush.bf16.msra.mxu2 %v6520_v28  ;;  %2355 = vmatpush.bf16.msra.mxu3 %v6528_v13 }
 0x83a   :  { %v1594_v41 = vadd.f32 0.112945676, %v1593_v30  ;;  %v1618_v7 = vmul.f32 2.1237322e-06, %v7854_v60  ;;  %v1570_v20 = vand.u32 2147483648, %v7784_v23  ;;  %v7871_v47 = vmin.f32 %v1696_v45, 16.0  ;;  %2375 = vmatpush.bf16.msrb.mxu0 %v6535_v46 }
 0x83b   :  { %v1629_v59 = vmul.f32 3.8918573e-05, %v7854_v60  ;;  %v7874_v18 = vadd.f32 %v1339_v53, %v7569_v37  ;;  %v1563_v27 = vadd.f32 %v7824_v6, %v1562_v62  ;;  %vm1565_vm11 = vweird.f32 %v7824_v6  ;;  %v6525_v53 = vld [vmem:[#allocation7 + $0x98] sm:$0xff] }
 0x83c   :  { %v1595_v26 = vmul.f32 %v1594_v41, %v7786_v1  ;;  %v1619_v24 = vadd.f32 0.00028619796, %v1618_v7  ;;  %v7880_v30 = vmul.f32 %v1547_v40, %v7635_v12  ;;  %v1583_v38 = vadd.f32 0.05243302, %v1582_v58  ;;  %v6510_v58 = vld [vmem:[#allocation7 + $0x20] sm:$0xff] }
 0x83d   :  { %v1630_v45 = vadd.f32 0.001143296, %v1629_v59  ;;  %v1698_v4 = vmul.f32 2.1237322e-06, %v7871_v47  ;;  %vm7893_vm15 = vcmp.eq.f32.partialorder %v1488_v39, 8.507059e+37  ;;  %vm1564_vm0 = vweird.f32 %v7784_v23  ;;  %v6534_v41 = vld [vmem:[#allocation7 + $0xe0] sm:$0xff]  ;;  %2319 = vmatpush.bf16.msrb.mxu1 %v6510_v58 }
 0x83e   :  { %v1665_v12 = vadd.f32 0.18741608, %v1664_v55  ;;  %v1596_v40 = vadd.f32 0.4994258, %v1595_v26  ;;  %v1620_v29 = vmul.f32 %v1619_v24, %v7854_v60  ;;  %v1487_v16 = vsel %vm7887_vm12, %v7780_v15, %v7865_v44  ;;  %vm7907_vm1 = vmor %vm1564_vm0, %vm1565_vm11  ;;  %v6519_v24 = vld [vmem:[#allocation7 + $0x68] sm:$0xff]  ;;  %2376 = vmatpush.bf16.msrb.mxu0 %v6534_v41  ;;  %v6518_v41 = vld [vmem:[#allocation7 + $0x60] sm:$0xff] }
 0x83f   :  { %v7899_v7 = vpop.eup %6781  ;;  %vm7911_vm2 = vcmp.eq.f32.partialorder %v1568_v17, 8.507059e+37  ;;  %v1631_v55 = vmul.f32 %v1630_v45, %v7854_v60  ;;  %v7917_v59 = vmul.f32 0.70710677, %v7874_v18  ;;  %v1567_v15 = vsel %vm7907_vm1, %v7824_v6, %v1563_v27  ;;  %v6527_v17 = vld [vmem:[#allocation7 + $0xa8] sm:$0xff]  ;;  %2337 = vmatpush.bf16.msra.mxu2 %v6519_v24  ;;  %v6509_v27 = vld [vmem:[#allocation7 + $0x18] sm:$0xff] }
 0x840   :  { %v1571_v44 = vor.u32 1.1754944e-38, %v1570_v20  ;;  %v1680_v0 = vmul.f32 %v7899_v7, %v7851_v32  ;;  %v1699_v26 = vadd.f32 0.00028619796, %v1698_v4  ;;  %v1584_v46 = vmul.f32 %v1583_v38, %v7786_v1  ;;  %v1301_v20 = vpop.f32.mrf.mxu2  ;;  %v6533_v4 = vld [vmem:[#allocation7 + $0xd8] sm:$0xff]  ;;  %2356 = vmatpush.bf16.msra.mxu3 %v6527_v17 }
 0x841   :  { %v1597_v28 = vmul.f32 %v1596_v40, %v7786_v1  ;;  %v1621_v45 = vadd.f32 0.0036580483, %v1620_v29  ;;  %v1632_v62 = vadd.f32 0.014752088, %v1631_v55  ;;  %v1666_v13 = vmul.f32 %v1665_v12, %v7701_v2  ;;  %v6526_v55 = vld [vmem:[#allocation7 + $0xa0] sm:$0xff]  ;;  %2320 = vmatpush.bf16.msrb.mxu1 %v6509_v27  ;;  %v6517_v27 = vld [vmem:[#allocation7 + $0x58] sm:$0xff] }
 0x842   :  { %v1681_v54 = vsub.f32 1.0, %v1680_v0  ;;  %v1688_v39 = vand.u32 2147483647, %v7851_v32  ;;  %v1816_v6 = vmul.f32 %v7917_v59, %v7917_v59  ;;  %v1690_v38 = vand.u32 2147483648, %v7851_v32  ;;  %2377 = vmatpush.bf16.msrb.mxu0 %v6533_v4 }
 0x843   :  { %v7931_v36 = vadd.f32 1.0, %v1597_v28  ;;  %v1622_v40 = vmul.f32 %v1621_v45, %v7854_v60  ;;  %v1633_v29 = vmul.f32 %v1632_v62, %v7854_v60  ;;  %v1572_v2 = vsel %vm7911_vm2, %v1571_v44, %v1567_v15  ;;  %2338 = vmatpush.bf16.msra.mxu2 %v6518_v41  ;;  %v6508_v44 = vld [vmem:[#allocation7 + $0x10] sm:$0xff] }
 0x844   :  { %v1682_v12 = vmul.f32 %v7899_v7, %v1681_v54  ;;  %vm1685_vm3 = vweird.f32 %v7899_v7  ;;  %v1700_v58 = vmul.f32 %v1699_v26, %v7871_v47  ;;  %v1585_v0 = vadd.f32 0.18741608, %v1584_v46  ;;  %v6532_v26 = vld [vmem:[#allocation7 + $0xd0] sm:$0xff]  ;;  %2357 = vmatpush.bf16.msra.mxu3 %v6526_v55 }
 0x845   :  { %6783 = vrcp.f32 %v7931_v36  ;;  %v7941_v24 = vmin.f32 %v1816_v6, 16.0  ;;  %v7944_v28 = vadd.f32 %v1301_v20, %v7580_v19  ;;  %vm1684_vm4 = vweird.f32 %v7851_v32  ;;  %2321 = vmatpush.bf16.msrb.mxu1 %v6508_v44  ;;  %v6506_v32 = vld [vmem:[#allocation7] sm:$0xff] }
 0x846   :  { %v1683_v23 = vadd.f32 %v7899_v7, %v1682_v12  ;;  %v1623_v54 = vadd.f32 0.05243302, %v1622_v40  ;;  %v1634_v15 = vadd.f32 0.112945676, %v1633_v29  ;;  %v7950_v17 = vmul.f32 %v7843_v3, %v7659_v56  ;;  %vm7959_vm5 = vmor %vm1684_vm4, %vm1685_vm3  ;;  %2378 = vmatpush.bf16.msrb.mxu0 %v6532_v26  ;;  %v6531_v12 = vld [vmem:[#allocation7 + $0xc8] sm:$0xff] }
 0x847   :  { %v9594_v46 = vclamps-f32 %v7802_v52, 1.0  ;;  %v1492_v62 = vsel %vm7893_vm15, %v7849_v31, %v1487_v16  ;;  %v1667_v6 = vadd.f32 1.1283791, %v1666_v13  ;;  %v1573_v20 = vmul.f32 %v1572_v2, %v7880_v30  ;;  %2339 = vmatpush.bf16.msra.mxu2 %v6517_v27  ;;  %v6507_v2 = vld [vmem:[#allocation7 + $0x8] sm:$0xff] }
 0x848   :  { %v1687_v56 = vsel %vm7959_vm5, %v7899_v7, %v1683_v23  ;;  %v1635_v52 = vmul.f32 %v1634_v15, %v7854_v60  ;;  %v1701_v3 = vadd.f32 0.0036580483, %v1700_v58  ;;  %v1691_v31 = vor.u32 1.1754944e-38, %v1690_v38  ;;  %2358 = vmatpush.bf16.msra.mxu3 %v6525_v53  ;;  %v6516_v15 = vld [vmem:[#allocation7 + $0x50] sm:$0xff] }
 0x849   :  { %v2019_v45 = vadd.f32 1.0, %v9594_v46  ;;  %v1586_v16 = vmul.f32 %v1585_v0, %v7786_v1  ;;  %v1818_v13 = vmul.f32 2.1237322e-06, %v7941_v24  ;;  %v7971_v4 = vmul.f32 0.70710677, %v7944_v28  ;;  %2322 = vmatpush.bf16.msrb.mxu1 %v6507_v2 }
 0x84a   :  { %v9597_v30 = vclamps-f32 %v7834_v8, 1.0  ;;  %vm1689_vm6 = vcmp.eq.f32.partialorder %v1688_v39, 8.507059e+37  ;;  %v1624_v7 = vmul.f32 %v1623_v54, %v7854_v60  ;;  %v1636_v29 = vadd.f32 0.4994258, %v1635_v52  ;;  %v1320_v54 = vpop.f32.mrf.mxu3  ;;  %2379 = vmatpush.bf16.msrb.mxu0 %v6531_v12 }
 0x84b   :  { %v7976_v38 = vpop.eup %6783  ;;  %v7979_v1 = vmul.f32 %v2019_v45, %v7669_v5  ;;  %v7982_v58 = vmul.f32 %v1492_v62, %v7810_v35  ;;  %v1692_v41 = vsel %vm1689_vm6, %v1691_v31, %v1687_v56  ;;  %v1736_v8 = vmul.f32 %v7971_v4, %v7971_v4  ;;  %v6524_v5 = vld [vmem:[#allocation7 + $0x90] sm:$0xff]  ;;  %2340 = vmatpush.bf16.msra.mxu2 %v6516_v15  ;;  %v6522_v15 = vld [vmem:[#allocation7 + $0x80] sm:$0xff] }
 0x84c   :  { %v2017_v40 = vadd.f32 1.0, %v9597_v30  ;;  %v5802_v39 = vclamps-f32 %v1573_v20, 1.0  ;;  %v1668_v55 = vmul.f32 %v1667_v6, %v7663_v43  ;;  %v1600_v0 = vmul.f32 %v7976_v38, %v7931_v36  ;;  %v6530_v20 = vld [vmem:[#allocation7 + $0xc0] sm:$0xff]  ;;  %2359 = vmatpush.bf16.msra.mxu3 %v6524_v5  ;;  %v6523_v30 = vld [vmem:[#allocation7 + $0x88] sm:$0xff] }
 0x84d   :  { %v1702_v23 = vmul.f32 %v1701_v3, %v7871_v47  ;;  %v1587_v44 = vadd.f32 1.1283791, %v1586_v16  ;;  %v1637_v35 = vmul.f32 %v1636_v29, %v7854_v60  ;;  %v1819_v26 = vadd.f32 0.00028619796, %v1818_v13  ;;  %v1284_v16 = vpop.f32.mrf.mxu1  ;;  %v6515_v13 = vld [vmem:[#allocation7 + $0x48] sm:$0xff]  ;;  %2323 = vmatpush.bf16.msrb.mxu1 %v6506_v32 }
 0x84e   :  { %v7991_v46 = vmin.f32 %v1736_v8, 16.0  ;;  %v7994_v45 = vmul.f32 %v2017_v40, %v7678_v33  ;;  %v1693_v62 = vmul.f32 %v1692_v41, %v1668_v55  ;;  %v1601_v43 = vsub.f32 1.0, %v1600_v0  ;;  %2380 = vmatpush.bf16.msrb.mxu0 %v6530_v20  ;;  %v1341_v0 = vpop.f32.mrf.mxu0 }
 0x84f   :  { %v1625_v6 = vadd.f32 0.18741608, %v1624_v7  ;;  %v1610_v56 = vand.u32 2147483648, %v7931_v36  ;;  %v7997_v52 = vadd.f32 1.0, %v1637_v35  ;;  %v8001_v27 = vadd.f32 %v1320_v54, %v7585_v21  ;;  %2341 = vmatpush.bf16.msra.mxu2 %v6515_v13  ;;  %v6514_v54 = vld [vmem:[#allocation7 + $0x40] sm:$0xff] }
 0x850   :  { %v1738_v3 = vmul.f32 2.1237322e-06, %v7991_v46  ;;  %v1602_v33 = vmul.f32 %v7976_v38, %v1601_v43  ;;  %vm1605_vm7 = vweird.f32 %v7976_v38  ;;  %v1608_v53 = vand.u32 2147483647, %v7931_v36  ;;  %2360 = vmatpush.bf16.msra.mxu3 %v6523_v30 }
 0x851   :  { %v1703_v31 = vadd.f32 0.05243302, %v1702_v23  ;;  %v5800_v40 = vclamps-f32 %v7982_v58, 1.0  ;;  %v2020_v7 = vadd.f32 1.0, %v5802_v39  ;;  %6785 = vrcp.f32 %v7997_v52 }
 0x852   :  { %v1820_v29 = vmul.f32 %v1819_v26, %v7941_v24  ;;  %v5805_v2 = vclamps-f32 %v1693_v62, 1.0  ;;  %v1603_v12 = vadd.f32 %v7976_v38, %v1602_v33  ;;  %vm1604_vm8 = vweird.f32 %v7931_v36 }
 0x853   :  { %v1626_v41 = vmul.f32 %v1625_v6, %v7854_v60  ;;  %vm1606_vm9 = vmor %vm1604_vm8, %vm1605_vm7  ;;  %v1611_v8 = vor.u32 1.1754944e-38, %v1610_v56  ;;  %v1739_v58 = vadd.f32 0.00028619796, %v1738_v3  ;;  %v8015_v39 = vmul.f32 0.70710677, %v8001_v27  ;;  %2342 = vmatpush.bf16.msra.mxu2 %v6514_v54 }
 0x854   :  { %v8018_v55 = vadd.f32 %v1284_v16, %v7567_v14  ;;  %v1588_v23 = vmul.f32 %v1587_v44, %v7754_v34  ;;  %v1607_v36 = vsel %vm1606_vm9, %v7976_v38, %v1603_v12  ;;  %vm1609_vm10 = vcmp.eq.f32.partialorder %v1608_v53, 8.507059e+37  ;;  %v1303_v38 = vpop.f32.mrf.mxu2  ;;  %2361 = vmatpush.bf16.msra.mxu3 %v6522_v15 }
 0x855   :  { %v1704_v60 = vmul.f32 %v1703_v31, %v7871_v47  ;;  %v1612_v5 = vsel %vm1609_vm10, %v1611_v8, %v1607_v36  ;;  %v8024_v35 = vmul.f32 0.5, %v7815_v42  ;;  %v1821_v26 = vadd.f32 0.0036580483, %v1820_v29 }
 0x856   :  { %v8027_v62 = vmul.f32 0.70710677, %v8018_v55  ;;  %v2023_v14 = vadd.f32 1.0, %v5805_v2  ;;  %v1613_v43 = vmul.f32 %v1612_v5, %v1588_v23  ;;  %v1627_v6 = vadd.f32 1.1283791, %v1626_v41 }
 0x857   :  { %v8030_v34 = vadd.f32 %v1341_v0, %v7569_v37  ;;  %v6786_v44 = vpop.eup %6785  ;;  %v2018_v32 = vadd.f32 1.0, %v5800_v40  ;;  %v1740_v20 = vmul.f32 %v1739_v58, %v7991_v46  ;;  %v1776_v42 = vmul.f32 %v8015_v39, %v8015_v39 }
 0x858   :  { %v1856_v56 = vmul.f32 %v8027_v62, %v8027_v62  ;;  %v2036_v3 = vmul.f32 %v2020_v7, %v7685_v22  ;;  %v1640_v33 = vmul.f32 %v6786_v44, %v7997_v52  ;;  %v8040_v37 = vmul.f32 0.5, %v7832_v51  ;;  %v1322_v7 = vpop.f32.mrf.mxu3 }
 0x859   :  { %v1705_v53 = vadd.f32 0.18741608, %v1704_v60  ;;  %v5803_v31 = vclamps-f32 %v1613_v43, 1.0  ;;  %v1822_v16 = vmul.f32 %v1821_v26, %v7941_v24  ;;  %v8046_v30 = vadd.f32 %v1303_v38, %v7580_v19 }
 0x85a   :  { %v8043_v13 = vmin.f32 %v1856_v56, 16.0  ;;  %v2039_v40 = vmul.f32 %v2023_v14, %v7696_v61  ;;  %v1628_v29 = vmul.f32 %v1627_v6, %v7829_v57  ;;  %v1641_v2 = vsub.f32 1.0, %v1640_v33 }
 0x85b   :  { %v8051_v22 = vmul.f32 0.70710677, %v8030_v34  ;;  %v1650_v51 = vand.u32 2147483648, %v7997_v52  ;;  %v1741_v12 = vadd.f32 0.0036580483, %v1740_v20  ;;  %v8054_v41 = vmin.f32 %v1776_v42, 16.0 }
 0x85c   :  { %v1858_v8 = vmul.f32 2.1237322e-06, %v8043_v13  ;;  %v1642_v58 = vmul.f32 %v6786_v44, %v1641_v2  ;;  %vm1645_vm11 = vweird.f32 %v6786_v44  ;;  %v1648_v19 = vand.u32 2147483647, %v7997_v52 }
 0x85d   :  { %v1976_v61 = vmul.f32 %v8051_v22, %v8051_v22  ;;  %v2021_v57 = vadd.f32 1.0, %v5803_v31  ;;  %v8061_v23 = vmul.f32 0.70710677, %v8046_v30  ;;  %v8064_v36 = vadd.f32 %v1322_v7, %v7585_v21 }
 0x85e   :  { %v1859_v0 = vadd.f32 0.00028619796, %v1858_v8  ;;  %v1643_v60 = vadd.f32 %v6786_v44, %v1642_v58  ;;  %vm1644_vm12 = vweird.f32 %v7997_v52  ;;  %v1823_v54 = vadd.f32 0.05243302, %v1822_v16 }
 0x85f   :  { %v8067_v15 = vmin.f32 %v1976_v61, 16.0  ;;  %vm1646_vm15 = vmor %vm1644_vm12, %vm1645_vm11  ;;  %v1651_v5 = vor.u32 1.1754944e-38, %v1650_v51  ;;  %v1742_v26 = vmul.f32 %v1741_v12, %v7991_v46  ;;  %v1896_v43 = vmul.f32 %v8061_v23, %v8061_v23 }
 0x860   :  { %v1860_v14 = vmul.f32 %v1859_v0, %v8043_v13  ;;  %v1647_v6 = vsel %vm1646_vm15, %v6786_v44, %v1643_v60  ;;  %vm1649_vm0 = vcmp.eq.f32.partialorder %v1648_v19, 8.507059e+37  ;;  %v2112_v38 = vpack.c.bf16 %v2036_v3, %v7950_v17 }
 0x861   :  { %v1978_v21 = vmul.f32 2.1237322e-06, %v8067_v15  ;;  %v2037_v52 = vmul.f32 %v2021_v57, %v7764_v63  ;;  %v1652_v20 = vsel %vm1649_vm0, %v1651_v5, %v1647_v6  ;;  %v1778_v42 = vmul.f32 2.1237322e-06, %v8054_v41 }
 0x862   :  { %v8078_v56 = vmul.f32 0.70710677, %v8064_v36  ;;  %v1653_v33 = vmul.f32 %v1652_v20, %v1628_v29  ;;  %v1861_v31 = vadd.f32 0.0036580483, %v1860_v14  ;;  %v8080_v2 = vmin.f32 %v1896_v43, 16.0  ;;  %2324 = vmatmul.bf16.vlgmr.msrb.gmra.mxu1 %v2112_v38 }
 0x863   :  { %v1979_v16 = vadd.f32 0.00028619796, %v1978_v21  ;;  %v1706_v44 = vmul.f32 %v1705_v53, %v7871_v47  ;;  %v1824_v7 = vmul.f32 %v1823_v54, %v7941_v24  ;;  %v1743_v51 = vadd.f32 0.05243302, %v1742_v26 }
 0x864   :  { %v2115_v17 = vpack.c.bf16 %v2039_v40, %v7979_v1  ;;  %v2034_v63 = vmul.f32 %v2018_v32, %v7682_v25  ;;  %v5804_v3 = vclamps-f32 %v1653_v33, 1.0  ;;  %v1898_v8 = vmul.f32 2.1237322e-06, %v8080_v2 }
 0x865   :  { %v1980_v12 = vmul.f32 %v1979_v16, %v8067_v15  ;;  %v8089_v29 = vmul.f32 0.5, %v7874_v18  ;;  %v1779_v58 = vadd.f32 0.00028619796, %v1778_v42  ;;  %v1936_v19 = vmul.f32 %v8078_v56, %v8078_v56 }
 0x866   :  { %2381 = vmatmul.bf16.vlgmr.msrb.gmra.mxu0 %v2115_v17  ;;  %v2113_v53 = vpack.c.bf16 %v2037_v52, %v7994_v45  ;;  %v2022_v61 = vadd.f32 1.0, %v5804_v3  ;;  %v1862_v1 = vmul.f32 %v1861_v31, %v8043_v13  ;;  %v1899_v25 = vadd.f32 0.00028619796, %v1898_v8 }
 0x867   :  { %v1981_v40 = vadd.f32 0.0036580483, %v1980_v12  ;;  %v1707_v32 = vadd.f32 1.1283791, %v1706_v44  ;;  %v1825_v57 = vadd.f32 0.18741608, %v1824_v7  ;;  %v1744_v0 = vmul.f32 %v1743_v51, %v7991_v46 }
 0x868   :  { %2343 = vmatmul.bf16.vlgmr.msra.gmra.mxu2 %v2113_v53  ;;  %v1709_v18 = vmul.f32 3.8918573e-05, %v7871_v47  ;;  %v2038_v60 = vmul.f32 %v2022_v61, %v8024_v35  ;;  %v1900_v5 = vmul.f32 %v1899_v25, %v8080_v2  ;;  %v1869_v45 = vmul.f32 3.8918573e-05, %v8043_v13 }
 0x869   :  { %v1982_v54 = vmul.f32 %v1981_v40, %v8067_v15  ;;  %v1780_v26 = vmul.f32 %v1779_v58, %v8054_v41  ;;  %v8102_v14 = vmin.f32 %v1936_v19, 16.0  ;;  %v1829_v6 = vmul.f32 3.8918573e-05, %v7941_v24 }
 0x86a   :  { %v1710_v43 = vadd.f32 0.001143296, %v1709_v18  ;;  %v1863_v21 = vadd.f32 0.05243302, %v1862_v1  ;;  %v1901_v38 = vadd.f32 0.0036580483, %v1900_v5  ;;  %v2114_v52 = vpack.c.bf16 %v2038_v60, %v2034_v63 }
 0x86b   :  { %v1870_v20 = vadd.f32 0.001143296, %v1869_v45  ;;  %v1826_v42 = vmul.f32 %v1825_v57, %v7941_v24  ;;  %v1983_v35 = vadd.f32 0.05243302, %v1982_v54  ;;  %v1830_v31 = vadd.f32 0.001143296, %v1829_v6 }
 0x86c   :  { %v1711_v33 = vmul.f32 %v1710_v43, %v7871_v47  ;;  %v1745_v16 = vadd.f32 0.18741608, %v1744_v0  ;;  %v1902_v44 = vmul.f32 %v1901_v38, %v8080_v2  ;;  %2362 = vmatmul.bf16.vlgmr.msra.gmra.mxu3 %v2114_v52  ;;  %v1989_v51 = vmul.f32 3.8918573e-05, %v8067_v15 }
 0x86d   :  { %v1871_v7 = vmul.f32 %v1870_v20, %v8043_v13  ;;  %v8111_v17 = vmul.f32 %v1707_v32, %v7847_v50  ;;  %v1938_v63 = vmul.f32 2.1237322e-06, %v8102_v14  ;;  %v1831_v12 = vmul.f32 %v1830_v31, %v7941_v24 }
 0x86e   :  { %v1712_v3 = vadd.f32 0.014752088, %v1711_v33  ;;  %v1781_v8 = vadd.f32 0.0036580483, %v1780_v26  ;;  %v8116_v58 = vmul.f32 0.5, %v8018_v55  ;;  %v1864_v19 = vmul.f32 %v1863_v21, %v8043_v13 }
 0x86f   :  { %v1872_v53 = vadd.f32 0.014752088, %v1871_v7  ;;  %v1827_v61 = vadd.f32 1.1283791, %v1826_v42  ;;  %v1984_v1 = vmul.f32 %v1983_v35, %v8067_v15  ;;  %v1832_v25 = vadd.f32 0.014752088, %v1831_v12 }
 0x870   :  { %v1713_v40 = vmul.f32 %v1712_v3, %v7871_v47  ;;  %v1746_v50 = vmul.f32 %v1745_v16, %v7991_v46  ;;  %v1903_v32 = vadd.f32 0.05243302, %v1902_v44  ;;  %v1990_v0 = vadd.f32 0.001143296, %v1989_v51 }
 0x871   :  { %v1873_v57 = vmul.f32 %v1872_v53, %v8043_v13  ;;  %v1939_v18 = vadd.f32 0.00028619796, %v1938_v63  ;;  %v1833_v55 = vmul.f32 %v1832_v25, %v7941_v24  ;;  %v1749_v54 = vmul.f32 3.8918573e-05, %v7991_v46 }
 0x872   :  { %v1714_v60 = vadd.f32 0.112945676, %v1713_v40  ;;  %v1782_v5 = vmul.f32 %v1781_v8, %v8054_v41  ;;  %v1865_v45 = vadd.f32 0.18741608, %v1864_v19  ;;  %v1991_v43 = vmul.f32 %v1990_v0, %v8067_v15 }
 0x873   :  { %v1874_v26 = vadd.f32 0.112945676, %v1873_v57  ;;  %v1985_v6 = vadd.f32 0.18741608, %v1984_v1  ;;  %v1834_v38 = vadd.f32 0.112945676, %v1833_v55  ;;  %v1904_v42 = vmul.f32 %v1903_v32, %v8080_v2 }
 0x874   :  { %v1715_v21 = vmul.f32 %v1714_v60, %v7871_v47  ;;  %v1750_v52 = vadd.f32 0.001143296, %v1749_v54  ;;  %v1747_v20 = vadd.f32 1.1283791, %v1746_v50  ;;  %v1992_v33 = vadd.f32 0.014752088, %v1991_v43 }
 0x875   :  { %v1875_v35 = vmul.f32 %v1874_v26, %v8043_v13  ;;  %v1940_v31 = vmul.f32 %v1939_v18, %v8102_v14  ;;  %v1835_v44 = vmul.f32 %v1834_v38, %v7941_v24  ;;  %v1866_v51 = vmul.f32 %v1865_v45, %v8043_v13 }
 0x876   :  { %v1716_v16 = vadd.f32 0.4994258, %v1715_v21  ;;  %v1751_v7 = vmul.f32 %v1750_v52, %v7991_v46  ;;  %v1993_v3 = vmul.f32 %v1992_v33, %v8067_v15  ;;  %v1909_v12 = vmul.f32 3.8918573e-05, %v8080_v2 }
 0x877   :  { %v1876_v63 = vadd.f32 0.4994258, %v1875_v35  ;;  %v1986_v8 = vmul.f32 %v1985_v6, %v8067_v15  ;;  %v1836_v53 = vadd.f32 0.4994258, %v1835_v44  ;;  %v1905_v40 = vadd.f32 0.18741608, %v1904_v42 }
 0x878   :  { %v1717_v19 = vmul.f32 %v1716_v16, %v7871_v47  ;;  %v1752_v1 = vadd.f32 0.014752088, %v1751_v7  ;;  %v1994_v50 = vadd.f32 0.112945676, %v1993_v3  ;;  %v1910_v32 = vadd.f32 0.001143296, %v1909_v12 }
 0x879   :  { %v1877_v25 = vmul.f32 %v1876_v63, %v8043_v13  ;;  %v8140_v57 = vmul.f32 0.5, %v8030_v34  ;;  %v1941_v0 = vadd.f32 0.0036580483, %v1940_v31  ;;  %v1837_v60 = vmul.f32 %v1836_v53, %v7941_v24 }
 0x87a   :  { %v8142_v18 = vadd.f32 1.0, %v1717_v19  ;;  %v1995_v54 = vmul.f32 %v1994_v50, %v8067_v15  ;;  %v1753_v47 = vmul.f32 %v1752_v1, %v7991_v46  ;;  %v1911_v45 = vmul.f32 %v1910_v32, %v8080_v2 }
 0x87b   :  { %v8145_v55 = vadd.f32 1.0, %v1877_v25  ;;  %v8151_v13 = vmul.f32 %v1827_v61, %v7917_v59  ;;  %v8153_v26 = vadd.f32 0.05243302, %v1782_v5  ;;  %v1867_v34 = vadd.f32 1.1283791, %v1866_v51 }
 0x87c   :  { %6787 = vrcp.f32 %v8142_v18  ;;  %v8157_v43 = vmul.f32 %v1747_v20, %v7971_v4  ;;  %v1987_v24 = vadd.f32 1.1283791, %v1986_v8  ;;  %v1906_v6 = vmul.f32 %v1905_v40, %v8080_v2 }
 0x87d   :  { %6789 = vrcp.f32 %v8145_v55  ;;  %v1730_v21 = vand.u32 2147483648, %v8142_v18  ;;  %v8162_v38 = vadd.f32 1.0, %v1837_v60  ;;  %v1996_v52 = vadd.f32 0.4994258, %v1995_v54 }
 0x87e   :  { %v1789_v59 = vmul.f32 3.8918573e-05, %v8054_v41  ;;  %v8166_v61 = vmul.f32 %v1941_v0, %v8102_v14  ;;  %v1728_v5 = vand.u32 2147483647, %v8142_v18  ;;  %v1754_v42 = vadd.f32 0.112945676, %v1753_v47 }
 0x87f   :  { %v1912_v4 = vadd.f32 0.014752088, %v1911_v45  ;;  %v8170_v20 = vmul.f32 %v1867_v34, %v8027_v62  ;;  %v1888_v35 = vand.u32 2147483647, %v8145_v55  ;;  %v1890_v33 = vand.u32 2147483648, %v8145_v55 }
 0x880   :  { %6791 = vrcp.f32 %v8162_v38  ;;  %v8176_v31 = vmul.f32 %v1987_v24, %v8051_v22  ;;  %v1997_v16 = vmul.f32 %v1996_v52, %v8067_v15  ;;  %v1755_v44 = vmul.f32 %v1754_v42, %v7991_v46 }
 0x881   :  { %v1913_v7 = vmul.f32 %v1912_v4, %v8080_v2  ;;  %v8181_v63 = vadd.f32 1.1283791, %v1906_v6  ;;  %vm1724_vm1 = vweird.f32 %v8142_v18  ;;  %v1731_v62 = vor.u32 1.1754944e-38, %v1730_v21 }
 0x882   :  { %v6788_v51 = vpop.eup %6787  ;;  %vm1884_vm2 = vweird.f32 %v8145_v55  ;;  %vm8186_vm3 = vcmp.eq.f32.partialorder %v1728_v5, 8.507059e+37  ;;  %v8190_v15 = vadd.f32 1.0, %v1997_v16  ;;  %v1756_v8 = vadd.f32 0.4994258, %v1755_v44 }
 0x883   :  { %v6790_v3 = vpop.eup %6789  ;;  %v1720_v12 = vmul.f32 %v6788_v51, %v8142_v18  ;;  %v1790_v19 = vadd.f32 0.001143296, %v1789_v59  ;;  %vm8193_vm4 = vcmp.eq.f32.partialorder %v1888_v35, 8.507059e+37  ;;  %v1891_v40 = vor.u32 1.1754944e-38, %v1890_v33 }
 0x884   :  { %v1880_v53 = vmul.f32 %v6790_v3, %v8145_v55  ;;  %v1914_v25 = vadd.f32 0.112945676, %v1913_v7  ;;  %v1848_v32 = vand.u32 2147483647, %v8162_v38  ;;  %v1850_v0 = vand.u32 2147483648, %v8162_v38 }
 0x885   :  { %v1721_v50 = vsub.f32 1.0, %v1720_v12  ;;  %6793 = vrcp.f32 %v8190_v15  ;;  %vm1844_vm5 = vweird.f32 %v8162_v38  ;;  %v1757_v47 = vmul.f32 %v1756_v8, %v7991_v46 }
 0x886   :  { %v6792_v60 = vpop.eup %6791  ;;  %v1881_v54 = vsub.f32 1.0, %v1880_v53  ;;  %v1915_v45 = vmul.f32 %v1914_v25, %v8080_v2  ;;  %vm1725_vm6 = vweird.f32 %v6788_v51  ;;  %v1791_v6 = vmul.f32 %v1790_v19, %v8054_v41 }
 0x887   :  { %v1722_v34 = vmul.f32 %v6788_v51, %v1721_v50  ;;  %v1840_v24 = vmul.f32 %v6792_v60, %v8162_v38  ;;  %vm1885_vm7 = vweird.f32 %v6790_v3  ;;  %v8205_v52 = vadd.f32 1.0, %v1757_v47  ;;  %vm1726_vm9 = vmor %vm1724_vm1, %vm1725_vm6 }
 0x888   :  { %v1882_v21 = vmul.f32 %v6790_v3, %v1881_v54  ;;  %v1916_v59 = vadd.f32 0.4994258, %v1915_v45  ;;  %vm8207_vm8 = vcmp.eq.f32.partialorder %v1848_v32, 8.507059e+37  ;;  %v1851_v46 = vor.u32 1.1754944e-38, %v1850_v0  ;;  %vm1886_vm11 = vmor %vm1884_vm2, %vm1885_vm7 }
 0x889   :  { %v1723_v5 = vadd.f32 %v6788_v51, %v1722_v34  ;;  %v1841_v42 = vsub.f32 1.0, %v1840_v24  ;;  %vm1845_vm10 = vweird.f32 %v6792_v60  ;;  %6795 = vrcp.f32 %v8205_v52 }
 0x88a   :  { %v1883_v35 = vadd.f32 %v6790_v3, %v1882_v21  ;;  %v1949_v33 = vmul.f32 3.8918573e-05, %v8102_v14  ;;  %v1917_v12 = vmul.f32 %v1916_v59, %v8080_v2  ;;  %v1792_v8 = vadd.f32 0.014752088, %v1791_v6  ;;  %vm1846_vm12 = vmor %vm1844_vm5, %vm1845_vm10 }
 0x88b   :  { %v6794_v16 = vpop.eup %6793  ;;  %v1727_v44 = vsel %vm1726_vm9, %v6788_v51, %v1723_v5  ;;  %v1842_v7 = vmul.f32 %v6792_v60, %v1841_v42  ;;  %v2008_v25 = vand.u32 2147483647, %v8190_v15  ;;  %v2010_v55 = vand.u32 2147483648, %v8190_v15 }
 0x88c   :  { %v1732_v19 = vsel %vm8186_vm3, %v1731_v62, %v1727_v44  ;;  %v1887_v18 = vsel %vm1886_vm11, %v6790_v3, %v1883_v35  ;;  %v2000_v53 = vmul.f32 %v6794_v16, %v8190_v15  ;;  %v8230_v62 = vadd.f32 1.0, %v1917_v12 }
 0x88d   :  { %v1733_v50 = vmul.f32 %v1732_v19, %v8111_v17  ;;  %v1892_v51 = vsel %vm8193_vm4, %v1891_v40, %v1887_v18  ;;  %v1843_v32 = vadd.f32 %v6792_v60, %v1842_v7  ;;  %v1950_v3 = vadd.f32 0.001143296, %v1949_v33 }
 0x88e   :  { %v1893_v0 = vmul.f32 %v1892_v51, %v8170_v20  ;;  %v2001_v2 = vsub.f32 1.0, %v2000_v53  ;;  %vm2005_vm15 = vweird.f32 %v6794_v16  ;;  %v1793_v17 = vmul.f32 %v1792_v8, %v8054_v41 }
 0x88f   :  { %v5806_v22 = vclamps-f32 %v1733_v50, 1.0  ;;  %v1847_v54 = vsel %vm1846_vm12, %v6792_v60, %v1843_v32  ;;  %v6796_v1 = vpop.eup %6795  ;;  %6797 = vrcp.f32 %v8230_v62  ;;  %vm2004_vm0 = vweird.f32 %v8190_v15 }
 0x890   :  { %v5810_v40 = vclamps-f32 %v1893_v0, 1.0  ;;  %v1852_v47 = vsel %vm8207_vm8, %v1851_v46, %v1847_v54  ;;  %v2002_v45 = vmul.f32 %v6794_v16, %v2001_v2  ;;  %v1760_v34 = vmul.f32 %v6796_v1, %v8205_v52  ;;  %vm2006_vm2 = vmor %vm2004_vm0, %vm2005_vm15 }
 0x891   :  { %v2024_v20 = vadd.f32 1.0, %v5806_v22  ;;  %v1853_v38 = vmul.f32 %v1852_v47, %v8151_v13  ;;  %vm2009_vm1 = vcmp.eq.f32.partialorder %v2008_v25, 8.507059e+37  ;;  %v1951_v6 = vmul.f32 %v1950_v3, %v8102_v14 }
 0x892   :  { %v2028_v24 = vadd.f32 1.0, %v5810_v40  ;;  %v2003_v60 = vadd.f32 %v6794_v16, %v2002_v45  ;;  %v2011_v59 = vor.u32 1.1754944e-38, %v2010_v55  ;;  %v1761_v5 = vsub.f32 1.0, %v1760_v34 }
 0x893   :  { %v2040_v21 = vmul.f32 %v2024_v20, %v8040_v37  ;;  %v1770_v42 = vand.u32 2147483648, %v8205_v52  ;;  %v5809_v13 = vclamps-f32 %v1853_v38, 1.0  ;;  %v1794_v15 = vadd.f32 0.112945676, %v1793_v17 }
 0x894   :  { %v2044_v4 = vmul.f32 %v2028_v24, %v8116_v58  ;;  %v2007_v46 = vsel %vm2006_vm2, %v6794_v16, %v2003_v60  ;;  %v1762_v33 = vmul.f32 %v6796_v1, %v1761_v5  ;;  %vm1765_vm3 = vweird.f32 %v6796_v1 }
 0x895   :  { %v2012_v35 = vsel %vm2009_vm1, %v2011_v59, %v2007_v46  ;;  %v1768_v44 = vand.u32 2147483647, %v8205_v52  ;;  %v6798_v7 = vpop.eup %6797  ;;  %v1795_v8 = vmul.f32 %v1794_v15, %v8054_v41  ;;  %v1952_v19 = vadd.f32 0.014752088, %v1951_v6 }
 0x896   :  { %v2116_v12 = vpack.c.bf16 %v2044_v4, %v2040_v21  ;;  %v2013_v37 = vmul.f32 %v2012_v35, %v8176_v31  ;;  %v1763_v18 = vadd.f32 %v6796_v1, %v1762_v33  ;;  %vm1764_vm4 = vweird.f32 %v8205_v52 }
 0x897   :  { %v1771_v53 = vor.u32 1.1754944e-38, %v1770_v42  ;;  %v1920_v58 = vmul.f32 %v6798_v7, %v8230_v62  ;;  %v2027_v25 = vadd.f32 1.0, %v5809_v13  ;;  %vm1766_vm5 = vmor %vm1764_vm4, %vm1765_vm3  ;;  %v1796_v50 = vadd.f32 0.4994258, %v1795_v8 }
 0x898   :  { %2329 = vmatmul.bf16.gmra.mxu1 %v2116_v12  ;;  %v5813_v16 = vclamps-f32 %v2013_v37, 1.0  ;;  %v1953_v51 = vmul.f32 %v1952_v19, %v8102_v14  ;;  %v1767_v32 = vsel %vm1766_vm5, %v6796_v1, %v1763_v18  ;;  %vm1769_vm6 = vcmp.eq.f32.partialorder %v1768_v44, 8.507059e+37 }
 0x899   :  { %v1921_v55 = vsub.f32 1.0, %v1920_v58  ;;  %v1930_v31 = vand.u32 2147483648, %v8230_v62  ;;  %v1772_v2 = vsel %vm1769_vm6, %v1771_v53, %v1767_v32  ;;  %v1797_v3 = vmul.f32 %v1796_v50, %v8054_v41 }
 0x89a   :  { %v2031_v0 = vadd.f32 1.0, %v5813_v16  ;;  %v1954_v52 = vadd.f32 0.112945676, %v1953_v51  ;;  %v1773_v22 = vmul.f32 %v1772_v2, %v8157_v43  ;;  %vm1925_vm7 = vweird.f32 %v6798_v7 }
 0x89b   :  { %v1922_v54 = vmul.f32 %v6798_v7, %v1921_v55  ;;  %v1928_v17 = vand.u32 2147483647, %v8230_v62  ;;  %v2043_v40 = vmul.f32 %v2027_v25, %v8089_v29  ;;  %v1798_v1 = vadd.f32 1.0, %v1797_v3 }
 0x89c   :  { %v2047_v47 = vmul.f32 %v2031_v0, %v8140_v57  ;;  %v1955_v45 = vmul.f32 %v1954_v52, %v8102_v14  ;;  %v1784_v20 = vmul.f32 %v8153_v26, %v8054_v41  ;;  %v1943_v38 = vadd.f32 0.05243302, %v8166_v61 }
 0x89d   :  { %v1923_v34 = vadd.f32 %v6798_v7, %v1922_v54  ;;  %vm1924_vm8 = vweird.f32 %v8230_v62  ;;  %v1908_v43 = vmul.f32 %v8181_v63, %v8061_v23  ;;  %v1931_v60 = vor.u32 1.1754944e-38, %v1930_v31 }
 0x89e   :  { %v2119_v24 = vpack.c.bf16 %v2047_v47, %v2043_v40  ;;  %vm1926_vm9 = vmor %vm1924_vm8, %vm1925_vm7  ;;  %6799 = vrcp.f32 %v1798_v1  ;;  %v5807_v29 = vclamps-f32 %v1773_v22, 1.0  ;;  %vm1929_vm10 = vcmp.eq.f32.partialorder %v1928_v17, 8.507059e+37 }
 0x89f   :  { %v1927_v57 = vsel %vm1926_vm9, %v6798_v7, %v1923_v34  ;;  %v1956_v6 = vadd.f32 0.4994258, %v1955_v45  ;;  %v1785_v61 = vadd.f32 0.18741608, %v1784_v20  ;;  %v1944_v5 = vmul.f32 %v1943_v38, %v8102_v14 }
 0x8a0   :  { %2386 = vmatmul.bf16.gmra.mxu0 %v2119_v24  ;;  %v1932_v21 = vsel %vm1929_vm10, %v1931_v60, %v1927_v57  ;;  %v2025_v42 = vadd.f32 1.0, %v5807_v29  ;;  %v1353_v63 = vmul.f32 0.5, %v7944_v28  ;;  %v1357_v13 = vmul.f32 0.5, %v8046_v30 }
 0x8a1   :  { %v1933_v59 = vmul.f32 %v1932_v21, %v1908_v43  ;;  %v1957_v26 = vmul.f32 %v1956_v6, %v8102_v14  ;;  %v1786_v35 = vmul.f32 %v1785_v61, %v8054_v41  ;;  %v1945_v33 = vadd.f32 0.18741608, %v1944_v5 }
 0x8a2   :  { %v2041_v44 = vmul.f32 %v2025_v42, %v1353_v63  ;;  %v1810_v37 = vand.u32 2147483648, %v1798_v1  ;;  %v1808_v18 = vand.u32 2147483647, %v1798_v1  ;;  %vm1804_vm12 = vweird.f32 %v1798_v1 }
 0x8a3   :  { %v5811_v62 = vclamps-f32 %v1933_v59, 1.0  ;;  %v1958_v4 = vadd.f32 1.0, %v1957_v26  ;;  %v1787_v53 = vadd.f32 1.1283791, %v1786_v35  ;;  %v1946_v28 = vmul.f32 %v1945_v33, %v8102_v14 }
 0x8a4   :  { %v6800_v23 = vpop.eup %6799  ;;  %v1811_v16 = vor.u32 1.1754944e-38, %v1810_v37  ;;  %vm1809_vm0 = vcmp.eq.f32.partialorder %v1808_v18, 8.507059e+37  ;;  %v1354_v45 = vmul.f32 0.5, %v8001_v27  ;;  %v1358_v20 = vmul.f32 0.5, %v8064_v36 }
 0x8a5   :  { %v2029_v46 = vadd.f32 1.0, %v5811_v62  ;;  %v1800_v15 = vmul.f32 %v6800_v23, %v1798_v1  ;;  %6801 = vrcp.f32 %v1958_v4  ;;  %vm1805_vm11 = vweird.f32 %v6800_v23 }
 0x8a6   :  { %vm1806_vm15 = vmor %vm1804_vm12, %vm1805_vm11  ;;  %v1788_v50 = vmul.f32 %v1787_v53, %v8015_v39  ;;  %v1947_v55 = vadd.f32 1.1283791, %v1946_v28  ;;  %v1970_v31 = vand.u32 2147483648, %v1958_v4  ;;  %v1968_v3 = vand.u32 2147483647, %v1958_v4 }
 0x8a7   :  { %v2045_v7 = vmul.f32 %v2029_v46, %v1357_v13  ;;  %v1801_v12 = vsub.f32 1.0, %v1800_v15  ;;  %vm1964_vm2 = vweird.f32 %v1958_v4 }
 0x8a8   :  { %v1971_v14 = vor.u32 1.1754944e-38, %v1970_v31  ;;  %v1948_v22 = vmul.f32 %v1947_v55, %v8078_v56  ;;  %vm1969_vm4 = vcmp.eq.f32.partialorder %v1968_v3, 8.507059e+37  ;;  %v6709_v56 = vld [vmem:[%s9549_s12] ss:$0 sm:$0xff] }
 0x8a9   :  { %v2117_v8 = vpack.c.bf16 %v2045_v7, %v2041_v44  ;;  %v1802_v19 = vmul.f32 %v6800_v23, %v1801_v12 }
 0x8ab   :  { %v6802_v58 = vpop.eup %6801  ;;  %2348 = vmatmul.bf16.gmra.mxu2 %v2117_v8  ;;  %v1803_v30 = vadd.f32 %v6800_v23, %v1802_v19 }
 0x8ac   :  { %v1960_v25 = vmul.f32 %v6802_v58, %v1958_v4  ;;  %vm1965_vm1 = vweird.f32 %v6802_v58 }
 0x8ad   :  { %v1807_v41 = vsel %vm1806_vm15, %v6800_v23, %v1803_v30  ;;  %vm1966_vm3 = vmor %vm1964_vm2, %vm1965_vm1 }
 0x8ae   :  { %v1812_v51 = vsel %vm1809_vm0, %v1811_v16, %v1807_v41  ;;  %v1961_v32 = vsub.f32 1.0, %v1960_v25 }
 0x8af   :  { %v1813_v0 = vmul.f32 %v1812_v51, %v1788_v50 }
 0x8b0   :  { %v1962_v2 = vmul.f32 %v6802_v58, %v1961_v32 }
 0x8b1   :  { %v5808_v54 = vclamps-f32 %v1813_v0, 1.0 }
 0x8b2   :  { %v1963_v52 = vadd.f32 %v6802_v58, %v1962_v2 }
 0x8b3   :  { %v2026_v1 = vadd.f32 1.0, %v5808_v54 }
 0x8b4   :  { %v1967_v17 = vsel %vm1966_vm3, %v6802_v58, %v1963_v52 }
 0x8b5   :  { %v1972_v40 = vsel %vm1969_vm4, %v1971_v14, %v1967_v17  ;;  %v2042_v34 = vmul.f32 %v2026_v1, %v1354_v45  ;;  %v6063_v45 = vld [vmem:[%s9570_s4 + $0x174] sm:$0xf0] }
 0x8b6   :  { %v1973_v47 = vmul.f32 %v1972_v40, %v1948_v22  ;;  %v6061_v40 = vld [vmem:[%s9570_s4 + $0x168] sm:$0xf] }
 0x8b8   :  { %v5812_v39 = vclamps-f32 %v1973_v47, 1.0  ;;  %v6560_v47 = vld [vmem:[%s9570_s4 + $0x170] sm:$0xf0] }
 0x8b9   :  { %v6062_v1 = vor.u32 %v6560_v47, %v6061_v40 }
 0x8ba   :  { %v2030_v38 = vadd.f32 1.0, %v5812_v39  ;;  %v6559_v39 = vld [vmem:[%s9570_s4 + $0x16c] sm:$0xf] }
 0x8bb   :  { %2664 = vmatpush.bf16.msra.mxu0 %v6062_v1  ;;  %6642 = vmatpush.bf16.msra.mxu1 %v6062_v1 }
 0x8bc   :  { %v2046_v43 = vmul.f32 %v2030_v38, %v1358_v20  ;;  %v6069_v20 = vld [vmem:[%s9570_s4 + $0x170] sm:$0xf]  ;;  %v6561_v38 = vld [vmem:[%s9570_s4 + $0x178] sm:$0xf0] }
 0x8be   :  { %v2118_v24 = vpack.c.bf16 %v2046_v43, %v2042_v34  ;;  %v6066_v34 = vor.u32 %v6559_v39, %v6063_v45  ;;  %v6070_v43 = vor.u32 %v6561_v38, %v6069_v20 }
 0x8c0   :  { %2367 = vmatmul.bf16.gmra.mxu3 %v2118_v24  ;;  %2683 = vmatpush.bf16.msrb.mxu2 %v6066_v34  ;;  %v6049_v24 = vld [vmem:[%s9570_s4 + $0x150] sm:$0xf] }
 0x8c1   :  { %2702 = vmatpush.bf16.msrb.mxu3 %v6070_v43 }
 0x8df   :  { %v2325_v60 = vpop.f32.mrf.mxu1 }
 0x8e0   :  { %v2326_v29 = vadd.f32 %v6709_v56, %v2325_v60  ;;  %v6557_v60 = vld [vmem:[%s9570_s4 + $0x158] sm:$0xf0] }
 0x8e3   :  { %v2382_v61 = vpop.f32.mrf.mxu0 }
 0x8e7   :  { %v2327_v21 = vpop.f32.mrf.mxu1 }
 0x8e8   :  { %v2328_v27 = vadd.f32 %v6709_v56, %v2327_v21  ;;  %v6558_v21 = vld [vmem:[%s9570_s4 + $0x160] sm:$0xf0] }
 0x8eb   :  { %v2344_v57 = vpop.f32.mrf.mxu2  ;;  %v2384_v63 = vpop.f32.mrf.mxu0 }
 0x8ec   :  { %v2345_v6 = vadd.f32 %v2344_v57, %v2326_v29  ;;  %v6050_v29 = vor.u32 %v6557_v60, %v6049_v24  ;;  %v6051_v57 = vld [vmem:[%s9570_s4 + $0x15c] sm:$0xf0] }
 0x8ee   :  { %2665 = vmatpush.bf16.msra.mxu0 %v6050_v29  ;;  %6643 = vmatpush.bf16.msra.mxu1 %v6050_v29 }
 0x8ef   :  { %v2363_v59 = vpop.f32.mrf.mxu3 }
 0x8f0   :  { %v2364_v26 = vadd.f32 %v2363_v59, %v2345_v6  ;;  %v6057_v6 = vld [vmem:[%s9570_s4 + $0x158] sm:$0xf] }
 0x8f2   :  { %v2383_v5 = vadd.f32 %v2382_v61, %v2364_v26  ;;  %v6058_v26 = vor.u32 %v6558_v21, %v6057_v6  ;;  %v6037_v61 = vld [vmem:[%s9570_s4 + $0x138] sm:$0xf] }
 0x8f3   :  { %v2346_v36 = vpop.f32.mrf.mxu2 }
 0x8f4   :  { %v2347_v62 = vadd.f32 %v2346_v36, %v2328_v27  ;;  %v2392_v42 = vadd.f32 %v2383_v5, %v7549_v48  ;;  %v6554_v27 = vld [vmem:[%s9570_s4 + $0x140] sm:$0xf0]  ;;  %v6553_v36 = vld [vmem:[%s9570_s4 + $0x13c] sm:$0xf]  ;;  %2703 = vmatpush.bf16.msrb.mxu3 %v6058_v26 }
 0x8f5   :  { %v6038_v5 = vor.u32 %v6554_v27, %v6037_v61  ;;  %v5989_v61 = vld [vmem:[%s9570_s4 + $0xd8] sm:$0xf]  ;;  %v6542_v27 = vld [vmem:[%s9570_s4 + $0xe0] sm:$0xf0] }
 0x8f6   :  { %2398 = vadd.xlane.f32.xlu0 %v2392_v42 }
 0x8f7   :  { %v2365_v4 = vpop.f32.mrf.mxu3  ;;  %2666 = vmatpush.bf16.msra.mxu0 %v6038_v5  ;;  %6644 = vmatpush.bf16.msra.mxu1 %v6038_v5  ;;  %v6541_v5 = vld [vmem:[%s9570_s4 + $0xdc] sm:$0xf] }
 0x8f8   :  { %v2366_v23 = vadd.f32 %v2365_v4, %v2347_v62  ;;  %v6039_v62 = vld [vmem:[%s9570_s4 + $0x144] sm:$0xf0] }
 0x8f9   :  { %v6042_v4 = vor.u32 %v6553_v36, %v6039_v62  ;;  %v5991_v36 = vld [vmem:[%s9570_s4 + $0xe4] sm:$0xf0]  ;;  %v6543_v62 = vld [vmem:[%s9570_s4 + $0xe8] sm:$0xf0] }
 0x8fa   :  { %v2385_v13 = vadd.f32 %v2384_v63, %v2366_v23  ;;  %v6555_v23 = vld [vmem:[%s9570_s4 + $0x148] sm:$0xf0]  ;;  %v6025_v63 = vld [vmem:[%s9570_s4 + $0x120] sm:$0xf] }
 0x8fc   :  { %v2393_v46 = vadd.f32 %v2385_v13, %v7551_v49  ;;  %v6551_v13 = vld [vmem:[%s9570_s4 + $0x128] sm:$0xf0] }
 0x8fe   :  { %2400 = vadd.xlane.f32.xlu1 %v2393_v46 }
 0x915   :  { %v2330_v15 = vpop.f32.mrf.mxu1 }
 0x916   :  { %v2331_v33 = vadd.f32 %v6709_v56, %v2330_v15  ;;  %v6550_v15 = vld [vmem:[%s9570_s4 + $0x124] sm:$0xf] }
 0x91d   :  { %v2387_v7 = vpop.f32.mrf.mxu0  ;;  %v2332_v12 = vpop.f32.mrf.mxu1 }
 0x91e   :  { %v2333_v18 = vadd.f32 %v6709_v56, %v2332_v12  ;;  %v6556_v56 = vld [vmem:[%s9570_s4 + $0x154] sm:$0xf] }
 0x91f   :  { %v6054_v59 = vor.u32 %v6556_v56, %v6051_v57 }
 0x921   :  { %2684 = vmatpush.bf16.msrb.mxu2 %v6054_v59  ;;  %v8414_v59 = vld [vmem:[%s9550_s13] ss:$0 sm:$0xff] }
 0x925   :  { %v2389_v16 = vpop.f32.mrf.mxu0  ;;  %2685 = vmatpush.bf16.msrb.mxu2 %v6042_v4 }
 0x92e   :  { %v2349_v35 = vpop.f32.mrf.mxu2 }
 0x92f   :  { %v2350_v44 = vadd.f32 %v2349_v35, %v2331_v33  ;;  %v6027_v35 = vld [vmem:[%s9570_s4 + $0x12c] sm:$0xf0]  ;;  %v6033_v33 = vld [vmem:[%s9570_s4 + $0x128] sm:$0xf] }
 0x930   :  { %v6030_v12 = vor.u32 %v6550_v15, %v6027_v35  ;;  %v6538_v15 = vld [vmem:[%s9570_s4 + $0xc4] sm:$0xf] }
 0x932   :  { %2686 = vmatpush.bf16.msrb.mxu2 %v6030_v12  ;;  %v6540_v12 = vld [vmem:[%s9570_s4 + $0xd0] sm:$0xf0] }
 0x936   :  { %v2351_v19 = vpop.f32.mrf.mxu2 }
 0x937   :  { %v2352_v48 = vadd.f32 %v2351_v19, %v2333_v18  ;;  %v6548_v19 = vld [vmem:[%s9570_s4 + $0x110] sm:$0xf0]  ;;  %v6547_v18 = vld [vmem:[%s9570_s4 + $0x10c] sm:$0xf] }
 0x943   :  { %v2368_v37 = vpop.f32.mrf.mxu3 }
 0x944   :  { %v2369_v8 = vadd.f32 %v2368_v37, %v2350_v44  ;;  %v6552_v44 = vld [vmem:[%s9570_s4 + $0x130] sm:$0xf0] }
 0x945   :  { %v6034_v37 = vor.u32 %v6552_v44, %v6033_v33  ;;  %v5979_v44 = vld [vmem:[%s9570_s4 + $0xcc] sm:$0xf0] }
 0x946   :  { %v2388_v53 = vadd.f32 %v2387_v7, %v2369_v8  ;;  %v6026_v7 = vor.u32 %v6551_v13, %v6025_v63  ;;  %v6013_v8 = vld [vmem:[%s9570_s4 + $0x108] sm:$0xf]  ;;  %v6711_v63 = vld [vmem:[%s9551_s14] ss:$0 sm:$0xff] }
 0x947   :  { %v5977_v13 = vld [vmem:[%s9570_s4 + $0xc0] sm:$0xf] }
 0x948   :  { %v2394_v58 = vadd.f32 %v2388_v53, %v7558_v9  ;;  %v6015_v53 = vld [vmem:[%s9570_s4 + $0x114] sm:$0xf0]  ;;  %2667 = vmatpush.bf16.msra.mxu0 %v6026_v7  ;;  %6645 = vmatpush.bf16.msra.mxu1 %v6026_v7  ;;  %v5985_v7 = vld [vmem:[%s9570_s4 + $0xc8] sm:$0xf] }
 0x94a   :  { %2402 = vadd.xlane.f32.xlu2 %v2394_v58 }
 0x94b   :  { %v2370_v28 = vpop.f32.mrf.mxu3 }
 0x94c   :  { %v2371_v30 = vadd.f32 %v2370_v28, %v2352_v48  ;;  %v6021_v48 = vld [vmem:[%s9570_s4 + $0x110] sm:$0xf] }
 0x94e   :  { %v2390_v49 = vadd.f32 %v2389_v16, %v2371_v30  ;;  %v6014_v30 = vor.u32 %v6548_v19, %v6013_v8  ;;  %v5986_v8 = vor.u32 %v6540_v12, %v5985_v7 }
 0x950   :  { %v2395_v25 = vadd.f32 %v2390_v49, %v7560_v11  ;;  %v6018_v49 = vor.u32 %v6547_v18, %v6015_v53  ;;  %2668 = vmatpush.bf16.msra.mxu0 %v6014_v30  ;;  %6646 = vmatpush.bf16.msra.mxu1 %v6014_v30 }
 0x952   :  { %2404 = vadd.xlane.f32.xlu0 %v2395_v25  ;;  %2687 = vmatpush.bf16.msrb.mxu2 %v6018_v49 }
 0x969   :  { %v2399_v41 = vpop.xlane.xlu0 %2398 }
 0x96a   :  { %v2406_v50 = vmul.f32 %v2399_v41, %v7222_v10  ;;  %v6001_v41 = vld [vmem:[%s9570_s4 + $0xf0] sm:$0xf] }
 0x96c   :  { %v8281_v51 = vsub.f32 %v2392_v42, %v2406_v50  ;;  %v6045_v42 = vld [vmem:[%s9570_s4 + $0x140] sm:$0xf]  ;;  %v6545_v50 = vld [vmem:[%s9570_s4 + $0xf8] sm:$0xf0] }
 0x96e   :  { %v2414_v32 = vmul.f32 %v8281_v51, %v8281_v51 }
 0x970   :  { %2418 = vadd.xlane.f32.xlu1 %v2414_v32  ;;  %v6544_v32 = vld [vmem:[%s9570_s4 + $0xf4] sm:$0xf] }
 0x971   :  { %v2401_v55 = vpop.xlane.xlu1 %2400 }
 0x972   :  { %v2407_v9 = vmul.f32 %v2401_v55, %v7222_v10 }
 0x974   :  { %v8286_v31 = vsub.f32 %v2393_v46, %v2407_v9  ;;  %v6046_v46 = vor.u32 %v6555_v23, %v6045_v42  ;;  %v6003_v9 = vld [vmem:[%s9570_s4 + $0xfc] sm:$0xf0]  ;;  %v5994_v42 = vor.u32 %v6541_v5, %v5991_v36 }
 0x976   :  { %v2415_v0 = vmul.f32 %v8286_v31, %v8286_v31  ;;  %2704 = vmatpush.bf16.msrb.mxu3 %v6046_v46  ;;  %v6539_v46 = vld [vmem:[%s9570_s4 + $0xc8] sm:$0xf0] }
 0x977   :  { %v5978_v33 = vor.u32 %v6539_v46, %v5977_v13 }
 0x978   :  { %2420 = vadd.xlane.f32.xlu2 %v2415_v0  ;;  %v6009_v0 = vld [vmem:[%s9570_s4 + $0xf8] sm:$0xf] }
 0x97a   :  { %2705 = vmatpush.bf16.msrb.mxu3 %v6034_v37  ;;  %v5982_v37 = vor.u32 %v6538_v15, %v5979_v44 }
 0x9bd   :  { %v2403_v11 = vpop.xlane.xlu2 %2402 }
 0x9be   :  { %v2408_v2 = vmul.f32 %v2403_v11, %v7222_v10  ;;  %v6546_v11 = vld [vmem:[%s9570_s4 + $0x100] sm:$0xf0] }
 0x9c0   :  { %v8291_v3 = vsub.f32 %v2394_v58, %v2408_v2  ;;  %v6549_v58 = vld [vmem:[%s9570_s4 + $0x118] sm:$0xf0] }
 0x9c2   :  { %v2416_v52 = vmul.f32 %v8291_v3, %v8291_v3 }
 0x9c4   :  { %2422 = vadd.xlane.f32.xlu0 %v2416_v52  ;;  %v6002_v52 = vor.u32 %v6545_v50, %v6001_v41 }
 0x9c5   :  { %v2405_v14 = vpop.xlane.xlu0 %2404 }
 0x9c6   :  { %v2409_v22 = vmul.f32 %v2405_v14, %v7222_v10  ;;  %v6006_v14 = vor.u32 %v6544_v32, %v6003_v9  ;;  %2669 = vmatpush.bf16.msra.mxu0 %v6002_v52  ;;  %6647 = vmatpush.bf16.msra.mxu1 %v6002_v52 }
 0x9c8   :  { %v8296_v54 = vsub.f32 %v2395_v25, %v2409_v22  ;;  %v6022_v25 = vor.u32 %v6549_v58, %v6021_v48  ;;  %v6010_v22 = vor.u32 %v6546_v11, %v6009_v0  ;;  %2688 = vmatpush.bf16.msrb.mxu2 %v6006_v14 }
 0x9ca   :  { %v2417_v17 = vmul.f32 %v8296_v54, %v8296_v54  ;;  %2706 = vmatpush.bf16.msrb.mxu3 %v6022_v25 }
 0x9cc   :  { %2424 = vadd.xlane.f32.xlu1 %v2417_v17  ;;  %2689 = vmatpush.bf16.msrb.mxu2 %v5994_v42 }
 0x9ce   :  { %2707 = vmatpush.bf16.msrb.mxu3 %v6010_v22 }
 0x9d0   :  { %2690 = vmatpush.bf16.msrb.mxu2 %v5982_v37 }
 0x9e3   :  { %v2419_v28 = vpop.xlane.xlu1 %2418 }
 0x9e4   :  { %v2426_v55 = vmul.f32 %v2419_v28, %v7222_v10 }
 0x9e6   :  { %v2430_v17 = vadd.f32 1e-12, %v2426_v55 }
 0x9e8   :  { %6803 = vrsqrt.f32 %v2430_v17  ;;  %vm2440_vm6 = vweird.f32 %v2430_v17 }
 0x9eb   :  { %v2421_v16 = vpop.xlane.xlu2 %2420 }
 0x9ec   :  { %v2427_v2 = vmul.f32 %v2421_v16, %v7222_v10 }
 0x9ee   :  { %v2431_v40 = vadd.f32 1e-12, %v2427_v2  ;;  %v6804_v47 = vpop.eup %6803 }
 0x9ef   :  { %v2435_v1 = vmul.f32 %v6804_v47, %v2430_v17  ;;  %vm2441_vm5 = vweird.f32 %v6804_v47 }
 0x9f0   :  { %6805 = vrsqrt.f32 %v2431_v40  ;;  %vm2442_vm8 = vmor %vm2440_vm6, %vm2441_vm5  ;;  %vm2450_vm9 = vweird.f32 %v2431_v40 }
 0x9f1   :  { %v2436_v20 = vmul.f32 %v6804_v47, %v2435_v1 }
 0x9f3   :  { %v2437_v34 = vmul.f32 0.5, %v2436_v20 }
 0x9f5   :  { %v2438_v24 = vsub.f32 1.5, %v2437_v34 }
 0x9f6   :  { %v6806_v39 = vpop.eup %6805 }
 0x9f7   :  { %v2445_v45 = vmul.f32 %v6806_v39, %v2431_v40  ;;  %v2439_v56 = vmul.f32 %v6804_v47, %v2438_v24  ;;  %vm2451_vm7 = vweird.f32 %v6806_v39 }
 0x9f8   :  { %vm2452_vm10 = vmor %vm2450_vm9, %vm2451_vm7 }
 0x9f9   :  { %v2446_v38 = vmul.f32 %v6806_v39, %v2445_v45  ;;  %v2443_v57 = vsel %vm2442_vm8, %v6804_v47, %v2439_v56 }
 0x9fa   :  { %v2474_v21 = vmul.f32 %v2443_v57, %v8281_v51  ;;  %v5990_v51 = vor.u32 %v6542_v27, %v5989_v61 }
 0x9fb   :  { %v2447_v43 = vmul.f32 0.5, %v2446_v38 }
 0x9fc   :  { %v2481_v23 = vmul.f32 %v8414_v59, %v2474_v21  ;;  %2670 = vmatpush.bf16.msra.mxu0 %v5990_v51  ;;  %6648 = vmatpush.bf16.msra.mxu1 %v5990_v51 }
 0x9fd   :  { %v2448_v60 = vsub.f32 1.5, %v2447_v43 }
 0x9fe   :  { %v8458_v19 = vadd.f32 %v6711_v63, %v2481_v23 }
 0x9ff   :  { %v2449_v29 = vmul.f32 %v6806_v39, %v2448_v60 }
 0xa00   :  { %2671 = vmatpush.bf16.msra.mxu0 %v5978_v33  ;;  %6649 = vmatpush.bf16.msra.mxu1 %v5978_v33 }
 0xa01   :  { %v2453_v6 = vsel %vm2452_vm10, %v6806_v39, %v2449_v29 }
 0xa02   :  { %v2475_v26 = vmul.f32 %v2453_v6, %v8286_v31  ;;  %v5997_v31 = vld [vmem:[%s9570_s4 + $0xe0] sm:$0xf]  ;;  %s7072_s4 = smov 1024  }
 0xa03   :  { %v5998_v4 = vor.u32 %v6543_v62, %v5997_v31 }
 0xa04   :  { %v2482_v35 = vmul.f32 %v8414_v59, %v2475_v26 }
 0xa05   :  { %2708 = vmatpush.bf16.msrb.mxu3 %v5998_v4 }
 0xa06   :  { %v8460_v18 = vadd.f32 %v6711_v63, %v2482_v35 }
 0xa08   :  { %v2525_v53 = vpack.c.bf16 %v8460_v18, %v8458_v19 }
 0xa09   :  { %2709 = vmatpush.bf16.msrb.mxu3 %v5986_v8 }
 0xa0a   :  { %2672 = vmatmul.bf16.vlgmr.msra.gmra.mxu0 %v2525_v53  ;;  %2691 = vmatmul.bf16.vlgmr.msrb.gmra.mxu2 %v2525_v53 }
 0xa0c   :  { %2710 = vmatmul.bf16.vlgmr.msrb.gmra.mxu3 %v2525_v53 }
 0xa37   :  { %v2423_v48 = vpop.xlane.xlu0 %2422 }
 0xa38   :  { %v2428_v58 = vmul.f32 %v2423_v48, %v7222_v10 }
 0xa3a   :  { %v2432_v28 = vadd.f32 1e-12, %v2428_v58 }
 0xa3c   :  { %6807 = vrsqrt.f32 %v2432_v28  ;;  %vm2460_vm12 = vweird.f32 %v2432_v28 }
 0xa3f   :  { %v2425_v30 = vpop.xlane.xlu1 %2424 }
 0xa40   :  { %v2429_v16 = vmul.f32 %v2425_v30, %v7222_v10 }
 0xa42   :  { %v6808_v49 = vpop.eup %6807  ;;  %v2433_v25 = vadd.f32 1e-12, %v2429_v16 }
 0xa43   :  { %v2455_v41 = vmul.f32 %v6808_v49, %v2432_v28  ;;  %vm2461_vm11 = vweird.f32 %v6808_v49 }
 0xa44   :  { %6809 = vrsqrt.f32 %v2433_v25  ;;  %vm2462_vm15 = vmor %vm2460_vm12, %vm2461_vm11  ;;  %vm2470_vm1 = vweird.f32 %v2433_v25 }
 0xa45   :  { %v2456_v50 = vmul.f32 %v6808_v49, %v2455_v41 }
 0xa47   :  { %v2457_v32 = vmul.f32 0.5, %v2456_v50 }
 0xa49   :  { %v2458_v55 = vsub.f32 1.5, %v2457_v32 }
 0xa4a   :  { %v6810_v9 = vpop.eup %6809 }
 0xa4b   :  { %v2459_v0 = vmul.f32 %v6808_v49, %v2458_v55  ;;  %v2465_v11 = vmul.f32 %v6810_v9, %v2433_v25  ;;  %vm2471_vm0 = vweird.f32 %v6810_v9 }
 0xa4c   :  { %vm2472_vm2 = vmor %vm2470_vm1, %vm2471_vm0 }
 0xa4d   :  { %v2466_v2 = vmul.f32 %v6810_v9, %v2465_v11  ;;  %v2463_v52 = vsel %vm2462_vm15, %v6808_v49, %v2459_v0 }
 0xa4e   :  { %v2476_v17 = vmul.f32 %v2463_v52, %v8291_v3  ;;  %v5974_v3 = vld [vmem:[%s9573_s5 + $0x3] sm:$0x7] }
 0xa4f   :  { %v2467_v14 = vmul.f32 0.5, %v2466_v2  ;;  %v2530_v43 = vperm.slane %v5974_v3, 0  ;;  %v2531_v56 = vperm.slane %v5974_v3, 1 }
 0xa50   :  { %v2483_v1 = vmul.f32 %v8414_v59, %v2476_v17 }
 0xa51   :  { %v2468_v22 = vsub.f32 1.5, %v2467_v14 }
 0xa52   :  { %v8470_v20 = vadd.f32 %v6711_v63, %v2483_v1 }
 0xa53   :  { %v2469_v40 = vmul.f32 %v6810_v9, %v2468_v22 }
 0xa55   :  { %v2473_v47 = vsel %vm2472_vm2, %v6810_v9, %v2469_v40 }
 0xa56   :  { %v2477_v39 = vmul.f32 %v2473_v47, %v8296_v54 }
 0xa58   :  { %v2484_v45 = vmul.f32 %v8414_v59, %v2477_v39  ;;  %v2532_v59 = vperm.slane %v5974_v3, 2 }
 0xa5a   :  { %v8472_v38 = vadd.f32 %v6711_v63, %v2484_v45 }
 0xa5c   :  { %v2526_v34 = vpack.c.bf16 %v8472_v38, %v8470_v20 }
 0xa5e   :  { %2677 = vmatmul.bf16.vlgmr.msra.gmra.mxu1 %v2526_v34  ;;  %2696 = vmatmul.bf16.gmra.mxu2 %v2526_v34 }
 0xa5f   :  { %2715 = vmatmul.bf16.gmra.mxu3 %v2526_v34 }
 0xa87   :  { %v2673_v54 = vpop.f32.mrf.mxu0 }
 0xa88   :  { %v2674_v24 = vadd.f32 %v2673_v54, %v2530_v43 }
 0xa8a   :  { %v2721_v60 = vmul.f32 0.125, %v2674_v24 }
 0xa8c   :  { %2811 = vrot.lane.b32.xlu1 %v2721_v60, %s7063_s9 }
 0xa8d   :  { %v2692_v29 = vpop.f32.mrf.mxu2 }
 0xa8e   :  { %v2693_v6 = vadd.f32 %v2692_v29, %v2531_v56 }
 0xa8f   :  { %v2711_v57 = vpop.f32.mrf.mxu3  ;;  %v2675_v21 = vpop.f32.mrf.mxu0 }
 0xa90   :  { %2815 = vrot.lane.b32.xlu0 %v2693_v6, %s7063_s9  ;;  %v2676_v26 = vadd.f32 %v2675_v21, %v2530_v43  ;;  %v8481_v5 = vadd.f32 %v2711_v57, %v2532_v59 }
 0xa92   :  { %v2722_v31 = vmul.f32 0.125, %v2676_v26 }
 0xa95   :  { %v2694_v61 = vpop.f32.mrf.mxu2 }
 0xa96   :  { %v2695_v51 = vadd.f32 %v2694_v61, %v2531_v56 }
 0xa97   :  { %v2713_v27 = vpop.f32.mrf.mxu3 }
 0xa98   :  { %v2714_v36 = vadd.f32 %v2713_v27, %v2532_v59  ;;  %2817 = vrot.lane.b32.xlu2 %v2695_v51, %s7063_s9  ;;  %6071 = vmatpush.xpose.msk.msrb.mxu0 %vm485_vm13, %v2695_v51 }
 0xa99   :  { %2813 = vrot.lane.b32.xlu0 %v2722_v31, %s7063_s9 }
 0xa9a   :  { %2802 = vmatpush.msrb.mxu1 %v2714_v36  ;;  %v6684_v62 = vpack.i.bf16 %v8481_v5, %v2714_v36 }
 0xa9c   :  { %2803 = vmatpush.msrb.mxu1 %v8481_v5  ;;  %6072 = vmatpush.xpose.msk.msrb.mxu0 %vm485_vm13, %v2693_v6 }
 0xa9f   :  { %6073 = vmatmul.msk.f32.vlgmr.msrb.gmra.mxu0 %vm485_vm13, %v2721_v60 }
 0xaa7   :  { %6074 = vmatmul.msk.f32.gmra.mxu0 %vm485_vm13, %v2722_v31 }
 0xadb   :  { %v2678_v42 = vpop.f32.mrf.mxu1 }
 0xadc   :  { %v2679_v4 = vadd.f32 %v2678_v42, %v2530_v43 }
 0xade   :  { %v2723_v23 = vmul.f32 0.125, %v2679_v4 }
 0xae0   :  { %3005 = vrot.lane.b32.xlu0 %v2723_v23, %s7063_s9 }
 0xae1   :  { %v2697_v63 = vpop.f32.mrf.mxu2 }
 0xae2   :  { %v2698_v13 = vadd.f32 %v2697_v63, %v2531_v56  ;;  %v2716_v46 = vpop.f32.mrf.mxu3 }
 0xae3   :  { %v8493_v44 = vadd.f32 %v2716_v46, %v2532_v59  ;;  %v2680_v7 = vpop.f32.mrf.mxu1 }
 0xae4   :  { %3009 = vrot.lane.b32.xlu1 %v2698_v13, %s7063_s9  ;;  %v2681_v8 = vadd.f32 %v2680_v7, %v2530_v43 }
 0xae6   :  { %v2724_v53 = vmul.f32 0.125, %v2681_v8 }
 0xae9   :  { %v2699_v15 = vpop.f32.mrf.mxu2 }
 0xaea   :  { %v2700_v35 = vadd.f32 %v2699_v15, %v2531_v56  ;;  %v2718_v33 = vpop.f32.mrf.mxu3 }
 0xaeb   :  { %v8495_v12 = vadd.f32 %v2718_v33, %v2532_v59 }
 0xaec   :  { %3011 = vrot.lane.b32.xlu2 %v2700_v35, %s7063_s9  ;;  %6083 = vmatpush.xpose.msk.msra.mxu0 %vm485_vm13, %v2700_v35 }
 0xaed   :  { %2996 = vmatpush.msra.mxu1 %v8495_v12  ;;  %v6689_v37 = vpack.i.bf16 %v8493_v44, %v8495_v12 }
 0xaef   :  { %2997 = vmatpush.msra.mxu1 %v8493_v44 }
 0xaf0   :  { %6084 = vmatpush.xpose.msk.msra.mxu0 %vm485_vm13, %v2698_v13 }
 0xaf2   :  { %v2818_v48 = vpop.permute.xlu2 %2817 }
 0xaf3   :  { %6085 = vmatmul.msk.f32.vlgmr.msra.gmra.mxu0 %vm485_vm13, %v2723_v23  ;;  %6077 = vmatpush.xpose.msk.msra.mxu2 %vm485_vm13, %v2818_v48 }
 0xaf4   :  { %3007 = vrot.lane.b32.xlu2 %v2724_v53, %s7063_s9 }
 0xafb   :  { %6086 = vmatmul.msk.f32.gmra.mxu0 %vm485_vm13, %v2724_v53 }
 0xafe   :  { %v2812_v28 = vpop.permute.xlu1 %2811 }
 0xb02   :  { %v2816_v58 = vpop.permute.xlu0 %2815 }
 0xb03   :  { %6078 = vmatpush.xpose.msk.msra.mxu2 %vm485_vm13, %v2816_v58 }
 0xb06   :  { %6079 = vmatmul.msk.f32.vlgmr.msra.gmra.mxu2 %vm485_vm13, %v2812_v28 }
 0xb0b   :  { %v2814_v30 = vpop.permute.xlu0 %2813 }
 0xb0e   :  { %6080 = vmatmul.msk.f32.gmra.mxu2 %vm485_vm13, %v2814_v30 }
 0xb1c   :  { %v2754_v0 = vpop.f32.mrf.mxu0 }
 0xb1d   :  { %v2760_v11 = vsel %vm521_vm14, %v2754_v0, -inf }
 0xb24   :  { %v2757_v17 = vpop.f32.mrf.mxu0 }
 0xb25   :  { %v2763_v40 = vsel %vm521_vm14, %v2757_v17, -inf }
 0xb46   :  { %v3012_v16 = vpop.permute.xlu2 %3011 }
 0xb47   :  { %6089 = vmatpush.xpose.msk.msrb.mxu2 %vm485_vm13, %v3012_v16 }
 0xb4e   :  { %v3008_v41 = vpop.permute.xlu2 %3007 }
 0xb52   :  { %v3006_v25 = vpop.permute.xlu0 %3005 }
 0xb56   :  { %v3010_v49 = vpop.permute.xlu1 %3009 }
 0xb57   :  { %6090 = vmatpush.xpose.msk.msrb.mxu2 %vm485_vm13, %v3010_v49 }
 0xb5a   :  { %6091 = vmatmul.msk.f32.vlgmr.msrb.gmra.mxu2 %vm485_vm13, %v3006_v25 }
 0xb62   :  { %6092 = vmatmul.msk.f32.gmra.mxu2 %vm485_vm13, %v3008_v41 }
 0xb70   :  { %v2948_v47 = vpop.f32.mrf.mxu0 }
 0xb71   :  { %v2954_v39 = vsel %vm521_vm14, %v2948_v47, -inf }
 0xb78   :  { %v2951_v1 = vpop.f32.mrf.mxu0 }
 0xb79   :  { %v2957_v45 = vsel %vm521_vm14, %v2951_v1, -inf }
 0xb89   :  { %v2844_v50 = vpop.f32.mrf.mxu2 }
 0xb8a   :  { %v2850_v32 = vsel %vm521_vm14, %v2844_v50, -inf }
 0xb8b   :  { %2851 = vmax.xlane.f32.xlu1 %v2850_v32 }
 0xb91   :  { %v2847_v55 = vpop.f32.mrf.mxu2 }
 0xb92   :  { %v2853_v9 = vsel %vm521_vm14, %v2847_v55, -inf }
 0xb93   :  { %2854 = vmax.xlane.f32.xlu0 %v2853_v9 }
 0xb9b   :  { %2761 = vmax.xlane.f32.xlu0 %v2760_v11 }
 0xbaf   :  { %6685 = vrot.lane.b32.xlu0 %v6684_v62, %s7063_s9 }
 0xbdd   :  { %v3038_v2 = vpop.f32.mrf.mxu2 }
 0xbde   :  { %v3044_v52 = vsel %vm521_vm14, %v3038_v2, -inf }
 0xbdf   :  { %3045 = vmax.xlane.f32.xlu2 %v3044_v52 }
 0xbe5   :  { %v3041_v14 = vpop.f32.mrf.mxu2 }
 0xbe6   :  { %v3047_v22 = vsel %vm521_vm14, %v3041_v14, -inf }
 0xbe7   :  { %3048 = vmax.xlane.f32.xlu1 %v3047_v22 }
 0xbef   :  { %2764 = vmax.xlane.f32.xlu1 %v2763_v40 }
 0xbf7   :  { %2955 = vmax.xlane.f32.xlu1 %v2954_v39 }
 0xbfe   :  { %v2852_v34 = vpop.xlane.xlu1 %2851 }
 0xbff   :  { %2958 = vmax.xlane.f32.xlu1 %v2957_v45  ;;  %v2856_v3 = vsub.f32 %v2844_v50, %v2852_v34 }
 0xc01   :  { %v2858_v43 = vmul.f32 1.442695, %v2856_v3 }
 0xc03   :  { %6811 = vpow2.f32 %v2858_v43 }
 0xc06   :  { %v2855_v54 = vpop.xlane.xlu0 %2854 }
 0xc07   :  { %v2857_v24 = vsub.f32 %v2847_v55, %v2855_v54 }
 0xc09   :  { %v6812_v60 = vpop.eup %6811  ;;  %v2860_v56 = vmul.f32 1.442695, %v2857_v24 }
 0xc0a   :  { %v2862_v29 = vsel %vm521_vm14, %v6812_v60, 0.0 }
 0xc0b   :  { %6813 = vpow2.f32 %v2860_v56  ;;  %2863 = vadd.xlane.f32.xlu2 %v2862_v29 }
 0xc0e   :  { %v2762_v57 = vpop.xlane.xlu0 %2761 }
 0xc0f   :  { %v2766_v6 = vsub.f32 %v2754_v0, %v2762_v57 }
 0xc11   :  { %v6814_v21 = vpop.eup %6813  ;;  %v2768_v59 = vmul.f32 1.442695, %v2766_v6 }
 0xc12   :  { %v2865_v26 = vsel %vm521_vm14, %v6814_v21, 0.0 }
 0xc13   :  { %6815 = vpow2.f32 %v2768_v59  ;;  %2866 = vadd.xlane.f32.xlu2 %v2865_v26 }
 0xc19   :  { %v6816_v61 = vpop.eup %6815 }
 0xc1a   :  { %v2772_v27 = vsel %vm521_vm14, %v6816_v61, 0.0 }
 0xc1b   :  { %2773 = vadd.xlane.f32.xlu1 %v2772_v27 }
 0xc21   :  { %v6686_v5 = vpop.permute.xlu0 %6685 }
 0xc22   :  { %v6687_v51 = vunpack.i.l.bf16 %v6686_v5  ;;  %v6688_v36 = vunpack.i.h.bf16 %v6686_v5 }
 0xc24   :  { %2900 = vmatpush.msra.mxu3 %v6687_v51 }
 0xc26   :  { %2901 = vmatpush.msra.mxu3 %v6688_v36  ;;  %v6569_v36 = vld [vmem:[#allocation2 + $0x78] sm:$0xff] }
 0xc27   :  { %3185 = vmatpush.bf16.msrb.mxu0 %v6569_v36  ;;  %v6255_v36 = vld [vmem:[#allocation5 + $0x1f8] sm:$0xf0] }
 0xc52   :  { %v3046_v31 = vpop.xlane.xlu2 %3045 }
 0xc53   :  { %v3050_v62 = vsub.f32 %v3038_v2, %v3046_v31  ;;  %v6568_v31 = vld [vmem:[#allocation2 + $0x70] sm:$0xff] }
 0xc54   :  { %3186 = vmatpush.bf16.msrb.mxu0 %v6568_v31 }
 0xc55   :  { %v3052_v42 = vmul.f32 1.442695, %v3050_v62  ;;  %v6567_v62 = vld [vmem:[#allocation2 + $0x68] sm:$0xff] }
 0xc57   :  { %6817 = vpow2.f32 %v3052_v42  ;;  %v6566_v42 = vld [vmem:[#allocation2 + $0x60] sm:$0xff] }
 0xc58   :  { %3187 = vmatpush.bf16.msrb.mxu0 %v6567_v62  ;;  %v6229_v62 = vld [vmem:[#allocation5 + $0x1c0] sm:$0xf] }
 0xc5a   :  { %v3049_v4 = vpop.xlane.xlu1 %3048 }
 0xc5b   :  { %v3051_v23 = vsub.f32 %v3041_v14, %v3049_v4  ;;  %v6565_v4 = vld [vmem:[#allocation2 + $0x58] sm:$0xff] }
 0xc5c   :  { %3188 = vmatpush.bf16.msrb.mxu0 %v6566_v42  ;;  %v6596_v42 = vld [vmem:[#allocation5 + $0x1cc] sm:$0xf0] }
 0xc5d   :  { %v6818_v63 = vpop.eup %6817  ;;  %v3054_v13 = vmul.f32 1.442695, %v3051_v23  ;;  %v6564_v23 = vld [vmem:[#allocation2 + $0x50] sm:$0xff] }
 0xc5e   :  { %v3056_v46 = vsel %vm521_vm14, %v6818_v63, 0.0 }
 0xc5f   :  { %6819 = vpow2.f32 %v3054_v13  ;;  %3057 = vadd.xlane.f32.xlu2 %v3056_v46  ;;  %v6562_v13 = vld [vmem:[#allocation2 + $0x40] sm:$0xff] }
 0xc60   :  { %3189 = vmatpush.bf16.msrb.mxu0 %v6565_v4  ;;  %v6594_v4 = vld [vmem:[#allocation5 + $0x1c4] sm:$0xf] }
 0xc62   :  { %v2765_v15 = vpop.xlane.xlu1 %2764 }
 0xc63   :  { %v2767_v35 = vsub.f32 %v2757_v17, %v2765_v15 }
 0xc64   :  { %3190 = vmatpush.bf16.msrb.mxu0 %v6564_v23 }
 0xc65   :  { %v6820_v33 = vpop.eup %6819  ;;  %v2770_v7 = vmul.f32 1.442695, %v2767_v35 }
 0xc66   :  { %v3059_v8 = vsel %vm521_vm14, %v6820_v33, 0.0 }
 0xc67   :  { %6821 = vpow2.f32 %v2770_v7  ;;  %3060 = vadd.xlane.f32.xlu0 %v3059_v8 }
 0xc6a   :  { %v2956_v53 = vpop.xlane.xlu1 %2955 }
 0xc6b   :  { %v2960_v48 = vsub.f32 %v2948_v47, %v2956_v53 }
 0xc6d   :  { %v6822_v58 = vpop.eup %6821  ;;  %v2962_v28 = vmul.f32 1.442695, %v2960_v48 }
 0xc6e   :  { %v2775_v30 = vsel %vm521_vm14, %v6822_v58, 0.0 }
 0xc6f   :  { %6823 = vpow2.f32 %v2962_v28  ;;  %2776 = vadd.xlane.f32.xlu1 %v2775_v30 }
 0xc72   :  { %v2959_v25 = vpop.xlane.xlu1 %2958 }
 0xc73   :  { %v2961_v41 = vsub.f32 %v2951_v1, %v2959_v25 }
 0xc75   :  { %v6824_v16 = vpop.eup %6823  ;;  %v2964_v50 = vmul.f32 1.442695, %v2961_v41 }
 0xc76   :  { %v2966_v49 = vsel %vm521_vm14, %v6824_v16, 0.0 }
 0xc77   :  { %6690 = vrot.lane.b32.xlu2 %v6689_v37, %s7063_s9  ;;  %2967 = vadd.xlane.f32.xlu1 %v2966_v49  ;;  %6825 = vpow2.f32 %v2964_v50 }
 0xc7d   :  { %v6826_v55 = vpop.eup %6825 }
 0xc7e   :  { %v2864_v32 = vpop.xlane.xlu2 %2863  ;;  %v2969_v9 = vsel %vm521_vm14, %v6826_v55, 0.0 }
 0xc7f   :  { %6827 = vrcp.f32 %v2864_v32  ;;  %v6712_v32 = vld [vmem:[%s9543_s6 + $0x1] ss:$0 sm:$0xff] }
 0xc85   :  { %v6828_v0 = vpop.eup %6827 }
 0xc86   :  { %v2870_v11 = vmul.f32 %v6828_v0, %v6812_v60  ;;  %v2867_v2 = vpop.xlane.xlu2 %2866 }
 0xc87   :  { %6829 = vrcp.f32 %v2867_v2 }
 0xc88   :  { %6081 = vmatmul.msk.f32.vlgmr.msra.gmra.mxu3 %vm521_vm14, %v2870_v11 }
 0xc8d   :  { %v6830_v52 = vpop.eup %6829 }
 0xc8e   :  { %v2774_v44 = vpop.xlane.xlu1 %2773  ;;  %v2871_v12 = vmul.f32 %v6830_v52, %v6814_v21 }
 0xc8f   :  { %6831 = vrcp.f32 %v2774_v44 }
 0xc90   :  { %6082 = vmatmul.msk.f32.gmra.mxu3 %vm521_vm14, %v2871_v12 }
 0xc95   :  { %v6832_v37 = vpop.eup %6831 }
 0xc96   :  { %v2780_v14 = vmul.f32 %v6832_v37, %v6816_v61 }
 0xc98   :  { %6075 = vmatmul.msk.f32.vlgmr.msrb.gmra.mxu1 %vm521_vm14, %v2780_v14 }
 0xca0   :  { %2970 = vadd.xlane.f32.xlu2 %v2969_v9 }
 0xcd2   :  { %v3058_v22 = vpop.xlane.xlu2 %3057 }
 0xcd3   :  { %6833 = vrcp.f32 %v3058_v22 }
 0xcd9   :  { %v6834_v47 = vpop.eup %6833 }
 0xcda   :  { %v6691_v17 = vpop.permute.xlu2 %6690  ;;  %v3061_v40 = vpop.xlane.xlu0 %3060  ;;  %v3064_v45 = vmul.f32 %v6834_v47, %v6818_v63  ;;  %v6563_v63 = vld [vmem:[#allocation2 + $0x48] sm:$0xff] }
 0xcdb   :  { %v6692_v39 = vunpack.i.l.bf16 %v6691_v17  ;;  %v6693_v1 = vunpack.i.h.bf16 %v6691_v17  ;;  %6835 = vrcp.f32 %v3061_v40  ;;  %3191 = vmatpush.bf16.msrb.mxu0 %v6563_v63  ;;  %v6230_v63 = vor.u32 %v6596_v42, %v6229_v62  ;;  %v6167_v62 = vld [vmem:[#allocation5 + $0x150] sm:$0xf0]  ;;  %v6173_v42 = vld [vmem:[#allocation5 + $0x148] sm:$0xf] }
 0xcdd   :  { %3094 = vmatpush.msrb.mxu3 %v6692_v39 }
 0xcdf   :  { %3095 = vmatpush.msrb.mxu3 %v6693_v1  ;;  %3192 = vmatpush.bf16.msrb.mxu0 %v6562_v13  ;;  %v6231_v13 = vld [vmem:[#allocation5 + $0x1d0] sm:$0xf0] }
 0xce0   :  { %6093 = vmatmul.msk.f32.vlgmr.msrb.gmra.mxu3 %vm521_vm14, %v3064_v45 }
 0xce1   :  { %v6836_v3 = vpop.eup %6835 }
 0xce2   :  { %v2777_v34 = vpop.xlane.xlu1 %2776  ;;  %v3065_v43 = vmul.f32 %v6836_v3, %v6820_v33 }
 0xce3   :  { %6837 = vrcp.f32 %v2777_v34 }
 0xce8   :  { %6094 = vmatmul.msk.f32.gmra.mxu3 %vm521_vm14, %v3065_v43 }
 0xce9   :  { %v6838_v54 = vpop.eup %6837 }
 0xcea   :  { %v2968_v24 = vpop.xlane.xlu1 %2967  ;;  %v2781_v60 = vmul.f32 %v6838_v54, %v6822_v58 }
 0xceb   :  { %6839 = vrcp.f32 %v2968_v24 }
 0xcec   :  { %6076 = vmatmul.msk.f32.gmra.mxu1 %vm521_vm14, %v2781_v60 }
 0xcf1   :  { %v6840_v56 = vpop.eup %6839 }
 0xcf2   :  { %v2974_v29 = vmul.f32 %v6840_v56, %v6824_v16 }
 0xcf4   :  { %6087 = vmatmul.msk.f32.vlgmr.msra.gmra.mxu1 %vm521_vm14, %v2974_v29  ;;  %v6245_v29 = vld [vmem:[#allocation5 + $0x1e0] sm:$0xf] }
 0xd0b   :  { %v2903_v59 = vpop.f32.mrf.mxu3 }
 0xd13   :  { %v2971_v57 = vpop.xlane.xlu2 %2970  ;;  %v2906_v26 = vpop.f32.mrf.mxu3 }
 0xd14   :  { %6841 = vrcp.f32 %v2971_v57  ;;  %v6694_v61 = vpack.i.bf16 %v2906_v26, %v2903_v59  ;;  %v6600_v57 = vld [vmem:[#allocation5 + $0x1ec] sm:$0xf0]  ;;  %v6247_v59 = vld [vmem:[#allocation5 + $0x1f0] sm:$0xf0]  ;;  %v6253_v26 = vld [vmem:[#allocation5 + $0x1e8] sm:$0xf] }
 0xd15   :  { %v2805_v46 = vpop.f32.mrf.mxu1 }
 0xd16   :  { %6695 = vrot.lane.b32.xlu1 %v6694_v61, %s7063_s9  ;;  %v6601_v61 = vld [vmem:[#allocation5 + $0x1f4] sm:$0xf0] }
 0xd1a   :  { %v6842_v6 = vpop.eup %6841 }
 0xd1b   :  { %v2975_v21 = vmul.f32 %v6842_v6, %v6826_v55  ;;  %v6598_v6 = vld [vmem:[#allocation5 + $0x1e4] sm:$0xf] }
 0xd1d   :  { %6088 = vmatmul.msk.f32.gmra.mxu1 %vm521_vm14, %v2975_v21  ;;  %v6246_v21 = vor.u32 %v6600_v57, %v6245_v29  ;;  %v6583_v29 = vld [vmem:[#allocation5 + $0x16c] sm:$0xf]  ;;  %v6191_v57 = vld [vmem:[#allocation5 + $0x178] sm:$0xf0] }
 0xd1f   :  { %3512 = vmatpush.bf16.msrb.mxu1 %v6246_v21  ;;  %v6165_v21 = vld [vmem:[#allocation5 + $0x140] sm:$0xf] }
 0xd23   :  { %3513 = vmatpush.bf16.msrb.mxu1 %v6230_v63  ;;  %v6175_v63 = vld [vmem:[#allocation5 + $0x158] sm:$0xf0] }
 0xd63   :  { %v3097_v27 = vpop.f32.mrf.mxu3 }
 0xd69   :  { %v2808_v7 = vpop.f32.mrf.mxu1 }
 0xd6b   :  { %v3100_v5 = vpop.f32.mrf.mxu3 }
 0xd6c   :  { %v6699_v51 = vpack.i.bf16 %v3100_v5, %v3097_v27  ;;  %v6250_v27 = vor.u32 %v6598_v6, %v6247_v59  ;;  %v6254_v5 = vor.u32 %v6601_v61, %v6253_v26 }
 0xd6e   :  { %6700 = vrot.lane.b32.xlu0 %v6699_v51, %s7063_s9  ;;  %v6599_v51 = vld [vmem:[#allocation5 + $0x1ec] sm:$0xf]  ;;  %3531 = vmatpush.bf16.msra.mxu2 %v6250_v27 }
 0xd6f   :  { %v6258_v31 = vor.u32 %v6599_v51, %v6255_v36  ;;  %3550 = vmatpush.bf16.msra.mxu3 %v6254_v5  ;;  %v6580_v5 = vld [vmem:[#allocation5 + $0x14c] sm:$0xf0]  ;;  %v6578_v51 = vld [vmem:[#allocation5 + $0x144] sm:$0xf] }
 0xd71   :  { %v2999_v58 = vpop.f32.mrf.mxu1  ;;  %3569 = vmatpush.bf16.msra.mxu0 %v6258_v31  ;;  %v6194_v31 = vor.u32 %v6583_v29, %v6191_v57  ;;  %v6571_v29 = vld [vmem:[#allocation5 + $0x10c] sm:$0xf]  ;;  %v6143_v57 = vld [vmem:[#allocation5 + $0x118] sm:$0xf0] }
 0xd88   :  { %v6696_v15 = vpop.permute.xlu1 %6695 }
 0xd89   :  { %v6698_v35 = vunpack.i.h.bf16 %v6696_v15  ;;  %v6697_v33 = vunpack.i.l.bf16 %v6696_v15  ;;  %v6597_v15 = vld [vmem:[#allocation5 + $0x1d4] sm:$0xf0] }
 0xd8b   :  { %v2918_v8 = vsel %vm485_vm13, %v2808_v7, %v6698_v35  ;;  %v2917_v53 = vsel %vm485_vm13, %v2805_v46, %v6697_v33  ;;  %v6237_v46 = vld [vmem:[#allocation5 + $0x1c8] sm:$0xf]  ;;  %v6234_v33 = vor.u32 %v6594_v4, %v6231_v13  ;;  %v6581_v4 = vld [vmem:[#allocation5 + $0x154] sm:$0xf0] }
 0xd8c   :  { %v3130_v48 = vpack.c.bf16 %v2918_v8, %v2917_v53  ;;  %v6238_v7 = vor.u32 %v6597_v15, %v6237_v46  ;;  %v6595_v8 = vld [vmem:[#allocation5 + $0x1cc] sm:$0xf]  ;;  %v6239_v53 = vld [vmem:[#allocation5 + $0x1d8] sm:$0xf0]  ;;  %v6166_v46 = vor.u32 %v6580_v5, %v6165_v21  ;;  %v6149_v15 = vld [vmem:[#allocation5 + $0x120] sm:$0xf] }
 0xd8d   :  { %3532 = vmatpush.bf16.msra.mxu2 %v6234_v33  ;;  %v6174_v33 = vor.u32 %v6581_v4, %v6173_v42 }
 0xd8e   :  { %3193 = vmatmul.bf16.vlgmr.msrb.gmra.mxu0 %v3130_v48  ;;  %v6213_v48 = vld [vmem:[#allocation5 + $0x1a0] sm:$0xf]  ;;  %3551 = vmatpush.bf16.msra.mxu3 %v6238_v7  ;;  %v6576_v7 = vld [vmem:[#allocation5 + $0x12c] sm:$0xf0] }
 0xd9a   :  { %v3002_v49 = vpop.f32.mrf.mxu1 }
 0xde0   :  { %v6701_v28 = vpop.permute.xlu0 %6700 }
 0xde1   :  { %v6703_v30 = vunpack.i.h.bf16 %v6701_v28  ;;  %v6702_v16 = vunpack.i.l.bf16 %v6701_v28  ;;  %v6592_v28 = vld [vmem:[#allocation5 + $0x1ac] sm:$0xf0] }
 0xde3   :  { %v3111_v25 = vsel %vm485_vm13, %v2999_v58, %v6702_v16  ;;  %v3112_v41 = vsel %vm485_vm13, %v3002_v49, %v6703_v30  ;;  %v6242_v58 = vor.u32 %v6595_v8, %v6239_v53  ;;  %v6590_v30 = vld [vmem:[#allocation5 + $0x1a4] sm:$0xf]  ;;  %v6215_v16 = vld [vmem:[#allocation5 + $0x1b0] sm:$0xf0] }
 0xde4   :  { %v3131_v50 = vpack.c.bf16 %v3112_v41, %v3111_v25  ;;  %v6214_v25 = vor.u32 %v6592_v28, %v6213_v48  ;;  %v6218_v41 = vor.u32 %v6590_v30, %v6215_v16  ;;  %v6574_v8 = vld [vmem:[#allocation5 + $0x124] sm:$0xf]  ;;  %v6151_v53 = vld [vmem:[#allocation5 + $0x130] sm:$0xf0]  ;;  %v6157_v28 = vld [vmem:[#allocation5 + $0x128] sm:$0xf] }
 0xde5   :  { %3570 = vmatpush.bf16.msra.mxu0 %v6242_v58  ;;  %v6577_v30 = vld [vmem:[#allocation5 + $0x134] sm:$0xf0]  ;;  %v6575_v16 = vld [vmem:[#allocation5 + $0x12c] sm:$0xf] }
 0xde6   :  { %3198 = vmatmul.bf16.gmra.mxu0 %v3131_v50  ;;  %v6221_v50 = vld [vmem:[#allocation5 + $0x1a8] sm:$0xf]  ;;  %3514 = vmatpush.bf16.msrb.mxu1 %v6214_v25  ;;  %v6159_v25 = vld [vmem:[#allocation5 + $0x138] sm:$0xf0] }
 0xde7   :  { %3533 = vmatpush.bf16.msra.mxu2 %v6218_v41 }
 0xe0b   :  { %v3194_v55 = vpop.f32.mrf.mxu0 }
 0xe0c   :  { %v3195_v9 = vadd.f32 %v6712_v32, %v3194_v55 }
 0xe0e   :  { %v3204_v0 = vadd.f32 %v3195_v9, %v8458_v19  ;;  %v6591_v9 = vld [vmem:[#allocation5 + $0x1ac] sm:$0xf] }
 0xe10   :  { %3212 = vadd.xlane.f32.xlu1 %v3204_v0 }
 0xe13   :  { %v3196_v11 = vpop.f32.mrf.mxu0 }
 0xe14   :  { %v3197_v2 = vadd.f32 %v6712_v32, %v3196_v11  ;;  %v6197_v11 = vld [vmem:[#allocation5 + $0x180] sm:$0xf] }
 0xe16   :  { %v3205_v52 = vadd.f32 %v3197_v2, %v8460_v18 }
 0xe18   :  { %3214 = vadd.xlane.f32.xlu0 %v3205_v52 }
 0xe63   :  { %v3199_v44 = vpop.f32.mrf.mxu0 }
 0xe64   :  { %v3200_v12 = vadd.f32 %v6712_v32, %v3199_v44  ;;  %v6586_v44 = vld [vmem:[#allocation5 + $0x184] sm:$0xf] }
 0xe66   :  { %v3206_v37 = vadd.f32 %v3200_v12, %v8470_v20  ;;  %v6199_v12 = vld [vmem:[#allocation5 + $0x190] sm:$0xf0] }
 0xe68   :  { %3216 = vadd.xlane.f32.xlu2 %v3206_v37 }
 0xe6b   :  { %v3201_v14 = vpop.f32.mrf.mxu0 }
 0xe6c   :  { %v3202_v22 = vadd.f32 %v6712_v32, %v3201_v14  ;;  %v6593_v32 = vld [vmem:[#allocation5 + $0x1b4] sm:$0xf0]  ;;  %v6205_v14 = vld [vmem:[#allocation5 + $0x188] sm:$0xf] }
 0xe6d   :  { %v6222_v55 = vor.u32 %v6593_v32, %v6221_v50  ;;  %v6150_v50 = vor.u32 %v6576_v7, %v6149_v15 }
 0xe6e   :  { %v3207_v17 = vadd.f32 %v3202_v22, %v8472_v38  ;;  %v6589_v22 = vld [vmem:[#allocation5 + $0x194] sm:$0xf0] }
 0xe6f   :  { %3552 = vmatpush.bf16.msra.mxu3 %v6222_v55  ;;  %v6154_v55 = vor.u32 %v6574_v8, %v6151_v53 }
 0xe70   :  { %3218 = vadd.xlane.f32.xlu2 %v3207_v17 }
 0xe83   :  { %v3213_v40 = vpop.xlane.xlu1 %3212 }
 0xe84   :  { %v3220_v47 = vmul.f32 %v3213_v40, %v7222_v10  ;;  %v6202_v40 = vor.u32 %v6586_v44, %v6199_v12 }
 0xe86   :  { %v8558_v19 = vsub.f32 %v3204_v0, %v3220_v47  ;;  %v6223_v0 = vld [vmem:[#allocation5 + $0x1b8] sm:$0xf0]  ;;  %v6206_v47 = vor.u32 %v6589_v22, %v6205_v14  ;;  %3534 = vmatpush.bf16.msra.mxu2 %v6202_v40  ;;  %v8588_v22 = vld [vmem:[%s9544_s7 + $0x1] ss:$0 sm:$0xff] }
 0xe87   :  { %v6226_v2 = vor.u32 %v6591_v9, %v6223_v0  ;;  %v6158_v9 = vor.u32 %v6577_v30, %v6157_v28 }
 0xe88   :  { %v3228_v39 = vmul.f32 %v8558_v19, %v8558_v19  ;;  %3553 = vmatpush.bf16.msra.mxu3 %v6206_v47 }
 0xe89   :  { %3571 = vmatpush.bf16.msra.mxu0 %v6226_v2  ;;  %v6162_v2 = vor.u32 %v6575_v16, %v6159_v25 }
 0xe8a   :  { %3232 = vadd.xlane.f32.xlu2 %v3228_v39  ;;  %v6207_v39 = vld [vmem:[#allocation5 + $0x198] sm:$0xf0] }
 0xe8b   :  { %v3215_v18 = vpop.xlane.xlu0 %3214 }
 0xe8c   :  { %v3221_v1 = vmul.f32 %v3215_v18, %v7222_v10  ;;  %v6181_v18 = vld [vmem:[#allocation5 + $0x160] sm:$0xf] }
 0xe8e   :  { %v8563_v45 = vsub.f32 %v3205_v52, %v3221_v1  ;;  %v6588_v52 = vld [vmem:[#allocation5 + $0x18c] sm:$0xf0] }
 0xe8f   :  { %v6584_v1 = vld [vmem:[#allocation5 + $0x16c] sm:$0xf0] }
 0xe90   :  { %v3229_v20 = vmul.f32 %v8563_v45, %v8563_v45  ;;  %v6182_v6 = vor.u32 %v6584_v1, %v6181_v18  ;;  %v6133_v18 = vld [vmem:[#allocation5 + $0x100] sm:$0xf]  ;;  %v6572_v1 = vld [vmem:[#allocation5 + $0x10c] sm:$0xf0] }
 0xe92   :  { %3234 = vadd.xlane.f32.xlu2 %v3229_v20 }
 0xedb   :  { %v3217_v38 = vpop.xlane.xlu2 %3216 }
 0xedc   :  { %v3222_v34 = vmul.f32 %v3217_v38, %v7222_v10 }
 0xede   :  { %v8568_v3 = vsub.f32 %v3206_v37, %v3222_v34  ;;  %v6198_v37 = vor.u32 %v6588_v52, %v6197_v11  ;;  %v6582_v34 = vld [vmem:[#allocation5 + $0x164] sm:$0xf] }
 0xee0   :  { %v3230_v43 = vmul.f32 %v8568_v3, %v8568_v3  ;;  %3515 = vmatpush.bf16.msrb.mxu1 %v6198_v37 }
 0xee2   :  { %3236 = vadd.xlane.f32.xlu1 %v3230_v43  ;;  %v6183_v43 = vld [vmem:[#allocation5 + $0x170] sm:$0xf0] }
 0xee3   :  { %v3219_v54 = vpop.xlane.xlu2 %3218  ;;  %v6186_v61 = vor.u32 %v6582_v34, %v6183_v43  ;;  %v6141_v34 = vld [vmem:[#allocation5 + $0x108] sm:$0xf]  ;;  %v6573_v43 = vld [vmem:[#allocation5 + $0x114] sm:$0xf0] }
 0xee4   :  { %v3223_v24 = vmul.f32 %v3219_v54, %v7222_v10  ;;  %v6189_v54 = vld [vmem:[#allocation5 + $0x168] sm:$0xf]  ;;  %3516 = vmatpush.bf16.msrb.mxu1 %v6182_v6 }
 0xee5   :  { %3535 = vmatpush.bf16.msra.mxu2 %v6186_v61 }
 0xee6   :  { %v8573_v60 = vsub.f32 %v3207_v17, %v3223_v24  ;;  %v6587_v17 = vld [vmem:[#allocation5 + $0x18c] sm:$0xf] }
 0xee7   :  { %v6210_v38 = vor.u32 %v6587_v17, %v6207_v39  ;;  %v6714_v39 = vld [vmem:[%s9545_s8 + $0x1] ss:$0 sm:$0xff] }
 0xee8   :  { %v3231_v56 = vmul.f32 %v8573_v60, %v8573_v60  ;;  %3517 = vmatpush.bf16.msrb.mxu1 %v6166_v46 }
 0xee9   :  { %3572 = vmatpush.bf16.msra.mxu0 %v6210_v38  ;;  %v6135_v38 = vld [vmem:[#allocation5 + $0x110] sm:$0xf0] }
 0xeea   :  { %3238 = vadd.xlane.f32.xlu2 %v3231_v56  ;;  %v6585_v56 = vld [vmem:[#allocation5 + $0x174] sm:$0xf0] }
 0xeeb   :  { %v6190_v27 = vor.u32 %v6585_v56, %v6189_v54  ;;  %v6142_v56 = vor.u32 %v6573_v43, %v6141_v34 }
 0xeec   :  { %3518 = vmatpush.bf16.msrb.mxu1 %v6150_v50 }
 0xeed   :  { %3554 = vmatpush.bf16.msra.mxu3 %v6190_v27  ;;  %3573 = vmatpush.bf16.msra.mxu0 %v6194_v31 }
 0xef1   :  { %3555 = vmatpush.bf16.msra.mxu3 %v6174_v33 }
 0xef5   :  { %3556 = vmatpush.bf16.msra.mxu3 %v6158_v9 }
 0xef9   :  { %3557 = vmatpush.bf16.msra.mxu3 %v6142_v56 }
 0xefd   :  { %v3233_v23 = vpop.xlane.xlu2 %3232 }
 0xefe   :  { %v3240_v35 = vmul.f32 %v3233_v23, %v7222_v10  ;;  %v6579_v23 = vld [vmem:[#allocation5 + $0x14c] sm:$0xf] }
 0xeff   :  { %v6178_v58 = vor.u32 %v6579_v23, %v6175_v63 }
 0xf00   :  { %v8578_v49 = vadd.f32 1e-12, %v3240_v35  ;;  %v6170_v35 = vor.u32 %v6578_v51, %v6167_v62 }
 0xf01   :  { %3574 = vmatpush.bf16.msra.mxu0 %v6178_v58 }
 0xf02   :  { %6843 = vrsqrt.f32 %v8578_v49  ;;  %3536 = vmatpush.bf16.msra.mxu2 %v6170_v35  ;;  %vm3254_vm14 = vweird.f32 %v8578_v49 }
 0xf05   :  { %v3235_v20 = vpop.xlane.xlu2 %3234  ;;  %3575 = vmatpush.bf16.msra.mxu0 %v6162_v2 }
 0xf06   :  { %v3241_v24 = vmul.f32 %v3235_v20, %v7222_v10  ;;  %3537 = vmatpush.bf16.msra.mxu2 %v6154_v55  ;;  %v6134_v20 = vor.u32 %v6572_v1, %v6133_v18 }
 0xf08   :  { %v6844_v59 = vpop.eup %6843  ;;  %v3245_v26 = vadd.f32 1e-12, %v3241_v24  ;;  %3519 = vmatpush.bf16.msrb.mxu1 %v6134_v20 }
 0xf09   :  { %v3249_v36 = vmul.f32 %v6844_v59, %v8578_v49  ;;  %vm3255_vm13 = vweird.f32 %v6844_v59 }
 0xf0a   :  { %6845 = vrsqrt.f32 %v3245_v26  ;;  %vm3256_vm3 = vmor %vm3254_vm14, %vm3255_vm13  ;;  %vm3264_vm5 = vweird.f32 %v3245_v26 }
 0xf0b   :  { %v3250_v13 = vmul.f32 %v6844_v59, %v3249_v36 }
 0xf0d   :  { %v3251_v48 = vmul.f32 0.5, %v3250_v13 }
 0xf0f   :  { %v3252_v41 = vsub.f32 1.5, %v3251_v48 }
 0xf10   :  { %v6846_v32 = vpop.eup %6845 }
 0xf11   :  { %v3253_v0 = vmul.f32 %v6844_v59, %v3252_v41  ;;  %v3259_v11 = vmul.f32 %v6846_v32, %v3245_v26  ;;  %vm3265_vm4 = vweird.f32 %v6846_v32 }
 0xf12   :  { %vm3266_vm6 = vmor %vm3264_vm5, %vm3265_vm4 }
 0xf13   :  { %v3260_v52 = vmul.f32 %v6846_v32, %v3259_v11  ;;  %v3257_v44 = vsel %vm3256_vm3, %v6844_v59, %v3253_v0 }
 0xf14   :  { %v3288_v14 = vmul.f32 %v3257_v44, %v8558_v19  ;;  %v6570_v19 = vld [vmem:[#allocation5 + $0x104] sm:$0xf] }
 0xf15   :  { %v3261_v12 = vmul.f32 0.5, %v3260_v52  ;;  %v6138_v24 = vor.u32 %v6570_v19, %v6135_v38 }
 0xf16   :  { %v3295_v47 = vmul.f32 %v8588_v22, %v3288_v14 }
 0xf17   :  { %v3262_v37 = vsub.f32 1.5, %v3261_v12  ;;  %3538 = vmatpush.bf16.msra.mxu2 %v6138_v24 }
 0xf18   :  { %v8596_v6 = vadd.f32 %v6714_v39, %v3295_v47 }
 0xf19   :  { %v3263_v17 = vmul.f32 %v6846_v32, %v3262_v37 }
 0xf1b   :  { %v3267_v49 = vsel %vm3266_vm6, %v6846_v32, %v3263_v17 }
 0xf1c   :  { %v3289_v40 = vmul.f32 %v3267_v49, %v8563_v45  ;;  %v6146_v45 = vor.u32 %v6571_v29, %v6143_v57 }
 0xf1e   :  { %v3296_v54 = vmul.f32 %v8588_v22, %v3289_v40  ;;  %3576 = vmatpush.bf16.msra.mxu0 %v6146_v45 }
 0xf20   :  { %v8598_v21 = vadd.f32 %v6714_v39, %v3296_v54 }
 0xf22   :  { %v3339_v59 = vpack.c.bf16 %v8598_v21, %v8596_v6 }
 0xf24   :  { %3520 = vmatmul.bf16.vlgmr.msrb.gmra.mxu1 %v3339_v59  ;;  %3539 = vmatmul.bf16.vlgmr.msra.gmra.mxu2 %v3339_v59 }
 0xf25   :  { %3558 = vmatmul.bf16.vlgmr.msra.gmra.mxu3 %v3339_v59  ;;  %3577 = vmatmul.bf16.vlgmr.msra.gmra.mxu0 %v3339_v59 }
 0xf55   :  { %v3237_v26 = vpop.xlane.xlu1 %3236 }
 0xf56   :  { %v3242_v61 = vmul.f32 %v3237_v26, %v7222_v10 }
 0xf58   :  { %v3246_v27 = vadd.f32 1e-12, %v3242_v61 }
 0xf5a   :  { %6847 = vrsqrt.f32 %v3246_v27  ;;  %vm3274_vm8 = vweird.f32 %v3246_v27 }
 0xf5d   :  { %v3239_v5 = vpop.xlane.xlu2 %3238 }
 0xf5e   :  { %v3243_v51 = vmul.f32 %v3239_v5, %v7222_v10 }
 0xf60   :  { %v6848_v36 = vpop.eup %6847  ;;  %v3247_v31 = vadd.f32 1e-12, %v3243_v51 }
 0xf61   :  { %v3269_v62 = vmul.f32 %v6848_v36, %v3246_v27  ;;  %vm3275_vm7 = vweird.f32 %v6848_v36 }
 0xf62   :  { %6849 = vrsqrt.f32 %v3247_v31  ;;  %vm3276_vm9 = vmor %vm3274_vm8, %vm3275_vm7  ;;  %vm3284_vm11 = vweird.f32 %v3247_v31 }
 0xf63   :  { %v3270_v42 = vmul.f32 %v6848_v36, %v3269_v62 }
 0xf65   :  { %v3271_v4 = vmul.f32 0.5, %v3270_v42 }
 0xf67   :  { %v3272_v23 = vsub.f32 1.5, %v3271_v4 }
 0xf68   :  { %v6850_v63 = vpop.eup %6849 }
 0xf69   :  { %v3273_v13 = vmul.f32 %v6848_v36, %v3272_v23  ;;  %v3279_v46 = vmul.f32 %v6850_v63, %v3247_v31  ;;  %vm3285_vm10 = vweird.f32 %v6850_v63 }
 0xf6a   :  { %vm3286_vm12 = vmor %vm3284_vm11, %vm3285_vm10 }
 0xf6b   :  { %v3280_v15 = vmul.f32 %v6850_v63, %v3279_v46  ;;  %v3277_v35 = vsel %vm3276_vm9, %v6848_v36, %v3273_v13 }
 0xf6c   :  { %v3290_v8 = vmul.f32 %v3277_v35, %v8568_v3  ;;  %v6130_v3 = vld [vmem:[%s9547_s10 + $0x4] sm:$0xf] }
 0xf6d   :  { %v3281_v33 = vmul.f32 0.5, %v3280_v15  ;;  %v8619_v50 = vperm.slane %v6130_v3, 3  ;;  %v8633_v52 = vperm.slane %v6130_v3, 1  ;;  %v8635_v44 = vperm.slane %v6130_v3, 2 }
 0xf6e   :  { %v3297_v28 = vmul.f32 %v8588_v22, %v3290_v8 }
 0xf6f   :  { %v3282_v7 = vsub.f32 1.5, %v3281_v33 }
 0xf70   :  { %v8608_v16 = vadd.f32 %v6714_v39, %v3297_v28 }
 0xf71   :  { %v3283_v53 = vmul.f32 %v6850_v63, %v3282_v7 }
 0xf73   :  { %v3287_v48 = vsel %vm3286_vm12, %v6850_v63, %v3283_v53 }
 0xf74   :  { %v3291_v58 = vmul.f32 %v3287_v48, %v8573_v60  ;;  %v8617_v60 = vperm.slane %v6130_v3, 0 }
 0xf76   :  { %v3298_v30 = vmul.f32 %v8588_v22, %v3291_v58 }
 0xf78   :  { %v8610_v25 = vadd.f32 %v6714_v39, %v3298_v30 }
 0xf7a   :  { %v3340_v41 = vpack.c.bf16 %v8610_v25, %v8608_v16 }
 0xf7c   :  { %3525 = vmatmul.bf16.gmra.mxu1 %v3340_v41  ;;  %3544 = vmatmul.bf16.gmra.mxu2 %v3340_v41 }
 0xf7d   :  { %3563 = vmatmul.bf16.gmra.mxu3 %v3340_v41  ;;  %3582 = vmatmul.bf16.gmra.mxu0 %v3340_v41 }
 0xfa1   :  { %v3521_v32 = vpop.f32.mrf.mxu1 }
 0xfa2   :  { %v8622_v55 = vadd.f32 %v3521_v32, %v8617_v60  ;;  %v3578_v9 = vpop.f32.mrf.mxu0 }
 0xfa3   :  { %v8625_v0 = vadd.f32 %v3578_v9, %v8619_v50 }
 0xfa4   :  { %v8628_v11 = vmul.f32 0.70710677, %v8622_v55 }
 0xfa5   :  { %v8631_v2 = vmul.f32 0.70710677, %v8625_v0 }
 0xfa6   :  { %v3620_v12 = vmul.f32 %v8628_v11, %v8628_v11 }
 0xfa7   :  { %v3740_v37 = vmul.f32 %v8631_v2, %v8631_v2  ;;  %v3540_v14 = vpop.f32.mrf.mxu2 }
 0xfa8   :  { %v8641_v22 = vmin.f32 %v3620_v12, 16.0  ;;  %v8644_v17 = vadd.f32 %v3540_v14, %v8633_v52  ;;  %v3559_v49 = vpop.f32.mrf.mxu3 }
 0xfa9   :  { %v8646_v40 = vmin.f32 %v3740_v37, 16.0  ;;  %v8649_v47 = vadd.f32 %v3559_v49, %v8635_v44  ;;  %v3523_v26 = vpop.f32.mrf.mxu1 }
 0xfaa   :  { %v3633_v39 = vmul.f32 3.8918573e-05, %v8641_v22  ;;  %v8654_v1 = vmul.f32 0.70710677, %v8644_v17  ;;  %v3622_v19 = vmul.f32 2.1237322e-06, %v8641_v22  ;;  %v8675_v62 = vadd.f32 %v3523_v26, %v8617_v60 }
 0xfab   :  { %v3753_v18 = vmul.f32 3.8918573e-05, %v8646_v40  ;;  %v8660_v43 = vmul.f32 0.70710677, %v8649_v47  ;;  %v3742_v24 = vmul.f32 2.1237322e-06, %v8646_v40 }
 0xfac   :  { %v3634_v20 = vadd.f32 0.001143296, %v3633_v39  ;;  %v3660_v34 = vmul.f32 %v8654_v1, %v8654_v1  ;;  %v3623_v45 = vadd.f32 0.00028619796, %v3622_v19  ;;  %v8684_v7 = vmul.f32 0.70710677, %v8675_v62 }
 0xfad   :  { %v3754_v38 = vadd.f32 0.001143296, %v3753_v18  ;;  %v3700_v57 = vmul.f32 %v8660_v43, %v8660_v43  ;;  %v3743_v36 = vadd.f32 0.00028619796, %v3742_v24  ;;  %v3580_v18 = vpop.f32.mrf.mxu0 }
 0xfae   :  { %v3635_v54 = vmul.f32 %v3634_v20, %v8641_v22  ;;  %v8665_v29 = vmin.f32 %v3660_v34, 16.0  ;;  %v3624_v42 = vmul.f32 %v3623_v45, %v8641_v22  ;;  %v3780_v37 = vmul.f32 %v8684_v7, %v8684_v7 }
 0xfaf   :  { %v3755_v56 = vmul.f32 %v3754_v38, %v8646_v40  ;;  %v8671_v51 = vmin.f32 %v3700_v57, 16.0  ;;  %v3744_v35 = vmul.f32 %v3743_v36, %v8646_v40 }
 0xfb0   :  { %v3636_v59 = vadd.f32 0.014752088, %v3635_v54  ;;  %v3673_v5 = vmul.f32 3.8918573e-05, %v8665_v29  ;;  %v3625_v8 = vadd.f32 0.0036580483, %v3624_v42 }
 0xfb1   :  { %v3756_v61 = vadd.f32 0.014752088, %v3755_v56  ;;  %v3713_v15 = vmul.f32 3.8918573e-05, %v8671_v51  ;;  %v3745_v3 = vadd.f32 0.0036580483, %v3744_v35  ;;  %v3581_v56 = vadd.f32 %v3580_v18, %v8619_v50 }
 0xfb2   :  { %v3637_v27 = vmul.f32 %v3636_v59, %v8641_v22  ;;  %v3674_v23 = vadd.f32 0.001143296, %v3673_v5  ;;  %v3662_v32 = vmul.f32 2.1237322e-06, %v8665_v29  ;;  %v3626_v9 = vmul.f32 %v3625_v8, %v8641_v22 }
 0xfb3   :  { %v3757_v31 = vmul.f32 %v3756_v61, %v8646_v40  ;;  %v3714_v41 = vadd.f32 0.001143296, %v3713_v15  ;;  %v3746_v19 = vmul.f32 %v3745_v3, %v8646_v40  ;;  %v3702_v38 = vmul.f32 2.1237322e-06, %v8671_v51 }
 0xfb4   :  { %v3638_v4 = vadd.f32 0.112945676, %v3637_v27  ;;  %v3675_v46 = vmul.f32 %v3674_v23, %v8665_v29  ;;  %v3663_v20 = vadd.f32 0.00028619796, %v3662_v32  ;;  %v3627_v34 = vadd.f32 0.05243302, %v3626_v9 }
 0xfb5   :  { %v3758_v63 = vadd.f32 0.112945676, %v3757_v31  ;;  %v3715_v39 = vmul.f32 %v3714_v41, %v8671_v51  ;;  %v8700_v24 = vmin.f32 %v3780_v37, 16.0  ;;  %v3747_v59 = vadd.f32 0.05243302, %v3746_v19 }
 0xfb6   :  { %v3639_v13 = vmul.f32 %v3638_v4, %v8641_v22  ;;  %v3676_v48 = vadd.f32 0.014752088, %v3675_v46  ;;  %v3664_v26 = vmul.f32 %v3663_v20, %v8665_v29  ;;  %v3703_v61 = vadd.f32 0.00028619796, %v3702_v38  ;;  %v3542_v20 = vpop.f32.mrf.mxu2 }
 0xfb7   :  { %v3759_v33 = vmul.f32 %v3758_v63, %v8646_v40  ;;  %v3716_v45 = vadd.f32 0.014752088, %v3715_v39  ;;  %v3628_v27 = vmul.f32 %v3627_v34, %v8641_v22  ;;  %v3793_v5 = vmul.f32 3.8918573e-05, %v8700_v24 }
 0xfb8   :  { %v3640_v53 = vadd.f32 0.4994258, %v3639_v13  ;;  %v3677_v30 = vmul.f32 %v3676_v48, %v8665_v29  ;;  %v8709_v36 = vmul.f32 0.70710677, %v3581_v56  ;;  %v3748_v23 = vmul.f32 %v3747_v59, %v8646_v40 }
 0xfb9   :  { %v3760_v58 = vadd.f32 0.4994258, %v3759_v33  ;;  %v3717_v42 = vmul.f32 %v3716_v45, %v8671_v51  ;;  %v3665_v63 = vadd.f32 0.0036580483, %v3664_v26  ;;  %v3704_v13 = vmul.f32 %v3703_v61, %v8671_v51 }
 0xfba   :  { %v3641_v28 = vmul.f32 %v3640_v53, %v8641_v22  ;;  %v3678_v49 = vadd.f32 0.112945676, %v3677_v30  ;;  %v3629_v46 = vadd.f32 0.18741608, %v3628_v27  ;;  %v3794_v15 = vadd.f32 0.001143296, %v3793_v5 }
 0xfbb   :  { %v3761_v12 = vmul.f32 %v3760_v58, %v8646_v40  ;;  %v3900_v35 = vmul.f32 %v8709_v36, %v8709_v36  ;;  %v3718_v48 = vadd.f32 0.112945676, %v3717_v42  ;;  %v3749_v58 = vadd.f32 0.18741608, %v3748_v23 }
 0xfbc   :  { %v8693_v14 = vadd.f32 1.0, %v3641_v28  ;;  %v3679_v57 = vmul.f32 %v3678_v49, %v8665_v29  ;;  %v3666_v28 = vmul.f32 %v3665_v63, %v8665_v29  ;;  %v3705_v30 = vadd.f32 0.0036580483, %v3704_v13 }
 0xfbd   :  { %v8698_v54 = vadd.f32 1.0, %v3761_v12  ;;  %v3795_v41 = vmul.f32 %v3794_v15, %v8700_v24  ;;  %v3630_v3 = vmul.f32 %v3629_v46, %v8641_v22  ;;  %v8727_v32 = vmul.f32 0.5, %v8622_v55 }
 0xfbe   :  { %6851 = vrcp.f32 %v8693_v14  ;;  %v3680_v31 = vadd.f32 0.4994258, %v3679_v57  ;;  %v8731_v37 = vmin.f32 %v3900_v35, 16.0  ;;  %v8734_v39 = vmul.f32 0.5, %v8625_v0 }
 0xfbf   :  { %6853 = vrcp.f32 %v8698_v54  ;;  %v3796_v12 = vadd.f32 0.014752088, %v3795_v41  ;;  %v3719_v19 = vmul.f32 %v3718_v48, %v8671_v51  ;;  %v3750_v22 = vmul.f32 %v3749_v58, %v8646_v40 }
 0xfc0   :  { %v3681_v53 = vmul.f32 %v3680_v31, %v8665_v29  ;;  %v3667_v38 = vadd.f32 0.05243302, %v3666_v28  ;;  %v3706_v55 = vmul.f32 %v3705_v30, %v8671_v51  ;;  %v3631_v57 = vadd.f32 1.1283791, %v3630_v3 }
 0xfc1   :  { %v3797_v34 = vmul.f32 %v3796_v12, %v8700_v24  ;;  %v8743_v45 = vmul.f32 0.5, %v8644_v17  ;;  %v8746_v59 = vmul.f32 0.5, %v8649_v47  ;;  %v3782_v0 = vmul.f32 2.1237322e-06, %v8700_v24 }
 0xfc2   :  { %v8736_v18 = vadd.f32 1.0, %v3681_v53  ;;  %v8750_v61 = vmul.f32 0.5, %v8675_v62  ;;  %v3913_v40 = vmul.f32 3.8918573e-05, %v8731_v37  ;;  %v8754_v27 = vadd.f32 %v3542_v20, %v8633_v52  ;;  %v6633_v20 = vld [vmem:[#allocation7 + $0x1f8] sm:$0xff] }
 0xfc3   :  { %v3720_v17 = vadd.f32 0.4994258, %v3719_v19  ;;  %v3798_v31 = vadd.f32 0.112945676, %v3797_v34  ;;  %v3751_v42 = vadd.f32 1.1283791, %v3750_v22  ;;  %v3668_v47 = vmul.f32 %v3667_v38, %v8665_v29  ;;  %4619 = vmatpush.bf16.msrb.mxu0 %v6633_v20 }
 0xfc4   :  { %v8712_v4 = vpop.eup %6851  ;;  %6855 = vrcp.f32 %v8736_v18  ;;  %v3707_v23 = vadd.f32 0.05243302, %v3706_v55  ;;  %v8759_v63 = vmul.f32 0.5, %v3581_v56  ;;  %v8762_v62 = vmul.f32 %v3631_v57, %v8628_v11  ;;  %v6609_v19 = vld [vmem:[#allocation7 + $0x138] sm:$0xff] }
 0xfc5   :  { %v8718_v33 = vpop.eup %6853  ;;  %v3644_v8 = vmul.f32 %v8712_v4, %v8693_v14  ;;  %vm3648_vm15 = vweird.f32 %v8693_v14  ;;  %v3652_v13 = vand.u32 2147483647, %v8693_v14  ;;  %v3783_v46 = vadd.f32 0.00028619796, %v3782_v0  ;;  %4562 = vmatpush.bf16.msra.mxu1 %v6609_v19 }
 0xfc6   :  { %v3764_v9 = vmul.f32 %v8718_v33, %v8698_v54  ;;  %v3654_v15 = vand.u32 2147483648, %v8693_v14  ;;  %v8769_v53 = vmul.f32 0.70710677, %v8754_v27  ;;  %vm3649_vm0 = vweird.f32 %v8712_v4 }
 0xfc7   :  { %v3645_v49 = vsub.f32 1.0, %v3644_v8  ;;  %v3914_v8 = vadd.f32 0.001143296, %v3913_v40  ;;  %v3721_v11 = vmul.f32 %v3720_v17, %v8671_v51  ;;  %v3799_v56 = vmul.f32 %v3798_v31, %v8700_v24  ;;  %vm8789_vm2 = vmor %vm3648_vm15, %vm3649_vm0  ;;  %v3561_v31 = vpop.f32.mrf.mxu3 }
 0xfc8   :  { %v3765_v26 = vsub.f32 1.0, %v3764_v9  ;;  %v8776_v58 = vmul.f32 %v3751_v42, %v8631_v2  ;;  %vm3768_vm1 = vweird.f32 %v8698_v54  ;;  %v3708_v28 = vmul.f32 %v3707_v23, %v8671_v51 }
 0xfc9   :  { %v3646_v5 = vmul.f32 %v8712_v4, %v3645_v49  ;;  %v3915_v30 = vmul.f32 %v3914_v8, %v8731_v37  ;;  %v3772_v3 = vand.u32 2147483647, %v8698_v54  ;;  %v3669_v9 = vadd.f32 0.18741608, %v3668_v47 }
 0xfca   :  { %v3766_v35 = vmul.f32 %v8718_v33, %v3765_v26  ;;  %v8781_v41 = vpop.eup %6855  ;;  %v3784_v12 = vmul.f32 %v3783_v46, %v8700_v24  ;;  %v3820_v49 = vmul.f32 %v8769_v53, %v8769_v53  ;;  %vm3769_vm13 = vweird.f32 %v8718_v33  ;;  %v6608_v46 = vld [vmem:[#allocation7 + $0x130] sm:$0xff] }
 0xfcb   :  { %v3647_v48 = vadd.f32 %v8712_v4, %v3646_v5  ;;  %v3774_v38 = vand.u32 2147483648, %v8698_v54  ;;  %v3916_v55 = vadd.f32 0.014752088, %v3915_v30  ;;  %v8799_v57 = vadd.f32 1.0, %v3721_v11  ;;  %vm8810_vm3 = vmor %vm3768_vm1, %vm3769_vm13  ;;  %4563 = vmatpush.bf16.msra.mxu1 %v6608_v46 }
 0xfcc   :  { %v3767_v22 = vadd.f32 %v8718_v33, %v3766_v35  ;;  %v3800_v0 = vadd.f32 0.4994258, %v3799_v56  ;;  %v8801_v26 = vmin.f32 %v3820_v49, 16.0  ;;  %v3655_v14 = vor.u32 1.1754944e-38, %v3654_v15  ;;  %v6632_v15 = vld [vmem:[#allocation7 + $0x1f0] sm:$0xff] }
 0xfcd   :  { %v3651_v34 = vsel %vm8789_vm2, %v8712_v4, %v3647_v48  ;;  %v3684_v40 = vmul.f32 %v8781_v41, %v8736_v18  ;;  %v3709_v5 = vadd.f32 0.18741608, %v3708_v28  ;;  %v3917_v17 = vmul.f32 %v3916_v55, %v8731_v37  ;;  %4620 = vmatpush.bf16.msrb.mxu0 %v6632_v15 }
 0xfce   :  { %vm3653_vm14 = vcmp.eq.f32.partialorder %v3652_v13, 8.507059e+37  ;;  %vm8814_vm4 = vcmp.eq.f32.partialorder %v3772_v3, 8.507059e+37  ;;  %v3670_v47 = vmul.f32 %v3669_v9, %v8665_v29  ;;  %v3785_v23 = vadd.f32 0.0036580483, %v3784_v12 }
 0xfcf   :  { %v3656_v35 = vsel %vm3653_vm14, %v3655_v14, %v3651_v34  ;;  %v3771_v13 = vsel %vm8810_vm3, %v8718_v33, %v3767_v22  ;;  %v3902_v54 = vmul.f32 2.1237322e-06, %v8731_v37  ;;  %v3918_v8 = vadd.f32 0.112945676, %v3917_v17 }
 0xfd0   :  { %6857 = vrcp.f32 %v8799_v57  ;;  %v3801_v48 = vmul.f32 %v3800_v0, %v8700_v24  ;;  %v3833_v11 = vmul.f32 3.8918573e-05, %v8801_v26  ;;  %v8827_v56 = vadd.f32 %v3561_v31, %v8635_v44 }
 0xfd1   :  { %v3775_v29 = vor.u32 1.1754944e-38, %v3774_v38  ;;  %v3685_v28 = vsub.f32 1.0, %v3684_v40  ;;  %v3710_v30 = vmul.f32 %v3709_v5, %v8671_v51  ;;  %v3919_v33 = vmul.f32 %v3918_v8, %v8731_v37 }
 0xfd2   :  { %v3671_v9 = vadd.f32 1.1283791, %v3670_v47  ;;  %v3786_v12 = vmul.f32 %v3785_v23, %v8700_v24  ;;  %v8833_v49 = vmul.f32 0.5, %v8754_v27  ;;  %v3834_v19 = vadd.f32 0.001143296, %v3833_v11 }
 0xfd3   :  { %v3657_v20 = vmul.f32 %v3656_v35, %v8762_v62  ;;  %v3776_v2 = vsel %vm8814_vm4, %v3775_v29, %v3771_v13  ;;  %vm3688_vm5 = vweird.f32 %v8736_v18  ;;  %v3903_v22 = vadd.f32 0.00028619796, %v3902_v54 }
 0xfd4   :  { %v3920_v38 = vadd.f32 0.4994258, %v3919_v33  ;;  %v8839_v51 = vadd.f32 1.0, %v3801_v48  ;;  %v3835_v55 = vmul.f32 %v3834_v19, %v8801_v26  ;;  %v8843_v34 = vmul.f32 0.70710677, %v8827_v56 }
 0xfd5   :  { %v3686_v0 = vmul.f32 %v8781_v41, %v3685_v28  ;;  %v3692_v62 = vand.u32 2147483647, %v8736_v18  ;;  %v3694_v14 = vand.u32 2147483648, %v8736_v18  ;;  %v3711_v40 = vadd.f32 1.1283791, %v3710_v30 }
 0xfd6   :  { %v8851_v5 = vpop.eup %6857  ;;  %v3787_v17 = vadd.f32 0.05243302, %v3786_v12  ;;  %v3921_v31 = vmul.f32 %v3920_v38, %v8731_v37  ;;  %v3836_v4 = vadd.f32 0.014752088, %v3835_v55  ;;  %v3860_v42 = vmul.f32 %v8843_v34, %v8843_v34 }
 0xfd7   :  { %v3777_v47 = vmul.f32 %v3776_v2, %v8776_v58  ;;  %vm3689_vm6 = vweird.f32 %v8781_v41  ;;  %v3904_v23 = vmul.f32 %v3903_v22, %v8731_v37  ;;  %v6259_v15 = vclamps-f32 %v3657_v20, 1.0 }
 0xfd8   :  { %6859 = vrcp.f32 %v8839_v51  ;;  %v3837_v35 = vmul.f32 %v3836_v4, %v8801_v26  ;;  %v8864_v13 = vmin.f32 %v3860_v42, 16.0  ;;  %v3687_v54 = vadd.f32 %v8781_v41, %v3686_v0  ;;  %vm8885_vm8 = vmor %vm3688_vm5, %vm3689_vm6 }
 0xfd9   :  { %v3724_v8 = vmul.f32 %v8851_v5, %v8799_v57  ;;  %v8869_v58 = vadd.f32 1.0, %v3921_v31  ;;  %vm8873_vm7 = vcmp.eq.f32.partialorder %v3692_v62, 8.507059e+37  ;;  %v3695_v29 = vor.u32 1.1754944e-38, %v3694_v14 }
 0xfda   :  { %v3732_v28 = vand.u32 2147483647, %v8799_v57  ;;  %v3822_v30 = vmul.f32 2.1237322e-06, %v8801_v26  ;;  %v3734_v33 = vand.u32 2147483648, %v8799_v57  ;;  %v4260_v20 = vadd.f32 1.0, %v6259_v15 }
 0xfdb   :  { %v3905_v12 = vadd.f32 0.0036580483, %v3904_v23  ;;  %v3838_v19 = vadd.f32 0.112945676, %v3837_v35  ;;  %v6262_v2 = vclamps-f32 %v3777_v47, 1.0  ;;  %v3691_v0 = vsel %vm8885_vm8, %v8781_v41, %v3687_v54  ;;  %v6617_v35 = vld [vmem:[#allocation7 + $0x178] sm:$0xff] }
 0xfdc   :  { %v3873_v38 = vmul.f32 3.8918573e-05, %v8864_v13  ;;  %v3725_v62 = vsub.f32 1.0, %v3724_v8  ;;  %6861 = vrcp.f32 %v8869_v58  ;;  %v3823_v18 = vadd.f32 0.00028619796, %v3822_v30  ;;  %4581 = vmatpush.bf16.msrb.mxu2 %v6617_v35 }
 0xfdd   :  { %v3839_v14 = vmul.f32 %v3838_v19, %v8801_v26  ;;  %v3672_v42 = vmul.f32 %v3671_v9, %v8654_v1  ;;  %v3906_v23 = vmul.f32 %v3905_v12, %v8731_v37  ;;  %v4263_v41 = vadd.f32 1.0, %v6262_v2 }
 0xfde   :  { %v3874_v31 = vadd.f32 0.001143296, %v3873_v38  ;;  %v3696_v54 = vsel %vm8873_vm7, %v3695_v29, %v3691_v0  ;;  %v8906_v30 = vmul.f32 %v3711_v40, %v8660_v43  ;;  %vm3728_vm9 = vweird.f32 %v8799_v57 }
 0xfdf   :  { %v3840_v15 = vadd.f32 0.4994258, %v3839_v14  ;;  %v3735_v22 = vor.u32 1.1754944e-38, %v3734_v33  ;;  %v3726_v9 = vmul.f32 %v8851_v5, %v3725_v62  ;;  %v3697_v43 = vmul.f32 %v3696_v54, %v3672_v42 }
 0xfe0   :  { %v3875_v8 = vmul.f32 %v3874_v31, %v8864_v13  ;;  %v3907_v38 = vadd.f32 0.05243302, %v3906_v23  ;;  %v8919_v0 = vmul.f32 %v4260_v20, %v8727_v32  ;;  %v8922_v14 = vmul.f32 %v4263_v41, %v8734_v39 }
 0xfe1   :  { %v3841_v11 = vmul.f32 %v3840_v15, %v8801_v26  ;;  %vm8924_vm10 = vcmp.eq.f32.partialorder %v3732_v28, 8.507059e+37  ;;  %vm3729_vm11 = vweird.f32 %v8851_v5  ;;  %v3727_v32 = vadd.f32 %v8851_v5, %v3726_v9 }
 0xfe2   :  { %v3876_v29 = vadd.f32 0.014752088, %v3875_v8  ;;  %v3908_v15 = vmul.f32 %v3907_v38, %v8731_v37  ;;  %vm8949_vm12 = vmor %vm3728_vm9, %vm3729_vm11  ;;  %vm3808_vm15 = vweird.f32 %v8839_v51  ;;  %vm3928_vm14 = vweird.f32 %v8869_v58 }
 0xfe3   :  { %v8937_v20 = vadd.f32 1.0, %v3841_v11 }
 0xfe4   :  { %v3877_v31 = vmul.f32 %v3876_v29, %v8864_v13 }
 0xfe5   :  { %6863 = vrcp.f32 %v8937_v20  ;;  %vm3848_vm6 = vweird.f32 %v8937_v20 }
 0xfe6   :  { %v3878_v35 = vadd.f32 0.112945676, %v3877_v31  ;;  %v3909_v31 = vadd.f32 0.18741608, %v3908_v15 }
 0xfe8   :  { %v3879_v11 = vmul.f32 %v3878_v35, %v8864_v13 }
 0xff9   :  { %v3526_v3 = vpop.f32.mrf.mxu1 }
 0xffa   :  { %v8846_v27 = vadd.f32 %v3526_v3, %v8617_v60  ;;  %v3788_v3 = vmul.f32 %v3787_v17, %v8700_v24  ;;  %v8897_v17 = vpop.eup %6859  ;;  %v3583_v12 = vpop.f32.mrf.mxu0 }
 0xffb   :  { %v3804_v1 = vmul.f32 %v8897_v17, %v8839_v51  ;;  %v8914_v2 = vpop.eup %6861  ;;  %v8932_v42 = vadd.f32 %v3583_v12, %v8619_v50  ;;  %v3731_v12 = vsel %vm8949_vm12, %v8851_v5, %v3727_v32  ;;  %vm3809_vm0 = vweird.f32 %v8897_v17 }
 0xffc   :  { %v8860_v46 = vmul.f32 0.70710677, %v8846_v27  ;;  %v3789_v47 = vadd.f32 0.18741608, %v3788_v3  ;;  %v3824_v3 = vmul.f32 %v3823_v18, %v8801_v26  ;;  %v3862_v18 = vmul.f32 2.1237322e-06, %v8864_v13  ;;  %v8987_v62 = vpop.eup %6863  ;;  %vm8991_vm2 = vmor %vm3808_vm15, %vm3809_vm0 }
 0xffd   :  { %v3924_v39 = vmul.f32 %v8914_v2, %v8869_v58  ;;  %v8957_v29 = vmul.f32 0.70710677, %v8932_v42  ;;  %v3736_v32 = vsel %vm8924_vm10, %v3735_v22, %v3731_v12  ;;  %vm3929_vm13 = vweird.f32 %v8914_v2 }
 0xffe   :  { %v3940_v48 = vmul.f32 %v8860_v46, %v8860_v46  ;;  %v3790_v40 = vmul.f32 %v3789_v47, %v8700_v24  ;;  %v3805_v24 = vsub.f32 1.0, %v3804_v1  ;;  %v3825_v28 = vadd.f32 0.0036580483, %v3824_v3  ;;  %vm9025_vm3 = vmor %vm3928_vm14, %vm3929_vm13 }
 0xfff   :  { %v6260_v47 = vclamps-f32 %v3697_v43, 1.0  ;;  %v3863_v41 = vadd.f32 0.00028619796, %v3862_v18  ;;  %v3814_v3 = vand.u32 2147483648, %v8839_v51  ;;  %v3925_v43 = vsub.f32 1.0, %v3924_v39 }
0x1000   :  { %v8890_v55 = vmin.f32 %v3940_v48, 16.0  ;;  %v6625_v48 = vld [vmem:[#allocation7 + $0x1b8] sm:$0xff]  ;;  %v8939_v23 = vadd.f32 1.1283791, %v3790_v40  ;;  %v3806_v9 = vmul.f32 %v8897_v17, %v3805_v24  ;;  %v3826_v57 = vmul.f32 %v3825_v28, %v8801_v26 }
0x1001   :  { %4600 = vmatpush.bf16.msrb.mxu3 %v6625_v48  ;;  %v3812_v48 = vand.u32 2147483647, %v8839_v51  ;;  %v3880_v40 = vadd.f32 0.4994258, %v3879_v11  ;;  %v3864_v24 = vmul.f32 %v3863_v41, %v8864_v13  ;;  %v4261_v5 = vadd.f32 1.0, %v6260_v47 }
0x1002   :  { %v3953_v4 = vmul.f32 3.8918573e-05, %v8890_v55  ;;  %v3942_v54 = vmul.f32 2.1237322e-06, %v8890_v55  ;;  %v3807_v39 = vadd.f32 %v8897_v17, %v3806_v9  ;;  %v3926_v28 = vmul.f32 %v8914_v2, %v3925_v43 }
0x1003   :  { %v3827_v35 = vadd.f32 0.05243302, %v3826_v57  ;;  %vm8979_vm1 = vcmp.eq.f32.partialorder %v3812_v48, 8.507059e+37  ;;  %v3815_v41 = vor.u32 1.1754944e-38, %v3814_v3  ;;  %v3910_v1 = vmul.f32 %v3909_v31, %v8731_v37 }
0x1004   :  { %v3954_v19 = vadd.f32 0.001143296, %v3953_v4  ;;  %v3865_v48 = vadd.f32 0.0036580483, %v3864_v24  ;;  %v3737_v11 = vmul.f32 %v3736_v32, %v8906_v30  ;;  %v3811_v12 = vsel %vm8991_vm2, %v8897_v17, %v3807_v39 }
0x1005   :  { %v3934_v43 = vand.u32 2147483648, %v8869_v58  ;;  %v3927_v57 = vadd.f32 %v8914_v2, %v3926_v28  ;;  %v3828_v37 = vmul.f32 %v3827_v35, %v8801_v26  ;;  %v3844_v30 = vmul.f32 %v8987_v62, %v8937_v20 }
0x1006   :  { %v3955_v33 = vmul.f32 %v3954_v19, %v8890_v55  ;;  %v3545_v19 = vpop.f32.mrf.mxu2  ;;  %v3932_v31 = vand.u32 2147483647, %v8869_v58  ;;  %v3866_v24 = vmul.f32 %v3865_v48, %v8864_v13  ;;  %v9017_v39 = vmul.f32 %v4261_v5, %v8743_v45 }
0x1007   :  { %v8967_v18 = vadd.f32 %v3545_v19, %v8633_v52  ;;  %v3792_v28 = vmul.f32 %v8939_v23, %v8684_v7  ;;  %v3816_v35 = vsel %vm8979_vm1, %v3815_v41, %v3811_v12  ;;  %v6261_v48 = vclamps-f32 %v3737_v11, 1.0  ;;  %v6606_v7 = vld [vmem:[#allocation7 + $0x120] sm:$0xff] }
0x1008   :  { %v3956_v4 = vadd.f32 0.014752088, %v3955_v33  ;;  %v4060_v33 = vmul.f32 %v8957_v29, %v8957_v29  ;;  %v3931_v45 = vsel %vm9025_vm3, %v8914_v2, %v3927_v57  ;;  %v3935_v5 = vor.u32 1.1754944e-38, %v3934_v43  ;;  %v6630_v23 = vld [vmem:[#allocation7 + $0x1e0] sm:$0xff] }
0x1009   :  { %v8985_v22 = vmul.f32 0.70710677, %v8967_v18  ;;  %v3845_v15 = vsub.f32 1.0, %v3844_v30  ;;  %v3817_v11 = vmul.f32 %v3816_v35, %v3792_v28  ;;  %vm3933_vm4 = vcmp.eq.f32.partialorder %v3932_v31, 8.507059e+37 }
0x100a   :  { %v3957_v8 = vmul.f32 %v3956_v4, %v8890_v55  ;;  %v3943_v4 = vadd.f32 0.00028619796, %v3942_v54  ;;  %v8977_v19 = vmin.f32 %v4060_v33, 16.0  ;;  %v6624_v54 = vld [vmem:[#allocation7 + $0x1b0] sm:$0xff]  ;;  %v3936_v43 = vsel %vm3933_vm4, %v3935_v5, %v3931_v45 }
0x100b   :  { %v3980_v33 = vmul.f32 %v8985_v22, %v8985_v22  ;;  %4601 = vmatpush.bf16.msrb.mxu3 %v6624_v54  ;;  %v4262_v58 = vadd.f32 1.0, %v6261_v48  ;;  %vm3849_vm5 = vweird.f32 %v8987_v62 }
0x100c   :  { %v3958_v38 = vadd.f32 0.112945676, %v3957_v8  ;;  %v3881_v8 = vmul.f32 %v3880_v40, %v8864_v13  ;;  %v3944_v3 = vmul.f32 %v3943_v4, %v8890_v55  ;;  %v4073_v51 = vmul.f32 3.8918573e-05, %v8977_v19  ;;  %v6607_v40 = vld [vmem:[#allocation7 + $0x128] sm:$0xff]  ;;  %vm9078_vm7 = vmor %vm3848_vm6, %vm3849_vm5 }
0x100d   :  { %4564 = vmatpush.bf16.msra.mxu1 %v6607_v40  ;;  %v9034_v12 = vmin.f32 %v3980_v33, 16.0 }
0x100e   :  { %v3959_v47 = vmul.f32 %v3958_v38, %v8890_v55  ;;  %v8996_v9 = vadd.f32 1.0, %v3881_v8  ;;  %v6631_v38 = vld [vmem:[#allocation7 + $0x1e8] sm:$0xff]  ;;  %v3945_v4 = vadd.f32 0.0036580483, %v3944_v3  ;;  %v4074_v32 = vadd.f32 0.001143296, %v4073_v51  ;;  %v3564_v51 = vpop.f32.mrf.mxu3 }
0x100f   :  { %4621 = vmatpush.bf16.msrb.mxu0 %v6631_v38  ;;  %v3911_v8 = vadd.f32 1.1283791, %v3910_v1  ;;  %v3829_v3 = vadd.f32 0.18741608, %v3828_v37  ;;  %v3867_v38 = vadd.f32 0.05243302, %v3866_v24  ;;  %v9046_v31 = vadd.f32 %v3564_v51, %v8635_v44 }
0x1010   :  { %6865 = vrcp.f32 %v8996_v9  ;;  %v3960_v17 = vadd.f32 0.4994258, %v3959_v47  ;;  %v6616_v47 = vld [vmem:[#allocation7 + $0x170] sm:$0xff]  ;;  %v4075_v1 = vmul.f32 %v4074_v32, %v8977_v19  ;;  %v3946_v2 = vmul.f32 %v3945_v4, %v8890_v55 }
0x1011   :  { %4582 = vmatpush.bf16.msrb.mxu2 %v6616_v47  ;;  %4565 = vmatpush.bf16.msra.mxu1 %v6606_v7  ;;  %v4062_v37 = vmul.f32 2.1237322e-06, %v8977_v19  ;;  %v3830_v33 = vmul.f32 %v3829_v3, %v8801_v26  ;;  %v3993_v32 = vmul.f32 3.8918573e-05, %v9034_v12  ;;  %v3846_v24 = vmul.f32 %v8987_v62, %v3845_v15 }
0x1012   :  { %v3961_v41 = vmul.f32 %v3960_v17, %v8890_v55  ;;  %v4076_v30 = vadd.f32 0.014752088, %v4075_v1  ;;  %v3912_v17 = vmul.f32 %v3911_v8, %v8709_v36  ;;  %v9050_v4 = vmul.f32 0.5, %v8827_v56 }
0x1013   :  { %4622 = vmatpush.bf16.msrb.mxu0 %v6630_v23  ;;  %v3868_v36 = vmul.f32 %v3867_v38, %v8864_v13  ;;  %v3947_v8 = vadd.f32 0.05243302, %v3946_v2  ;;  %v6263_v26 = vclamps-f32 %v3817_v11, 1.0  ;;  %v4063_v45 = vadd.f32 0.00028619796, %v4062_v37 }
0x1014   :  { %v9052_v28 = vadd.f32 1.0, %v3961_v41  ;;  %v4077_v35 = vmul.f32 %v4076_v30, %v8977_v19  ;;  %v3937_v47 = vmul.f32 %v3936_v43, %v3912_v17  ;;  %v3994_v5 = vadd.f32 0.001143296, %v3993_v32 }
0x1015   :  { %v3831_v3 = vadd.f32 1.1283791, %v3830_v33  ;;  %v3852_v7 = vand.u32 2147483647, %v8937_v20  ;;  %v9059_v56 = vmul.f32 0.70710677, %v9046_v31  ;;  %v3847_v23 = vadd.f32 %v8987_v62, %v3846_v24 }
0x1016   :  { %v9036_v40 = vpop.eup %6865  ;;  %6867 = vrcp.f32 %v9052_v28  ;;  %v4078_v48 = vadd.f32 0.112945676, %v4077_v35  ;;  %v3995_v15 = vmul.f32 %v3994_v5, %v9034_v12  ;;  %v6266_v41 = vclamps-f32 %v3937_v47, 1.0 }
0x1017   :  { %v3884_v57 = vmul.f32 %v9036_v40, %v8996_v9  ;;  %v3854_v1 = vand.u32 2147483648, %v8937_v20  ;;  %v3869_v51 = vadd.f32 0.18741608, %v3868_v36  ;;  %v3948_v11 = vmul.f32 %v3947_v8, %v8890_v55 }
0x1018   :  { %v9069_v2 = vmul.f32 0.5, %v8846_v27  ;;  %v4064_v43 = vmul.f32 %v4063_v45, %v8977_v19  ;;  %v4264_v37 = vadd.f32 1.0, %v6263_v26  ;;  %v3832_v30 = vmul.f32 %v3831_v3, %v8769_v53 }
0x1019   :  { %v3885_v54 = vsub.f32 1.0, %v3884_v57  ;;  %v9073_v57 = vmul.f32 %v4262_v58, %v8746_v59  ;;  %v4020_v20 = vmul.f32 %v9059_v56, %v9059_v56  ;;  %v3851_v27 = vsel %vm9078_vm7, %v8987_v62, %v3847_v23  ;;  %v3528_v58 = vpop.f32.mrf.mxu1 }
0x101a   :  { %vm3853_vm8 = vcmp.eq.f32.partialorder %v3852_v7, 8.507059e+37  ;;  %v4079_v59 = vmul.f32 %v4078_v48, %v8977_v19  ;;  %v3996_v33 = vadd.f32 0.014752088, %v3995_v15  ;;  %v4267_v32 = vadd.f32 1.0, %v6266_v41 }
0x101b   :  { %v3886_v38 = vmul.f32 %v9036_v40, %v3885_v54  ;;  %v3855_v24 = vor.u32 1.1754944e-38, %v3854_v1  ;;  %v3870_v53 = vmul.f32 %v3869_v51, %v8864_v13  ;;  %v3949_v35 = vadd.f32 0.18741608, %v3948_v11 }
0x101c   :  { %v9089_v47 = vpop.eup %6867  ;;  %vm3889_vm9 = vweird.f32 %v9036_v40  ;;  %v4065_v8 = vadd.f32 0.0036580483, %v4064_v43  ;;  %v3982_v26 = vmul.f32 2.1237322e-06, %v9034_v12  ;;  %vm3888_vm10 = vweird.f32 %v8996_v9 }
0x101d   :  { %v3887_v36 = vadd.f32 %v9036_v40, %v3886_v38  ;;  %v3856_v62 = vsel %vm3853_vm8, %v3855_v24, %v3851_v27  ;;  %v3894_v54 = vand.u32 2147483648, %v8996_v9  ;;  %v9096_v45 = vmin.f32 %v4020_v20, 16.0  ;;  %vm9103_vm11 = vmor %vm3888_vm10, %vm3889_vm9  ;;  %v6615_v20 = vld [vmem:[#allocation7 + $0x168] sm:$0xff] }
0x101e   :  { %v3892_v13 = vand.u32 2147483647, %v8996_v9  ;;  %v4080_v5 = vadd.f32 0.4994258, %v4079_v59  ;;  %v3997_v3 = vmul.f32 %v3996_v33, %v9034_v12  ;;  %v9101_v7 = vadd.f32 %v3528_v58, %v8617_v60  ;;  %v3585_v59 = vpop.f32.mrf.mxu0  ;;  %4583 = vmatpush.bf16.msrb.mxu2 %v6615_v20 }
0x101f   :  { %v3871_v23 = vadd.f32 1.1283791, %v3870_v53  ;;  %v3950_v15 = vmul.f32 %v3949_v35, %v8890_v55  ;;  %v3964_v41 = vmul.f32 %v9089_v47, %v9052_v28  ;;  %v9111_v1 = vmul.f32 0.5, %v8932_v42  ;;  %v6623_v42 = vld [vmem:[#allocation7 + $0x1a8] sm:$0xff] }
0x1020   :  { %v3857_v9 = vmul.f32 %v3856_v62, %v3832_v30  ;;  %v3891_v51 = vsel %vm9103_vm11, %v9036_v40, %v3887_v36  ;;  %v4066_v60 = vmul.f32 %v4065_v8, %v8977_v19  ;;  %v3983_v11 = vadd.f32 0.00028619796, %v3982_v26  ;;  %4602 = vmatpush.bf16.msrb.mxu3 %v6623_v42  ;;  %v3547_v42 = vpop.f32.mrf.mxu2 }
0x1021   :  { %v9118_v38 = vmul.f32 %v4264_v37, %v8750_v61  ;;  %v9121_v43 = vmul.f32 %v4267_v32, %v8759_v63  ;;  %v3895_v55 = vor.u32 1.1754944e-38, %v3894_v54  ;;  %v4033_v17 = vmul.f32 3.8918573e-05, %v9096_v45  ;;  %v6605_v63 = vld [vmem:[#allocation7 + $0x118] sm:$0xff]  ;;  %v6614_v54 = vld [vmem:[#allocation7 + $0x160] sm:$0xff] }
0x1022   :  { %vm3893_vm12 = vcmp.eq.f32.partialorder %v3892_v13, 8.507059e+37  ;;  %v4081_v30 = vmul.f32 %v4080_v5, %v8977_v19  ;;  %v3998_v27 = vadd.f32 0.112945676, %v3997_v3  ;;  %v9126_v40 = vmul.f32 0.70710677, %v9101_v7  ;;  %v6629_v32 = vld [vmem:[#allocation7 + $0x1d8] sm:$0xff]  ;;  %4566 = vmatpush.bf16.msra.mxu1 %v6605_v63  ;;  %4584 = vmatpush.bf16.msrb.mxu2 %v6614_v54 }
0x1023   :  { %v3872_v33 = vmul.f32 %v3871_v23, %v8843_v34  ;;  %v3896_v61 = vsel %vm3893_vm12, %v3895_v55, %v3891_v51  ;;  %v3951_v37 = vadd.f32 1.1283791, %v3950_v15  ;;  %v3965_v24 = vsub.f32 1.0, %v3964_v41  ;;  %4623 = vmatpush.bf16.msrb.mxu0 %v6629_v32  ;;  %v6622_v13 = vld [vmem:[#allocation7 + $0x1a0] sm:$0xff]  ;;  %v6604_v51 = vld [vmem:[#allocation7 + $0x110] sm:$0xff] }
0x1024   :  { %v6264_v53 = vclamps-f32 %v3857_v9, 1.0  ;;  %v4067_v35 = vadd.f32 0.05243302, %v4066_v60  ;;  %v3984_v58 = vmul.f32 %v3983_v11, %v9034_v12  ;;  %v4100_v36 = vmul.f32 %v9126_v40, %v9126_v40  ;;  %4603 = vmatpush.bf16.msrb.mxu3 %v6622_v13  ;;  %v6628_v60 = vld [vmem:[#allocation7 + $0x1d0] sm:$0xff] }
0x1025   :  { %v4357_v8 = vpack.c.bf16 %v9118_v38, %v8919_v0  ;;  %v4360_v34 = vpack.c.bf16 %v9121_v43, %v8922_v14  ;;  %v4034_v26 = vadd.f32 0.001143296, %v4033_v17  ;;  %v9137_v62 = vadd.f32 %v3585_v59, %v8619_v50  ;;  %v6613_v59 = vld [vmem:[#allocation7 + $0x158] sm:$0xff] }
0x1026   :  { %v3897_v5 = vmul.f32 %v3896_v61, %v3872_v33  ;;  %v9139_v3 = vadd.f32 1.0, %v4081_v30  ;;  %v3999_v23 = vmul.f32 %v3998_v27, %v9034_v12  ;;  %v9142_v48 = vmin.f32 %v4100_v36, 16.0  ;;  %4567 = vmatpush.bf16.msra.mxu1 %v6604_v51  ;;  %4585 = vmatpush.bf16.msrb.mxu2 %v6613_v59  ;;  %v6627_v36 = vld [vmem:[#allocation7 + $0x1c8] sm:$0xff] }
0x1027   :  { %v9145_v15 = vmul.f32 %v3951_v37, %v8860_v46  ;;  %v3966_v41 = vmul.f32 %v9089_v47, %v3965_v24  ;;  %v3972_v9 = vand.u32 2147483647, %v9052_v28  ;;  %v3974_v50 = vand.u32 2147483648, %v9052_v28  ;;  %4624 = vmatpush.bf16.msrb.mxu0 %v6628_v60  ;;  %v6621_v24 = vld [vmem:[#allocation7 + $0x198] sm:$0xff]  ;;  %v6620_v60 = vld [vmem:[#allocation7 + $0x190] sm:$0xff] }
0x1028   :  { %v4265_v11 = vadd.f32 1.0, %v6264_v53  ;;  %v4068_v55 = vmul.f32 %v4067_v35, %v8977_v19  ;;  %v3985_v17 = vadd.f32 0.0036580483, %v3984_v58  ;;  %v4102_v20 = vmul.f32 2.1237322e-06, %v9142_v48  ;;  %v6603_v58 = vld [vmem:[#allocation7 + $0x108] sm:$0xff]  ;;  %4604 = vmatpush.bf16.msrb.mxu3 %v6621_v24 }
0x1029   :  { %vm3969_vm15 = vweird.f32 %v9089_v47  ;;  %v4035_v46 = vmul.f32 %v4034_v26, %v9096_v45  ;;  %v4113_v30 = vmul.f32 3.8918573e-05, %v9142_v48  ;;  %v9156_v27 = vmul.f32 0.70710677, %v9137_v62 }
0x102a   :  { %v6265_v33 = vclamps-f32 %v3897_v5, 1.0  ;;  %6869 = vrcp.f32 %v9139_v3  ;;  %v4000_v61 = vadd.f32 0.4994258, %v3999_v23  ;;  %v4103_v37 = vadd.f32 0.00028619796, %v4102_v20  ;;  %4568 = vmatpush.bf16.msra.mxu1 %v6603_v58  ;;  %v6611_v58 = vld [vmem:[#allocation7 + $0x148] sm:$0xff] }
0x102b   :  { %v3967_v63 = vadd.f32 %v9089_v47, %v3966_v41  ;;  %v4114_v32 = vadd.f32 0.001143296, %v4113_v30  ;;  %v4220_v53 = vmul.f32 %v9156_v27, %v9156_v27  ;;  %v9163_v35 = vadd.f32 %v3547_v42, %v8633_v52  ;;  %4625 = vmatpush.bf16.msrb.mxu0 %v6627_v36  ;;  %v6612_v52 = vld [vmem:[#allocation7 + $0x150] sm:$0xff]  ;;  %v6619_v36 = vld [vmem:[#allocation7 + $0x188] sm:$0xff] }
0x102c   :  { %vm3968_vm0 = vweird.f32 %v9052_v28  ;;  %v4069_v26 = vadd.f32 0.18741608, %v4068_v55  ;;  %v4022_v54 = vmul.f32 2.1237322e-06, %v9096_v45  ;;  %v4104_v13 = vmul.f32 %v4103_v37, %v9142_v48  ;;  %4586 = vmatpush.bf16.msrb.mxu2 %v6612_v52  ;;  %v6602_v37 = vld [vmem:[#allocation7 + $0x100] sm:$0xff]  ;;  %4605 = vmatpush.bf16.msrb.mxu3 %v6620_v60 }
0x102d   :  { %v3986_v5 = vmul.f32 %v3985_v17, %v9034_v12  ;;  %v4036_v23 = vadd.f32 0.014752088, %v4035_v46  ;;  %v4115_v41 = vmul.f32 %v4114_v32, %v9142_v48  ;;  %v9170_v51 = vmin.f32 %v4220_v53, 16.0  ;;  %vm9174_vm1 = vmor %vm3968_vm0, %vm3969_vm15 }
0x102e   :  { %v4266_v20 = vadd.f32 1.0, %v6265_v33  ;;  %vm9178_vm2 = vcmp.eq.f32.partialorder %v3972_v9, 8.507059e+37  ;;  %v3975_v17 = vor.u32 1.1754944e-38, %v3974_v50  ;;  %v4001_v42 = vmul.f32 %v4000_v61, %v9034_v12  ;;  %v6626_v9 = vld [vmem:[#allocation7 + $0x1c0] sm:$0xff]  ;;  %4569 = vmatpush.bf16.msra.mxu1 %v6602_v37 }
0x102f   :  { %v9184_v46 = vmul.f32 %v4265_v11, %v8833_v49  ;;  %v3971_v30 = vsel %vm9174_vm1, %v9089_v47, %v3967_v63  ;;  %v4116_v59 = vadd.f32 0.014752088, %v4115_v41  ;;  %v9190_v33 = vmul.f32 0.70710677, %v9163_v35  ;;  %4626 = vmatpush.bf16.msrb.mxu0 %v6626_v9 }
0x1030   :  { %v9192_v24 = vpop.eup %6869  ;;  %v4070_v50 = vmul.f32 %v4069_v26, %v8977_v19  ;;  %v4105_v32 = vadd.f32 0.0036580483, %v4104_v13  ;;  %v4222_v61 = vmul.f32 2.1237322e-06, %v9170_v51  ;;  %v4233_v49 = vmul.f32 3.8918573e-05, %v9170_v51  ;;  %4587 = vmatpush.bf16.msrb.mxu2 %v6611_v58  ;;  %4606 = vmatpush.bf16.msrb.mxu3 %v6619_v36 }
0x1031   :  { %v3987_v11 = vadd.f32 0.05243302, %v3986_v5  ;;  %v4023_v53 = vadd.f32 0.00028619796, %v4022_v54  ;;  %v4037_v47 = vmul.f32 %v4036_v23, %v9096_v45  ;;  %v4117_v63 = vmul.f32 %v4116_v59, %v9142_v48  ;;  %4570 = vmatmul.bf16.vlgmr.msra.gmra.mxu1 %v4357_v8 }
0x1032   :  { %v3976_v41 = vsel %vm9178_vm2, %v3975_v17, %v3971_v30  ;;  %v9201_v19 = vadd.f32 1.0, %v4001_v42  ;;  %v4223_v26 = vadd.f32 0.00028619796, %v4222_v61  ;;  %v4234_v13 = vadd.f32 0.001143296, %v4233_v49  ;;  %4627 = vmatmul.bf16.vlgmr.msrb.gmra.mxu0 %v4360_v34 }
0x1033   :  { %v4358_v52 = vpack.c.bf16 %v9184_v46, %v9017_v39  ;;  %v4282_v54 = vmul.f32 %v4266_v20, %v9050_v4  ;;  %v4084_v5 = vmul.f32 %v9192_v24, %v9139_v3  ;;  %v4140_v23 = vmul.f32 %v9190_v33, %v9190_v33  ;;  %v6618_v46 = vld [vmem:[#allocation7 + $0x180] sm:$0xff] }
0x1034   :  { %v4071_v60 = vadd.f32 1.1283791, %v4070_v50  ;;  %v9211_v28 = vmul.f32 0.5, %v9101_v7  ;;  %v4106_v55 = vmul.f32 %v4105_v32, %v9142_v48  ;;  %v4118_v17 = vadd.f32 0.112945676, %v4117_v63  ;;  %v6610_v7 = vld [vmem:[#allocation7 + $0x140] sm:$0xff]  ;;  %4607 = vmatpush.bf16.msrb.mxu3 %v6618_v46 }
0x1035   :  { %v3977_v39 = vmul.f32 %v3976_v41, %v9145_v15  ;;  %v4038_v4 = vadd.f32 0.112945676, %v4037_v47  ;;  %v4224_v20 = vmul.f32 %v4223_v26, %v9170_v51  ;;  %v4235_v42 = vmul.f32 %v4234_v13, %v9170_v51  ;;  %4588 = vmatpush.bf16.msrb.mxu2 %v6610_v7  ;;  %v3566_v47 = vpop.f32.mrf.mxu3 }
0x1036   :  { %v3988_v30 = vmul.f32 %v3987_v11, %v9034_v12  ;;  %6871 = vrcp.f32 %v9201_v19  ;;  %v4024_v0 = vmul.f32 %v4023_v53, %v9096_v45  ;;  %v4119_v38 = vmul.f32 %v4118_v17, %v9142_v48 }
0x1037   :  { %v4359_v8 = vpack.c.bf16 %v4282_v54, %v9073_v57  ;;  %v4085_v15 = vsub.f32 1.0, %v4084_v5  ;;  %v4236_v59 = vadd.f32 0.014752088, %v4235_v42  ;;  %v9228_v37 = vmin.f32 %v4140_v23, 16.0 }
0x1038   :  { %v9231_v14 = vmul.f32 %v4071_v60, %v8957_v29  ;;  %v4107_v43 = vadd.f32 0.05243302, %v4106_v55  ;;  %v4120_v34 = vadd.f32 0.4994258, %v4119_v38  ;;  %v4225_v9 = vadd.f32 0.0036580483, %v4224_v20  ;;  %4589 = vmatmul.bf16.vlgmr.msrb.gmra.mxu2 %v4358_v52 }
0x1039   :  { %v4039_v50 = vmul.f32 %v4038_v4, %v9096_v45  ;;  %v4237_v32 = vmul.f32 %v4236_v59, %v9170_v51  ;;  %v4142_v61 = vmul.f32 2.1237322e-06, %v9228_v37  ;;  %v4153_v57 = vmul.f32 3.8918573e-05, %v9228_v37  ;;  %4608 = vmatmul.bf16.vlgmr.msrb.gmra.mxu3 %v4359_v8 }
0x103a   :  { %v6267_v49 = vclamps-f32 %v3977_v39, 1.0  ;;  %vm4088_vm13 = vweird.f32 %v9139_v3  ;;  %v4092_v11 = vand.u32 2147483647, %v9139_v3  ;;  %v4094_v29 = vand.u32 2147483648, %v9139_v3 }
0x103b   :  { %v4025_v53 = vadd.f32 0.0036580483, %v4024_v0  ;;  %v3989_v63 = vadd.f32 0.18741608, %v3988_v30  ;;  %v4121_v58 = vmul.f32 %v4120_v34, %v9142_v48  ;;  %v4238_v36 = vadd.f32 0.112945676, %v4237_v32 }
0x103c   :  { %v4143_v41 = vadd.f32 0.00028619796, %v4142_v61  ;;  %v9241_v26 = vpop.eup %6871  ;;  %v4086_v13 = vmul.f32 %v9192_v24, %v4085_v15  ;;  %v4108_v54 = vmul.f32 %v4107_v43, %v9142_v48  ;;  %v4226_v5 = vmul.f32 %v4225_v9, %v9170_v51 }
0x103d   :  { %v4154_v23 = vadd.f32 0.001143296, %v4153_v57  ;;  %v4040_v60 = vadd.f32 0.4994258, %v4039_v50  ;;  %v9246_v55 = vadd.f32 1.0, %v4121_v58  ;;  %v4239_v52 = vmul.f32 %v4238_v36, %v9170_v51 }
0x103e   :  { %v9250_v17 = vadd.f32 %v3566_v47, %v8635_v44  ;;  %v4268_v39 = vadd.f32 1.0, %v6267_v49  ;;  %vm9252_vm14 = vcmp.eq.f32.partialorder %v4092_v11, 8.507059e+37  ;;  %v4095_v20 = vor.u32 1.1754944e-38, %v4094_v29 }
0x103f   :  { %v4026_v42 = vmul.f32 %v4025_v53, %v9096_v45  ;;  %v4155_v7 = vmul.f32 %v4154_v23, %v9228_v37  ;;  %vm4089_vm3 = vweird.f32 %v9192_v24  ;;  %v4004_v46 = vmul.f32 %v9241_v26, %v9201_v19 }
0x1040   :  { %6873 = vrcp.f32 %v9246_v55  ;;  %v4144_v44 = vmul.f32 %v4143_v41, %v9228_v37  ;;  %v4087_v30 = vadd.f32 %v9192_v24, %v4086_v13  ;;  %v4109_v0 = vadd.f32 0.18741608, %v4108_v54  ;;  %vm9278_vm4 = vmor %vm4088_vm13, %vm4089_vm3 }
0x1041   :  { %v4227_v38 = vadd.f32 0.05243302, %v4226_v5  ;;  %v4240_v8 = vadd.f32 0.4994258, %v4239_v52  ;;  %v3990_v15 = vmul.f32 %v3989_v63, %v9034_v12  ;;  %v4041_v59 = vmul.f32 %v4040_v60, %v9096_v45 }
0x1042   :  { %v4156_v43 = vadd.f32 0.014752088, %v4155_v7  ;;  %v9267_v34 = vmul.f32 0.70710677, %v9250_v17  ;;  %v9270_v9 = vmul.f32 %v4268_v39, %v9069_v2  ;;  %v4014_v50 = vand.u32 2147483648, %v9201_v19 }
0x1043   :  { %v4027_v32 = vadd.f32 0.05243302, %v4026_v42  ;;  %v4241_v61 = vmul.f32 %v4240_v8, %v9170_v51  ;;  %v4005_v57 = vsub.f32 1.0, %v4004_v46  ;;  %v4145_v49 = vadd.f32 0.0036580483, %v4144_v44 }
0x1044   :  { %v4157_v11 = vmul.f32 %v4156_v43, %v9228_v37  ;;  %v4180_v2 = vmul.f32 %v9267_v34, %v9267_v34  ;;  %v4091_v29 = vsel %vm9278_vm4, %v9192_v24, %v4087_v30  ;;  %v4110_v53 = vmul.f32 %v4109_v0, %v9142_v48 }
0x1045   :  { %v4228_v47 = vmul.f32 %v4227_v38, %v9170_v51  ;;  %v9290_v3 = vadd.f32 1.0, %v4241_v61  ;;  %v9292_v58 = vadd.f32 1.1283791, %v3990_v15  ;;  %v9294_v36 = vadd.f32 1.0, %v4041_v59 }
0x1046   :  { %v6874_v63 = vpop.eup %6873  ;;  %v4158_v41 = vadd.f32 0.112945676, %v4157_v11  ;;  %v9296_v13 = vmin.f32 %v4180_v2, 16.0  ;;  %v4012_v54 = vand.u32 2147483647, %v9201_v19  ;;  %v9299_v5 = vor.u32 1.1754944e-38, %v4014_v50 }
0x1047   :  { %v4028_v24 = vmul.f32 %v4027_v32, %v9096_v45  ;;  %v4124_v48 = vmul.f32 %v6874_v63, %v9246_v55  ;;  %v4096_v23 = vsel %vm9252_vm14, %v4095_v20, %v4091_v29  ;;  %v4006_v60 = vmul.f32 %v9241_v26, %v4005_v57 }
0x1048   :  { %6875 = vrcp.f32 %v9290_v3  ;;  %v4146_v52 = vmul.f32 %v4145_v49, %v9228_v37  ;;  %v4111_v39 = vadd.f32 1.1283791, %v4110_v53  ;;  %v4229_v7 = vadd.f32 0.18741608, %v4228_v47 }
0x1049   :  { %v4125_v42 = vsub.f32 1.0, %v4124_v48  ;;  %v4159_v46 = vmul.f32 %v4158_v41, %v9228_v37  ;;  %vm4008_vm5 = vweird.f32 %v9201_v19  ;;  %6877 = vrcp.f32 %v9294_v36 }
0x104a   :  { %v4134_v44 = vand.u32 2147483648, %v9246_v55  ;;  %v4182_v4 = vmul.f32 2.1237322e-06, %v9296_v13  ;;  %v4193_v20 = vmul.f32 3.8918573e-05, %v9296_v13  ;;  %vm4129_vm6 = vweird.f32 %v6874_v63 }
0x104b   :  { %v4126_v30 = vmul.f32 %v6874_v63, %v4125_v42  ;;  %v4132_v0 = vand.u32 2147483647, %v9246_v55  ;;  %v4160_v38 = vadd.f32 0.4994258, %v4159_v46  ;;  %vm4009_vm7 = vweird.f32 %v9241_v26 }
0x104c   :  { %v4147_v8 = vadd.f32 0.05243302, %v4146_v52  ;;  %v4183_v15 = vadd.f32 0.00028619796, %v4182_v4  ;;  %v4194_v59 = vadd.f32 0.001143296, %v4193_v20  ;;  %vm4128_vm8 = vweird.f32 %v9246_v55  ;;  %vm9341_vm12 = vmor %vm4008_vm5, %vm4009_vm7 }
0x104d   :  { %v4127_v43 = vadd.f32 %v6874_v63, %v4126_v30  ;;  %v4230_v50 = vmul.f32 %v4229_v7, %v9170_v51  ;;  %v4161_v32 = vmul.f32 %v4160_v38, %v9228_v37  ;;  %v4007_v12 = vadd.f32 %v9241_v26, %v4006_v60  ;;  %vm4130_vm9 = vmor %vm4128_vm8, %vm4129_vm6 }
0x104e   :  { %v6876_v61 = vpop.eup %6875  ;;  %v4135_v57 = vor.u32 1.1754944e-38, %v4134_v44  ;;  %v4184_v49 = vmul.f32 %v4183_v15, %v9296_v13  ;;  %v4195_v11 = vmul.f32 %v4194_v59, %v9296_v13  ;;  %vm9322_vm10 = vcmp.eq.f32.partialorder %v4012_v54, 8.507059e+37 }
0x104f   :  { %v4112_v29 = vmul.f32 %v4111_v39, %v9126_v40  ;;  %v4131_v55 = vsel %vm4130_vm9, %v6874_v63, %v4127_v43  ;;  %vm4133_vm11 = vcmp.eq.f32.partialorder %v4132_v0, 8.507059e+37  ;;  %v4244_v51 = vmul.f32 %v6876_v61, %v9290_v3  ;;  %v9328_v53 = vpop.eup %6877 }
0x1050   :  { %v4136_v47 = vsel %vm4133_vm11, %v4135_v57, %v4131_v55  ;;  %v4148_v41 = vmul.f32 %v4147_v8, %v9228_v37  ;;  %v9331_v48 = vadd.f32 1.0, %v4161_v32  ;;  %v4196_v60 = vadd.f32 0.014752088, %v4195_v11 }
0x1051   :  { %v4097_v52 = vmul.f32 %v4096_v23, %v9231_v14  ;;  %v4137_v54 = vmul.f32 %v4136_v47, %v4112_v29  ;;  %v4231_v42 = vadd.f32 1.1283791, %v4230_v50  ;;  %v4245_v7 = vsub.f32 1.0, %v4244_v51 }
0x1052   :  { %v4252_v46 = vand.u32 2147483647, %v9290_v3  ;;  %v4254_v40 = vand.u32 2147483648, %v9290_v3  ;;  %6879 = vrcp.f32 %v9331_v48  ;;  %v4185_v63 = vadd.f32 0.0036580483, %v4184_v49 }
0x1053   :  { %v6271_v44 = vclamps-f32 %v4137_v54, 1.0  ;;  %v4246_v14 = vmul.f32 %v6876_v61, %v4245_v7  ;;  %vm4249_vm15 = vweird.f32 %v6876_v61  ;;  %v4197_v23 = vmul.f32 %v4196_v60, %v9296_v13 }
0x1054   :  { %v4011_v4 = vsel %vm9341_vm12, %v9241_v26, %v4007_v12  ;;  %v4029_v20 = vadd.f32 0.18741608, %v4028_v24  ;;  %v4044_v30 = vmul.f32 %v9328_v53, %v9294_v36  ;;  %v4149_v0 = vadd.f32 0.18741608, %v4148_v41 }
0x1055   :  { %v4272_v38 = vadd.f32 1.0, %v6271_v44  ;;  %v4247_v19 = vadd.f32 %v6876_v61, %v4246_v14  ;;  %vm4248_vm0 = vweird.f32 %v9290_v3  ;;  %v4198_v8 = vadd.f32 0.112945676, %v4197_v23 }
0x1056   :  { %v6270_v15 = vclamps-f32 %v4097_v52, 1.0  ;;  %v4232_v59 = vmul.f32 %v4231_v42, %v9156_v27  ;;  %vm4250_vm1 = vmor %vm4248_vm0, %vm4249_vm15  ;;  %v4255_v43 = vor.u32 1.1754944e-38, %v4254_v40  ;;  %v4186_v50 = vmul.f32 %v4185_v63, %v9296_v13 }
0x1057   :  { %v4288_v32 = vmul.f32 %v4272_v38, %v9211_v28  ;;  %v4251_v26 = vsel %vm4250_vm1, %v6876_v61, %v4247_v19  ;;  %vm4253_vm2 = vcmp.eq.f32.partialorder %v4252_v46, 8.507059e+37  ;;  %v4199_v24 = vmul.f32 %v4198_v8, %v9296_v13 }
0x1058   :  { %v6880_v12 = vpop.eup %6879  ;;  %v4016_v57 = vsel %vm9322_vm10, %v9299_v5, %v4011_v4  ;;  %v4045_v3 = vsub.f32 1.0, %v4044_v30  ;;  %v4256_v49 = vsel %vm4253_vm2, %v4255_v43, %v4251_v26  ;;  %v4150_v11 = vmul.f32 %v4149_v0, %v9228_v37 }
0x1059   :  { %v3992_v27 = vmul.f32 %v9292_v58, %v8985_v22  ;;  %v3603_v29 = vmul.f32 0.5, %v9137_v62  ;;  %v4257_v55 = vmul.f32 %v4256_v49, %v4232_v59  ;;  %v4164_v28 = vmul.f32 %v6880_v12, %v9331_v48 }
0x105a   :  { %v4271_v61 = vadd.f32 1.0, %v6270_v15  ;;  %v4187_v51 = vadd.f32 0.05243302, %v4186_v50  ;;  %v4200_v47 = vadd.f32 0.4994258, %v4199_v24  ;;  %v4361_v41 = vpack.c.bf16 %v4288_v32, %v9270_v9 }
0x105b   :  { %v4017_v60 = vmul.f32 %v4016_v57, %v3992_v27  ;;  %v4030_v5 = vmul.f32 %v4029_v20, %v9096_v45  ;;  %v6274_v2 = vclamps-f32 %v4257_v55, 1.0  ;;  %v4165_v52 = vsub.f32 1.0, %v4164_v28 }
0x105c   :  { %v4046_v37 = vmul.f32 %v9328_v53, %v4045_v3  ;;  %v4151_v54 = vadd.f32 1.1283791, %v4150_v11  ;;  %v4174_v22 = vand.u32 2147483648, %v9331_v48  ;;  %v4201_v62 = vmul.f32 %v4200_v47, %v9296_v13  ;;  %4575 = vmatmul.bf16.gmra.mxu1 %v4361_v41 }
0x105d   :  { %v4275_v58 = vadd.f32 1.0, %v6274_v2  ;;  %v4166_v42 = vmul.f32 %v6880_v12, %v4165_v52  ;;  %vm4169_vm13 = vweird.f32 %v6880_v12  ;;  %v4172_v7 = vand.u32 2147483647, %v9331_v48 }
0x105e   :  { %v4287_v9 = vmul.f32 %v4271_v61, %v9111_v1  ;;  %v4054_v46 = vand.u32 2147483648, %v9294_v36  ;;  %v4188_v45 = vmul.f32 %v4187_v51, %v9296_v13  ;;  %v4202_v40 = vadd.f32 1.0, %v4201_v62 }
0x105f   :  { %v6268_v63 = vclamps-f32 %v4017_v60, 1.0  ;;  %v4291_v39 = vmul.f32 %v4275_v58, %v3603_v29  ;;  %v4167_v44 = vadd.f32 %v6880_v12, %v4166_v42  ;;  %vm4168_vm14 = vweird.f32 %v9331_v48 }
0x1060   :  { %v4047_v14 = vadd.f32 %v9328_v53, %v4046_v37  ;;  %vm4049_vm3 = vweird.f32 %v9328_v53  ;;  %vm4170_vm4 = vmor %vm4168_vm14, %vm4169_vm13  ;;  %v4175_v23 = vor.u32 1.1754944e-38, %v4174_v22  ;;  %6881 = vrcp.f32 %v4202_v40 }
0x1061   :  { %v4152_v4 = vmul.f32 %v4151_v54, %v9190_v33  ;;  %v4171_v1 = vsel %vm4170_vm4, %v6880_v12, %v4167_v44  ;;  %vm4173_vm5 = vcmp.eq.f32.partialorder %v4172_v7, 8.507059e+37  ;;  %v4364_v20 = vpack.c.bf16 %v4291_v39, %v4287_v9 }
0x1062   :  { %vm4048_vm6 = vweird.f32 %v9294_v36  ;;  %v4052_v30 = vand.u32 2147483647, %v9294_v36  ;;  %v4176_v0 = vsel %vm4173_vm5, %v4175_v23, %v4171_v1  ;;  %v4189_v38 = vadd.f32 0.18741608, %v4188_v45 }
0x1063   :  { %vm4050_vm7 = vmor %vm4048_vm6, %vm4049_vm3  ;;  %v4177_v48 = vmul.f32 %v4176_v0, %v4152_v4  ;;  %4632 = vmatmul.bf16.gmra.mxu0 %v4364_v20  ;;  %v4031_v19 = vadd.f32 1.1283791, %v4030_v5  ;;  %v4269_v15 = vadd.f32 1.0, %v6268_v63  ;;  %v4055_v59 = vor.u32 1.1754944e-38, %v4054_v46 }
0x1064   :  { %v4051_v8 = vsel %vm4050_vm7, %v9328_v53, %v4047_v14  ;;  %v3597_v33 = vmul.f32 0.5, %v8967_v18  ;;  %vm4053_vm8 = vcmp.eq.f32.partialorder %v4052_v30, 8.507059e+37  ;;  %v4190_v32 = vmul.f32 %v4189_v38, %v9296_v13 }
0x1065   :  { %v6272_v43 = vclamps-f32 %v4177_v48, 1.0  ;;  %v4056_v26 = vsel %vm4053_vm8, %v4055_v59, %v4051_v8  ;;  %v3601_v36 = vmul.f32 0.5, %v9163_v35  ;;  %v4032_v57 = vmul.f32 %v4031_v19, %v9059_v56 }
0x1066   :  { %v6882_v50 = vpop.eup %6881  ;;  %v4285_v3 = vmul.f32 %v4269_v15, %v3597_v33  ;;  %v4191_v27 = vadd.f32 1.1283791, %v4190_v32  ;;  %v4214_v29 = vand.u32 2147483648, %v4202_v40  ;;  %v4212_v28 = vand.u32 2147483647, %v4202_v40 }
0x1067   :  { %v4273_v24 = vadd.f32 1.0, %v6272_v43  ;;  %v4204_v12 = vmul.f32 %v6882_v50, %v4202_v40  ;;  %v4057_v53 = vmul.f32 %v4056_v26, %v4032_v57  ;;  %vm4209_vm9 = vweird.f32 %v6882_v50 }
0x1068   :  { %vm4208_vm10 = vweird.f32 %v4202_v40  ;;  %v4215_v13 = vor.u32 1.1754944e-38, %v4214_v29  ;;  %v4192_v51 = vmul.f32 %v4191_v27, %v9267_v34  ;;  %vm4213_vm12 = vcmp.eq.f32.partialorder %v4212_v28, 8.507059e+37  ;;  %v6715_v34 = vld [vmem:[%s9549_s12 + $0x1] ss:$0 sm:$0xff] }
0x1069   :  { %v4289_v49 = vmul.f32 %v4273_v24, %v3601_v36  ;;  %v4205_v11 = vsub.f32 1.0, %v4204_v12  ;;  %vm4210_vm11 = vmor %vm4208_vm10, %vm4209_vm9  ;;  %v6269_v35 = vclamps-f32 %v4057_v53, 1.0  ;;  %v3598_v2 = vmul.f32 0.5, %v9046_v31 }
0x106a   :  { %v3602_v52 = vmul.f32 0.5, %v9250_v17 }
0x106b   :  { %v4206_v55 = vmul.f32 %v6882_v50, %v4205_v11  ;;  %v4362_v18 = vpack.c.bf16 %v4289_v49, %v4285_v3  ;;  %v4270_v60 = vadd.f32 1.0, %v6269_v35 }
0x106d   :  { %v4207_v61 = vadd.f32 %v6882_v50, %v4206_v55  ;;  %4594 = vmatmul.bf16.gmra.mxu2 %v4362_v18  ;;  %v4286_v54 = vmul.f32 %v4270_v60, %v3598_v2  ;;  %v6640_v2 = vld [vmem:[#allocation8 + $0x30] sm:$0xff] }
0x106f   :  { %v4211_v47 = vsel %vm4210_vm11, %v6882_v50, %v4207_v61 }
0x1070   :  { %v4216_v56 = vsel %vm4213_vm12, %v4215_v13, %v4211_v47 }
0x1071   :  { %v4217_v41 = vmul.f32 %v4216_v56, %v4192_v51  ;;  %v6641_v56 = vld [vmem:[#allocation8 + $0x38] sm:$0xff] }
0x1072   :  { %4810 = vmatpush.bf16.msrb.mxu1 %v6641_v56 }
0x1073   :  { %v6273_v5 = vclamps-f32 %v4217_v41, 1.0 }
0x1075   :  { %v4274_v37 = vadd.f32 1.0, %v6273_v5 }
0x1076   :  { %4811 = vmatpush.bf16.msrb.mxu1 %v6640_v2 }
0x1077   :  { %v4290_v22 = vmul.f32 %v4274_v37, %v3602_v52  ;;  %v6639_v52 = vld [vmem:[#allocation8 + $0x28] sm:$0xff] }
0x1079   :  { %v4363_v62 = vpack.c.bf16 %v4290_v22, %v4286_v54  ;;  %v6638_v22 = vld [vmem:[#allocation8 + $0x20] sm:$0xff] }
0x107a   :  { %4812 = vmatpush.bf16.msrb.mxu1 %v6639_v52 }
0x107b   :  { %4613 = vmatmul.bf16.gmra.mxu3 %v4363_v62 }
0x107e   :  { %4813 = vmatpush.bf16.msrb.mxu1 %v6638_v22 }
0x10ae   :  { %v4571_v58 = vpop.f32.mrf.mxu1 }
0x10af   :  { %v4572_v42 = vadd.f32 %v6715_v34, %v4571_v58  ;;  %v4628_v45 = vpop.f32.mrf.mxu0 }
0x10b6   :  { %v4573_v63 = vpop.f32.mrf.mxu1 }
0x10b7   :  { %v4574_v39 = vadd.f32 %v6715_v34, %v4573_v63  ;;  %v4630_v1 = vpop.f32.mrf.mxu0 }
0x10bb   :  { %v4590_v7 = vpop.f32.mrf.mxu2 }
0x10bc   :  { %v4591_v9 = vadd.f32 %v4590_v7, %v4572_v42  ;;  %v4609_v46 = vpop.f32.mrf.mxu3  ;;  %v6637_v42 = vld [vmem:[#allocation8 + $0x18] sm:$0xff] }
0x10bd   :  { %4814 = vmatpush.bf16.msrb.mxu1 %v6637_v42 }
0x10be   :  { %v4610_v40 = vadd.f32 %v4609_v46, %v4591_v9  ;;  %v6636_v46 = vld [vmem:[#allocation8 + $0x10] sm:$0xff] }
0x10c0   :  { %v4629_v31 = vadd.f32 %v4628_v45, %v4610_v40 }
0x10c1   :  { %4815 = vmatpush.bf16.msrb.mxu1 %v6636_v46 }
0x10c2   :  { %v4638_v17 = vadd.f32 %v4629_v31, %v8596_v6 }
0x10c3   :  { %v4592_v44 = vpop.f32.mrf.mxu2 }
0x10c4   :  { %v4593_v14 = vadd.f32 %v4592_v44, %v4574_v39  ;;  %4646 = vadd.xlane.f32.xlu1 %v4638_v17  ;;  %v4611_v23 = vpop.f32.mrf.mxu3  ;;  %v6635_v39 = vld [vmem:[#allocation8 + $0x8] sm:$0xff] }
0x10c5   :  { %4816 = vmatpush.bf16.msrb.mxu1 %v6635_v39 }
0x10c6   :  { %v4612_v4 = vadd.f32 %v4611_v23, %v4593_v14 }
0x10c8   :  { %v4631_v20 = vadd.f32 %v4630_v1, %v4612_v4  ;;  %v6716_v4 = vld [vmem:[%s9550_s13 + $0x1] ss:$0 sm:$0xff] }
0x10ca   :  { %v4639_v30 = vadd.f32 %v4631_v20, %v8598_v21 }
0x10cc   :  { %4648 = vadd.xlane.f32.xlu2 %v4639_v30 }
0x10d9   :  { %v4576_v0 = vpop.f32.mrf.mxu1 }
0x10da   :  { %v4577_v48 = vadd.f32 %v6715_v34, %v4576_v0  ;;  %v6717_v0 = vld [vmem:[%s9551_s14 + $0x1] ss:$0 sm:$0xff] }
0x10e0   :  { %v4633_v8 = vpop.f32.mrf.mxu0 }
0x10e1   :  { %v4578_v15 = vpop.f32.mrf.mxu1 }
0x10e2   :  { %v4579_v6 = vadd.f32 %v6715_v34, %v4578_v15 }
0x10e8   :  { %v4635_v12 = vpop.f32.mrf.mxu0 }
0x10f0   :  { %v4595_v38 = vpop.f32.mrf.mxu2 }
0x10f1   :  { %v4596_v19 = vadd.f32 %v4595_v38, %v4577_v48 }
0x10f8   :  { %v4597_v50 = vpop.f32.mrf.mxu2 }
0x10f9   :  { %v4598_v32 = vadd.f32 %v4597_v50, %v4579_v6 }
0x10fe   :  { %v4614_v59 = vpop.f32.mrf.mxu3 }
0x10ff   :  { %v4615_v43 = vadd.f32 %v4614_v59, %v4596_v19 }
0x1101   :  { %v4634_v33 = vadd.f32 %v4633_v8, %v4615_v43  ;;  %v6634_v8 = vld [vmem:[#allocation8] sm:$0xff] }
0x1102   :  { %4817 = vmatpush.bf16.msrb.mxu1 %v6634_v8 }
0x1103   :  { %v4640_v26 = vadd.f32 %v4634_v33, %v8608_v16 }
0x1105   :  { %4650 = vadd.xlane.f32.xlu0 %v4640_v26 }
0x1106   :  { %v4616_v36 = vpop.f32.mrf.mxu3 }
0x1107   :  { %v4617_v24 = vadd.f32 %v4616_v36, %v4598_v32 }
0x1109   :  { %v4636_v21 = vadd.f32 %v4635_v12, %v4617_v24 }
0x110b   :  { %v4641_v57 = vadd.f32 %v4636_v21, %v8610_v25 }
0x110d   :  { %4652 = vadd.xlane.f32.xlu1 %v4641_v57 }
0x1137   :  { %v4647_v3 = vpop.xlane.xlu1 %4646 }
0x1138   :  { %v4654_v49 = vmul.f32 %v4647_v3, %v7222_v10 }
0x113a   :  { %v4658_v11 = vsub.f32 %v4638_v17, %v4654_v49 }
0x113c   :  { %v4662_v53 = vmul.f32 %v4658_v11, %v4658_v11 }
0x113e   :  { %4666 = vadd.xlane.f32.xlu2 %v4662_v53 }
0x113f   :  { %v4649_v27 = vpop.xlane.xlu2 %4648 }
0x1140   :  { %v4655_v29 = vmul.f32 %v4649_v27, %v7222_v10 }
0x1142   :  { %v4659_v55 = vsub.f32 %v4639_v30, %v4655_v29 }
0x1144   :  { %v4663_v28 = vmul.f32 %v4659_v55, %v4659_v55 }
0x1146   :  { %4668 = vadd.xlane.f32.xlu0 %v4663_v28 }
0x1178   :  { %v4651_v16 = vpop.xlane.xlu0 %4650 }
0x1179   :  { %v4656_v18 = vmul.f32 %v4651_v16, %v7222_v10 }
0x117b   :  { %v9397_v61 = vsub.f32 %v4640_v26, %v4656_v18 }
0x117d   :  { %v4664_v25 = vmul.f32 %v9397_v61, %v9397_v61 }
0x117f   :  { %4670 = vadd.xlane.f32.xlu1 %v4664_v25 }
0x1180   :  { %v4653_v13 = vpop.xlane.xlu1 %4652 }
0x1181   :  { %v4657_v35 = vmul.f32 %v4653_v13, %v7222_v10 }
0x1183   :  { %v9402_v51 = vsub.f32 %v4641_v57, %v4657_v35 }
0x1185   :  { %v4665_v47 = vmul.f32 %v9402_v51, %v9402_v51 }
0x1187   :  { %4672 = vadd.xlane.f32.xlu2 %v4665_v47 }
0x11b1   :  { %v4667_v41 = vpop.xlane.xlu2 %4666 }
0x11b2   :  { %v4674_v60 = vmul.f32 %v4667_v41, %v7222_v10 }
0x11b4   :  { %v4678_v5 = vadd.f32 1e-12, %v4674_v60 }
0x11b6   :  { %6883 = vrsqrt.f32 %v4678_v5  ;;  %vm4688_vm0 = vweird.f32 %v4678_v5 }
0x11b9   :  { %v4669_v37 = vpop.xlane.xlu0 %4668 }
0x11ba   :  { %v4675_v54 = vmul.f32 %v4669_v37, %v7222_v10 }
0x11bc   :  { %v6884_v62 = vpop.eup %6883  ;;  %v4679_v58 = vadd.f32 1e-12, %v4675_v54 }
0x11bd   :  { %v4683_v34 = vmul.f32 %v6884_v62, %v4678_v5  ;;  %vm4689_vm15 = vweird.f32 %v6884_v62  ;;  %v9421_v5 = vld [vmem:[%s9553_s16] ss:$0 sm:$0xff] }
0x11be   :  { %6885 = vrsqrt.f32 %v4679_v58  ;;  %vm4690_vm1 = vmor %vm4688_vm0, %vm4689_vm15  ;;  %vm4698_vm13 = vweird.f32 %v4679_v58 }
0x11bf   :  { %v4684_v7 = vmul.f32 %v6884_v62, %v4683_v34 }
0x11c1   :  { %v4685_v9 = vmul.f32 0.5, %v4684_v7 }
0x11c3   :  { %v4686_v45 = vsub.f32 1.5, %v4685_v9 }
0x11c4   :  { %v6886_v40 = vpop.eup %6885 }
0x11c5   :  { %v4687_v63 = vmul.f32 %v6884_v62, %v4686_v45  ;;  %v4693_v31 = vmul.f32 %v6886_v40, %v4679_v58  ;;  %vm4699_vm2 = vweird.f32 %v6886_v40 }
0x11c6   :  { %vm4700_vm14 = vmor %vm4698_vm13, %vm4699_vm2 }
0x11c7   :  { %v4694_v17 = vmul.f32 %v6886_v40, %v4693_v31  ;;  %v4691_v44 = vsel %vm4690_vm1, %v6884_v62, %v4687_v63 }
0x11c8   :  { %v4722_v1 = vmul.f32 %v4691_v44, %v4658_v11 }
0x11c9   :  { %v4695_v14 = vmul.f32 0.5, %v4694_v17 }
0x11ca   :  { %v4729_v38 = vmul.f32 %v6716_v4, %v4722_v1 }
0x11cb   :  { %v4696_v23 = vsub.f32 1.5, %v4695_v14 }
0x11cc   :  { %v4736_v15 = vadd.f32 %v6717_v0, %v4729_v38 }
0x11cd   :  { %v4697_v20 = vmul.f32 %v6886_v40, %v4696_v23 }
0x11cf   :  { %v4701_v30 = vsel %vm4700_vm14, %v6886_v40, %v4697_v20 }
0x11d0   :  { %v4723_v48 = vmul.f32 %v4701_v30, %v4659_v55 }
0x11d2   :  { %v4730_v19 = vmul.f32 %v6716_v4, %v4723_v48 }
0x11d4   :  { %v4737_v59 = vadd.f32 %v6717_v0, %v4730_v19 }
0x11d6   :  { %v4756_v43 = vpack.c.bf16 %v4737_v59, %v4736_v15 }
0x11d8   :  { %4818 = vmatmul.bf16.vlgmr.msrb.gmra.mxu1 %v4756_v43 }
0x11f2   :  { %v4671_v50 = vpop.xlane.xlu1 %4670 }
0x11f3   :  { %v4676_v6 = vmul.f32 %v4671_v50, %v7222_v10 }
0x11f5   :  { %v4680_v33 = vadd.f32 1e-12, %v4676_v6 }
0x11f7   :  { %6887 = vrsqrt.f32 %v4680_v33  ;;  %vm4708_vm4 = vweird.f32 %v4680_v33 }
0x11fa   :  { %v4673_v32 = vpop.xlane.xlu2 %4672 }
0x11fb   :  { %v4677_v26 = vmul.f32 %v4673_v32, %v7222_v10 }
0x11fd   :  { %v6888_v36 = vpop.eup %6887  ;;  %v4681_v24 = vadd.f32 1e-12, %v4677_v26 }
0x11fe   :  { %v4703_v12 = vmul.f32 %v6888_v36, %v4680_v33  ;;  %vm4709_vm3 = vweird.f32 %v6888_v36 }
0x11ff   :  { %6889 = vrsqrt.f32 %v4681_v24  ;;  %vm4710_vm5 = vmor %vm4708_vm4, %vm4709_vm3  ;;  %vm4718_vm7 = vweird.f32 %v4681_v24 }
0x1200   :  { %v4704_v21 = vmul.f32 %v6888_v36, %v4703_v12 }
0x1202   :  { %v4705_v57 = vmul.f32 0.5, %v4704_v21 }
0x1204   :  { %v4706_v3 = vsub.f32 1.5, %v4705_v57 }
0x1205   :  { %v6890_v49 = vpop.eup %6889 }
0x1206   :  { %v4707_v11 = vmul.f32 %v6888_v36, %v4706_v3  ;;  %v4713_v53 = vmul.f32 %v6890_v49, %v4681_v24  ;;  %vm4719_vm6 = vweird.f32 %v6890_v49 }
0x1207   :  { %vm4720_vm8 = vmor %vm4718_vm7, %vm4719_vm6 }
0x1208   :  { %v4714_v27 = vmul.f32 %v6890_v49, %v4713_v53  ;;  %v4711_v29 = vsel %vm4710_vm5, %v6888_v36, %v4707_v11 }
0x1209   :  { %v4724_v16 = vmul.f32 %v4711_v29, %v9397_v61 }
0x120a   :  { %v4715_v55 = vmul.f32 0.5, %v4714_v27 }
0x120b   :  { %v4731_v35 = vmul.f32 %v6716_v4, %v4724_v16 }
0x120c   :  { %v4716_v28 = vsub.f32 1.5, %v4715_v55 }
0x120d   :  { %v4738_v56 = vadd.f32 %v6717_v0, %v4731_v35 }
0x120e   :  { %v4717_v18 = vmul.f32 %v6890_v49, %v4716_v28 }
0x1210   :  { %v4721_v25 = vsel %vm4720_vm8, %v6890_v49, %v4717_v18 }
0x1211   :  { %v4725_v13 = vmul.f32 %v4721_v25, %v9402_v51 }
0x1213   :  { %v4732_v47 = vmul.f32 %v6716_v4, %v4725_v13 }
0x1215   :  { %v4739_v41 = vadd.f32 %v6717_v0, %v4732_v47 }
0x1217   :  { %v4757_v60 = vpack.c.bf16 %v4739_v41, %v4738_v56 }
0x1219   :  { %4823 = vmatmul.bf16.gmra.mxu1 %v4757_v60 }
0x1255   :  { %v4819_v2 = vpop.f32.mrf.mxu1 }
0x1256   :  { %v9424_v61 = vadd.f32 %v9421_v5, %v4819_v2 }
0x1258   :  { %v4833_v52 = vmul.f32 0.70710677, %v9424_v61 }
0x125a   :  { %v4837_v37 = vmul.f32 %v4833_v52, %v4833_v52 }
0x125c   :  { %v4838_v54 = vmin.f32 %v4837_v37, 16.0 }
0x125d   :  { %v4821_v51 = vpop.f32.mrf.mxu1 }
0x125e   :  { %v4839_v22 = vmul.f32 2.1237322e-06, %v4838_v54  ;;  %v9428_v62 = vadd.f32 %v9421_v5, %v4821_v51  ;;  %v4850_v58 = vmul.f32 3.8918573e-05, %v4838_v54 }
0x1260   :  { %v4840_v34 = vadd.f32 0.00028619796, %v4839_v22  ;;  %v9431_v42 = vmul.f32 0.70710677, %v9428_v62  ;;  %v4851_v7 = vadd.f32 0.001143296, %v4850_v58 }
0x1262   :  { %v4841_v9 = vmul.f32 %v4840_v34, %v4838_v54  ;;  %v4877_v46 = vmul.f32 %v9431_v42, %v9431_v42  ;;  %v4852_v45 = vmul.f32 %v4851_v7, %v4838_v54 }
0x1264   :  { %v4878_v40 = vmin.f32 %v4877_v46, 16.0  ;;  %v4853_v63 = vadd.f32 0.014752088, %v4852_v45  ;;  %v4842_v31 = vadd.f32 0.0036580483, %v4841_v9  ;;  %v4829_v9 = vmul.f32 0.5, %v9424_v61 }
0x1266   :  { %v4879_v39 = vmul.f32 2.1237322e-06, %v4878_v40  ;;  %v4890_v17 = vmul.f32 3.8918573e-05, %v4878_v40  ;;  %v4854_v44 = vmul.f32 %v4853_v63, %v4838_v54  ;;  %v4843_v1 = vmul.f32 %v4842_v31, %v4838_v54 }
0x1268   :  { %v4880_v14 = vadd.f32 0.00028619796, %v4879_v39  ;;  %v4891_v23 = vadd.f32 0.001143296, %v4890_v17  ;;  %v4855_v4 = vadd.f32 0.112945676, %v4854_v44 }
0x1269   :  { %v4844_v8 = vadd.f32 0.05243302, %v4843_v1  ;;  %v4830_v44 = vmul.f32 0.5, %v9428_v62 }
0x126a   :  { %v4881_v20 = vmul.f32 %v4880_v14, %v4878_v40  ;;  %v4892_v30 = vmul.f32 %v4891_v23, %v4878_v40  ;;  %v4856_v0 = vmul.f32 %v4855_v4, %v4838_v54 }
0x126b   :  { %v4845_v33 = vmul.f32 %v4844_v8, %v4838_v54 }
0x126c   :  { %v4893_v38 = vadd.f32 0.014752088, %v4892_v30  ;;  %v4882_v48 = vadd.f32 0.0036580483, %v4881_v20  ;;  %v4857_v19 = vadd.f32 0.4994258, %v4856_v0 }
0x126d   :  { %v4846_v24 = vadd.f32 0.18741608, %v4845_v33 }
0x126e   :  { %v4894_v15 = vmul.f32 %v4893_v38, %v4878_v40  ;;  %v4858_v59 = vmul.f32 %v4857_v19, %v4838_v54  ;;  %v4883_v50 = vmul.f32 %v4882_v48, %v4878_v40 }
0x126f   :  { %v4847_v49 = vmul.f32 %v4846_v24, %v4838_v54 }
0x1270   :  { %v4895_v43 = vadd.f32 0.112945676, %v4894_v15  ;;  %v4859_v6 = vadd.f32 1.0, %v4858_v59  ;;  %v4884_v36 = vadd.f32 0.05243302, %v4883_v50 }
0x1271   :  { %v4848_v55 = vadd.f32 1.1283791, %v4847_v49 }
0x1272   :  { %v4896_v32 = vmul.f32 %v4895_v43, %v4878_v40  ;;  %6891 = vrcp.f32 %v4859_v6  ;;  %v4885_v3 = vmul.f32 %v4884_v36, %v4878_v40  ;;  %v4871_v29 = vand.u32 2147483648, %v4859_v6 }
0x1273   :  { %v4869_v16 = vand.u32 2147483647, %v4859_v6  ;;  %vm4865_vm10 = vweird.f32 %v4859_v6  ;;  %v4849_v56 = vmul.f32 %v4848_v55, %v4833_v52 }
0x1274   :  { %v4897_v26 = vadd.f32 0.4994258, %v4896_v32  ;;  %v4886_v27 = vadd.f32 0.18741608, %v4885_v3  ;;  %v4872_v35 = vor.u32 1.1754944e-38, %v4871_v29 }
0x1275   :  { %vm4870_vm12 = vcmp.eq.f32.partialorder %v4869_v16, 8.507059e+37 }
0x1276   :  { %v4898_v12 = vmul.f32 %v4897_v26, %v4878_v40  ;;  %v4887_v13 = vmul.f32 %v4886_v27, %v4878_v40 }
0x1278   :  { %v4899_v21 = vadd.f32 1.0, %v4898_v12  ;;  %v6892_v57 = vpop.eup %6891  ;;  %v4888_v51 = vadd.f32 1.1283791, %v4887_v13 }
0x1279   :  { %v4861_v11 = vmul.f32 %v6892_v57, %v4859_v6  ;;  %vm4866_vm9 = vweird.f32 %v6892_v57 }
0x127a   :  { %6893 = vrcp.f32 %v4899_v21  ;;  %vm4867_vm11 = vmor %vm4865_vm10, %vm4866_vm9  ;;  %v4911_v54 = vand.u32 2147483648, %v4899_v21  ;;  %v4909_v58 = vand.u32 2147483647, %v4899_v21  ;;  %vm4905_vm0 = vweird.f32 %v4899_v21 }
0x127b   :  { %v4862_v53 = vsub.f32 1.0, %v4861_v11  ;;  %v4889_v52 = vmul.f32 %v4888_v51, %v9431_v42 }
0x127c   :  { %v4912_v45 = vor.u32 1.1754944e-38, %v4911_v54  ;;  %vm4910_vm2 = vcmp.eq.f32.partialorder %v4909_v58, 8.507059e+37 }
0x127d   :  { %v4863_v28 = vmul.f32 %v6892_v57, %v4862_v53 }
0x127f   :  { %v4864_v25 = vadd.f32 %v6892_v57, %v4863_v28 }
0x1280   :  { %v6894_v18 = vpop.eup %6893 }
0x1281   :  { %v4901_v47 = vmul.f32 %v6894_v18, %v4899_v21  ;;  %v4868_v41 = vsel %vm4867_vm11, %v6892_v57, %v4864_v25  ;;  %vm4906_vm15 = vweird.f32 %v6894_v18 }
0x1282   :  { %v4873_v60 = vsel %vm4870_vm12, %v4872_v35, %v4868_v41  ;;  %vm4907_vm1 = vmor %vm4905_vm0, %vm4906_vm15 }
0x1283   :  { %v4902_v2 = vsub.f32 1.0, %v4901_v47  ;;  %v4874_v37 = vmul.f32 %v4873_v60, %v4849_v56 }
0x1285   :  { %v4903_v22 = vmul.f32 %v6894_v18, %v4902_v2  ;;  %v6438_v34 = vclamps-f32 %v4874_v37, 1.0 }
0x1287   :  { %v4904_v7 = vadd.f32 %v6894_v18, %v4903_v22  ;;  %v4997_v46 = vadd.f32 1.0, %v6438_v34 }
0x1289   :  { %v4908_v40 = vsel %vm4907_vm1, %v6894_v18, %v4904_v7  ;;  %v9437_v63 = vmul.f32 %v4997_v46, %v4829_v9 }
0x128a   :  { %v4913_v31 = vsel %vm4910_vm2, %v4912_v45, %v4908_v40 }
0x128b   :  { %v4914_v39 = vmul.f32 %v4913_v31, %v4889_v52  ;;  %5007 = vadd.xlane.f32.xlu0 %v9437_v63 }
0x128d   :  { %v6439_v17 = vclamps-f32 %v4914_v39, 1.0 }
0x128f   :  { %v4998_v14 = vadd.f32 1.0, %v6439_v17 }
0x1291   :  { %v9441_v23 = vmul.f32 %v4998_v14, %v4830_v44 }
0x1293   :  { %5009 = vadd.xlane.f32.xlu1 %v9441_v23 }
0x1296   :  { %v4824_v61 = vpop.f32.mrf.mxu1 }
0x1297   :  { %v9445_v4 = vadd.f32 %v9421_v5, %v4824_v61 }
0x1299   :  { %v4835_v42 = vmul.f32 0.70710677, %v9445_v4 }
0x129b   :  { %v4917_v1 = vmul.f32 %v4835_v42, %v4835_v42 }
0x129d   :  { %v4918_v20 = vmin.f32 %v4917_v1, 16.0 }
0x129e   :  { %v4826_v30 = vpop.f32.mrf.mxu1 }
0x129f   :  { %v4919_v0 = vmul.f32 2.1237322e-06, %v4918_v20  ;;  %v9449_v38 = vadd.f32 %v9421_v5, %v4826_v30  ;;  %v4930_v48 = vmul.f32 3.8918573e-05, %v4918_v20 }
0x12a1   :  { %v4920_v62 = vadd.f32 0.00028619796, %v4919_v0  ;;  %v9452_v19 = vmul.f32 0.70710677, %v9449_v38  ;;  %v4931_v8 = vadd.f32 0.001143296, %v4930_v48 }
0x12a3   :  { %v4921_v15 = vmul.f32 %v4920_v62, %v4918_v20  ;;  %v4957_v59 = vmul.f32 %v9452_v19, %v9452_v19  ;;  %v4932_v43 = vmul.f32 %v4931_v8, %v4918_v20 }
0x12a5   :  { %v4958_v50 = vmin.f32 %v4957_v59, 16.0  ;;  %v4933_v6 = vadd.f32 0.014752088, %v4932_v43  ;;  %v4922_v33 = vadd.f32 0.0036580483, %v4921_v15  ;;  %v4831_v59 = vmul.f32 0.5, %v9445_v4 }
0x12a7   :  { %v4959_v32 = vmul.f32 2.1237322e-06, %v4958_v50  ;;  %v4970_v26 = vmul.f32 3.8918573e-05, %v4958_v50  ;;  %v4934_v36 = vmul.f32 %v4933_v6, %v4918_v20  ;;  %v4923_v21 = vmul.f32 %v4922_v33, %v4918_v20 }
0x12a9   :  { %v4960_v24 = vadd.f32 0.00028619796, %v4959_v32  ;;  %v4971_v5 = vadd.f32 0.001143296, %v4970_v26  ;;  %v4935_v12 = vadd.f32 0.112945676, %v4934_v36 }
0x12aa   :  { %v4924_v29 = vadd.f32 0.05243302, %v4923_v21 }
0x12ab   :  { %v4961_v57 = vmul.f32 %v4960_v24, %v4958_v50  ;;  %v4972_v3 = vmul.f32 %v4971_v5, %v4958_v50  ;;  %v4936_v49 = vmul.f32 %v4935_v12, %v4918_v20  ;;  %v4832_v24 = vmul.f32 0.5, %v9449_v38 }
0x12ac   :  { %v4925_v13 = vmul.f32 %v4924_v29, %v4918_v20  ;;  %v5131_v29 = vld [vmem:[#allocation10 + $0xf0] sm:$0xff] }
0x12ad   :  { %v4973_v11 = vadd.f32 0.014752088, %v4972_v3  ;;  %v4962_v53 = vadd.f32 0.0036580483, %v4961_v57  ;;  %v4937_v27 = vadd.f32 0.4994258, %v4936_v49 }
0x12ae   :  { %v4926_v41 = vadd.f32 0.18741608, %v4925_v13  ;;  %v5163_v13 = vld [vmem:[#allocation10 + $0x1f0] sm:$0xff] }
0x12af   :  { %v4974_v55 = vmul.f32 %v4973_v11, %v4958_v50  ;;  %v4938_v28 = vmul.f32 %v4937_v27, %v4918_v20  ;;  %v4963_v18 = vmul.f32 %v4962_v53, %v4958_v50  ;;  %v5115_v53 = vld [vmem:[#allocation10 + $0x70] sm:$0xff]  ;;  %v5116_v27 = vld [vmem:[#allocation10 + $0x78] sm:$0xff] }
0x12b0   :  { %v4927_v51 = vmul.f32 %v4926_v41, %v4918_v20  ;;  %v5129_v41 = vld [vmem:[#allocation10 + $0xe0] sm:$0xff] }
0x12b1   :  { %v4975_v16 = vadd.f32 0.112945676, %v4974_v55  ;;  %v4939_v25 = vadd.f32 1.0, %v4938_v28  ;;  %v4964_v56 = vadd.f32 0.05243302, %v4963_v18  ;;  %v5238_v55 = vpack.c.bf16 %v5116_v27, %v5115_v53  ;;  %v5147_v28 = vld [vmem:[#allocation10 + $0x170] sm:$0xff] }
0x12b2   :  { %v4928_v9 = vadd.f32 1.1283791, %v4927_v51  ;;  %v5162_v51 = vld [vmem:[#allocation10 + $0x1e8] sm:$0xff]  ;;  %v5140_v53 = vld [vmem:[#allocation10 + $0x138] sm:$0xff] }
0x12b3   :  { %v4976_v35 = vmul.f32 %v4975_v16, %v4958_v50  ;;  %6895 = vrcp.f32 %v4939_v25  ;;  %v4965_v54 = vmul.f32 %v4964_v56, %v4958_v50  ;;  %v4951_v7 = vand.u32 2147483648, %v4939_v25  ;;  %v5148_v16 = vld [vmem:[#allocation10 + $0x178] sm:$0xff]  ;;  %5313 = vmatpush.bf16.xpose.msra.mxu2 %v5238_v55  ;;  %v5114_v56 = vld [vmem:[#allocation10 + $0x68] sm:$0xff] }
0x12b4   :  { %v4949_v45 = vand.u32 2147483647, %v4939_v25  ;;  %vm4945_vm14 = vweird.f32 %v4939_v25  ;;  %v4929_v44 = vmul.f32 %v4928_v9, %v4835_v42  ;;  %v5111_v9 = vld [vmem:[#allocation10 + $0x50] sm:$0xff]  ;;  %v5156_v55 = vld [vmem:[#allocation10 + $0x1b8] sm:$0xff] }
0x12b5   :  { %v4977_v47 = vadd.f32 0.4994258, %v4976_v35  ;;  %v4966_v34 = vadd.f32 0.18741608, %v4965_v54  ;;  %v4952_v39 = vor.u32 1.1754944e-38, %v4951_v7  ;;  %v5164_v35 = vld [vmem:[#allocation10 + $0x1f8] sm:$0xff] }
0x12b6   :  { %vm4950_vm4 = vcmp.eq.f32.partialorder %v4949_v45, 8.507059e+37  ;;  %v5161_v54 = vld [vmem:[#allocation10 + $0x1e0] sm:$0xff]  ;;  %v5127_v45 = vld [vmem:[#allocation10 + $0xd0] sm:$0xff] }
0x12b7   :  { %v4978_v60 = vmul.f32 %v4977_v47, %v4958_v50  ;;  %v4967_v31 = vmul.f32 %v4966_v34, %v4958_v50  ;;  %v5262_v47 = vpack.c.bf16 %v5164_v35, %v5163_v13  ;;  %v5261_v7 = vpack.c.bf16 %v5162_v51, %v5161_v54  ;;  %v5121_v13 = vld [vmem:[#allocation10 + $0xa0] sm:$0xff] }
0x12b9   :  { %v4979_v2 = vadd.f32 1.0, %v4978_v60  ;;  %v6896_v37 = vpop.eup %6895  ;;  %v4968_v0 = vadd.f32 1.1283791, %v4967_v31  ;;  %5370 = vmatpush.bf16.xpose.msra.mxu1 %v5262_v47  ;;  %v5130_v60 = vld [vmem:[#allocation10 + $0xe8] sm:$0xff]  ;;  %v5144_v31 = vld [vmem:[#allocation10 + $0x158] sm:$0xff] }
0x12ba   :  { %v4941_v22 = vmul.f32 %v6896_v37, %v4939_v25  ;;  %vm4946_vm13 = vweird.f32 %v6896_v37  ;;  %v5254_v25 = vpack.c.bf16 %v5148_v16, %v5147_v28  ;;  %v5122_v47 = vld [vmem:[#allocation10 + $0xa8] sm:$0xff] }
0x12bb   :  { %6897 = vrcp.f32 %v4979_v2  ;;  %vm4947_vm3 = vmor %vm4945_vm14, %vm4946_vm13  ;;  %v4991_v30 = vand.u32 2147483648, %v4979_v2  ;;  %v4989_v62 = vand.u32 2147483647, %v4979_v2  ;;  %vm4985_vm6 = vweird.f32 %v4979_v2 }
0x12bc   :  { %v4942_v58 = vsub.f32 1.0, %v4941_v22  ;;  %v4969_v42 = vmul.f32 %v4968_v0, %v9452_v19  ;;  %5351 = vmatpush.bf16.xpose.msra.mxu0 %v5254_v25  ;;  %v5109_v0 = vld [vmem:[#allocation10 + $0x40] sm:$0xff]  ;;  %v5106_v25 = vld [vmem:[#allocation10 + $0x28] sm:$0xff] }
0x12bd   :  { %v4992_v50 = vor.u32 1.1754944e-38, %v4991_v30  ;;  %vm4990_vm8 = vcmp.eq.f32.partialorder %v4989_v62, 8.507059e+37  ;;  %v5125_v62 = vld [vmem:[#allocation10 + $0xc0] sm:$0xff] }
0x12be   :  { %v4943_v46 = vmul.f32 %v6896_v37, %v4942_v58  ;;  %v5245_v58 = vpack.c.bf16 %v5130_v60, %v5129_v41  ;;  %v5241_v41 = vpack.c.bf16 %v5122_v47, %v5121_v13  ;;  %v5178_v13 = vld [vmem:[#allocation10 + $0x268] sm:$0xff] }
0x12c0   :  { %v4944_v40 = vadd.f32 %v6896_v37, %v4943_v46  ;;  %v5112_v46 = vld [vmem:[#allocation10 + $0x58] sm:$0xff] }
0x12c1   :  { %v6898_v52 = vpop.eup %6897  ;;  %5371 = vmatpush.bf16.xpose.msra.mxu1 %v5261_v7  ;;  %v5104_v7 = vld [vmem:[#allocation10 + $0x18] sm:$0xff] }
0x12c2   :  { %v4981_v17 = vmul.f32 %v6898_v52, %v4979_v2  ;;  %v4948_v14 = vsel %vm4947_vm3, %v6896_v37, %v4944_v40  ;;  %vm4986_vm5 = vweird.f32 %v6898_v52  ;;  %v5145_v2 = vld [vmem:[#allocation10 + $0x160] sm:$0xff]  ;;  %v5146_v37 = vld [vmem:[#allocation10 + $0x168] sm:$0xff]  ;;  %v5143_v40 = vld [vmem:[#allocation10 + $0x150] sm:$0xff] }
0x12c3   :  { %v4953_v61 = vsel %vm4950_vm4, %v4952_v39, %v4948_v14  ;;  %vm4987_vm7 = vmor %vm4985_vm6, %vm4986_vm5  ;;  %v5253_v34 = vpack.c.bf16 %v5146_v37, %v5145_v2  ;;  %v5159_v39 = vld [vmem:[#allocation10 + $0x1d0] sm:$0xff]  ;;  %v5153_v2 = vld [vmem:[#allocation10 + $0x1a0] sm:$0xff] }
0x12c4   :  { %v4982_v1 = vsub.f32 1.0, %v4981_v17  ;;  %v4954_v20 = vmul.f32 %v4953_v61, %v4929_v44  ;;  %v5160_v17 = vld [vmem:[#allocation10 + $0x1d8] sm:$0xff]  ;;  %v5236_v44 = vpack.c.bf16 %v5112_v46, %v5111_v9  ;;  %v5252_v61 = vpack.c.bf16 %v5144_v31, %v5143_v40  ;;  %v5154_v37 = vld [vmem:[#allocation10 + $0x1a8] sm:$0xff]  ;;  %v5119_v9 = vld [vmem:[#allocation10 + $0x90] sm:$0xff] }
0x12c5   :  { %5352 = vmatpush.bf16.xpose.msra.mxu0 %v5253_v34  ;;  %v5257_v54 = vpack.c.bf16 %v5154_v37, %v5153_v2  ;;  %v5103_v34 = vld [vmem:[#allocation10 + $0x10] sm:$0xff]  ;;  %v5136_v40 = vld [vmem:[#allocation10 + $0x118] sm:$0xff]  ;;  %v5225_v2 = vld [vmem:[#allocation10 + $0x3e0] sm:$0xff] }
0x12c6   :  { %v4983_v48 = vmul.f32 %v6898_v52, %v4982_v1  ;;  %v6440_v8 = vclamps-f32 %v4954_v20, 1.0  ;;  %v5260_v1 = vpack.c.bf16 %v5160_v17, %v5159_v39  ;;  %v5232_v46 = vpack.c.bf16 %v5104_v7, %v5103_v34  ;;  %v5151_v17 = vld [vmem:[#allocation10 + $0x190] sm:$0xff]  ;;  %v5226_v37 = vld [vmem:[#allocation10 + $0x3e8] sm:$0xff] }
0x12c8   :  { %v4984_v15 = vadd.f32 %v6898_v52, %v4983_v48  ;;  %v4999_v43 = vadd.f32 1.0, %v6440_v8  ;;  %v5110_v48 = vld [vmem:[#allocation10 + $0x48] sm:$0xff] }
0x12c9   :  { %5372 = vmatpush.bf16.xpose.msra.mxu1 %v5260_v1  ;;  %v5101_v1 = vld [vmem:[#allocation10] sm:$0xff] }
0x12ca   :  { %v4988_v6 = vsel %vm4987_vm7, %v6898_v52, %v4984_v15  ;;  %v9458_v33 = vmul.f32 %v4999_v43, %v4831_v59  ;;  %v5128_v52 = vld [vmem:[#allocation10 + $0xd8] sm:$0xff]  ;;  %v5126_v15 = vld [vmem:[#allocation10 + $0xc8] sm:$0xff]  ;;  %v5141_v59 = vld [vmem:[#allocation10 + $0x140] sm:$0xff] }
0x12cb   :  { %v4993_v32 = vsel %vm4990_vm8, %v4992_v50, %v4988_v6  ;;  %v5244_v14 = vpack.c.bf16 %v5128_v52, %v5127_v45  ;;  %v5142_v43 = vld [vmem:[#allocation10 + $0x148] sm:$0xff]  ;;  %v5157_v50 = vld [vmem:[#allocation10 + $0x1c0] sm:$0xff]  ;;  %v5120_v45 = vld [vmem:[#allocation10 + $0x98] sm:$0xff] }
0x12cc   :  { %v4994_v26 = vmul.f32 %v4993_v32, %v4969_v42  ;;  %5011 = vadd.xlane.f32.xlu2 %v9458_v33  ;;  %v5158_v42 = vld [vmem:[#allocation10 + $0x1c8] sm:$0xff]  ;;  %v5235_v32 = vpack.c.bf16 %v5110_v48, %v5109_v0  ;;  %v5135_v52 = vld [vmem:[#allocation10 + $0x110] sm:$0xff]  ;;  %v5240_v31 = vpack.c.bf16 %v5120_v45, %v5119_v9  ;;  %v5117_v0 = vld [vmem:[#allocation10 + $0x80] sm:$0xff] }
0x12cd   :  { %5353 = vmatpush.bf16.xpose.msra.mxu0 %v5252_v61  ;;  %v5248_v39 = vpack.c.bf16 %v5136_v40, %v5135_v52  ;;  %v5118_v48 = vld [vmem:[#allocation10 + $0x88] sm:$0xff]  ;;  %v9499_v52 = vld [vmem:[%s9554_s17] ss:$0 sm:$0xff] }
0x12ce   :  { %v6441_v36 = vclamps-f32 %v4994_v26, 1.0  ;;  %v5243_v26 = vpack.c.bf16 %v5126_v15, %v5125_v62  ;;  %v5133_v62 = vld [vmem:[#allocation10 + $0x100] sm:$0xff]  ;;  %v5134_v15 = vld [vmem:[#allocation10 + $0x108] sm:$0xff] }
0x12d0   :  { %v5000_v5 = vadd.f32 1.0, %v6441_v36  ;;  %v5251_v36 = vpack.c.bf16 %v5142_v43, %v5141_v59  ;;  %v5149_v59 = vld [vmem:[#allocation10 + $0x180] sm:$0xff]  ;;  %v5150_v43 = vld [vmem:[#allocation10 + $0x188] sm:$0xff] }
0x12d2   :  { %v9462_v12 = vmul.f32 %v5000_v5, %v4832_v24  ;;  %v5259_v5 = vpack.c.bf16 %v5158_v42, %v5157_v50  ;;  %v5179_v42 = vld [vmem:[#allocation10 + $0x270] sm:$0xff] }
0x12d4   :  { %5013 = vadd.xlane.f32.xlu0 %v9462_v12  ;;  %5373 = vmatpush.bf16.xpose.msra.mxu1 %v5259_v5  ;;  %v5211_v5 = vld [vmem:[#allocation10 + $0x370] sm:$0xff] }
0x12d5   :  { %5354 = vmatpush.bf16.xpose.msra.mxu0 %v5251_v36 }
0x12fe   :  { %v5008_v4 = vpop.xlane.xlu0 %5007 }
0x12ff   :  { %v5015_v21 = vmul.f32 %v5008_v4, %v7222_v10 }
0x1301   :  { %v9467_v19 = vsub.f32 %v9437_v63, %v5015_v21  ;;  %v5132_v63 = vld [vmem:[#allocation10 + $0xf8] sm:$0xff]  ;;  %v5107_v21 = vld [vmem:[#allocation10 + $0x30] sm:$0xff] }
0x1302   :  { %v5246_v18 = vpack.c.bf16 %v5132_v63, %v5131_v29  ;;  %v5155_v29 = vld [vmem:[#allocation10 + $0x1b0] sm:$0xff] }
0x1303   :  { %v5023_v57 = vmul.f32 %v9467_v19, %v9467_v19 }
0x1304   :  { %5332 = vmatpush.bf16.xpose.msra.mxu3 %v5246_v18  ;;  %v5105_v18 = vld [vmem:[#allocation10 + $0x20] sm:$0xff] }
0x1305   :  { %5027 = vadd.xlane.f32.xlu1 %v5023_v57  ;;  %v5108_v57 = vld [vmem:[#allocation10 + $0x38] sm:$0xff]  ;;  %v5233_v35 = vpack.c.bf16 %v5106_v25, %v5105_v18  ;;  %v5177_v25 = vld [vmem:[#allocation10 + $0x260] sm:$0xff] }
0x1306   :  { %v5010_v3 = vpop.xlane.xlu1 %5009  ;;  %v5234_v63 = vpack.c.bf16 %v5108_v57, %v5107_v21  ;;  %v5239_v57 = vpack.c.bf16 %v5118_v48, %v5117_v0  ;;  %v5191_v0 = vld [vmem:[#allocation10 + $0x2d0] sm:$0xff] }
0x1307   :  { %v5016_v49 = vmul.f32 %v5010_v3, %v7222_v10  ;;  %v5123_v3 = vld [vmem:[#allocation10 + $0xb0] sm:$0xff] }
0x1309   :  { %v9473_v38 = vsub.f32 %v9441_v23, %v5016_v49  ;;  %v5113_v23 = vld [vmem:[#allocation10 + $0x60] sm:$0xff]  ;;  %v5124_v49 = vld [vmem:[#allocation10 + $0xb8] sm:$0xff] }
0x130a   :  { %v5237_v22 = vpack.c.bf16 %v5114_v56, %v5113_v23  ;;  %v5242_v28 = vpack.c.bf16 %v5124_v49, %v5123_v3  ;;  %v5137_v23 = vld [vmem:[#allocation10 + $0x120] sm:$0xff]  ;;  %v5138_v56 = vld [vmem:[#allocation10 + $0x128] sm:$0xff]  ;;  %v5247_v3 = vpack.c.bf16 %v5134_v15, %v5133_v62  ;;  %v5227_v49 = vld [vmem:[#allocation10 + $0x3f0] sm:$0xff] }
0x130b   :  { %v5024_v11 = vmul.f32 %v9473_v38, %v9473_v38  ;;  %v5249_v60 = vpack.c.bf16 %v5138_v56, %v5137_v23  ;;  %v5194_v23 = vld [vmem:[#allocation10 + $0x2e8] sm:$0xff]  ;;  %v5209_v56 = vld [vmem:[#allocation10 + $0x360] sm:$0xff]  ;;  %v5192_v62 = vld [vmem:[#allocation10 + $0x2d8] sm:$0xff] }
0x130c   :  { %5314 = vmatpush.bf16.xpose.msra.mxu2 %v5237_v22  ;;  %5333 = vmatpush.bf16.xpose.msra.mxu3 %v5245_v58  ;;  %v5207_v15 = vld [vmem:[#allocation10 + $0x350] sm:$0xff] }
0x130d   :  { %5029 = vadd.xlane.f32.xlu2 %v5024_v11  ;;  %v5139_v11 = vld [vmem:[#allocation10 + $0x130] sm:$0xff] }
0x130e   :  { %v5250_v16 = vpack.c.bf16 %v5140_v53, %v5139_v11  ;;  %v5228_v11 = vld [vmem:[#allocation10 + $0x3f8] sm:$0xff]  ;;  %v5255_v53 = vpack.c.bf16 %v5150_v43, %v5149_v59 }
0x130f   :  { %v5208_v59 = vld [vmem:[#allocation10 + $0x358] sm:$0xff] }
0x1310   :  { %5355 = vmatpush.bf16.xpose.msra.mxu0 %v5250_v16  ;;  %v5284_v43 = vpack.c.bf16 %v5208_v59, %v5207_v15  ;;  %v5216_v15 = vld [vmem:[#allocation10 + $0x398] sm:$0xff] }
0x1314   :  { %5315 = vmatpush.bf16.xpose.msra.mxu2 %v5236_v44  ;;  %5334 = vmatpush.bf16.xpose.msra.mxu3 %v5244_v14  ;;  %v5152_v44 = vld [vmem:[#allocation10 + $0x198] sm:$0xff] }
0x1315   :  { %v5256_v61 = vpack.c.bf16 %v5152_v44, %v5151_v17 }
0x1318   :  { %5356 = vmatpush.bf16.xpose.msra.mxu0 %v5249_v60 }
0x131c   :  { %5316 = vmatpush.bf16.xpose.msra.mxu2 %v5235_v32  ;;  %5335 = vmatpush.bf16.xpose.msra.mxu3 %v5243_v26  ;;  %v5195_v32 = vld [vmem:[#allocation10 + $0x2f0] sm:$0xff] }
0x1320   :  { %5357 = vmatpush.bf16.xpose.msra.mxu0 %v5248_v39  ;;  %v9505_v39 = vld [vmem:[%s9555_s18] ss:$0 sm:$0xff] }
0x1324   :  { %5317 = vmatpush.bf16.xpose.msra.mxu2 %v5234_v63  ;;  %5336 = vmatpush.bf16.xpose.msra.mxu3 %v5242_v28  ;;  %v5294_v28 = vpack.c.bf16 %v5228_v11, %v5227_v49  ;;  %v5221_v49 = vld [vmem:[#allocation10 + $0x3c0] sm:$0xff]  ;;  %v5222_v11 = vld [vmem:[#allocation10 + $0x3c8] sm:$0xff] }
0x1328   :  { %5358 = vmatpush.bf16.xpose.msra.mxu0 %v5247_v3 }
0x132c   :  { %5318 = vmatpush.bf16.xpose.msra.mxu2 %v5233_v35  ;;  %5337 = vmatpush.bf16.xpose.msra.mxu3 %v5241_v41  ;;  %v5193_v35 = vld [vmem:[#allocation10 + $0x2e0] sm:$0xff]  ;;  %v5210_v41 = vld [vmem:[#allocation10 + $0x368] sm:$0xff] }
0x132d   :  { %v5285_v34 = vpack.c.bf16 %v5210_v41, %v5209_v56  ;;  %v5170_v56 = vld [vmem:[#allocation10 + $0x228] sm:$0xff]  ;;  %v5185_v41 = vld [vmem:[#allocation10 + $0x2a0] sm:$0xff] }
0x1334   :  { %5319 = vmatpush.bf16.xpose.msra.mxu2 %v5232_v46  ;;  %5338 = vmatpush.bf16.xpose.msra.mxu3 %v5240_v31  ;;  %v5293_v46 = vpack.c.bf16 %v5226_v37, %v5225_v2  ;;  %v5186_v2 = vld [vmem:[#allocation10 + $0x2a8] sm:$0xff]  ;;  %v5201_v37 = vld [vmem:[#allocation10 + $0x320] sm:$0xff] }
0x133c   :  { %5339 = vmatpush.bf16.xpose.msra.mxu3 %v5239_v57 }
0x133f   :  { %v5012_v20 = vpop.xlane.xlu2 %5011 }
0x1340   :  { %v5017_v30 = vmul.f32 %v5012_v20, %v7222_v10  ;;  %v5102_v20 = vld [vmem:[#allocation10 + $0x8] sm:$0xff] }
0x1341   :  { %v5231_v36 = vpack.c.bf16 %v5102_v20, %v5101_v1  ;;  %v5175_v20 = vld [vmem:[#allocation10 + $0x250] sm:$0xff] }
0x1342   :  { %v9479_v8 = vsub.f32 %v9458_v33, %v5017_v30 }
0x1343   :  { %5320 = vmatpush.bf16.xpose.msra.mxu2 %v5231_v36  ;;  %v5189_v36 = vld [vmem:[#allocation10 + $0x2c0] sm:$0xff] }
0x1344   :  { %v5025_v6 = vmul.f32 %v9479_v8, %v9479_v8 }
0x1346   :  { %5031 = vadd.xlane.f32.xlu0 %v5025_v6  ;;  %v5180_v6 = vld [vmem:[#allocation10 + $0x278] sm:$0xff] }
0x1347   :  { %v5014_v24 = vpop.xlane.xlu0 %5013 }
0x1348   :  { %v5018_v4 = vmul.f32 %v5014_v24, %v7222_v10  ;;  %v5196_v24 = vld [vmem:[#allocation10 + $0x2f8] sm:$0xff] }
0x134a   :  { %v9485_v33 = vsub.f32 %v9462_v12, %v5018_v4  ;;  %v5258_v12 = vpack.c.bf16 %v5156_v55, %v5155_v29  ;;  %v5212_v4 = vld [vmem:[#allocation10 + $0x378] sm:$0xff]  ;;  %v5278_v55 = vpack.c.bf16 %v5196_v24, %v5195_v32  ;;  %v5173_v32 = vld [vmem:[#allocation10 + $0x240] sm:$0xff] }
0x134b   :  { %v5286_v63 = vpack.c.bf16 %v5212_v4, %v5211_v5  ;;  %v5190_v5 = vld [vmem:[#allocation10 + $0x2c8] sm:$0xff]  ;;  %v5205_v4 = vld [vmem:[#allocation10 + $0x340] sm:$0xff] }
0x134c   :  { %v5026_v27 = vmul.f32 %v9485_v33, %v9485_v33  ;;  %5374 = vmatpush.bf16.xpose.msra.mxu1 %v5258_v12  ;;  %5408 = vmatpush.bf16.xpose.msrb.mxu3 %v5278_v55  ;;  %v5275_v57 = vpack.c.bf16 %v5190_v5, %v5189_v36  ;;  %v5187_v55 = vld [vmem:[#allocation10 + $0x2b0] sm:$0xff]  ;;  %v5214_v5 = vld [vmem:[#allocation10 + $0x388] sm:$0xff] }
0x134d   :  { %5427 = vmatpush.bf16.xpose.msrb.mxu0 %v5286_v63 }
0x134e   :  { %5033 = vadd.xlane.f32.xlu1 %v5026_v27  ;;  %v5270_v27 = vpack.c.bf16 %v5180_v6, %v5179_v42  ;;  %v5224_v42 = vld [vmem:[#allocation10 + $0x3d8] sm:$0xff] }
0x1350   :  { %5389 = vmatpush.bf16.xpose.msrb.mxu2 %v5270_v27  ;;  %v5171_v27 = vld [vmem:[#allocation10 + $0x230] sm:$0xff] }
0x1354   :  { %5375 = vmatpush.bf16.xpose.msra.mxu1 %v5257_v54 }
0x1355   :  { %5428 = vmatpush.bf16.xpose.msrb.mxu0 %v5285_v34 }
0x135c   :  { %5376 = vmatpush.bf16.xpose.msra.mxu1 %v5256_v61 }
0x135d   :  { %5429 = vmatpush.bf16.xpose.msrb.mxu0 %v5284_v43  ;;  %v5165_v43 = vld [vmem:[#allocation10 + $0x200] sm:$0xff] }
0x1364   :  { %5377 = vmatpush.bf16.xpose.msra.mxu1 %v5255_v53  ;;  %v5291_v53 = vpack.c.bf16 %v5222_v11, %v5221_v49 }
0x136c   :  { %5446 = vmatpush.bf16.xpose.msrb.mxu1 %v5294_v28  ;;  %v5188_v28 = vld [vmem:[#allocation10 + $0x2b8] sm:$0xff] }
0x1374   :  { %5447 = vmatpush.bf16.xpose.msrb.mxu1 %v5293_v46 }
0x1378   :  { %v5028_v51 = vpop.xlane.xlu1 %5027 }
0x1379   :  { %v5035_v22 = vmul.f32 %v5028_v51, %v7222_v10  ;;  %v5269_v51 = vpack.c.bf16 %v5178_v13, %v5177_v25  ;;  %v5219_v13 = vld [vmem:[#allocation10 + $0x3b0] sm:$0xff] }
0x137b   :  { %v9490_v58 = vadd.f32 1e-12, %v5035_v22  ;;  %v5277_v22 = vpack.c.bf16 %v5194_v23, %v5193_v35  ;;  %5390 = vmatpush.bf16.xpose.msrb.mxu2 %v5269_v51  ;;  %v5220_v35 = vld [vmem:[#allocation10 + $0x3b8] sm:$0xff]  ;;  %v5169_v23 = vld [vmem:[#allocation10 + $0x220] sm:$0xff] }
0x137d   :  { %6899 = vrsqrt.f32 %v9490_v58  ;;  %vm5049_vm10 = vweird.f32 %v9490_v58  ;;  %5409 = vmatpush.bf16.xpose.msrb.mxu3 %v5277_v22  ;;  %v5273_v22 = vpack.c.bf16 %v5186_v2, %v5185_v41 }
0x1380   :  { %v5030_v14 = vpop.xlane.xlu2 %5029 }
0x1381   :  { %v5036_v30 = vmul.f32 %v5030_v14, %v7222_v10 }
0x1383   :  { %v5040_v50 = vadd.f32 1e-12, %v5036_v30  ;;  %v6900_v26 = vpop.eup %6899  ;;  %v5176_v30 = vld [vmem:[#allocation10 + $0x258] sm:$0xff] }
0x1384   :  { %v5044_v21 = vmul.f32 %v6900_v26, %v9490_v58  ;;  %vm5050_vm9 = vweird.f32 %v6900_v26  ;;  %v5268_v48 = vpack.c.bf16 %v5176_v30, %v5175_v20  ;;  %v5200_v20 = vld [vmem:[#allocation10 + $0x318] sm:$0xff] }
0x1385   :  { %6901 = vrsqrt.f32 %v5040_v50  ;;  %vm5051_vm11 = vmor %vm5049_vm10, %vm5050_vm9  ;;  %vm5059_vm15 = vweird.f32 %v5040_v50 }
0x1386   :  { %v5045_v29 = vmul.f32 %v6900_v26, %v5044_v21  ;;  %5391 = vmatpush.bf16.xpose.msrb.mxu2 %v5268_v48  ;;  %v5206_v21 = vld [vmem:[#allocation10 + $0x348] sm:$0xff] }
0x1387   :  { %v5283_v3 = vpack.c.bf16 %v5206_v21, %v5205_v4 }
0x1388   :  { %v5046_v16 = vmul.f32 0.5, %v5045_v29  ;;  %v5172_v29 = vld [vmem:[#allocation10 + $0x238] sm:$0xff] }
0x1389   :  { %5430 = vmatpush.bf16.xpose.msrb.mxu0 %v5283_v3  ;;  %v5266_v63 = vpack.c.bf16 %v5172_v29, %v5171_v27 }
0x138a   :  { %v5047_v18 = vsub.f32 1.5, %v5046_v16  ;;  %v5203_v16 = vld [vmem:[#allocation10 + $0x330] sm:$0xff] }
0x138b   :  { %v6902_v12 = vpop.eup %6901 }
0x138c   :  { %v5054_v47 = vmul.f32 %v6902_v12, %v5040_v50  ;;  %v5048_v60 = vmul.f32 %v6900_v26, %v5047_v18  ;;  %vm5060_vm12 = vweird.f32 %v6902_v12  ;;  %v5223_v50 = vld [vmem:[#allocation10 + $0x3d0] sm:$0xff]  ;;  %v5274_v18 = vpack.c.bf16 %v5188_v28, %v5187_v55 }
0x138d   :  { %vm5061_vm0 = vmor %vm5059_vm15, %vm5060_vm12  ;;  %v5292_v6 = vpack.c.bf16 %v5224_v42, %v5223_v50  ;;  %v5166_v50 = vld [vmem:[#allocation10 + $0x208] sm:$0xff] }
0x138e   :  { %v5055_v54 = vmul.f32 %v6902_v12, %v5054_v47  ;;  %v5052_v7 = vsel %vm5051_vm11, %v6900_v26, %v5048_v60  ;;  %v5174_v26 = vld [vmem:[#allocation10 + $0x248] sm:$0xff]  ;;  %v5290_v47 = vpack.c.bf16 %v5220_v35, %v5219_v13  ;;  %v5265_v60 = vpack.c.bf16 %v5170_v56, %v5169_v23 }
0x138f   :  { %v5083_v40 = vmul.f32 %v5052_v7, %v9467_v19  ;;  %5448 = vmatpush.bf16.xpose.msrb.mxu1 %v5292_v6  ;;  %v5267_v24 = vpack.c.bf16 %v5174_v26, %v5173_v32  ;;  %v5217_v7 = vld [vmem:[#allocation10 + $0x3a0] sm:$0xff]  ;;  %v5182_v32 = vld [vmem:[#allocation10 + $0x288] sm:$0xff]  ;;  %v5263_v21 = vpack.c.bf16 %v5166_v50, %v5165_v43 }
0x1390   :  { %v5056_v9 = vmul.f32 0.5, %v5055_v54  ;;  %v5202_v54 = vld [vmem:[#allocation10 + $0x328] sm:$0xff]  ;;  %v5181_v6 = vld [vmem:[#allocation10 + $0x280] sm:$0xff] }
0x1391   :  { %v5090_v17 = vmul.f32 %v9499_v52, %v5083_v40  ;;  %5392 = vmatpush.bf16.xpose.msrb.mxu2 %v5267_v24  ;;  %v5281_v34 = vpack.c.bf16 %v5202_v54, %v5201_v37  ;;  %v5197_v26 = vld [vmem:[#allocation10 + $0x300] sm:$0xff]  ;;  %v5198_v24 = vld [vmem:[#allocation10 + $0x308] sm:$0xff] }
0x1392   :  { %v5057_v45 = vsub.f32 1.5, %v5056_v9  ;;  %v5218_v9 = vld [vmem:[#allocation10 + $0x3a8] sm:$0xff]  ;;  %v5279_v3 = vpack.c.bf16 %v5198_v24, %v5197_v26 }
0x1393   :  { %v5097_v19 = vadd.f32 %v9505_v39, %v5090_v17  ;;  %v5183_v17 = vld [vmem:[#allocation10 + $0x290] sm:$0xff] }
0x1394   :  { %v5058_v58 = vmul.f32 %v6902_v12, %v5057_v45  ;;  %v5289_v45 = vpack.c.bf16 %v5218_v9, %v5217_v7 }
0x1396   :  { %v5062_v31 = vsel %vm5061_vm0, %v6902_v12, %v5058_v58  ;;  %v5204_v12 = vld [vmem:[#allocation10 + $0x338] sm:$0xff]  ;;  %v5167_v58 = vld [vmem:[#allocation10 + $0x210] sm:$0xff] }
0x1397   :  { %v5084_v44 = vmul.f32 %v5062_v31, %v9473_v38  ;;  %v5276_v38 = vpack.c.bf16 %v5192_v62, %v5191_v0  ;;  %5449 = vmatpush.bf16.xpose.msrb.mxu1 %v5291_v53  ;;  %v5282_v25 = vpack.c.bf16 %v5204_v12, %v5203_v16  ;;  %v5168_v31 = vld [vmem:[#allocation10 + $0x218] sm:$0xff]  ;;  %v5215_v62 = vld [vmem:[#allocation10 + $0x390] sm:$0xff] }
0x1398   :  { %v5288_v59 = vpack.c.bf16 %v5216_v15, %v5215_v62 }
0x1399   :  { %v5091_v14 = vmul.f32 %v9499_v52, %v5084_v44  ;;  %5410 = vmatpush.bf16.xpose.msrb.mxu3 %v5276_v38  ;;  %5393 = vmatpush.bf16.xpose.msrb.mxu2 %v5266_v63 }
0x139a   :  { %5431 = vmatpush.bf16.xpose.msrb.mxu0 %v5282_v25 }
0x139b   :  { %v5098_v61 = vadd.f32 %v9505_v39, %v5091_v14  ;;  %v5264_v14 = vpack.c.bf16 %v5168_v31, %v5167_v58 }
0x139d   :  { %v9512_v1 = vpack.c.bf16 %v5098_v61, %v5097_v19  ;;  %v5184_v19 = vld [vmem:[#allocation10 + $0x298] sm:$0xff]  ;;  %v5199_v61 = vld [vmem:[#allocation10 + $0x310] sm:$0xff] }
0x139e   :  { %v5272_v0 = vpack.c.bf16 %v5184_v19, %v5183_v17  ;;  %v5280_v48 = vpack.c.bf16 %v5200_v20, %v5199_v61 }
0x139f   :  { %5321 = vmatmul.bf16.vlgmr.msra.gmra.mxu2 %v9512_v1  ;;  %5340 = vmatmul.bf16.vlgmr.msra.gmra.mxu3 %v9512_v1 }
0x13a0   :  { %5359 = vmatmul.bf16.vlgmr.msra.gmra.mxu0 %v9512_v1  ;;  %5378 = vmatmul.bf16.vlgmr.msra.gmra.mxu1 %v9512_v1 }
0x13a1   :  { %5411 = vmatpush.bf16.xpose.msrb.mxu3 %v5275_v57  ;;  %5450 = vmatpush.bf16.xpose.msrb.mxu1 %v5290_v47  ;;  %v5271_v57 = vpack.c.bf16 %v5182_v32, %v5181_v6 }
0x13a2   :  { %5394 = vmatpush.bf16.xpose.msrb.mxu2 %v5265_v60  ;;  %5432 = vmatpush.bf16.xpose.msrb.mxu0 %v5281_v34 }
0x13a9   :  { %5412 = vmatpush.bf16.xpose.msrb.mxu3 %v5274_v18  ;;  %5451 = vmatpush.bf16.xpose.msrb.mxu1 %v5289_v45 }
0x13aa   :  { %5395 = vmatpush.bf16.xpose.msrb.mxu2 %v5264_v14  ;;  %5433 = vmatpush.bf16.xpose.msrb.mxu0 %v5280_v48 }
0x13b1   :  { %5413 = vmatpush.bf16.xpose.msrb.mxu3 %v5273_v22  ;;  %5452 = vmatpush.bf16.xpose.msrb.mxu1 %v5288_v59 }
0x13b2   :  { %5396 = vmatpush.bf16.xpose.msrb.mxu2 %v5263_v21  ;;  %5434 = vmatpush.bf16.xpose.msrb.mxu0 %v5279_v3 }
0x13b9   :  { %v5032_v51 = vpop.xlane.xlu0 %5031  ;;  %5414 = vmatpush.bf16.xpose.msrb.mxu3 %v5272_v0 }
0x13ba   :  { %v5037_v46 = vmul.f32 %v5032_v51, %v7222_v10 }
0x13bc   :  { %v5041_v40 = vadd.f32 1e-12, %v5037_v46 }
0x13be   :  { %6903 = vrsqrt.f32 %v5041_v40  ;;  %vm5069_vm2 = vweird.f32 %v5041_v40 }
0x13c1   :  { %v5034_v44 = vpop.xlane.xlu1 %5033  ;;  %5415 = vmatpush.bf16.xpose.msrb.mxu3 %v5271_v57 }
0x13c2   :  { %v5038_v30 = vmul.f32 %v5034_v44, %v7222_v10  ;;  %v5213_v10 = vld [vmem:[#allocation10 + $0x380] sm:$0xff] }
0x13c3   :  { %v5287_v49 = vpack.c.bf16 %v5214_v5, %v5213_v10 }
0x13c4   :  { %v5042_v38 = vadd.f32 1e-12, %v5038_v30  ;;  %v6904_v42 = vpop.eup %6903 }
0x13c5   :  { %v5064_v36 = vmul.f32 %v6904_v42, %v5041_v40  ;;  %vm5070_vm1 = vweird.f32 %v6904_v42  ;;  %5453 = vmatpush.bf16.xpose.msrb.mxu1 %v5287_v49 }
0x13c6   :  { %6905 = vrsqrt.f32 %v5042_v38  ;;  %vm5071_vm13 = vmor %vm5069_vm2, %vm5070_vm1  ;;  %vm5079_vm3 = vweird.f32 %v5042_v38 }
0x13c7   :  { %v5065_v4 = vmul.f32 %v6904_v42, %v5064_v36 }
0x13c9   :  { %v5066_v11 = vmul.f32 0.5, %v5065_v4 }
0x13cb   :  { %v5067_v27 = vsub.f32 1.5, %v5066_v11 }
0x13cc   :  { %v6906_v53 = vpop.eup %6905 }
0x13cd   :  { %v5074_v29 = vmul.f32 %v6906_v53, %v5042_v38  ;;  %v5068_v55 = vmul.f32 %v6904_v42, %v5067_v27  ;;  %vm5080_vm14 = vweird.f32 %v6906_v53 }
0x13ce   :  { %vm5081_vm4 = vmor %vm5079_vm3, %vm5080_vm14 }
0x13cf   :  { %v5075_v63 = vmul.f32 %v6906_v53, %v5074_v29  ;;  %v5072_v28 = vsel %vm5071_vm13, %v6904_v42, %v5068_v55 }
0x13d0   :  { %v5085_v18 = vmul.f32 %v5072_v28, %v9479_v8  ;;  %v5295_v8 = vld [vmem:[%s9557_s20] sm:$0xff]  ;;  %s7071_s20 = smov [#allocation11]  }
0x13d1   :  { %v5076_v16 = vmul.f32 0.5, %v5075_v63  ;;  %v5297_v51 = vperm.slane %v5295_v8, 0  ;;  %v5298_v22 = vperm.slane %v5295_v8, 1  ;;  %v5303_v32 = vperm.slane %v5295_v8, 6  ;;  %s5501_s25 = sshll.u32 %s7071_s20, 4  ;;  %s5502_s25 = int_to_ptr.vmem [resolvable:$true] %s5501_s25 }
0x13d2   :  { %v5092_v35 = vmul.f32 %v9499_v52, %v5085_v18  ;;  %v5304_v26 = vperm.slane %v5295_v8, 7  ;;  %v5301_v57 = vperm.slane %v5295_v8, 4  ;;  %v5302_v3 = vperm.slane %v5295_v8, 5 }
0x13d3   :  { %v5077_v12 = vsub.f32 1.5, %v5076_v16 }
0x13d4   :  { %v5099_v56 = vadd.f32 %v9505_v39, %v5092_v35 }
0x13d5   :  { %v5078_v25 = vmul.f32 %v6906_v53, %v5077_v12 }
0x13d7   :  { %v5082_v13 = vsel %vm5081_vm4, %v6906_v53, %v5078_v25 }
0x13d8   :  { %v5086_v47 = vmul.f32 %v5082_v13, %v9485_v33  ;;  %v5299_v33 = vperm.slane %v5295_v8, 2 }
0x13da   :  { %v5093_v23 = vmul.f32 %v9499_v52, %v5086_v47  ;;  %v5300_v52 = vperm.slane %v5295_v8, 3 }
0x13dc   :  { %v5100_v41 = vadd.f32 %v9505_v39, %v5093_v23 }
0x13de   :  { %v5230_v60 = vpack.c.bf16 %v5100_v41, %v5099_v56 }
0x13e0   :  { %5326 = vmatmul.bf16.gmra.mxu2 %v5230_v60  ;;  %5345 = vmatmul.bf16.gmra.mxu3 %v5230_v60 }
0x13e1   :  { %5364 = vmatmul.bf16.gmra.mxu0 %v5230_v60  ;;  %5383 = vmatmul.bf16.gmra.mxu1 %v5230_v60 }
0x13f0   :  { %5397 = vmatmul.bf16.vlgmr.msrb.gmra.mxu2 %v9512_v1  ;;  %5416 = vmatmul.bf16.vlgmr.msrb.gmra.mxu3 %v9512_v1 }
0x13f1   :  { %5435 = vmatmul.bf16.vlgmr.msrb.gmra.mxu0 %v9512_v1  ;;  %5454 = vmatmul.bf16.vlgmr.msrb.gmra.mxu1 %v9512_v1 }
0x1400   :  { %5402 = vmatmul.bf16.gmra.mxu2 %v5230_v60  ;;  %5421 = vmatmul.bf16.gmra.mxu3 %v5230_v60 }
0x1401   :  { %5440 = vmatmul.bf16.gmra.mxu0 %v5230_v60  ;;  %5459 = vmatmul.bf16.gmra.mxu1 %v5230_v60 }
0x141d   :  { %v5360_v39 = vpop.f32.mrf.mxu0  ;;  %v5379_v2 = vpop.f32.mrf.mxu1 }
0x141e   :  { %v5361_v37 = vadd.f32 %v5360_v39, %v5299_v33  ;;  %v5380_v54 = vadd.f32 %v5379_v2, %v5300_v52 }
0x1420   :  { %5467 = vst [vmem:[#allocation11 + $0x10] sm:$0xff] %v5361_v37 }
0x1421   :  { %5468 = vst [vmem:[#allocation11 + $0x18] sm:$0xff] %v5380_v54 }
0x1422   :  { %v5322_v34 = vpop.f32.mrf.mxu2  ;;  %v5341_v1 = vpop.f32.mrf.mxu3 }
0x1423   :  { %v5323_v7 = vadd.f32 %v5322_v34, %v5297_v51  ;;  %v5342_v9 = vadd.f32 %v5341_v1, %v5298_v22 }
0x1425   :  { %5465 = vst [vmem:[#allocation11] sm:$0xff] %v5323_v7  ;;  %v5362_v46 = vpop.f32.mrf.mxu0  ;;  %v5381_v45 = vpop.f32.mrf.mxu1 }
0x1426   :  { %5466 = vst [vmem:[#allocation11 + $0x8] sm:$0xff] %v5342_v9  ;;  %v5363_v40 = vadd.f32 %v5362_v46, %v5299_v33  ;;  %v5382_v58 = vadd.f32 %v5381_v45, %v5300_v52 }
0x1428   :  { %5475 = vst [vmem:[#allocation11 + $0x50] sm:$0xff] %v5363_v40 }
0x1429   :  { %5476 = vst [vmem:[#allocation11 + $0x58] sm:$0xff] %v5382_v58 }
0x142a   :  { %v5324_v31 = vpop.f32.mrf.mxu2  ;;  %v5343_v17 = vpop.f32.mrf.mxu3 }
0x142b   :  { %v5325_v44 = vadd.f32 %v5324_v31, %v5297_v51  ;;  %v5344_v14 = vadd.f32 %v5343_v17, %v5298_v22 }
0x142d   :  { %5473 = vst [vmem:[#allocation11 + $0x40] sm:$0xff] %v5325_v44 }
0x142e   :  { %5474 = vst [vmem:[#allocation11 + $0x48] sm:$0xff] %v5344_v14 }
0x145e   :  { %v5365_v19 = vpop.f32.mrf.mxu0  ;;  %v5384_v61 = vpop.f32.mrf.mxu1 }
0x145f   :  { %v5366_v20 = vadd.f32 %v5365_v19, %v5299_v33  ;;  %v5385_v30 = vadd.f32 %v5384_v61, %v5300_v52 }
0x1461   :  { %5483 = vst [vmem:[#allocation11 + $0x90] sm:$0xff] %v5366_v20 }
0x1462   :  { %5484 = vst [vmem:[#allocation11 + $0x98] sm:$0xff] %v5385_v30 }
0x1463   :  { %v5327_v0 = vpop.f32.mrf.mxu2  ;;  %v5346_v48 = vpop.f32.mrf.mxu3 }
0x1464   :  { %v5328_v62 = vadd.f32 %v5327_v0, %v5297_v51  ;;  %v5347_v15 = vadd.f32 %v5346_v48, %v5298_v22 }
0x1466   :  { %5481 = vst [vmem:[#allocation11 + $0x80] sm:$0xff] %v5328_v62  ;;  %v5367_v59 = vpop.f32.mrf.mxu0  ;;  %v5386_v38 = vpop.f32.mrf.mxu1 }
0x1467   :  { %5482 = vst [vmem:[#allocation11 + $0x88] sm:$0xff] %v5347_v15  ;;  %v5368_v43 = vadd.f32 %v5367_v59, %v5299_v33  ;;  %v5387_v50 = vadd.f32 %v5386_v38, %v5300_v52 }
0x1469   :  { %5491 = vst [vmem:[#allocation11 + $0xd0] sm:$0xff] %v5368_v43 }
0x146a   :  { %5492 = vst [vmem:[#allocation11 + $0xd8] sm:$0xff] %v5387_v50 }
0x146b   :  { %v5329_v42 = vpop.f32.mrf.mxu2  ;;  %v5348_v6 = vpop.f32.mrf.mxu3 }
0x146c   :  { %v5330_v36 = vadd.f32 %v5329_v42, %v5297_v51  ;;  %v5349_v24 = vadd.f32 %v5348_v6, %v5298_v22 }
0x146e   :  { %5489 = vst [vmem:[#allocation11 + $0xc0] sm:$0xff] %v5330_v36  ;;  %v5436_v10 = vpop.f32.mrf.mxu0  ;;  %v5455_v5 = vpop.f32.mrf.mxu1 }
0x146f   :  { %5490 = vst [vmem:[#allocation11 + $0xc8] sm:$0xff] %v5349_v24  ;;  %v5437_v4 = vadd.f32 %v5436_v10, %v5303_v32  ;;  %v5456_v21 = vadd.f32 %v5455_v5, %v5304_v26 }
0x1471   :  { %5471 = vst [vmem:[#allocation11 + $0x30] sm:$0xff] %v5437_v4 }
0x1472   :  { %5472 = vst [vmem:[#allocation11 + $0x38] sm:$0xff] %v5456_v21 }
0x1473   :  { %v5398_v49 = vpop.f32.mrf.mxu2  ;;  %v5417_v11 = vpop.f32.mrf.mxu3 }
0x1474   :  { %v5399_v53 = vadd.f32 %v5398_v49, %v5301_v57  ;;  %v5418_v27 = vadd.f32 %v5417_v11, %v5302_v3 }
0x1476   :  { %5469 = vst [vmem:[#allocation11 + $0x20] sm:$0xff] %v5399_v53  ;;  %v5438_v29 = vpop.f32.mrf.mxu0  ;;  %v5457_v55 = vpop.f32.mrf.mxu1 }
0x1477   :  { %5470 = vst [vmem:[#allocation11 + $0x28] sm:$0xff] %v5418_v27  ;;  %v5439_v63 = vadd.f32 %v5438_v29, %v5303_v32  ;;  %v5458_v28 = vadd.f32 %v5457_v55, %v5304_v26 }
0x1479   :  { %5479 = vst [vmem:[#allocation11 + $0x70] sm:$0xff] %v5439_v63 }
0x147a   :  { %5480 = vst [vmem:[#allocation11 + $0x78] sm:$0xff] %v5458_v28 }
0x147b   :  { %v5400_v16 = vpop.f32.mrf.mxu2  ;;  %v5419_v12 = vpop.f32.mrf.mxu3 }
0x147c   :  { %v5401_v18 = vadd.f32 %v5400_v16, %v5301_v57  ;;  %v5420_v25 = vadd.f32 %v5419_v12, %v5302_v3 }
0x147e   :  { %5477 = vst [vmem:[#allocation11 + $0x60] sm:$0xff] %v5401_v18  ;;  %v5441_v13 = vpop.f32.mrf.mxu0  ;;  %v5460_v35 = vpop.f32.mrf.mxu1 }
0x147f   :  { %5478 = vst [vmem:[#allocation11 + $0x68] sm:$0xff] %v5420_v25  ;;  %v5442_v47 = vadd.f32 %v5441_v13, %v5303_v32  ;;  %v5461_v23 = vadd.f32 %v5460_v35, %v5304_v26 }
0x1481   :  { %5487 = vst [vmem:[#allocation11 + $0xb0] sm:$0xff] %v5442_v47 }
0x1482   :  { %5488 = vst [vmem:[#allocation11 + $0xb8] sm:$0xff] %v5461_v23 }
0x1483   :  { %v5403_v56 = vpop.f32.mrf.mxu2  ;;  %v5422_v41 = vpop.f32.mrf.mxu3 }
0x1484   :  { %v5404_v60 = vadd.f32 %v5403_v56, %v5301_v57  ;;  %v5423_v8 = vadd.f32 %v5422_v41, %v5302_v3 }
0x1486   :  { %5485 = vst [vmem:[#allocation11 + $0xa0] sm:$0xff] %v5404_v60  ;;  %v5443_v33 = vpop.f32.mrf.mxu0  ;;  %v5462_v52 = vpop.f32.mrf.mxu1 }
0x1487   :  { %5486 = vst [vmem:[#allocation11 + $0xa8] sm:$0xff] %v5423_v8  ;;  %v5444_v39 = vadd.f32 %v5443_v33, %v5303_v32  ;;  %v5463_v2 = vadd.f32 %v5462_v52, %v5304_v26 }
0x1489   :  { %5495 = vst [vmem:[#allocation11 + $0xf0] sm:$0xff] %v5444_v39 }
0x148a   :  { %5496 = vst [vmem:[#allocation11 + $0xf8] sm:$0xff] %v5463_v2 }
0x148b   :  { %v5405_v37 = vpop.f32.mrf.mxu2  ;;  %v5424_v54 = vpop.f32.mrf.mxu3 }
0x148c   :  { %v5406_v51 = vadd.f32 %v5405_v37, %v5301_v57  ;;  %v5425_v22 = vadd.f32 %v5424_v54, %v5302_v3 }
0x148e   :  { %5493 = vst [vmem:[#allocation11 + $0xe0] sm:$0xff] %v5406_v51 }
0x148f   :  { %5494 = vst [vmem:[#allocation11 + $0xe8] sm:$0xff] %v5425_v22 }
0x1490   :  { %5509 = dma.vmem_to_hbm [thread:$0]  %s5502_s25, 4096, %s5504_s15, [#allocation4], %s7072_s4, %s7072_s4, %s7063_s9  }
0x1491   :  { %7057 = dma.done.wait [#allocation4], 4096  }
0x1492   :  { %7058 = vsyncadd [#allocation4], 4294963200 }
0x1493   :  { %5514 = vsyncpa [#allocation3], 1 }
0x1494   :  { %5515 = vsyncpa [#allocation6], 1 }
0x1495   :  { %5516 = vsyncpa [#allocation9], 1 }
0x1496   :  { %5517 = vsyncpa [#allocation4], 1 }

</bundles_post_ra>
